<compile_context>
chip_gen: v5e
topology: v5e:2x2
jax: 0.10.0
libtpu: 0.0.40
codegen_flags: <defaults>
</compile_context>

<pallas_src>
import jax
import jax.numpy as jnp
import numpy as np
from jax.experimental import pallas as pl
from jax.experimental.pallas import tpu as pltpu

TB = 8  # images per grid step (block-diag pooling matrices scale as TB^2 -- keep modest)


# ------------------------------ fused kernel --------------------------------


def _lenet_kernel(x_ref, w1_ref, b1_ref, p1w_ref, p1h_ref,
                  w2_ref, b2_ref, p2w_ref, p2h_ref,
                  wf1_ref, bf1_ref, wf2_ref, bf2_ref, wf3_ref, bf3_ref,
                  o_ref):
    f32 = jnp.float32

    def sigmoid(v):
        # exp -> EUP slot; exact reciprocal/divide kept for numerics (see header).
        return 1.0 / (1.0 + jnp.exp(-v))

    tb = x_ref.shape[0]
    img = x_ref[:, 0]                                   # (TB, 36, 32): 32x32 padded image + 4 zero rows

    # ---- conv1 (5x5, pad=2), banded over kw: 5 matmuls with M = TB*32 --------------
    # y1[b*32 + r, wo*6 + c] = bias + sum_kh img[b, r+kh, :] @ W1[kh]
    y1 = jnp.broadcast_to(b1_ref[...], (tb * 32, 168))
    for kh in range(5):
        sl = img[:, kh:kh + 32, :].reshape(tb * 32, 32)          # layout-trivial merge
        y1 = y1 + jnp.dot(sl, w1_ref[kh], preferred_element_type=f32)
    a1 = sigmoid(y1)                                             # (TB*32, 168)

    # ---- pool1 (2x2 avg) as two matmuls: lanes first, then per-image rows ----------
    a1 = jnp.dot(a1, p1w_ref[...], preferred_element_type=f32)   # (TB*32, 84)
    a1 = jnp.dot(p1h_ref[...], a1, preferred_element_type=f32)   # (TB*24, 84), rows 0..13 valid/img

    # ---- conv2 (5x5), banded over kw: 5 matmuls with M = TB*16 ----------------------
    a1 = a1.reshape(tb, 24, 84)
    y2 = jnp.broadcast_to(b2_ref[...], (tb * 16, 160))
    for kh in range(5):
        sl = a1[:, kh:kh + 16, :].reshape(tb * 16, 84)
        y2 = y2 + jnp.dot(sl, w2_ref[kh], preferred_element_type=f32)
    a2 = sigmoid(y2)                                             # (TB*16, 160), rows 0..9 valid/img

    # ---- pool2 ----------------------------------------------------------------------
    a2 = jnp.dot(a2, p2w_ref[...], preferred_element_type=f32)   # (TB*16, 80)
    a2 = jnp.dot(p2h_ref[...], a2, preferred_element_type=f32)   # (TB*8, 80), rows 0..4 valid/img

    # ---- FC head, once per block with M = TB ----------------------------------------
    a2 = a2.reshape(tb, 8, 80)
    flat = jnp.concatenate([a2[:, hp, :] for hp in range(5)], axis=-1)    # (TB, 400)
    z = jnp.dot(flat, wf1_ref[...], preferred_element_type=f32) + bf1_ref[...]   # (TB, 120)
    z = jnp.dot(z, wf2_ref[...], preferred_element_type=f32) + bf2_ref[...]      # (TB, 84)
    z = jnp.dot(z, wf3_ref[...], preferred_element_type=f32) + bf3_ref[...]      # (TB, 10)

    o_ref[...] = z.astype(o_ref.dtype)                           # one (TB, 10) store per step


# ----------------------- one-time weight re-layout ---------------------------


def prepare_params(params, tb=TB):
    """Re-layout PyTorch-style LeNet weights once (host side), outside the forward."""
    f32 = np.float32
    w1 = np.asarray(params["conv1_w"], f32)   # (6, 1, 5, 5)
    b1 = np.asarray(params["conv1_b"], f32)
    w2 = np.asarray(params["conv2_w"], f32)   # (16, 6, 5, 5)
    b2 = np.asarray(params["conv2_b"], f32)
    wf1 = np.asarray(params["fc1_w"], f32)    # (120, 400)
    bf1 = np.asarray(params["fc1_b"], f32)
    wf2 = np.asarray(params["fc2_w"], f32)    # (84, 120)
    bf2 = np.asarray(params["fc2_b"], f32)
    wf3 = np.asarray(params["fc3_w"], f32)    # (10, 84)
    bf3 = np.asarray(params["fc3_b"], f32)

    # conv1 banded over kw: W1[kh, wi, wo*6 + c] = w1[c, 0, kh, wi - wo], 0 <= wi-wo < 5
    W1 = np.zeros((5, 32, 168), f32)
    for kh in range(5):
        for kw in range(5):
            for wo in range(28):
                W1[kh, wo + kw, wo * 6:(wo + 1) * 6] = w1[:, 0, kh, kw]
    b1row = np.tile(b1, 28)[None, :]                              # (1, 168)

    # pool1: lane-pooling (right) and per-image row-pooling (left, block-diag over TB).
    pw = np.zeros((28, 14), f32)
    pw[np.arange(28), np.arange(28) // 2] = 0.5
    P1W = np.kron(pw, np.eye(6, dtype=f32))                       # (168, 84)
    ph = np.zeros((24, 32), f32)                                  # rows 14..23 stay zero
    ph[np.arange(14), 2 * np.arange(14)] = 0.5
    ph[np.arange(14), 2 * np.arange(14) + 1] = 0.5
    P1H = np.kron(np.eye(tb, dtype=f32), ph)                      # (tb*24, tb*32)

    # conv2 banded over kw: W2[kh, wi*6+cin, wo*16+cout] = w2[cout, cin, kh, wi-wo]
    W2 = np.zeros((5, 84, 160), f32)
    for kh in range(5):
        for kw in range(5):
            for wo in range(10):
                W2[kh, (wo + kw) * 6:(wo + kw + 1) * 6,
                       wo * 16:(wo + 1) * 16] = w2[:, :, kh, kw].T
    b2row = np.tile(b2, 10)[None, :]                              # (1, 160)

    pw2 = np.zeros((10, 5), f32)
    pw2[np.arange(10), np.arange(10) // 2] = 0.5
    P2W = np.kron(pw2, np.eye(16, dtype=f32))                     # (160, 80)
    ph2 = np.zeros((8, 16), f32)                                  # rows 5..7 stay zero
    ph2[np.arange(5), 2 * np.arange(5)] = 0.5
    ph2[np.arange(5), 2 * np.arange(5) + 1] = 0.5
    P2H = np.kron(np.eye(tb, dtype=f32), ph2)                     # (tb*8, tb*16)

    # fc1: fold PyTorch's (C, H, W) flatten into the in-kernel lane order hp*80+wp*16+c.
    Wf1 = wf1.reshape(120, 16, 5, 5).transpose(2, 3, 1, 0).reshape(400, 120)

    j = lambda a: jnp.asarray(a, jnp.float32)
    return dict(w1=j(W1), b1=j(b1row), p1w=j(P1W), p1h=j(P1H),
                w2=j(W2), b2=j(b2row), p2w=j(P2W), p2h=j(P2H),
                wf1=j(Wf1), bf1=j(bf1[None, :]),
                wf2=j(wf2.T), bf2=j(bf2[None, :]),
                wf3=j(wf3.T), bf3=j(bf3[None, :]))


# ------------------------------- forward -------------------------------------


def _const_spec(arr):
    nd = arr.ndim
    return pl.BlockSpec(arr.shape, lambda i, _nd=nd: (0,) * _nd)


def lenet_forward(prep, x, tb=TB):
    """x: (B, 1, 28, 28) float32 NCHW. Returns (B, 10) logits."""
    B = x.shape[0]
    Bp = pl.cdiv(B, tb) * tb
    # conv1 padding=2 on all sides, plus 4 extra zero rows at the bottom so every
    # per-kh row window is a fixed 32 rows (keeps all in-kernel reshapes layout-trivial).
    xp = jnp.pad(x.astype(jnp.float32),
                 ((0, Bp - B), (0, 0), (2, 6), (2, 2)))           # (Bp, 1, 36, 32)

    weights = (prep["w1"], prep["b1"], prep["p1w"], prep["p1h"],
               prep["w2"], prep["b2"], prep["p2w"], prep["p2h"],
               prep["wf1"], prep["bf1"], prep["wf2"], prep["bf2"],
               prep["wf3"], prep["bf3"])

    out = pl.pallas_call(
        _lenet_kernel,
        out_shape=jax.ShapeDtypeStruct((Bp, 10), jnp.float32),
        grid=(Bp // tb,),
        in_specs=[pl.BlockSpec((tb, 1, 36, 32), lambda i: (i, 0, 0, 0))]
                 + [_const_spec(a) for a in weights],
        out_specs=pl.BlockSpec((tb, 10), lambda i: (i, 0)),
        compiler_params=pltpu.CompilerParams(
            dimension_semantics=("parallel",)),
    )(xp, *weights)
    return out[:B]


# ----------------------------- init & reference ------------------------------


def init_params(key):
    """Deterministic PyTorch-style uniform(-1/sqrt(fan_in), 1/sqrt(fan_in)) init."""
    specs = {
        "conv1_w": ((6, 1, 5, 5), 1 * 5 * 5),
        "conv1_b": ((6,), 1 * 5 * 5),
        "conv2_w": ((16, 6, 5, 5), 6 * 5 * 5),
        "conv2_b": ((16,), 6 * 5 * 5),
        "fc1_w": ((120, 400), 400),
        "fc1_b": ((120,), 400),
        "fc2_w": ((84, 120), 120),
        "fc2_b": ((84,), 120),
        "fc3_w": ((10, 84), 84),
        "fc3_b": ((10,), 84),
    }
    params = {}
    keys = jax.random.split(key, len(specs))
    for (name, (shape, fan_in)), k in zip(specs.items(), keys):
        bound = 1.0 / np.sqrt(fan_in)
        params[name] = jax.random.uniform(
            k, shape, dtype=jnp.float32, minval=-bound, maxval=bound)
    return params


def lenet_reference(params, x):
    def conv(x, w, b, pad):
        y = jax.lax.conv_general_dilated(
            x, w, window_strides=(1, 1), padding=[(pad, pad), (pad, pad)],
            dimension_numbers=("NCHW", "OIHW", "NCHW"))
        return y + b.reshape(1, -1, 1, 1)

    def pool(x):
        B, C, H, W = x.shape
        return x.reshape(B, C, H // 2, 2, W // 2, 2).mean(axis=(3, 5))

    def sig(x):
        return 1.0 / (1.0 + jnp.exp(-x))

    x = pool(sig(conv(x, params["conv1_w"], params["conv1_b"], 2)))
    x = pool(sig(conv(x, params["conv2_w"], params["conv2_b"], 0)))
    x = x.reshape(x.shape[0], -1)
    x = x @ params["fc1_w"].T + params["fc1_b"]
    x = x @ params["fc2_w"].T + params["fc2_b"]
    x = x @ params["fc3_w"].T + params["fc3_b"]
    return x


if __name__ == "__main__":
    key = jax.random.PRNGKey(0)
    k_x, k_p = jax.random.split(key)
    params = init_params(k_p)
    prep = prepare_params(params, tb=TB)   # one-time host-side weight re-layout

    # LeNet's fc1 (16*5*5 inputs) pins spatial size to 28x28 and in_channels to 1.
    # B=16 with TB=8 -> grid=(2,): >= 2 steps so v7x's two TensorCores both get work.
    x = jax.random.normal(k_x, (16, 1, 28, 28), dtype=jnp.float32)

    out = jax.jit(lenet_forward)(prep, x)
    out = jax.block_until_ready(out)
    assert out.shape == (16, 10)

    ref = jax.block_until_ready(lenet_reference(params, x))
    np.testing.assert_allclose(np.asarray(out), np.asarray(ref), rtol=2e-3, atol=2e-3)

    print("KERNEL_OK")
</pallas_src>

<mosaic_0001>
module attributes {stable_mosaic.version = 11 : i64} {
  func.func @_lenet_kernel(%arg0: i32, %arg1: memref<8x1x36x32xf32, #tpu.memory_space<vmem>>, %arg2: memref<5x32x168xf32, #tpu.memory_space<vmem>>, %arg3: memref<1x168xf32, #tpu.memory_space<vmem>>, %arg4: memref<168x84xf32, #tpu.memory_space<vmem>>, %arg5: memref<192x256xf32, #tpu.memory_space<vmem>>, %arg6: memref<5x84x160xf32, #tpu.memory_space<vmem>>, %arg7: memref<1x160xf32, #tpu.memory_space<vmem>>, %arg8: memref<160x80xf32, #tpu.memory_space<vmem>>, %arg9: memref<64x128xf32, #tpu.memory_space<vmem>>, %arg10: memref<400x120xf32, #tpu.memory_space<vmem>>, %arg11: memref<1x120xf32, #tpu.memory_space<vmem>>, %arg12: memref<120x84xf32, #tpu.memory_space<vmem>>, %arg13: memref<1x84xf32, #tpu.memory_space<vmem>>, %arg14: memref<84x10xf32, #tpu.memory_space<vmem>>, %arg15: memref<1x10xf32, #tpu.memory_space<vmem>>, %arg16: memref<8x10xf32, #tpu.memory_space<vmem>>) attributes {dimension_semantics = [#tpu.dimension_semantics<parallel>], iteration_bounds = array<i64: 2>, scalar_prefetch = 0 : i64, scratch_operands = 0 : i64, tpu.core_type = #tpu.core_type<tc>, window_params = [{transform_indices = @transform_0, window_bounds = array<i64: 8, 1, 36, 32>}, {pipeline_mode = #tpu.pipeline_mode<synchronous>, transform_indices = @transform_1, window_bounds = array<i64: 5, 32, 168>}, {pipeline_mode = #tpu.pipeline_mode<synchronous>, transform_indices = @transform_2, window_bounds = array<i64: 1, 168>}, {pipeline_mode = #tpu.pipeline_mode<synchronous>, transform_indices = @transform_3, window_bounds = array<i64: 168, 84>}, {pipeline_mode = #tpu.pipeline_mode<synchronous>, transform_indices = @transform_4, window_bounds = array<i64: 192, 256>}, {pipeline_mode = #tpu.pipeline_mode<synchronous>, transform_indices = @transform_5, window_bounds = array<i64: 5, 84, 160>}, {pipeline_mode = #tpu.pipeline_mode<synchronous>, transform_indices = @transform_6, window_bounds = array<i64: 1, 160>}, {pipeline_mode = #tpu.pipeline_mode<synchronous>, transform_indices = @transform_7, window_bounds = array<i64: 160, 80>}, {pipeline_mode = #tpu.pipeline_mode<synchronous>, transform_indices = @transform_8, window_bounds = array<i64: 64, 128>}, {pipeline_mode = #tpu.pipeline_mode<synchronous>, transform_indices = @transform_9, window_bounds = array<i64: 400, 120>}, {pipeline_mode = #tpu.pipeline_mode<synchronous>, transform_indices = @transform_10, window_bounds = array<i64: 1, 120>}, {pipeline_mode = #tpu.pipeline_mode<synchronous>, transform_indices = @transform_11, window_bounds = array<i64: 120, 84>}, {pipeline_mode = #tpu.pipeline_mode<synchronous>, transform_indices = @transform_12, window_bounds = array<i64: 1, 84>}, {pipeline_mode = #tpu.pipeline_mode<synchronous>, transform_indices = @transform_13, window_bounds = array<i64: 84, 10>}, {pipeline_mode = #tpu.pipeline_mode<synchronous>, transform_indices = @transform_14, window_bounds = array<i64: 1, 10>}, {transform_indices = @transform_15, window_bounds = array<i64: 8, 10>}]} {
    %c0 = arith.constant 0 : index
    %c0_0 = arith.constant 0 : index
    %c0_1 = arith.constant 0 : index
    %c0_2 = arith.constant 0 : index
    %0 = vector.load %arg1[%c0, %c0_0, %c0_1, %c0_2] : memref<8x1x36x32xf32, #tpu.memory_space<vmem>>, vector<8x1x36x32xf32>
    %1 = vector.shape_cast %0 : vector<8x1x36x32xf32> to vector<8x36x32xf32>
    %c0_3 = arith.constant 0 : index
    %c0_4 = arith.constant 0 : index
    %2 = vector.load %arg3[%c0_3, %c0_4] : memref<1x168xf32, #tpu.memory_space<vmem>>, vector<1x168xf32>
    %3 = vector.shape_cast %2 : vector<1x168xf32> to vector<1x168xf32>
    %4 = vector.broadcast %3 : vector<1x168xf32> to vector<256x168xf32>
    %5 = vector.extract_strided_slice %1 {offsets = [0, 0, 0], sizes = [8, 32, 32], strides = [1, 1, 1]} : vector<8x36x32xf32> to vector<8x32x32xf32>
    %6 = vector.shape_cast %5 : vector<8x32x32xf32> to vector<256x32xf32>
    %c0_5 = arith.constant 0 : index
    %c0_6 = arith.constant 0 : index
    %c0_7 = arith.constant 0 : index
    %7 = vector.load %arg2[%c0_5, %c0_6, %c0_7] : memref<5x32x168xf32, #tpu.memory_space<vmem>>, vector<1x32x168xf32>
    %8 = vector.shape_cast %7 : vector<1x32x168xf32> to vector<32x168xf32>
    %cst = arith.constant dense<0.000000e+00> : vector<256x168xf32>
    %9 = tpu.matmul %6, %8, %cst {dimension_numbers = #tpu.dot_dimension_numbers<[1], [0], [0], [1], [0, 0, 1, 1], [], []>} : vector<256x32xf32>, vector<32x168xf32>, vector<256x168xf32> -> vector<256x168xf32>
    %10 = arith.addf %4, %9 : vector<256x168xf32>
    %11 = vector.extract_strided_slice %1 {offsets = [0, 1, 0], sizes = [8, 32, 32], strides = [1, 1, 1]} : vector<8x36x32xf32> to vector<8x32x32xf32>
    %12 = vector.shape_cast %11 : vector<8x32x32xf32> to vector<256x32xf32>
    %c1 = arith.constant 1 : index
    %c0_8 = arith.constant 0 : index
    %c0_9 = arith.constant 0 : index
    %13 = vector.load %arg2[%c1, %c0_8, %c0_9] : memref<5x32x168xf32, #tpu.memory_space<vmem>>, vector<1x32x168xf32>
    %14 = vector.shape_cast %13 : vector<1x32x168xf32> to vector<32x168xf32>
    %cst_10 = arith.constant dense<0.000000e+00> : vector<256x168xf32>
    %15 = tpu.matmul %12, %14, %cst_10 {dimension_numbers = #tpu.dot_dimension_numbers<[1], [0], [0], [1], [0, 0, 1, 1], [], []>} : vector<256x32xf32>, vector<32x168xf32>, vector<256x168xf32> -> vector<256x168xf32>
    %16 = arith.addf %10, %15 : vector<256x168xf32>
    %17 = vector.extract_strided_slice %1 {offsets = [0, 2, 0], sizes = [8, 32, 32], strides = [1, 1, 1]} : vector<8x36x32xf32> to vector<8x32x32xf32>
    %18 = vector.shape_cast %17 : vector<8x32x32xf32> to vector<256x32xf32>
    %c2 = arith.constant 2 : index
    %c0_11 = arith.constant 0 : index
    %c0_12 = arith.constant 0 : index
    %19 = vector.load %arg2[%c2, %c0_11, %c0_12] : memref<5x32x168xf32, #tpu.memory_space<vmem>>, vector<1x32x168xf32>
    %20 = vector.shape_cast %19 : vector<1x32x168xf32> to vector<32x168xf32>
    %cst_13 = arith.constant dense<0.000000e+00> : vector<256x168xf32>
    %21 = tpu.matmul %18, %20, %cst_13 {dimension_numbers = #tpu.dot_dimension_numbers<[1], [0], [0], [1], [0, 0, 1, 1], [], []>} : vector<256x32xf32>, vector<32x168xf32>, vector<256x168xf32> -> vector<256x168xf32>
    %22 = arith.addf %16, %21 : vector<256x168xf32>
    %23 = vector.extract_strided_slice %1 {offsets = [0, 3, 0], sizes = [8, 32, 32], strides = [1, 1, 1]} : vector<8x36x32xf32> to vector<8x32x32xf32>
    %24 = vector.shape_cast %23 : vector<8x32x32xf32> to vector<256x32xf32>
    %c3 = arith.constant 3 : index
    %c0_14 = arith.constant 0 : index
    %c0_15 = arith.constant 0 : index
    %25 = vector.load %arg2[%c3, %c0_14, %c0_15] : memref<5x32x168xf32, #tpu.memory_space<vmem>>, vector<1x32x168xf32>
    %26 = vector.shape_cast %25 : vector<1x32x168xf32> to vector<32x168xf32>
    %cst_16 = arith.constant dense<0.000000e+00> : vector<256x168xf32>
    %27 = tpu.matmul %24, %26, %cst_16 {dimension_numbers = #tpu.dot_dimension_numbers<[1], [0], [0], [1], [0, 0, 1, 1], [], []>} : vector<256x32xf32>, vector<32x168xf32>, vector<256x168xf32> -> vector<256x168xf32>
    %28 = arith.addf %22, %27 : vector<256x168xf32>
    %29 = vector.extract_strided_slice %1 {offsets = [0, 4, 0], sizes = [8, 32, 32], strides = [1, 1, 1]} : vector<8x36x32xf32> to vector<8x32x32xf32>
    %30 = vector.shape_cast %29 : vector<8x32x32xf32> to vector<256x32xf32>
    %c4 = arith.constant 4 : index
    %c0_17 = arith.constant 0 : index
    %c0_18 = arith.constant 0 : index
    %31 = vector.load %arg2[%c4, %c0_17, %c0_18] : memref<5x32x168xf32, #tpu.memory_space<vmem>>, vector<1x32x168xf32>
    %32 = vector.shape_cast %31 : vector<1x32x168xf32> to vector<32x168xf32>
    %cst_19 = arith.constant dense<0.000000e+00> : vector<256x168xf32>
    %33 = tpu.matmul %30, %32, %cst_19 {dimension_numbers = #tpu.dot_dimension_numbers<[1], [0], [0], [1], [0, 0, 1, 1], [], []>} : vector<256x32xf32>, vector<32x168xf32>, vector<256x168xf32> -> vector<256x168xf32>
    %34 = arith.addf %28, %33 : vector<256x168xf32>
    %cst_20 = arith.constant 0.000000e+00 : f32
    %35 = vector.broadcast %cst_20 : f32 to vector<256x168xf32>
    %36 = arith.subf %35, %34 : vector<256x168xf32>
    %37 = math.exp %36 : vector<256x168xf32>
    %cst_21 = arith.constant 1.000000e+00 : f32
    %38 = vector.broadcast %cst_21 : f32 to vector<256x168xf32>
    %39 = arith.addf %38, %37 : vector<256x168xf32>
    %cst_22 = arith.constant 1.000000e+00 : f32
    %40 = vector.broadcast %cst_22 : f32 to vector<256x168xf32>
    %41 = arith.divf %40, %39 : vector<256x168xf32>
    %c0_23 = arith.constant 0 : index
    %c0_24 = arith.constant 0 : index
    %42 = vector.load %arg4[%c0_23, %c0_24] : memref<168x84xf32, #tpu.memory_space<vmem>>, vector<168x84xf32>
    %cst_25 = arith.constant dense<0.000000e+00> : vector<256x84xf32>
    %43 = tpu.matmul %41, %42, %cst_25 {dimension_numbers = #tpu.dot_dimension_numbers<[1], [0], [0], [1], [0, 0, 1, 1], [], []>} : vector<256x168xf32>, vector<168x84xf32>, vector<256x84xf32> -> vector<256x84xf32>
    %c0_26 = arith.constant 0 : index
    %c0_27 = arith.constant 0 : index
    %44 = vector.load %arg5[%c0_26, %c0_27] : memref<192x256xf32, #tpu.memory_space<vmem>>, vector<192x256xf32>
    %cst_28 = arith.constant dense<0.000000e+00> : vector<192x84xf32>
    %45 = tpu.matmul %44, %43, %cst_28 {dimension_numbers = #tpu.dot_dimension_numbers<[1], [0], [0], [1], [0, 0, 1, 1], [], []>} : vector<192x256xf32>, vector<256x84xf32>, vector<192x84xf32> -> vector<192x84xf32>
    %46 = vector.shape_cast %45 : vector<192x84xf32> to vector<8x24x84xf32>
    %c0_29 = arith.constant 0 : index
    %c0_30 = arith.constant 0 : index
    %47 = vector.load %arg7[%c0_29, %c0_30] : memref<1x160xf32, #tpu.memory_space<vmem>>, vector<1x160xf32>
    %48 = vector.shape_cast %47 : vector<1x160xf32> to vector<1x160xf32>
    %49 = vector.broadcast %48 : vector<1x160xf32> to vector<128x160xf32>
    %50 = vector.extract_strided_slice %46 {offsets = [0, 0, 0], sizes = [8, 16, 84], strides = [1, 1, 1]} : vector<8x24x84xf32> to vector<8x16x84xf32>
    %51 = vector.shape_cast %50 : vector<8x16x84xf32> to vector<128x84xf32>
    %c0_31 = arith.constant 0 : index
    %c0_32 = arith.constant 0 : index
    %c0_33 = arith.constant 0 : index
    %52 = vector.load %arg6[%c0_31, %c0_32, %c0_33] : memref<5x84x160xf32, #tpu.memory_space<vmem>>, vector<1x84x160xf32>
    %53 = vector.shape_cast %52 : vector<1x84x160xf32> to vector<84x160xf32>
    %cst_34 = arith.constant dense<0.000000e+00> : vector<128x160xf32>
    %54 = tpu.matmul %51, %53, %cst_34 {dimension_numbers = #tpu.dot_dimension_numbers<[1], [0], [0], [1], [0, 0, 1, 1], [], []>} : vector<128x84xf32>, vector<84x160xf32>, vector<128x160xf32> -> vector<128x160xf32>
    %55 = arith.addf %49, %54 : vector<128x160xf32>
    %56 = vector.extract_strided_slice %46 {offsets = [0, 1, 0], sizes = [8, 16, 84], strides = [1, 1, 1]} : vector<8x24x84xf32> to vector<8x16x84xf32>
    %57 = vector.shape_cast %56 : vector<8x16x84xf32> to vector<128x84xf32>
    %c1_35 = arith.constant 1 : index
    %c0_36 = arith.constant 0 : index
    %c0_37 = arith.constant 0 : index
    %58 = vector.load %arg6[%c1_35, %c0_36, %c0_37] : memref<5x84x160xf32, #tpu.memory_space<vmem>>, vector<1x84x160xf32>
    %59 = vector.shape_cast %58 : vector<1x84x160xf32> to vector<84x160xf32>
    %cst_38 = arith.constant dense<0.000000e+00> : vector<128x160xf32>
    %60 = tpu.matmul %57, %59, %cst_38 {dimension_numbers = #tpu.dot_dimension_numbers<[1], [0], [0], [1], [0, 0, 1, 1], [], []>} : vector<128x84xf32>, vector<84x160xf32>, vector<128x160xf32> -> vector<128x160xf32>
    %61 = arith.addf %55, %60 : vector<128x160xf32>
    %62 = vector.extract_strided_slice %46 {offsets = [0, 2, 0], sizes = [8, 16, 84], strides = [1, 1, 1]} : vector<8x24x84xf32> to vector<8x16x84xf32>
    %63 = vector.shape_cast %62 : vector<8x16x84xf32> to vector<128x84xf32>
    %c2_39 = arith.constant 2 : index
    %c0_40 = arith.constant 0 : index
    %c0_41 = arith.constant 0 : index
    %64 = vector.load %arg6[%c2_39, %c0_40, %c0_41] : memref<5x84x160xf32, #tpu.memory_space<vmem>>, vector<1x84x160xf32>
    %65 = vector.shape_cast %64 : vector<1x84x160xf32> to vector<84x160xf32>
    %cst_42 = arith.constant dense<0.000000e+00> : vector<128x160xf32>
    %66 = tpu.matmul %63, %65, %cst_42 {dimension_numbers = #tpu.dot_dimension_numbers<[1], [0], [0], [1], [0, 0, 1, 1], [], []>} : vector<128x84xf32>, vector<84x160xf32>, vector<128x160xf32> -> vector<128x160xf32>
    %67 = arith.addf %61, %66 : vector<128x160xf32>
    %68 = vector.extract_strided_slice %46 {offsets = [0, 3, 0], sizes = [8, 16, 84], strides = [1, 1, 1]} : vector<8x24x84xf32> to vector<8x16x84xf32>
    %69 = vector.shape_cast %68 : vector<8x16x84xf32> to vector<128x84xf32>
    %c3_43 = arith.constant 3 : index
    %c0_44 = arith.constant 0 : index
    %c0_45 = arith.constant 0 : index
    %70 = vector.load %arg6[%c3_43, %c0_44, %c0_45] : memref<5x84x160xf32, #tpu.memory_space<vmem>>, vector<1x84x160xf32>
    %71 = vector.shape_cast %70 : vector<1x84x160xf32> to vector<84x160xf32>
    %cst_46 = arith.constant dense<0.000000e+00> : vector<128x160xf32>
    %72 = tpu.matmul %69, %71, %cst_46 {dimension_numbers = #tpu.dot_dimension_numbers<[1], [0], [0], [1], [0, 0, 1, 1], [], []>} : vector<128x84xf32>, vector<84x160xf32>, vector<128x160xf32> -> vector<128x160xf32>
    %73 = arith.addf %67, %72 : vector<128x160xf32>
    %74 = vector.extract_strided_slice %46 {offsets = [0, 4, 0], sizes = [8, 16, 84], strides = [1, 1, 1]} : vector<8x24x84xf32> to vector<8x16x84xf32>
    %75 = vector.shape_cast %74 : vector<8x16x84xf32> to vector<128x84xf32>
    %c4_47 = arith.constant 4 : index
    %c0_48 = arith.constant 0 : index
    %c0_49 = arith.constant 0 : index
    %76 = vector.load %arg6[%c4_47, %c0_48, %c0_49] : memref<5x84x160xf32, #tpu.memory_space<vmem>>, vector<1x84x160xf32>
    %77 = vector.shape_cast %76 : vector<1x84x160xf32> to vector<84x160xf32>
    %cst_50 = arith.constant dense<0.000000e+00> : vector<128x160xf32>
    %78 = tpu.matmul %75, %77, %cst_50 {dimension_numbers = #tpu.dot_dimension_numbers<[1], [0], [0], [1], [0, 0, 1, 1], [], []>} : vector<128x84xf32>, vector<84x160xf32>, vector<128x160xf32> -> vector<128x160xf32>
    %79 = arith.addf %73, %78 : vector<128x160xf32>
    %cst_51 = arith.constant 0.000000e+00 : f32
    %80 = vector.broadcast %cst_51 : f32 to vector<128x160xf32>
    %81 = arith.subf %80, %79 : vector<128x160xf32>
    %82 = math.exp %81 : vector<128x160xf32>
    %cst_52 = arith.constant 1.000000e+00 : f32
    %83 = vector.broadcast %cst_52 : f32 to vector<128x160xf32>
    %84 = arith.addf %83, %82 : vector<128x160xf32>
    %cst_53 = arith.constant 1.000000e+00 : f32
    %85 = vector.broadcast %cst_53 : f32 to vector<128x160xf32>
    %86 = arith.divf %85, %84 : vector<128x160xf32>
    %c0_54 = arith.constant 0 : index
    %c0_55 = arith.constant 0 : index
    %87 = vector.load %arg8[%c0_54, %c0_55] : memref<160x80xf32, #tpu.memory_space<vmem>>, vector<160x80xf32>
    %cst_56 = arith.constant dense<0.000000e+00> : vector<128x80xf32>
    %88 = tpu.matmul %86, %87, %cst_56 {dimension_numbers = #tpu.dot_dimension_numbers<[1], [0], [0], [1], [0, 0, 1, 1], [], []>} : vector<128x160xf32>, vector<160x80xf32>, vector<128x80xf32> -> vector<128x80xf32>
    %c0_57 = arith.constant 0 : index
    %c0_58 = arith.constant 0 : index
    %89 = vector.load %arg9[%c0_57, %c0_58] : memref<64x128xf32, #tpu.memory_space<vmem>>, vector<64x128xf32>
    %cst_59 = arith.constant dense<0.000000e+00> : vector<64x80xf32>
    %90 = tpu.matmul %89, %88, %cst_59 {dimension_numbers = #tpu.dot_dimension_numbers<[1], [0], [0], [1], [0, 0, 1, 1], [], []>} : vector<64x128xf32>, vector<128x80xf32>, vector<64x80xf32> -> vector<64x80xf32>
    %91 = vector.shape_cast %90 : vector<64x80xf32> to vector<8x8x80xf32>
    %92 = vector.extract_strided_slice %91 {offsets = [0, 0, 0], sizes = [8, 1, 80], strides = [1, 1, 1]} : vector<8x8x80xf32> to vector<8x1x80xf32>
    %93 = vector.shape_cast %92 : vector<8x1x80xf32> to vector<8x80xf32>
    %94 = vector.extract_strided_slice %91 {offsets = [0, 1, 0], sizes = [8, 1, 80], strides = [1, 1, 1]} : vector<8x8x80xf32> to vector<8x1x80xf32>
    %95 = vector.shape_cast %94 : vector<8x1x80xf32> to vector<8x80xf32>
    %96 = vector.extract_strided_slice %91 {offsets = [0, 2, 0], sizes = [8, 1, 80], strides = [1, 1, 1]} : vector<8x8x80xf32> to vector<8x1x80xf32>
    %97 = vector.shape_cast %96 : vector<8x1x80xf32> to vector<8x80xf32>
    %98 = vector.extract_strided_slice %91 {offsets = [0, 3, 0], sizes = [8, 1, 80], strides = [1, 1, 1]} : vector<8x8x80xf32> to vector<8x1x80xf32>
    %99 = vector.shape_cast %98 : vector<8x1x80xf32> to vector<8x80xf32>
    %100 = vector.extract_strided_slice %91 {offsets = [0, 4, 0], sizes = [8, 1, 80], strides = [1, 1, 1]} : vector<8x8x80xf32> to vector<8x1x80xf32>
    %101 = vector.shape_cast %100 : vector<8x1x80xf32> to vector<8x80xf32>
    %102 = tpu.concatenate %93, %95, %97, %99, %101 in 1 : vector<8x80xf32>, vector<8x80xf32>, vector<8x80xf32>, vector<8x80xf32>, vector<8x80xf32> -> vector<8x400xf32>
    %c0_60 = arith.constant 0 : index
    %c0_61 = arith.constant 0 : index
    %103 = vector.load %arg10[%c0_60, %c0_61] : memref<400x120xf32, #tpu.memory_space<vmem>>, vector<400x120xf32>
    %cst_62 = arith.constant dense<0.000000e+00> : vector<8x120xf32>
    %104 = tpu.matmul %102, %103, %cst_62 {dimension_numbers = #tpu.dot_dimension_numbers<[1], [0], [0], [1], [0, 0, 1, 1], [], []>} : vector<8x400xf32>, vector<400x120xf32>, vector<8x120xf32> -> vector<8x120xf32>
    %c0_63 = arith.constant 0 : index
    %c0_64 = arith.constant 0 : index
    %105 = vector.load %arg11[%c0_63, %c0_64] : memref<1x120xf32, #tpu.memory_space<vmem>>, vector<1x120xf32>
    %106 = vector.broadcast %105 : vector<1x120xf32> to vector<8x120xf32>
    %107 = arith.addf %104, %106 : vector<8x120xf32>
    %c0_65 = arith.constant 0 : index
    %c0_66 = arith.constant 0 : index
    %108 = vector.load %arg12[%c0_65, %c0_66] : memref<120x84xf32, #tpu.memory_space<vmem>>, vector<120x84xf32>
    %cst_67 = arith.constant dense<0.000000e+00> : vector<8x84xf32>
    %109 = tpu.matmul %107, %108, %cst_67 {dimension_numbers = #tpu.dot_dimension_numbers<[1], [0], [0], [1], [0, 0, 1, 1], [], []>} : vector<8x120xf32>, vector<120x84xf32>, vector<8x84xf32> -> vector<8x84xf32>
    %c0_68 = arith.constant 0 : index
    %c0_69 = arith.constant 0 : index
    %110 = vector.load %arg13[%c0_68, %c0_69] : memref<1x84xf32, #tpu.memory_space<vmem>>, vector<1x84xf32>
    %111 = vector.broadcast %110 : vector<1x84xf32> to vector<8x84xf32>
    %112 = arith.addf %109, %111 : vector<8x84xf32>
    %c0_70 = arith.constant 0 : index
    %c0_71 = arith.constant 0 : index
    %113 = vector.load %arg14[%c0_70, %c0_71] : memref<84x10xf32, #tpu.memory_space<vmem>>, vector<84x10xf32>
    %cst_72 = arith.constant dense<0.000000e+00> : vector<8x10xf32>
    %114 = tpu.matmul %112, %113, %cst_72 {dimension_numbers = #tpu.dot_dimension_numbers<[1], [0], [0], [1], [0, 0, 1, 1], [], []>} : vector<8x84xf32>, vector<84x10xf32>, vector<8x10xf32> -> vector<8x10xf32>
    %c0_73 = arith.constant 0 : index
    %c0_74 = arith.constant 0 : index
    %115 = vector.load %arg15[%c0_73, %c0_74] : memref<1x10xf32, #tpu.memory_space<vmem>>, vector<1x10xf32>
    %116 = vector.broadcast %115 : vector<1x10xf32> to vector<8x10xf32>
    %117 = arith.addf %114, %116 : vector<8x10xf32>
    %c0_75 = arith.constant 0 : index
    %c0_76 = arith.constant 0 : index
    %118 = vector.load %arg16[%c0_75, %c0_76] : memref<8x10xf32, #tpu.memory_space<vmem>>, vector<8x10xf32>
    tpu.vector_store %arg16[%c0_75, %c0_76], %117 {strides = array<i32>} : memref<8x10xf32, #tpu.memory_space<vmem>>, vector<8x10xf32>,
    return
  }
  func.func @transform_0(%arg0: i32) -> (i32, i32, i32, i32) {
    %c0_i32 = arith.constant 0 : i32
    %c0_i32_0 = arith.constant 0 : i32
    %c0_i32_1 = arith.constant 0 : i32
    %c0_i32_2 = arith.constant 0 : i32
    return %arg0, %c0_i32, %c0_i32_0, %c0_i32_1 : i32, i32, i32, i32
  }
  func.func @transform_1(%arg0: i32) -> (i32, i32, i32) {
    %c0_i32 = arith.constant 0 : i32
    %c0_i32_0 = arith.constant 0 : i32
    %c0_i32_1 = arith.constant 0 : i32
    %c0_i32_2 = arith.constant 0 : i32
    return %c0_i32, %c0_i32_0, %c0_i32_1 : i32, i32, i32
  }
  func.func @transform_2(%arg0: i32) -> (i32, i32) {
    %c0_i32 = arith.constant 0 : i32
    %c0_i32_0 = arith.constant 0 : i32
    %c0_i32_1 = arith.constant 0 : i32
    return %c0_i32, %c0_i32_0 : i32, i32
  }
  func.func @transform_3(%arg0: i32) -> (i32, i32) {
    %c0_i32 = arith.constant 0 : i32
    %c0_i32_0 = arith.constant 0 : i32
    %c0_i32_1 = arith.constant 0 : i32
    return %c0_i32, %c0_i32_0 : i32, i32
  }
  func.func @transform_4(%arg0: i32) -> (i32, i32) {
    %c0_i32 = arith.constant 0 : i32
    %c0_i32_0 = arith.constant 0 : i32
    %c0_i32_1 = arith.constant 0 : i32
    return %c0_i32, %c0_i32_0 : i32, i32
  }
  func.func @transform_5(%arg0: i32) -> (i32, i32, i32) {
    %c0_i32 = arith.constant 0 : i32
    %c0_i32_0 = arith.constant 0 : i32
    %c0_i32_1 = arith.constant 0 : i32
    %c0_i32_2 = arith.constant 0 : i32
    return %c0_i32, %c0_i32_0, %c0_i32_1 : i32, i32, i32
  }
  func.func @transform_6(%arg0: i32) -> (i32, i32) {
    %c0_i32 = arith.constant 0 : i32
    %c0_i32_0 = arith.constant 0 : i32
    %c0_i32_1 = arith.constant 0 : i32
    return %c0_i32, %c0_i32_0 : i32, i32
  }
  func.func @transform_7(%arg0: i32) -> (i32, i32) {
    %c0_i32 = arith.constant 0 : i32
    %c0_i32_0 = arith.constant 0 : i32
    %c0_i32_1 = arith.constant 0 : i32
    return %c0_i32, %c0_i32_0 : i32, i32
  }
  func.func @transform_8(%arg0: i32) -> (i32, i32) {
    %c0_i32 = arith.constant 0 : i32
    %c0_i32_0 = arith.constant 0 : i32
    %c0_i32_1 = arith.constant 0 : i32
    return %c0_i32, %c0_i32_0 : i32, i32
  }
  func.func @transform_9(%arg0: i32) -> (i32, i32) {
    %c0_i32 = arith.constant 0 : i32
    %c0_i32_0 = arith.constant 0 : i32
    %c0_i32_1 = arith.constant 0 : i32
    return %c0_i32, %c0_i32_0 : i32, i32
  }
  func.func @transform_10(%arg0: i32) -> (i32, i32) {
    %c0_i32 = arith.constant 0 : i32
    %c0_i32_0 = arith.constant 0 : i32
    %c0_i32_1 = arith.constant 0 : i32
    return %c0_i32, %c0_i32_0 : i32, i32
  }
  func.func @transform_11(%arg0: i32) -> (i32, i32) {
    %c0_i32 = arith.constant 0 : i32
    %c0_i32_0 = arith.constant 0 : i32
    %c0_i32_1 = arith.constant 0 : i32
    return %c0_i32, %c0_i32_0 : i32, i32
  }
  func.func @transform_12(%arg0: i32) -> (i32, i32) {
    %c0_i32 = arith.constant 0 : i32
    %c0_i32_0 = arith.constant 0 : i32
    %c0_i32_1 = arith.constant 0 : i32
    return %c0_i32, %c0_i32_0 : i32, i32
  }
  func.func @transform_13(%arg0: i32) -> (i32, i32) {
    %c0_i32 = arith.constant 0 : i32
    %c0_i32_0 = arith.constant 0 : i32
    %c0_i32_1 = arith.constant 0 : i32
    return %c0_i32, %c0_i32_0 : i32, i32
  }
  func.func @transform_14(%arg0: i32) -> (i32, i32) {
    %c0_i32 = arith.constant 0 : i32
    %c0_i32_0 = arith.constant 0 : i32
    %c0_i32_1 = arith.constant 0 : i32
    return %c0_i32, %c0_i32_0 : i32, i32
  }
  func.func @transform_15(%arg0: i32) -> (i32, i32) {
    %c0_i32 = arith.constant 0 : i32
    %c0_i32_0 = arith.constant 0 : i32
    return %arg0, %c0_i32 : i32, i32
  }
}

</mosaic_0001>

<bundles_post_ra>
// kernel: lenet_forward.1
= control target key start
LH: loop header
LB: loop body
LE: loop exit
PB: predicated region body
PF: predicated region fallthrough
CT: control target
= control target key end

     0   :  { %s14282_s0 = inlined_call_operand.vmem [shape: f32[16,1,36,32], index: 0, kind: input, shape index: {}]   ;;  %s14283_s1 = inlined_call_operand.vmem [shape: f32[5,32,168], index: 1, kind: input, shape index: {}]   ;;  %s14284_s2 = inlined_call_operand.vmem [shape: f32[1,168], index: 2, kind: input, shape index: {}]   ;;  %s14285_s3 = inlined_call_operand.vmem [shape: f32[168,84], index: 3, kind: input, shape index: {}]   ;;  %s14286_s4 = inlined_call_operand.vmem [shape: f32[192,256], index: 4, kind: input, shape index: {}]   ;;  %s14287_s5 = inlined_call_operand.vmem [shape: f32[5,84,160], index: 5, kind: input, shape index: {}]   ;;  %s14288_s6 = inlined_call_operand.vmem [shape: f32[1,160], index: 6, kind: input, shape index: {}]   ;;  %s14289_s7 = inlined_call_operand.vmem [shape: f32[160,80], index: 7, kind: input, shape index: {}]   ;;  %s14290_s8 = inlined_call_operand.vmem [shape: f32[64,128], index: 8, kind: input, shape index: {}]   ;;  %s14291_s9 = inlined_call_operand.vmem [shape: f32[400,120], index: 9, kind: input, shape index: {}]   ;;  %s14292_s10 = inlined_call_operand.vmem [shape: f32[1,120], index: 10, kind: input, shape index: {}]   ;;  %s14293_s11 = inlined_call_operand.vmem [shape: f32[120,84], index: 11, kind: input, shape index: {}]   ;;  %s14294_s12 = inlined_call_operand.vmem [shape: f32[1,84], index: 12, kind: input, shape index: {}]   ;;  %s14295_s13 = inlined_call_operand.vmem [shape: f32[84,10], index: 13, kind: input, shape index: {}]   ;;  %s14296_s14 = inlined_call_operand.vmem [shape: f32[1,10], index: 14, kind: input, shape index: {}]   ;;  %s14297_s15 = inlined_call_operand.hbm [shape: f32[16,10], index: 15, kind: output, shape index: {}]  }
   0x1   :  { %14320 = sst [smem:[#allocation160_spill]] %s14282_s0 }
   0x2   :  { %14321 = sst [smem:[#allocation161_spill]] %s14283_s1 }
   0x3   :  { %20 = vsyncpa [#allocation3], 0 }
   0x4   :  { %22 = vsyncpa [#allocation3 + $0x1], 0  ;;  %s8332_s18 = smov 0   ;;  %s8334_s19 = smov 0  }
   0x5   :  { %s8336_s20 = smov 0   ;;  %s8338_s21 = smov 0  }
   0x6 LB: > { %14322 = sst [smem:[#allocation5_spill]] %s8234_s18  ;;  %s7039_s22 = sadd.s32 4294967295, %s8246_s21   ;;  %s8246_s21 = sphi %s8338_s21, %s14934_s21   ;;  %s8242_s20 = sphi %s8336_s20, %s14936_s20   ;;  %s8238_s19 = sphi %s8334_s19, %s14938_s19   ;;  %s8234_s18 = sphi %s8332_s18, %s14937_s18  }
   0x7   : > { %14323 = sst [smem:[#allocation6_spill]] %s8242_s20  ;;  %s7040_s23 = sadd.s32 4294967294, %s8246_s21  }
   0x8   : > { %s8355_s24 = sadd.s32 1, %s8246_s21   ;;  %s355_s25 = sadd.s32 1, %s8242_s20 }
   0x9   : > { %14324 = sst [smem:[#allocation7_spill]] %s8355_s24  ;;  %s352_s26 = ssub.s32 %s8246_s21, %s8355_s24 }
   0xa   : > { %p365_p0 = scmp.ne.s32.totalorder %s8242_s20, %s8238_s19  ;;  %p353_p1 = scmp.eq.s32.totalorder %s352_s26, 0 }
   0xb   : > { %p366_p2 = scmp.eq.s32.totalorder %s7039_s22, 1  ;;  %p371_p3 = scmp.ne.s32.totalorder %s8238_s19, %s8234_s18 }
   0xc   : > { %p372_p4 = scmp.eq.s32.totalorder %s7040_s23, 1  ;;  %p7043_p7 = scmp.ge.s32.totalorder %s8246_s21, 1 }
   0xd   : > { %s8365_s27 = scalar_select %p353_p1, %s8242_s20, %s355_s25  }
   0xe   : > { %p8367_p5 = por %p366_p2, %p365_p0  ;;  %p8371_p6 = por %p372_p4, %p371_p3 }
   0xf   : > { %14325 = sst [smem:[#allocation8_spill]] %s8365_s27  ;;  %p442_p8 = scmp.lt.s32.totalorder %s8246_s21, 3 }
  0x10   : > { %s14327_s29 = scalar_select %p8371_p6, 1, 0 }
  0x11   : > { %p443_p9 = pnand %p7043_p7, %p442_p8 }
  0x12   : > { %14328 = sst [smem:[#allocation9_spill]] %s14327_s29 }
  0x13   : > { %446 = sbr.rel (%p443_p9) target bundleno = 2799 (0xaef), region = 80 }
  0x18   : > { %s14329_s1 = sld [smem:[#allocation161_spill]]  ;;  %s8386_s27 = sshll.u32 %s7039_s22, 3  ;;  %vm552_vm0 = vcmask 261120   ;;  %vm947_vm1 = vcmask 1046528   ;;  %vm1383_vm2 = vcmask 1045504   ;;  %vm1819_vm3 = vcmask 1044480  }
  0x19   : > { %p492_p10 = scmp.lt.s32.totalorder %s8386_s27, 15  ;;  %s14330_s0 = sld [smem:[#allocation160_spill]]  ;;  %vm2255_vm4 = vcmask 1043456   ;;  %vm3928_vm8 = vcmask 326656  }
  0x1a   : > { %s8249_s20 = smov 112   ;;  %s8250_s26 = smov 32  }
  0x1b   : > { %s493_s29 = scalar_select %p492_p10, %s8386_s27, 15 }
  0x1c   : > { %s488_s22 = sand.u32 1, %s8238_s19  }
  0x1d   : > { %s7713_s17 = smul.u32 40, %s493_s29  ;;  %s8248_s29 = smov 80  }
  0x1e   : > { %v550_v0 = vld [vmem:[%s14329_s1 + $0x30] sm:$0xff]  ;;  %v551_v1 = vld [vmem:[%s14329_s1 + $0x38] sm:$0xff]  ;;  %v548_v2 = vld [vmem:[%s14329_s1 + $0x20] sm:$0xff]  ;;  %s7044_s25 = sshll.u32 %s488_s22, 3 }
  0x1f   : > { %661 = vmatpush.msra.mxu0 %v550_v0  ;;  %774 = vmatpush.msra.mxu1 %v551_v1  ;;  %v549_v3 = vld [vmem:[%s14329_s1 + $0x28] sm:$0xff]  ;;  %v7117_v4 = vld [vmem:[%s14329_s1 + $0x70] sm:$0xff]  ;;  %v7118_v5 = vld [vmem:[%s14329_s1 + $0x78] sm:$0xff]  ;;  %s8432_s18 = scalar_lea.vmem %s14330_s0, %s7713_s17  ;;  %s490_s30 = scalar_lea.vmem [#allocation2], %s7044_s25 }
  0x20   : > { %1105 = vmatpush.msra.mxu2 %v7117_v4  ;;  %1218 = vmatpush.msra.mxu3 %v7118_v5  ;;  %v546_v6 = vld [vmem:[%s14329_s1 + $0x10] sm:$0xff]  ;;  %v547_v7 = vld [vmem:[%s14329_s1 + $0x18] sm:$0xff]  ;;  %v7115_v8 = vld [vmem:[%s14329_s1 + $0x60] sm:$0xff]  ;;  %s6978_s16 = sshll.u32 %s490_s30, 4  ;;  %s6966_s17 = scalar_lea.sflag [#allocation3], %s488_s22  ;;  %s6979_s16 = int_to_ptr.vmem [resolvable:$true] %s6978_s16 }
  0x21   : > { %662 = vmatpush.msra.mxu0 %v548_v2  ;;  %775 = vmatpush.msra.mxu1 %v549_v3  ;;  %v7116_v9 = vld [vmem:[%s14329_s1 + $0x68] sm:$0xff]  ;;  %v544_v10 = vld [vmem:[%s14329_s1] sm:$0xff]  ;;  %v7113_v12 = vld [vmem:[%s14329_s1 + $0x50] sm:$0xff]  ;;  %s8204_s25 = scalar_lea.hbm %s14297_s15, 16 }
  0x22   : > { %v545_v11 = vld [vmem:[%s14329_s1 + $0x8] sm:$0xff]  ;;  %1106 = vmatpush.msra.mxu2 %v7115_v8  ;;  %1219 = vmatpush.msra.mxu3 %v7116_v9  ;;  %v7114_v13 = vld [vmem:[%s14329_s1 + $0x58] sm:$0xff]  ;;  %v7111_v14 = vld [vmem:[%s14329_s1 + $0x40] sm:$0xff] }
  0x23   : > { %663 = vmatpush.msra.mxu0 %v546_v6  ;;  %776 = vmatpush.msra.mxu1 %v547_v7  ;;  %v7112_v15 = vld [vmem:[%s14329_s1 + $0x48] sm:$0xff]  ;;  %v8435_v16 = vld [vmem:[%s8432_s18] sm:$0xff]  ;;  %v8447_v20 = vld [vmem:[%s8432_s18 + $0x10] sm:$0xff] }
  0x24   : > { %1107 = vmatpush.msra.mxu2 %v7113_v12  ;;  %1220 = vmatpush.msra.mxu3 %v7114_v13  ;;  %v8438_v17 = vld [vmem:[%s8432_s18 + $0x8] sm:$0xff]  ;;  %v948_v18 = vrot.slane %v8435_v16, 1  ;;  %v951_v22 = vrot.slane %v8447_v20, 1  ;;  %v8459_v24 = vld [vmem:[%s8432_s18 + $0x18] sm:$0xff]  ;;  %v8470_v27 = vld [vmem:[%s8432_s18 + $0x20] sm:$0xf] }
  0x25   : > { %664 = vmatpush.msra.mxu0 %v544_v10  ;;  %777 = vmatpush.msra.mxu1 %v545_v11  ;;  %v949_v19 = vrot.slane %v8438_v17, 1  ;;  %v953_v25 = vrot.slane %v8459_v24, 1  ;;  %v955_v28 = vrot.slane %v8470_v27, 1  ;;  %v8481_v30 = vld [vmem:[%s8432_s18 + $0x28] sm:$0xff]  ;;  %v8484_v31 = vld [vmem:[%s8432_s18 + $0x30] sm:$0xff]  ;;  %v8496_v35 = vld [vmem:[%s8432_s18 + $0x38] sm:$0xff] }
  0x26   : > { %1108 = vmatpush.msra.mxu2 %v7111_v14  ;;  %1221 = vmatpush.msra.mxu3 %v7112_v15  ;;  %v957_v32 = vrot.slane %v8481_v30, 1  ;;  %v958_v33 = vrot.slane %v8484_v31, 1  ;;  %v960_v36 = vrot.slane %v8496_v35, 1  ;;  %v8507_v38 = vld [vmem:[%s8432_s18 + $0x40] sm:$0xff]  ;;  %v8518_v41 = vld [vmem:[%s8432_s18 + $0x48] sm:$0xf] }
  0x27   : > { %7047 = vmatmul.msk.f32.vlgmr.msra.gmra.mxu0 %vm552_vm0, %v8435_v16  ;;  %7079 = vmatmul.msk.f32.vlgmr.msra.gmra.mxu1 %vm552_vm0, %v8435_v16  ;;  %v950_v21 = vsel %vm947_vm1, %v948_v18, %v949_v19  ;;  %v952_v23 = vsel %vm947_vm1, %v949_v19, %v951_v22  ;;  %v954_v26 = vsel %vm947_vm1, %v951_v22, %v953_v25  ;;  %v962_v39 = vrot.slane %v8507_v38, 1  ;;  %v8529_v44 = vld [vmem:[%s8432_s18 + $0x50] sm:$0xff]  ;;  %v8532_v45 = vld [vmem:[%s8432_s18 + $0x58] sm:$0xff]  ;;  %v8544_v49 = vld [vmem:[%s8432_s18 + $0x60] sm:$0xff] }
  0x28   : > { %7119 = vmatmul.msk.f32.vlgmr.msra.gmra.mxu2 %vm552_vm0, %v950_v21  ;;  %7151 = vmatmul.msk.f32.vlgmr.msra.gmra.mxu3 %vm552_vm0, %v950_v21  ;;  %v956_v29 = vsel %vm947_vm1, %v953_v25, %v955_v28  ;;  %v959_v34 = vsel %vm947_vm1, %v957_v32, %v958_v33  ;;  %v961_v37 = vsel %vm947_vm1, %v958_v33, %v960_v36  ;;  %v964_v42 = vrot.slane %v8518_v41, 1  ;;  %v8555_v52 = vld [vmem:[%s8432_s18 + $0x68] sm:$0xff]  ;;  %v8566_v55 = vld [vmem:[%s8432_s18 + $0x70] sm:$0xf]  ;;  %v8577_v58 = vld [vmem:[%s8432_s18 + $0x78] sm:$0xff] }
  0x29   : > { %v963_v40 = vsel %vm947_vm1, %v960_v36, %v962_v39  ;;  %v966_v46 = vrot.slane %v8529_v44, 1  ;;  %v967_v47 = vrot.slane %v8532_v45, 1  ;;  %v969_v50 = vrot.slane %v8544_v49, 1  ;;  %v8580_v59 = vld [vmem:[%s8432_s18 + $0x80] sm:$0xff]  ;;  %v8592_v63 = vld [vmem:[%s8432_s18 + $0x88] sm:$0xff]  ;;  %v8603_v2 = vld [vmem:[%s8432_s18 + $0x90] sm:$0xff] }
  0x2a   : > { %v965_v43 = vsel %vm947_vm1, %v962_v39, %v964_v42  ;;  %v971_v53 = vrot.slane %v8555_v52, 1  ;;  %v973_v56 = vrot.slane %v8566_v55, 1  ;;  %v975_v60 = vrot.slane %v8577_v58, 1  ;;  %v8614_v5 = vld [vmem:[%s8432_s18 + $0x98] sm:$0xf]  ;;  %v8625_v8 = vld [vmem:[%s8432_s18 + $0xa0] sm:$0xff] }
  0x2b   : > { %v968_v48 = vsel %vm947_vm1, %v966_v46, %v967_v47  ;;  %v970_v51 = vsel %vm947_vm1, %v967_v47, %v969_v50  ;;  %v976_v61 = vrot.slane %v8580_v59, 1  ;;  %v978_v0 = vrot.slane %v8592_v63, 1  ;;  %v8628_v9 = vld [vmem:[%s8432_s18 + $0xa8] sm:$0xff]  ;;  %v8644_v15 = vld [vmem:[%s8432_s18 + $0xb0] sm:$0xff] }
  0x2c   : > { %v972_v54 = vsel %vm947_vm1, %v969_v50, %v971_v53  ;;  %v974_v57 = vsel %vm947_vm1, %v971_v53, %v973_v56  ;;  %v980_v3 = vrot.slane %v8603_v2, 1  ;;  %v982_v6 = vrot.slane %v8614_v5, 1  ;;  %v8704_v50 = vld [vmem:[%s8432_s18 + $0xd0] sm:$0xff] }
  0x2d   : > { %v977_v62 = vsel %vm947_vm1, %v975_v60, %v976_v61  ;;  %v979_v1 = vsel %vm947_vm1, %v976_v61, %v978_v0  ;;  %v984_v10 = vrot.slane %v8625_v8, 1  ;;  %v985_v11 = vrot.slane %v8628_v9, 1 }
  0x2e   : > { %v981_v4 = vsel %vm947_vm1, %v978_v0, %v980_v3  ;;  %v983_v7 = vsel %vm947_vm1, %v980_v3, %v982_v6  ;;  %v987_v18 = vrot.slane %v8644_v15, 1  ;;  %v994_v53 = vrot.slane %v8704_v50, 1 }
  0x2f   : > { %7048 = vmatmul.msk.f32.gmra.mxu0 %vm552_vm0, %v8438_v17  ;;  %7080 = vmatmul.msk.f32.gmra.mxu1 %vm552_vm0, %v8438_v17  ;;  %v986_v14 = vsel %vm947_vm1, %v984_v10, %v985_v11  ;;  %v8743_v10 = vld [vmem:[%s8432_s18 + $0xe0] sm:$0xff] }
  0x30   : > { %7120 = vmatmul.msk.f32.gmra.mxu2 %vm552_vm0, %v952_v23  ;;  %7152 = vmatmul.msk.f32.gmra.mxu3 %vm552_vm0, %v952_v23  ;;  %v988_v25 = vsel %vm947_vm1, %v985_v11, %v987_v18  ;;  %14331 = vst [vmem:[#allocation10_spill] sm:$0xff] %v8743_v10  ;;  %v998_v11 = vrot.slane %v8743_v10, 1 }
  0x37   : > { %7049 = vmatmul.msk.f32.gmra.mxu0 %vm552_vm0, %v8447_v20  ;;  %7081 = vmatmul.msk.f32.gmra.mxu1 %vm552_vm0, %v8447_v20 }
  0x38   : > { %7121 = vmatmul.msk.f32.gmra.mxu2 %vm552_vm0, %v954_v26  ;;  %7153 = vmatmul.msk.f32.gmra.mxu3 %vm552_vm0, %v954_v26  ;;  %v8663_v26 = vld [vmem:[%s8432_s18 + $0xb8] sm:$0xff] }
  0x39   : > { %v989_v28 = vrot.slane %v8663_v26, 1 }
  0x3b   : > { %v990_v36 = vsel %vm947_vm1, %v987_v18, %v989_v28 }
  0x3f   : > { %7050 = vmatmul.msk.f32.gmra.mxu0 %vm552_vm0, %v8459_v24  ;;  %7082 = vmatmul.msk.f32.gmra.mxu1 %vm552_vm0, %v8459_v24 }
  0x40   : > { %7122 = vmatmul.msk.f32.gmra.mxu2 %vm552_vm0, %v956_v29  ;;  %7154 = vmatmul.msk.f32.gmra.mxu3 %vm552_vm0, %v956_v29 }
  0x47   : > { %7051 = vmatmul.msk.f32.gmra.mxu0 %vm552_vm0, %v8481_v30  ;;  %7083 = vmatmul.msk.f32.gmra.mxu1 %vm552_vm0, %v8481_v30 }
  0x48   : > { %7123 = vmatmul.msk.f32.gmra.mxu2 %vm552_vm0, %v959_v34  ;;  %7155 = vmatmul.msk.f32.gmra.mxu3 %vm552_vm0, %v959_v34 }
  0x4f   : > { %7052 = vmatmul.msk.f32.gmra.mxu0 %vm552_vm0, %v8484_v31  ;;  %7084 = vmatmul.msk.f32.gmra.mxu1 %vm552_vm0, %v8484_v31 }
  0x50   : > { %7124 = vmatmul.msk.f32.gmra.mxu2 %vm552_vm0, %v961_v37  ;;  %7156 = vmatmul.msk.f32.gmra.mxu3 %vm552_vm0, %v961_v37  ;;  %v8682_v37 = vld [vmem:[%s8432_s18 + $0xc0] sm:$0xf] }
  0x51   : > { %v991_v39 = vrot.slane %v8682_v37, 1 }
  0x53   : > { %v992_v47 = vsel %vm947_vm1, %v989_v28, %v991_v39  ;;  %v8762_v39 = vld [vmem:[%s8432_s18 + $0xe8] sm:$0xf] }
  0x54   : > { %14336 = vst [vmem:[#allocation15_spill] sm:$0xff] %v8762_v39 }
  0x57   : > { %7053 = vmatmul.msk.f32.gmra.mxu0 %vm552_vm0, %v8496_v35  ;;  %7085 = vmatmul.msk.f32.gmra.mxu1 %vm552_vm0, %v8496_v35 }
  0x58   : > { %7125 = vmatmul.msk.f32.gmra.mxu2 %vm552_vm0, %v963_v40  ;;  %7157 = vmatmul.msk.f32.gmra.mxu3 %vm552_vm0, %v963_v40 }
  0x5f   : > { %7054 = vmatmul.msk.f32.gmra.mxu0 %vm552_vm0, %v8507_v38  ;;  %7086 = vmatmul.msk.f32.gmra.mxu1 %vm552_vm0, %v8507_v38 }
  0x60   : > { %7126 = vmatmul.msk.f32.gmra.mxu2 %vm552_vm0, %v965_v43  ;;  %7158 = vmatmul.msk.f32.gmra.mxu3 %vm552_vm0, %v965_v43 }
  0x67   : > { %7055 = vmatmul.msk.f32.gmra.mxu0 %vm552_vm0, %v8529_v44  ;;  %7087 = vmatmul.msk.f32.gmra.mxu1 %vm552_vm0, %v8529_v44 }
  0x68   : > { %7127 = vmatmul.msk.f32.gmra.mxu2 %vm552_vm0, %v968_v48  ;;  %7159 = vmatmul.msk.f32.gmra.mxu3 %vm552_vm0, %v968_v48  ;;  %v8701_v48 = vld [vmem:[%s8432_s18 + $0xc8] sm:$0xff] }
  0x6f   : > { %7056 = vmatmul.msk.f32.gmra.mxu0 %vm552_vm0, %v8532_v45  ;;  %7088 = vmatmul.msk.f32.gmra.mxu1 %vm552_vm0, %v8532_v45 }
  0x70   : > { %7128 = vmatmul.msk.f32.gmra.mxu2 %vm552_vm0, %v970_v51  ;;  %7160 = vmatmul.msk.f32.gmra.mxu3 %vm552_vm0, %v970_v51  ;;  %v993_v51 = vrot.slane %v8701_v48, 1 }
  0x72   : > { %v995_v61 = vsel %vm947_vm1, %v993_v51, %v994_v53 }
  0x77   : > { %7057 = vmatmul.msk.f32.gmra.mxu0 %vm552_vm0, %v8544_v49  ;;  %7089 = vmatmul.msk.f32.gmra.mxu1 %vm552_vm0, %v8544_v49 }
  0x78   : > { %7129 = vmatmul.msk.f32.gmra.mxu2 %vm552_vm0, %v972_v54  ;;  %7161 = vmatmul.msk.f32.gmra.mxu3 %vm552_vm0, %v972_v54 }
  0x7f   : > { %7058 = vmatmul.msk.f32.gmra.mxu0 %vm552_vm0, %v8555_v52  ;;  %7090 = vmatmul.msk.f32.gmra.mxu1 %vm552_vm0, %v8555_v52 }
  0x80   : > { %7130 = vmatmul.msk.f32.gmra.mxu2 %vm552_vm0, %v974_v57  ;;  %7162 = vmatmul.msk.f32.gmra.mxu3 %vm552_vm0, %v974_v57 }
  0x87   : > { %7059 = vmatmul.msk.f32.gmra.mxu0 %vm552_vm0, %v8577_v58  ;;  %7091 = vmatmul.msk.f32.gmra.mxu1 %vm552_vm0, %v8577_v58 }
  0x88   : > { %7131 = vmatmul.msk.f32.gmra.mxu2 %vm552_vm0, %v977_v62  ;;  %7163 = vmatmul.msk.f32.gmra.mxu3 %vm552_vm0, %v977_v62  ;;  %v8724_v62 = vld [vmem:[%s8432_s18 + $0xd8] sm:$0xff] }
  0x89   : > { %v996_v0 = vrot.slane %v8724_v62, 1 }
  0x8f   : > { %7060 = vmatmul.msk.f32.gmra.mxu0 %vm552_vm0, %v8580_v59  ;;  %7092 = vmatmul.msk.f32.gmra.mxu1 %vm552_vm0, %v8580_v59 }
  0x90   : > { %7132 = vmatmul.msk.f32.gmra.mxu2 %vm552_vm0, %v979_v1  ;;  %7164 = vmatmul.msk.f32.gmra.mxu3 %vm552_vm0, %v979_v1 }
  0x97   : > { %7061 = vmatmul.msk.f32.gmra.mxu0 %vm552_vm0, %v8592_v63  ;;  %7093 = vmatmul.msk.f32.gmra.mxu1 %vm552_vm0, %v8592_v63 }
  0x98   : > { %7133 = vmatmul.msk.f32.gmra.mxu2 %vm552_vm0, %v981_v4  ;;  %7165 = vmatmul.msk.f32.gmra.mxu3 %vm552_vm0, %v981_v4 }
  0x9f   : > { %7062 = vmatmul.msk.f32.gmra.mxu0 %vm552_vm0, %v8603_v2  ;;  %7094 = vmatmul.msk.f32.gmra.mxu1 %vm552_vm0, %v8603_v2 }
  0xa0   : > { %7134 = vmatmul.msk.f32.gmra.mxu2 %vm552_vm0, %v983_v7  ;;  %7166 = vmatmul.msk.f32.gmra.mxu3 %vm552_vm0, %v983_v7  ;;  %v997_v7 = vsel %vm947_vm1, %v994_v53, %v996_v0 }
  0xa4   : > { %v8634_v12 = vpop.f32.mrf.mxu0  ;;  %v8636_v13 = vpop.f32.mrf.mxu1 }
  0xa7   : > { %7063 = vmatmul.msk.f32.gmra.mxu0 %vm552_vm0, %v8625_v8  ;;  %7095 = vmatmul.msk.f32.gmra.mxu1 %vm552_vm0, %v8625_v8 }
  0xa8   : > { %7135 = vmatmul.msk.f32.gmra.mxu2 %vm552_vm0, %v986_v14  ;;  %7167 = vmatmul.msk.f32.gmra.mxu3 %vm552_vm0, %v986_v14 }
  0xab   : > { %v8653_v22 = vpop.f32.mrf.mxu2  ;;  %v8655_v23 = vpop.f32.mrf.mxu3 }
  0xac   : > { %v8649_v19 = vpop.f32.mrf.mxu0  ;;  %v8651_v21 = vpop.f32.mrf.mxu1 }
  0xaf   : > { %7064 = vmatmul.msk.f32.gmra.mxu0 %vm552_vm0, %v8628_v9  ;;  %7096 = vmatmul.msk.f32.gmra.mxu1 %vm552_vm0, %v8628_v9 }
  0xb0   : > { %7136 = vmatmul.msk.f32.gmra.mxu2 %vm552_vm0, %v988_v25  ;;  %7168 = vmatmul.msk.f32.gmra.mxu3 %vm552_vm0, %v988_v25 }
  0xb3   : > { %v8672_v33 = vpop.f32.mrf.mxu2  ;;  %v8674_v34 = vpop.f32.mrf.mxu3 }
  0xb4   : > { %v8668_v29 = vpop.f32.mrf.mxu0  ;;  %v8670_v32 = vpop.f32.mrf.mxu1 }
  0xb7   : > { %7065 = vmatmul.msk.f32.gmra.mxu0 %vm552_vm0, %v8644_v15  ;;  %7097 = vmatmul.msk.f32.gmra.mxu1 %vm552_vm0, %v8644_v15 }
  0xb8   : > { %7137 = vmatmul.msk.f32.gmra.mxu2 %vm552_vm0, %v990_v36  ;;  %7169 = vmatmul.msk.f32.gmra.mxu3 %vm552_vm0, %v990_v36  ;;  %v999_v36 = vsel %vm947_vm1, %v996_v0, %v998_v11 }
  0xbb   : > { %v8691_v43 = vpop.f32.mrf.mxu2  ;;  %v8693_v46 = vpop.f32.mrf.mxu3 }
  0xbc   : > { %v8687_v40 = vpop.f32.mrf.mxu0  ;;  %v8689_v42 = vpop.f32.mrf.mxu1 }
  0xbf   : > { %7066 = vmatmul.msk.f32.gmra.mxu0 %vm552_vm0, %v8663_v26  ;;  %7098 = vmatmul.msk.f32.gmra.mxu1 %vm552_vm0, %v8663_v26 }
  0xc0   : > { %7138 = vmatmul.msk.f32.gmra.mxu2 %vm552_vm0, %v992_v47  ;;  %7170 = vmatmul.msk.f32.gmra.mxu3 %vm552_vm0, %v992_v47  ;;  %v1000_v47 = vrot.slane %v8762_v39, 1  ;;  %v8784_v39 = vld [vmem:[%s8432_s18 + $0xf8] sm:$0xff] }
  0xc1   : > { %14342 = vst [vmem:[#allocation21_spill] sm:$0xff] %v8784_v39 }
  0xc2   : > { %v1001_v0 = vsel %vm947_vm1, %v998_v11, %v1000_v47 }
  0xc3   : > { %v8714_v57 = vpop.f32.mrf.mxu2  ;;  %v8716_v60 = vpop.f32.mrf.mxu3 }
  0xc4   : > { %v8710_v54 = vpop.f32.mrf.mxu0  ;;  %v8712_v56 = vpop.f32.mrf.mxu1 }
  0xc7   : > { %7067 = vmatmul.msk.f32.gmra.mxu0 %vm552_vm0, %v8701_v48  ;;  %7099 = vmatmul.msk.f32.gmra.mxu1 %vm552_vm0, %v8701_v48 }
  0xc8   : > { %7139 = vmatmul.msk.f32.gmra.mxu2 %vm552_vm0, %v995_v61  ;;  %7171 = vmatmul.msk.f32.gmra.mxu3 %vm552_vm0, %v995_v61 }
  0xcb   : > { %v8733_v4 = vpop.f32.mrf.mxu2  ;;  %v8735_v6 = vpop.f32.mrf.mxu3 }
  0xcc   : > { %v8729_v1 = vpop.f32.mrf.mxu0  ;;  %v8731_v3 = vpop.f32.mrf.mxu1 }
  0xcf   : > { %7068 = vmatmul.msk.f32.gmra.mxu0 %vm552_vm0, %v8704_v50  ;;  %7100 = vmatmul.msk.f32.gmra.mxu1 %vm552_vm0, %v8704_v50 }
  0xd0   : > { %7140 = vmatmul.msk.f32.gmra.mxu2 %vm552_vm0, %v997_v7  ;;  %7172 = vmatmul.msk.f32.gmra.mxu3 %vm552_vm0, %v997_v7 }
  0xd3   : > { %v8752_v25 = vpop.f32.mrf.mxu2  ;;  %v8754_v28 = vpop.f32.mrf.mxu3 }
  0xd4   : > { %v8748_v14 = vpop.f32.mrf.mxu0  ;;  %v8750_v18 = vpop.f32.mrf.mxu1  ;;  %14334 = vst [vmem:[#allocation13_spill] sm:$0xff] %v8752_v25 }
  0xd5   : > { %14332 = vst [vmem:[#allocation11_spill] sm:$0xff] %v8748_v14 }
  0xd6   : > { %14333 = vst [vmem:[#allocation12_spill] sm:$0xff] %v8750_v18 }
  0xd7   : > { %14335 = vst [vmem:[#allocation14_spill] sm:$0xff] %v8754_v28  ;;  %7069 = vmatmul.msk.f32.gmra.mxu0 %vm552_vm0, %v8724_v62  ;;  %7101 = vmatmul.msk.f32.gmra.mxu1 %vm552_vm0, %v8724_v62 }
  0xd8   : > { %7141 = vmatmul.msk.f32.gmra.mxu2 %vm552_vm0, %v999_v36  ;;  %7173 = vmatmul.msk.f32.gmra.mxu3 %vm552_vm0, %v999_v36  ;;  %v8781_v36 = vld [vmem:[%s8432_s18 + $0xf0] sm:$0xff] }
  0xd9   : > { %14341 = vst [vmem:[#allocation20_spill] sm:$0xff] %v8781_v36 }
  0xdb   : > { %v8771_v61 = vpop.f32.mrf.mxu2  ;;  %v8773_v7 = vpop.f32.mrf.mxu3 }
  0xdc   : > { %v8767_v51 = vpop.f32.mrf.mxu0  ;;  %v8769_v53 = vpop.f32.mrf.mxu1  ;;  %14339 = vst [vmem:[#allocation18_spill] sm:$0xff] %v8771_v61 }
  0xdd   : > { %14337 = vst [vmem:[#allocation16_spill] sm:$0xff] %v8767_v51  ;;  %v1003_v51 = vrot.slane %v8784_v39, 1 }
  0xde   : > { %14338 = vst [vmem:[#allocation17_spill] sm:$0xff] %v8769_v53  ;;  %v1002_v53 = vrot.slane %v8781_v36, 1 }
  0xdf   : > { %14340 = vst [vmem:[#allocation19_spill] sm:$0xff] %v8773_v7  ;;  %7070 = vmatmul.msk.f32.gmra.mxu0 %vm552_vm0, %v8743_v10  ;;  %7102 = vmatmul.msk.f32.gmra.mxu1 %vm552_vm0, %v8743_v10 }
  0xe0   : > { %7142 = vmatmul.msk.f32.gmra.mxu2 %vm552_vm0, %v1001_v0  ;;  %7174 = vmatmul.msk.f32.gmra.mxu3 %vm552_vm0, %v1001_v0  ;;  %v1004_v47 = vsel %vm947_vm1, %v1002_v53, %v1003_v51  ;;  %v7189_v0 = vld [vmem:[%s14329_s1 + $0xb0] sm:$0xff] }
  0xe1   : > { %1541 = vmatpush.msrb.mxu0 %v7189_v0 }
  0xe3   : > { %v8794_v18 = vpop.f32.mrf.mxu2  ;;  %v8796_v11 = vpop.f32.mrf.mxu3 }
  0xe4   : > { %v8790_v7 = vpop.f32.mrf.mxu0  ;;  %v8792_v61 = vpop.f32.mrf.mxu1  ;;  %14345 = vst [vmem:[#allocation24_spill] sm:$0xff] %v8794_v18 }
  0xe5   : > { %14343 = vst [vmem:[#allocation22_spill] sm:$0xff] %v8790_v7  ;;  %v8810_v7 = vld [vmem:[%s8432_s18 + $0x100] sm:$0xff] }
  0xe6   : > { %14344 = vst [vmem:[#allocation23_spill] sm:$0xff] %v8792_v61  ;;  %v7190_v61 = vld [vmem:[%s14329_s1 + $0xb8] sm:$0xff] }
  0xe7   : > { %14346 = vst [vmem:[#allocation25_spill] sm:$0xff] %v8796_v11  ;;  %7071 = vmatmul.msk.f32.gmra.mxu0 %vm552_vm0, %v8781_v36  ;;  %7103 = vmatmul.msk.f32.gmra.mxu1 %vm552_vm0, %v8781_v36  ;;  %v1005_v11 = vrot.slane %v8810_v7, 1 }
  0xe8   : > { %14347 = vst [vmem:[#allocation26_spill] sm:$0xff] %v8810_v7  ;;  %1654 = vmatpush.msrb.mxu1 %v7190_v61  ;;  %7143 = vmatmul.msk.f32.gmra.mxu2 %vm552_vm0, %v1004_v47 }
  0xe9   : > { %7175 = vmatmul.msk.f32.gmra.mxu3 %vm552_vm0, %v1004_v47  ;;  %v1006_v61 = vsel %vm947_vm1, %v1003_v51, %v1005_v11  ;;  %v8829_v47 = vld [vmem:[%s8432_s18 + $0x108] sm:$0xff] }
  0xea   : > { %14352 = vst [vmem:[#allocation31_spill] sm:$0xff] %v8829_v47  ;;  %v1007_v0 = vrot.slane %v8829_v47, 1 }
  0xeb   : > { %v8819_v36 = vpop.f32.mrf.mxu2  ;;  %v8821_v14 = vpop.f32.mrf.mxu3 }
  0xec   : > { %v8815_v53 = vpop.f32.mrf.mxu0  ;;  %v8817_v18 = vpop.f32.mrf.mxu1  ;;  %14350 = vst [vmem:[#allocation29_spill] sm:$0xff] %v8819_v36  ;;  %v1008_v51 = vsel %vm947_vm1, %v1005_v11, %v1007_v0 }
  0xed   : > { %14348 = vst [vmem:[#allocation27_spill] sm:$0xff] %v8815_v53 }
  0xee   : > { %14349 = vst [vmem:[#allocation28_spill] sm:$0xff] %v8817_v18 }
  0xef   : > { %14351 = vst [vmem:[#allocation30_spill] sm:$0xff] %v8821_v14  ;;  %7072 = vmatmul.msk.f32.gmra.mxu0 %vm552_vm0, %v8784_v39  ;;  %7104 = vmatmul.msk.f32.gmra.mxu1 %vm552_vm0, %v8784_v39 }
  0xf0   : > { %7144 = vmatmul.msk.f32.gmra.mxu2 %vm552_vm0, %v1006_v61 }
  0xf1   : > { %7176 = vmatmul.msk.f32.gmra.mxu3 %vm552_vm0, %v1006_v61  ;;  %v8848_v61 = vld [vmem:[%s8432_s18 + $0x110] sm:$0xf] }
  0xf2   : > { %14357 = vst [vmem:[#allocation36_spill] sm:$0xff] %v8848_v61 }
  0xf3   : > { %v8838_v14 = vpop.f32.mrf.mxu2  ;;  %v8840_v53 = vpop.f32.mrf.mxu3 }
  0xf4   : > { %v8834_v36 = vpop.f32.mrf.mxu0  ;;  %v8836_v18 = vpop.f32.mrf.mxu1  ;;  %14355 = vst [vmem:[#allocation34_spill] sm:$0xff] %v8838_v14  ;;  %v1009_v14 = vrot.slane %v8848_v61, 1  ;;  %v7185_v61 = vld [vmem:[%s14329_s1 + $0x90] sm:$0xff] }
  0xf5   : > { %14353 = vst [vmem:[#allocation32_spill] sm:$0xff] %v8834_v36 }
  0xf6   : > { %14354 = vst [vmem:[#allocation33_spill] sm:$0xff] %v8836_v18  ;;  %v1010_v11 = vsel %vm947_vm1, %v1007_v0, %v1009_v14  ;;  %v7261_v14 = vld [vmem:[%s14329_s1 + $0xf0] sm:$0xff]  ;;  %v7262_v0 = vld [vmem:[%s14329_s1 + $0xf8] sm:$0xff] }
  0xf7   : > { %14356 = vst [vmem:[#allocation35_spill] sm:$0xff] %v8840_v53  ;;  %7073 = vmatmul.msk.f32.gmra.mxu0 %vm552_vm0, %v8810_v7  ;;  %7105 = vmatmul.msk.f32.gmra.mxu1 %vm552_vm0, %v8810_v7  ;;  %v8867_v7 = vld [vmem:[%s8432_s18 + $0x118] sm:$0xff] }
  0xf8   : > { %7145 = vmatmul.msk.f32.gmra.mxu2 %vm552_vm0, %v1008_v51  ;;  %2090 = vmatpush.msrb.mxu3 %v7262_v0  ;;  %v7184_v0 = vld [vmem:[%s14329_s1 + $0x88] sm:$0xff] }
  0xf9   : > { %7177 = vmatmul.msk.f32.gmra.mxu3 %vm552_vm0, %v1008_v51  ;;  %v8870_v51 = vld [vmem:[%s8432_s18 + $0x120] sm:$0xff]  ;;  %1977 = vmatpush.msrb.mxu2 %v7261_v14 }
  0xfa   : > { %v7183_v14 = vld [vmem:[%s14329_s1 + $0x80] sm:$0xff] }
  0xfb   : > { %v8857_v36 = vpop.f32.mrf.mxu2  ;;  %v8859_v39 = vpop.f32.mrf.mxu3 }
  0xfc   : > { %v8853_v18 = vpop.f32.mrf.mxu0  ;;  %v8855_v53 = vpop.f32.mrf.mxu1  ;;  %14360 = vst [vmem:[#allocation39_spill] sm:$0xff] %v8857_v36  ;;  %v1011_v36 = vrot.slane %v8867_v7, 1 }
  0xfd   : > { %14358 = vst [vmem:[#allocation37_spill] sm:$0xff] %v8853_v18  ;;  %v1012_v18 = vrot.slane %v8870_v51, 1 }
  0xfe   : > { %14359 = vst [vmem:[#allocation38_spill] sm:$0xff] %v8855_v53  ;;  %v7187_v53 = vld [vmem:[%s14329_s1 + $0xa0] sm:$0xff] }
  0xff   : > { %14361 = vst [vmem:[#allocation40_spill] sm:$0xff] %v8859_v39  ;;  %7074 = vmatmul.msk.f32.gmra.mxu0 %vm552_vm0, %v8829_v47  ;;  %7106 = vmatmul.msk.f32.gmra.mxu1 %vm552_vm0, %v8829_v47  ;;  %v7188_v39 = vld [vmem:[%s14329_s1 + $0xa8] sm:$0xff] }
 0x100   : > { %7146 = vmatmul.msk.f32.gmra.mxu2 %vm552_vm0, %v1010_v11  ;;  %1542 = vmatpush.msrb.mxu0 %v7187_v53  ;;  %v7259_v53 = vld [vmem:[%s14329_s1 + $0xe0] sm:$0xff] }
 0x101   : > { %7178 = vmatmul.msk.f32.gmra.mxu3 %vm552_vm0, %v1010_v11  ;;  %1655 = vmatpush.msrb.mxu1 %v7188_v39  ;;  %v7186_v11 = vld [vmem:[%s14329_s1 + $0x98] sm:$0xff]  ;;  %v7260_v39 = vld [vmem:[%s14329_s1 + $0xe8] sm:$0xff] }
 0x102   : > { %1543 = vmatpush.msrb.mxu0 %v7185_v61  ;;  %1978 = vmatpush.msrb.mxu2 %v7259_v53  ;;  %v1013_v61 = vsel %vm947_vm1, %v1011_v36, %v1012_v18  ;;  %v7255_v53 = vld [vmem:[%s14329_s1 + $0xc0] sm:$0xff] }
 0x103   : > { %v8904_v25 = vpop.f32.mrf.mxu2  ;;  %v8906_v10 = vpop.f32.mrf.mxu3  ;;  %1656 = vmatpush.msrb.mxu1 %v7186_v11  ;;  %2091 = vmatpush.msrb.mxu3 %v7260_v39  ;;  %v8926_v11 = vld [vmem:[%s8432_s18 + $0x128] sm:$0xff] }
 0x104   : > { %v8894_v47 = vpop.f32.mrf.mxu0  ;;  %v8896_v28 = vpop.f32.mrf.mxu1  ;;  %14364 = vst [vmem:[#allocation43_spill] sm:$0xff] %v8904_v25  ;;  %1544 = vmatpush.msrb.mxu0 %v7183_v14  ;;  %v7256_v39 = vld [vmem:[%s14329_s1 + $0xc8] sm:$0xff]  ;;  %v1014_v36 = vrot.slane %v8926_v11, 1 }
 0x105   : > { %14362 = vst [vmem:[#allocation41_spill] sm:$0xff] %v8894_v47  ;;  %1657 = vmatpush.msrb.mxu1 %v7184_v0 }
 0x106   : > { %14363 = vst [vmem:[#allocation42_spill] sm:$0xff] %v8896_v28  ;;  %v7257_v28 = vld [vmem:[%s14329_s1 + $0xd0] sm:$0xff] }
 0x107   : > { %14365 = vst [vmem:[#allocation44_spill] sm:$0xff] %v8906_v10  ;;  %v7258_v10 = vld [vmem:[%s14329_s1 + $0xd8] sm:$0xff]  ;;  %7075 = vmatmul.msk.f32.gmra.mxu0 %vm552_vm0, %v8867_v7  ;;  %7107 = vmatmul.msk.f32.gmra.mxu1 %vm552_vm0, %v8867_v7 }
 0x108   : > { %1979 = vmatpush.msrb.mxu2 %v7257_v28  ;;  %2092 = vmatpush.msrb.mxu3 %v7258_v10  ;;  %v1015_v10 = vsel %vm947_vm1, %v1012_v18, %v1014_v36  ;;  %v8951_v28 = vld [vmem:[%s8432_s18 + $0x130] sm:$0xff] }
 0x109   : > { %7147 = vmatmul.msk.f32.gmra.mxu2 %vm552_vm0, %v1013_v61  ;;  %7179 = vmatmul.msk.f32.gmra.mxu3 %vm552_vm0, %v1013_v61  ;;  %v1016_v61 = vrot.slane %v8951_v28, 1 }
 0x10a   : > { %1980 = vmatpush.msrb.mxu2 %v7255_v53  ;;  %2093 = vmatpush.msrb.mxu3 %v7256_v39 }
 0x10b   : > { %v8941_v25 = vpop.f32.mrf.mxu2  ;;  %v8943_v47 = vpop.f32.mrf.mxu3  ;;  %v1017_v18 = vsel %vm947_vm1, %v1014_v36, %v1016_v61 }
 0x10c   : > { %v8937_v14 = vpop.f32.mrf.mxu0  ;;  %v8939_v0 = vpop.f32.mrf.mxu1  ;;  %14368 = vst [vmem:[#allocation47_spill] sm:$0xff] %v8941_v25 }
 0x10d   : > { %14366 = vst [vmem:[#allocation45_spill] sm:$0xff] %v8937_v14  ;;  %v1385_v14 = vrot.slane %v8438_v17, 2 }
 0x10e   : > { %14367 = vst [vmem:[#allocation46_spill] sm:$0xff] %v8939_v0  ;;  %v8970_v0 = vld [vmem:[%s8432_s18 + $0x138] sm:$0xf] }
 0x10f   : > { %14369 = vst [vmem:[#allocation48_spill] sm:$0xff] %v8943_v47  ;;  %7076 = vmatmul.msk.f32.gmra.mxu0 %vm552_vm0, %v8870_v51  ;;  %7108 = vmatmul.msk.f32.gmra.mxu1 %vm552_vm0, %v8870_v51 }
 0x110   : > { %14374 = vst [vmem:[#allocation53_spill] sm:$0xff] %v8970_v0 }
 0x111   : > { %7148 = vmatmul.msk.f32.gmra.mxu2 %vm552_vm0, %v1015_v10  ;;  %7180 = vmatmul.msk.f32.gmra.mxu3 %vm552_vm0, %v1015_v10  ;;  %v1018_v10 = vrot.slane %v8970_v0, 1 }
 0x113   : > { %v8960_v47 = vpop.f32.mrf.mxu2  ;;  %v8962_v25 = vpop.f32.mrf.mxu3  ;;  %v1019_v36 = vsel %vm947_vm1, %v1016_v61, %v1018_v10 }
 0x114   : > { %v8956_v53 = vpop.f32.mrf.mxu0  ;;  %v8958_v39 = vpop.f32.mrf.mxu1  ;;  %14372 = vst [vmem:[#allocation51_spill] sm:$0xff] %v8960_v47 }
 0x115   : > { %14370 = vst [vmem:[#allocation49_spill] sm:$0xff] %v8956_v53 }
 0x116   : > { %14371 = vst [vmem:[#allocation50_spill] sm:$0xff] %v8958_v39 }
 0x117   : > { %14373 = vst [vmem:[#allocation52_spill] sm:$0xff] %v8962_v25  ;;  %7077 = vmatmul.msk.f32.gmra.mxu0 %vm552_vm0, %v8926_v11  ;;  %7109 = vmatmul.msk.f32.gmra.mxu1 %vm552_vm0, %v8926_v11 }
 0x119   : > { %7149 = vmatmul.msk.f32.gmra.mxu2 %vm552_vm0, %v1017_v18  ;;  %7181 = vmatmul.msk.f32.gmra.mxu3 %vm552_vm0, %v1017_v18  ;;  %v1384_v18 = vrot.slane %v8435_v16, 2 }
 0x11b   : > { %v8979_v25 = vpop.f32.mrf.mxu2  ;;  %v8981_v53 = vpop.f32.mrf.mxu3  ;;  %v1386_v0 = vsel %vm1383_vm2, %v1384_v18, %v1385_v14 }
 0x11c   : > { %v8975_v39 = vpop.f32.mrf.mxu0  ;;  %v8977_v47 = vpop.f32.mrf.mxu1  ;;  %14377 = vst [vmem:[#allocation56_spill] sm:$0xff] %v8979_v25  ;;  %v1820_v25 = vrot.slane %v8435_v16, 3  ;;  %v1387_v16 = vrot.slane %v8447_v20, 2 }
 0x11d   : > { %14375 = vst [vmem:[#allocation54_spill] sm:$0xff] %v8975_v39 }
 0x11e   : > { %14376 = vst [vmem:[#allocation55_spill] sm:$0xff] %v8977_v47 }
 0x11f   : > { %14378 = vst [vmem:[#allocation57_spill] sm:$0xff] %v8981_v53  ;;  %7078 = vmatmul.msk.f32.gmra.mxu0 %vm552_vm0, %v8951_v28  ;;  %7110 = vmatmul.msk.f32.gmra.mxu1 %vm552_vm0, %v8951_v28  ;;  %v1821_v53 = vrot.slane %v8438_v17, 3  ;;  %v1823_v17 = vrot.slane %v8447_v20, 3  ;;  %v1825_v20 = vrot.slane %v8459_v24, 3 }
 0x121   : > { %7150 = vmatmul.msk.f32.gmra.mxu2 %vm552_vm0, %v1019_v36  ;;  %7182 = vmatmul.msk.f32.gmra.mxu3 %vm552_vm0, %v1019_v36  ;;  %v1822_v36 = vsel %vm1819_vm3, %v1820_v25, %v1821_v53  ;;  %v1824_v25 = vsel %vm1819_vm3, %v1821_v53, %v1823_v17  ;;  %v1826_v53 = vsel %vm1819_vm3, %v1823_v17, %v1825_v20  ;;  %v1393_v17 = vrot.slane %v8481_v30, 2 }
 0x123   : > { %v8999_v61 = vpop.f32.mrf.mxu2  ;;  %v9001_v10 = vpop.f32.mrf.mxu3 }
 0x124   : > { %v8994_v47 = vpop.f32.mrf.mxu0  ;;  %v8996_v39 = vpop.f32.mrf.mxu1  ;;  %14381 = vst [vmem:[#allocation60_spill] sm:$0xff] %v8999_v61 }
 0x125   : > { %14379 = vst [vmem:[#allocation58_spill] sm:$0xff] %v8994_v47 }
 0x126   : > { %14380 = vst [vmem:[#allocation59_spill] sm:$0xff] %v8996_v39 }
 0x127   : > { %14382 = vst [vmem:[#allocation61_spill] sm:$0xff] %v9001_v10  ;;  %7191 = vmatmul.msk.f32.vlgmr.msrb.gmra.mxu0 %vm552_vm0, %v1386_v0  ;;  %7223 = vmatmul.msk.f32.vlgmr.msrb.gmra.mxu1 %vm552_vm0, %v1386_v0  ;;  %v1388_v10 = vsel %vm1383_vm2, %v1385_v14, %v1387_v16  ;;  %v1389_v0 = vrot.slane %v8459_v24, 2  ;;  %v1827_v24 = vrot.slane %v8470_v27, 3 }
 0x129   : > { %7263 = vmatmul.msk.f32.vlgmr.msrb.gmra.mxu2 %vm552_vm0, %v1822_v36  ;;  %7295 = vmatmul.msk.f32.vlgmr.msrb.gmra.mxu3 %vm552_vm0, %v1822_v36 }
 0x12b   : > { %v9015_v61 = vpop.f32.mrf.mxu2  ;;  %v9017_v47 = vpop.f32.mrf.mxu3 }
 0x12c   : > { %v9010_v18 = vpop.f32.mrf.mxu0  ;;  %v9012_v39 = vpop.f32.mrf.mxu1  ;;  %14384 = vst [vmem:[#allocation63_spill] sm:$0xff] %v9015_v61 }
 0x12d   : > { %14383 = vst [vmem:[#allocation62_spill] sm:$0xff] %v9012_v39 }
 0x12e   : > { %14385 = vst [vmem:[#allocation64_spill] sm:$0xff] %v9017_v47  ;;  %v1390_v47 = vsel %vm1383_vm2, %v1387_v16, %v1389_v0 }
 0x12f   : > { %7192 = vmatmul.msk.f32.gmra.mxu0 %vm552_vm0, %v1388_v10  ;;  %7224 = vmatmul.msk.f32.gmra.mxu1 %vm552_vm0, %v1388_v10  ;;  %v1391_v10 = vrot.slane %v8470_v27, 2  ;;  %v1394_v27 = vrot.slane %v8484_v31, 2 }
 0x131   : > { %7264 = vmatmul.msk.f32.gmra.mxu2 %vm552_vm0, %v1824_v25  ;;  %7296 = vmatmul.msk.f32.gmra.mxu3 %vm552_vm0, %v1824_v25 }
 0x133   : > { %v9031_v61 = vpop.f32.mrf.mxu2  ;;  %v9033_v39 = vpop.f32.mrf.mxu3 }
 0x134   : > { %v9026_v36 = vpop.f32.mrf.mxu0  ;;  %v9028_v14 = vpop.f32.mrf.mxu1  ;;  %14387 = vst [vmem:[#allocation66_spill] sm:$0xff] %v9031_v61 }
 0x135   : > { %14386 = vst [vmem:[#allocation65_spill] sm:$0xff] %v9028_v14 }
 0x136   : > { %14388 = vst [vmem:[#allocation67_spill] sm:$0xff] %v9033_v39  ;;  %v1392_v39 = vsel %vm1383_vm2, %v1389_v0, %v1391_v10  ;;  %v1829_v0 = vrot.slane %v8481_v30, 3  ;;  %v1396_v30 = vrot.slane %v8496_v35, 2 }
 0x137   : > { %7193 = vmatmul.msk.f32.gmra.mxu0 %vm552_vm0, %v1390_v47  ;;  %7225 = vmatmul.msk.f32.gmra.mxu1 %vm552_vm0, %v1390_v47  ;;  %v1828_v47 = vsel %vm1819_vm3, %v1825_v20, %v1827_v24 }
 0x139   : > { %7265 = vmatmul.msk.f32.gmra.mxu2 %vm552_vm0, %v1826_v53  ;;  %7297 = vmatmul.msk.f32.gmra.mxu3 %vm552_vm0, %v1826_v53  ;;  %v1830_v53 = vrot.slane %v8484_v31, 3  ;;  %v1832_v31 = vrot.slane %v8496_v35, 3  ;;  %v1834_v35 = vrot.slane %v8507_v38, 3 }
 0x13b   : > { %v9047_v61 = vpop.f32.mrf.mxu2  ;;  %v9049_v14 = vpop.f32.mrf.mxu3  ;;  %v1831_v24 = vsel %vm1819_vm3, %v1829_v0, %v1830_v53  ;;  %v1833_v0 = vsel %vm1819_vm3, %v1830_v53, %v1832_v31  ;;  %v1835_v53 = vsel %vm1819_vm3, %v1832_v31, %v1834_v35  ;;  %v1402_v31 = vrot.slane %v8529_v44, 2 }
 0x13c   : > { %v9042_v25 = vpop.f32.mrf.mxu0  ;;  %v9044_v16 = vpop.f32.mrf.mxu1  ;;  %14389 = vst [vmem:[#allocation68_spill] sm:$0xff] %v9047_v61 }
 0x13d   : > { %14390 = vst [vmem:[#allocation69_spill] sm:$0xff] %v9049_v14 }
 0x13f   : > { %7194 = vmatmul.msk.f32.gmra.mxu0 %vm552_vm0, %v1392_v39  ;;  %7226 = vmatmul.msk.f32.gmra.mxu1 %vm552_vm0, %v1392_v39  ;;  %v1395_v39 = vsel %vm1383_vm2, %v1393_v17, %v1394_v27 }
 0x141   : > { %7266 = vmatmul.msk.f32.gmra.mxu2 %vm552_vm0, %v1828_v47  ;;  %7298 = vmatmul.msk.f32.gmra.mxu3 %vm552_vm0, %v1828_v47 }
 0x143   : > { %v9065_v61 = vpop.f32.mrf.mxu2  ;;  %v9067_v20 = vpop.f32.mrf.mxu3 }
 0x144   : > { %v9060_v10 = vpop.f32.mrf.mxu0  ;;  %v9062_v14 = vpop.f32.mrf.mxu1  ;;  %14392 = vst [vmem:[#allocation71_spill] sm:$0xff] %v9065_v61 }
 0x145   : > { %14391 = vst [vmem:[#allocation70_spill] sm:$0xff] %v9062_v14 }
 0x146   : > { %14393 = vst [vmem:[#allocation72_spill] sm:$0xff] %v9067_v20  ;;  %v1397_v20 = vsel %vm1383_vm2, %v1394_v27, %v1396_v30 }
 0x147   : > { %7195 = vmatmul.msk.f32.gmra.mxu0 %vm552_vm0, %v1395_v39  ;;  %7227 = vmatmul.msk.f32.gmra.mxu1 %vm552_vm0, %v1395_v39  ;;  %v1398_v39 = vrot.slane %v8507_v38, 2  ;;  %v1836_v38 = vrot.slane %v8518_v41, 3 }
 0x149   : > { %7267 = vmatmul.msk.f32.gmra.mxu2 %vm552_vm0, %v1831_v24  ;;  %7299 = vmatmul.msk.f32.gmra.mxu3 %vm552_vm0, %v1831_v24 }
 0x14b   : > { %v9081_v61 = vpop.f32.mrf.mxu2  ;;  %v9083_v14 = vpop.f32.mrf.mxu3 }
 0x14c   : > { %v9076_v47 = vpop.f32.mrf.mxu0  ;;  %v9078_v17 = vpop.f32.mrf.mxu1  ;;  %14395 = vst [vmem:[#allocation74_spill] sm:$0xff] %v9081_v61 }
 0x14d   : > { %14394 = vst [vmem:[#allocation73_spill] sm:$0xff] %v9078_v17 }
 0x14e   : > { %14396 = vst [vmem:[#allocation75_spill] sm:$0xff] %v9083_v14  ;;  %v1399_v14 = vsel %vm1383_vm2, %v1396_v30, %v1398_v39 }
 0x14f   : > { %7196 = vmatmul.msk.f32.gmra.mxu0 %vm552_vm0, %v1397_v20  ;;  %7228 = vmatmul.msk.f32.gmra.mxu1 %vm552_vm0, %v1397_v20  ;;  %v1400_v20 = vrot.slane %v8518_v41, 2  ;;  %v1403_v41 = vrot.slane %v8532_v45, 2 }
 0x151   : > { %7268 = vmatmul.msk.f32.gmra.mxu2 %vm552_vm0, %v1833_v0  ;;  %7300 = vmatmul.msk.f32.gmra.mxu3 %vm552_vm0, %v1833_v0 }
 0x153   : > { %v9097_v61 = vpop.f32.mrf.mxu2  ;;  %v9099_v17 = vpop.f32.mrf.mxu3 }
 0x154   : > { %v9092_v24 = vpop.f32.mrf.mxu0  ;;  %v9094_v27 = vpop.f32.mrf.mxu1  ;;  %14398 = vst [vmem:[#allocation77_spill] sm:$0xff] %v9097_v61 }
 0x155   : > { %14397 = vst [vmem:[#allocation76_spill] sm:$0xff] %v9094_v27 }
 0x156   : > { %14399 = vst [vmem:[#allocation78_spill] sm:$0xff] %v9099_v17  ;;  %v1401_v17 = vsel %vm1383_vm2, %v1398_v39, %v1400_v20  ;;  %v1838_v39 = vrot.slane %v8529_v44, 3  ;;  %v1405_v44 = vrot.slane %v8544_v49, 2 }
 0x157   : > { %7197 = vmatmul.msk.f32.gmra.mxu0 %vm552_vm0, %v1399_v14  ;;  %7229 = vmatmul.msk.f32.gmra.mxu1 %vm552_vm0, %v1399_v14  ;;  %v1837_v14 = vsel %vm1819_vm3, %v1834_v35, %v1836_v38 }
 0x159   : > { %7269 = vmatmul.msk.f32.gmra.mxu2 %vm552_vm0, %v1835_v53  ;;  %7301 = vmatmul.msk.f32.gmra.mxu3 %vm552_vm0, %v1835_v53  ;;  %v1839_v53 = vrot.slane %v8532_v45, 3  ;;  %v1841_v45 = vrot.slane %v8544_v49, 3  ;;  %v1843_v49 = vrot.slane %v8555_v52, 3 }
 0x15b   : > { %v9113_v61 = vpop.f32.mrf.mxu2  ;;  %v9115_v27 = vpop.f32.mrf.mxu3  ;;  %v1840_v38 = vsel %vm1819_vm3, %v1838_v39, %v1839_v53  ;;  %v1842_v39 = vsel %vm1819_vm3, %v1839_v53, %v1841_v45  ;;  %v1844_v53 = vsel %vm1819_vm3, %v1841_v45, %v1843_v49  ;;  %v1411_v45 = vrot.slane %v8577_v58, 2 }
 0x15c   : > { %v9108_v0 = vpop.f32.mrf.mxu0  ;;  %v9110_v30 = vpop.f32.mrf.mxu1  ;;  %14400 = vst [vmem:[#allocation79_spill] sm:$0xff] %v9113_v61 }
 0x15d   : > { %14401 = vst [vmem:[#allocation80_spill] sm:$0xff] %v9115_v27 }
 0x15f   : > { %7198 = vmatmul.msk.f32.gmra.mxu0 %vm552_vm0, %v1401_v17  ;;  %7230 = vmatmul.msk.f32.gmra.mxu1 %vm552_vm0, %v1401_v17  ;;  %v1404_v17 = vsel %vm1383_vm2, %v1402_v31, %v1403_v41 }
 0x161   : > { %7270 = vmatmul.msk.f32.gmra.mxu2 %vm552_vm0, %v1837_v14  ;;  %7302 = vmatmul.msk.f32.gmra.mxu3 %vm552_vm0, %v1837_v14 }
 0x163   : > { %v9131_v61 = vpop.f32.mrf.mxu2  ;;  %v9133_v35 = vpop.f32.mrf.mxu3 }
 0x164   : > { %v9126_v20 = vpop.f32.mrf.mxu0  ;;  %v9128_v27 = vpop.f32.mrf.mxu1  ;;  %14403 = vst [vmem:[#allocation82_spill] sm:$0xff] %v9131_v61 }
 0x165   : > { %14402 = vst [vmem:[#allocation81_spill] sm:$0xff] %v9128_v27 }
 0x166   : > { %14404 = vst [vmem:[#allocation83_spill] sm:$0xff] %v9133_v35  ;;  %v1406_v35 = vsel %vm1383_vm2, %v1403_v41, %v1405_v44 }
 0x167   : > { %7199 = vmatmul.msk.f32.gmra.mxu0 %vm552_vm0, %v1404_v17  ;;  %7231 = vmatmul.msk.f32.gmra.mxu1 %vm552_vm0, %v1404_v17  ;;  %v1407_v17 = vrot.slane %v8555_v52, 2  ;;  %v1845_v52 = vrot.slane %v8566_v55, 3 }
 0x169   : > { %7271 = vmatmul.msk.f32.gmra.mxu2 %vm552_vm0, %v1840_v38  ;;  %7303 = vmatmul.msk.f32.gmra.mxu3 %vm552_vm0, %v1840_v38 }
 0x16b   : > { %v9147_v61 = vpop.f32.mrf.mxu2 }
 0x16c   : > { %v9142_v14 = vpop.f32.mrf.mxu0  ;;  %v9144_v31 = vpop.f32.mrf.mxu1  ;;  %14406 = vst [vmem:[#allocation85_spill] sm:$0xff] %v9147_v61 }
 0x16d   : > { %14405 = vst [vmem:[#allocation84_spill] sm:$0xff] %v9144_v31  ;;  %v9149_v27 = vpop.f32.mrf.mxu3 }
 0x16e   : > { %14407 = vst [vmem:[#allocation86_spill] sm:$0xff] %v9149_v27  ;;  %v1408_v27 = vsel %vm1383_vm2, %v1405_v44, %v1407_v17 }
 0x16f   : > { %7200 = vmatmul.msk.f32.gmra.mxu0 %vm552_vm0, %v1406_v35  ;;  %7232 = vmatmul.msk.f32.gmra.mxu1 %vm552_vm0, %v1406_v35  ;;  %v1409_v35 = vrot.slane %v8566_v55, 2  ;;  %v1412_v55 = vrot.slane %v8580_v59, 2 }
 0x171   : > { %7272 = vmatmul.msk.f32.gmra.mxu2 %vm552_vm0, %v1842_v39  ;;  %7304 = vmatmul.msk.f32.gmra.mxu3 %vm552_vm0, %v1842_v39 }
 0x173   : > { %v9163_v61 = vpop.f32.mrf.mxu2 }
 0x174   : > { %v9158_v38 = vpop.f32.mrf.mxu0  ;;  %v9160_v41 = vpop.f32.mrf.mxu1  ;;  %14409 = vst [vmem:[#allocation88_spill] sm:$0xff] %v9163_v61 }
 0x175   : > { %14408 = vst [vmem:[#allocation87_spill] sm:$0xff] %v9160_v41  ;;  %v9165_v31 = vpop.f32.mrf.mxu3 }
 0x176   : > { %14410 = vst [vmem:[#allocation89_spill] sm:$0xff] %v9165_v31  ;;  %v1410_v31 = vsel %vm1383_vm2, %v1407_v17, %v1409_v35  ;;  %v1847_v17 = vrot.slane %v8577_v58, 3  ;;  %v1414_v58 = vrot.slane %v8592_v63, 2 }
 0x177   : > { %7201 = vmatmul.msk.f32.gmra.mxu0 %vm552_vm0, %v1408_v27  ;;  %7233 = vmatmul.msk.f32.gmra.mxu1 %vm552_vm0, %v1408_v27  ;;  %v1846_v27 = vsel %vm1819_vm3, %v1843_v49, %v1845_v52 }
 0x179   : > { %7273 = vmatmul.msk.f32.gmra.mxu2 %vm552_vm0, %v1844_v53  ;;  %7305 = vmatmul.msk.f32.gmra.mxu3 %vm552_vm0, %v1844_v53  ;;  %v1848_v53 = vrot.slane %v8580_v59, 3  ;;  %v1850_v59 = vrot.slane %v8592_v63, 3  ;;  %v1852_v63 = vrot.slane %v8603_v2, 3 }
 0x17b   : > { %v9179_v61 = vpop.f32.mrf.mxu2  ;;  %v1849_v52 = vsel %vm1819_vm3, %v1847_v17, %v1848_v53  ;;  %v1851_v17 = vsel %vm1819_vm3, %v1848_v53, %v1850_v59  ;;  %v1853_v53 = vsel %vm1819_vm3, %v1850_v59, %v1852_v63  ;;  %v1420_v59 = vrot.slane %v8625_v8, 2 }
 0x17c   : > { %v9174_v39 = vpop.f32.mrf.mxu0  ;;  %v9176_v44 = vpop.f32.mrf.mxu1  ;;  %14413 = vst [vmem:[#allocation92_spill] sm:$0xff] %v9179_v61 }
 0x17d   : > { %14411 = vst [vmem:[#allocation90_spill] sm:$0xff] %v9174_v39  ;;  %v9181_v41 = vpop.f32.mrf.mxu3 }
 0x17e   : > { %14412 = vst [vmem:[#allocation91_spill] sm:$0xff] %v9176_v44 }
 0x17f   : > { %14414 = vst [vmem:[#allocation93_spill] sm:$0xff] %v9181_v41  ;;  %7202 = vmatmul.msk.f32.gmra.mxu0 %vm552_vm0, %v1410_v31  ;;  %7234 = vmatmul.msk.f32.gmra.mxu1 %vm552_vm0, %v1410_v31  ;;  %v1413_v31 = vsel %vm1383_vm2, %v1411_v45, %v1412_v55 }
 0x181   : > { %7274 = vmatmul.msk.f32.gmra.mxu2 %vm552_vm0, %v1846_v27  ;;  %7306 = vmatmul.msk.f32.gmra.mxu3 %vm552_vm0, %v1846_v27 }
 0x183   : > { %v9197_v61 = vpop.f32.mrf.mxu2 }
 0x184   : > { %v9192_v35 = vpop.f32.mrf.mxu0  ;;  %v9194_v41 = vpop.f32.mrf.mxu1  ;;  %14417 = vst [vmem:[#allocation96_spill] sm:$0xff] %v9197_v61 }
 0x185   : > { %14415 = vst [vmem:[#allocation94_spill] sm:$0xff] %v9192_v35  ;;  %v9199_v49 = vpop.f32.mrf.mxu3 }
 0x186   : > { %14416 = vst [vmem:[#allocation95_spill] sm:$0xff] %v9194_v41 }
 0x187   : > { %14418 = vst [vmem:[#allocation97_spill] sm:$0xff] %v9199_v49  ;;  %7203 = vmatmul.msk.f32.gmra.mxu0 %vm552_vm0, %v1413_v31  ;;  %7235 = vmatmul.msk.f32.gmra.mxu1 %vm552_vm0, %v1413_v31  ;;  %v1415_v49 = vsel %vm1383_vm2, %v1412_v55, %v1414_v58  ;;  %v1416_v31 = vrot.slane %v8603_v2, 2  ;;  %v1854_v2 = vrot.slane %v8614_v5, 3 }
 0x189   : > { %7275 = vmatmul.msk.f32.gmra.mxu2 %vm552_vm0, %v1849_v52  ;;  %7307 = vmatmul.msk.f32.gmra.mxu3 %vm552_vm0, %v1849_v52 }
 0x18c   : > { %v9208_v27 = vpop.f32.mrf.mxu0  ;;  %v9210_v45 = vpop.f32.mrf.mxu1 }
 0x18d   : > { %14419 = vst [vmem:[#allocation98_spill] sm:$0xff] %v9208_v27  ;;  %v9213_v61 = vpop.f32.mrf.mxu2  ;;  %v9215_v41 = vpop.f32.mrf.mxu3 }
 0x18e   : > { %14420 = vst [vmem:[#allocation99_spill] sm:$0xff] %v9210_v45 }
 0x18f   : > { %14421 = vst [vmem:[#allocation100_spill] sm:$0xff] %v9213_v61  ;;  %7204 = vmatmul.msk.f32.gmra.mxu0 %vm552_vm0, %v1415_v49  ;;  %7236 = vmatmul.msk.f32.gmra.mxu1 %vm552_vm0, %v1415_v49  ;;  %v1418_v49 = vrot.slane %v8614_v5, 2  ;;  %v1421_v5 = vrot.slane %v8628_v9, 2 }
 0x190   : > { %14422 = vst [vmem:[#allocation101_spill] sm:$0xff] %v9215_v41  ;;  %v1417_v41 = vsel %vm1383_vm2, %v1414_v58, %v1416_v31 }
 0x191   : > { %7276 = vmatmul.msk.f32.gmra.mxu2 %vm552_vm0, %v1851_v17  ;;  %7308 = vmatmul.msk.f32.gmra.mxu3 %vm552_vm0, %v1851_v17 }
 0x194   : > { %v9224_v52 = vpop.f32.mrf.mxu0  ;;  %v9226_v55 = vpop.f32.mrf.mxu1 }
 0x195   : > { %14423 = vst [vmem:[#allocation102_spill] sm:$0xff] %v9224_v52  ;;  %v9229_v61 = vpop.f32.mrf.mxu2  ;;  %v9231_v45 = vpop.f32.mrf.mxu3 }
 0x196   : > { %14424 = vst [vmem:[#allocation103_spill] sm:$0xff] %v9226_v55 }
 0x197   : > { %14425 = vst [vmem:[#allocation104_spill] sm:$0xff] %v9229_v61  ;;  %7205 = vmatmul.msk.f32.gmra.mxu0 %vm552_vm0, %v1417_v41  ;;  %7237 = vmatmul.msk.f32.gmra.mxu1 %vm552_vm0, %v1417_v41  ;;  %v1855_v41 = vsel %vm1819_vm3, %v1852_v63, %v1854_v2 }
 0x198   : > { %14426 = vst [vmem:[#allocation105_spill] sm:$0xff] %v9231_v45  ;;  %v1419_v45 = vsel %vm1383_vm2, %v1416_v31, %v1418_v49  ;;  %v1856_v31 = vrot.slane %v8625_v8, 3  ;;  %v1857_v49 = vrot.slane %v8628_v9, 3 }
 0x199   : > { %7277 = vmatmul.msk.f32.gmra.mxu2 %vm552_vm0, %v1853_v53  ;;  %7309 = vmatmul.msk.f32.gmra.mxu3 %vm552_vm0, %v1853_v53  ;;  %v538_v53 = vld [vmem:[%s14284_s2] sm:$0x3] }
 0x19a   : > { %v1858_v8 = vsel %vm1819_vm3, %v1856_v31, %v1857_v49 }
 0x19c   : > { %v9240_v17 = vpop.f32.mrf.mxu0  ;;  %v9242_v58 = vpop.f32.mrf.mxu1 }
 0x19d   : > { %14427 = vst [vmem:[#allocation106_spill] sm:$0xff] %v9240_v17  ;;  %v9245_v61 = vpop.f32.mrf.mxu2  ;;  %v9247_v55 = vpop.f32.mrf.mxu3 }
 0x19e   : > { %14428 = vst [vmem:[#allocation107_spill] sm:$0xff] %v9242_v58 }
 0x19f   : > { %14429 = vst [vmem:[#allocation108_spill] sm:$0xff] %v9245_v61  ;;  %7206 = vmatmul.msk.f32.gmra.mxu0 %vm552_vm0, %v1419_v45  ;;  %7238 = vmatmul.msk.f32.gmra.mxu1 %vm552_vm0, %v1419_v45  ;;  %v9263_v45 = vperm.slane %v538_v53, 1  ;;  %v1422_v61 = vsel %vm1383_vm2, %v1420_v59, %v1421_v5 }
 0x1a0   : > { %14430 = vst [vmem:[#allocation109_spill] sm:$0xff] %v9247_v55  ;;  %v9261_v55 = vperm.slane %v538_v53, 0  ;;  %v1423_v53 = vrot.slane %v8644_v15, 2 }
 0x1a1   : > { %7278 = vmatmul.msk.f32.gmra.mxu2 %vm552_vm0, %v1855_v41  ;;  %7310 = vmatmul.msk.f32.gmra.mxu3 %vm552_vm0, %v1855_v41  ;;  %v876_v41 = vadd.f32 %v8636_v13, %v9263_v45 }
 0x1a2   : > { %v875_v9 = vadd.f32 %v8634_v12, %v9261_v55  ;;  %v1424_v12 = vsel %vm1383_vm2, %v1421_v5, %v1423_v53 }
 0x1a4   : > { %v1546_v63 = vpop.f32.mrf.mxu0  ;;  %v1659_v2 = vpop.f32.mrf.mxu1  ;;  %v1319_v59 = vadd.f32 %v8653_v22, %v875_v9 }
 0x1a5   : > { %v9266_v58 = vpop.f32.mrf.mxu2  ;;  %v9268_v17 = vpop.f32.mrf.mxu3 }
 0x1a6   : > { %14431 = vst [vmem:[#allocation110_spill] sm:$0xff] %v9266_v58  ;;  %v1320_v58 = vadd.f32 %v8655_v23, %v876_v41  ;;  %v878_v23 = vadd.f32 %v8651_v21, %v9263_v45 }
 0x1a7   : > { %14432 = vst [vmem:[#allocation111_spill] sm:$0xff] %v9268_v17  ;;  %7207 = vmatmul.msk.f32.gmra.mxu0 %vm552_vm0, %v1422_v61  ;;  %7239 = vmatmul.msk.f32.gmra.mxu1 %vm552_vm0, %v1422_v61  ;;  %v1859_v61 = vrot.slane %v8644_v15, 3  ;;  %v1755_v17 = vadd.f32 %v1546_v63, %v1319_v59  ;;  %v877_v15 = vadd.f32 %v8649_v19, %v9261_v55 }
 0x1a8   : > { %v1756_v31 = vadd.f32 %v1659_v2, %v1320_v58  ;;  %v1425_v58 = vrot.slane %v8663_v26, 2 }
 0x1a9   : > { %7279 = vmatmul.msk.f32.gmra.mxu2 %vm552_vm0, %v1858_v8  ;;  %7311 = vmatmul.msk.f32.gmra.mxu3 %vm552_vm0, %v1858_v8  ;;  %v1860_v22 = vsel %vm1819_vm3, %v1857_v49, %v1859_v61  ;;  %v1321_v5 = vadd.f32 %v8672_v33, %v877_v15 }
 0x1aa   : > { %v1426_v19 = vsel %vm1383_vm2, %v1423_v53, %v1425_v58 }
 0x1ac   : > { %v1549_v52 = vpop.f32.mrf.mxu0  ;;  %v1662_v27 = vpop.f32.mrf.mxu1 }
 0x1ad   : > { %v1982_v35 = vpop.f32.mrf.mxu2  ;;  %v2095_v13 = vpop.f32.mrf.mxu3  ;;  %v1757_v63 = vadd.f32 %v1549_v52, %v1321_v5 }
 0x1ae   : > { %v9284_v44 = vadd.f32 %v1982_v35, %v1755_v17  ;;  %v9286_v39 = vadd.f32 %v2095_v13, %v1756_v31  ;;  %v1322_v35 = vadd.f32 %v8674_v34, %v878_v23  ;;  %v1861_v17 = vrot.slane %v8663_v26, 3 }
 0x1af   : > { %7208 = vmatmul.msk.f32.gmra.mxu0 %vm552_vm0, %v1424_v12  ;;  %7240 = vmatmul.msk.f32.gmra.mxu1 %vm552_vm0, %v1424_v12  ;;  %v879_v26 = vadd.f32 %v8668_v29, %v9261_v55  ;;  %v880_v34 = vadd.f32 %v8670_v32, %v9263_v45  ;;  %v1863_v31 = vrot.slane %v8682_v37, 3 }
 0x1b0   : > { %14433 = vst [vmem:[#allocation112_spill] sm:$0xff] %v9284_v44  ;;  %v1758_v49 = vadd.f32 %v1662_v27, %v1322_v35  ;;  %v1862_v33 = vsel %vm1819_vm3, %v1859_v61, %v1861_v17  ;;  %v1427_v27 = vrot.slane %v8682_v37, 2  ;;  %v881_v37 = vadd.f32 %v8687_v40, %v9261_v55 }
 0x1b1   : > { %14434 = vst [vmem:[#allocation113_spill] sm:$0xff] %v9286_v39  ;;  %7280 = vmatmul.msk.f32.gmra.mxu2 %vm552_vm0, %v1860_v22  ;;  %7312 = vmatmul.msk.f32.gmra.mxu3 %vm552_vm0, %v1860_v22  ;;  %v1323_v52 = vadd.f32 %v8691_v43, %v879_v26  ;;  %v1324_v53 = vadd.f32 %v8693_v46, %v880_v34  ;;  %v1430_v35 = vrot.slane %v8704_v50, 2  ;;  %v1432_v34 = vrot.slane %v8724_v62, 2 }
 0x1b2   : > { %v1428_v29 = vsel %vm1383_vm2, %v1425_v58, %v1427_v27  ;;  %v1864_v43 = vsel %vm1819_vm3, %v1861_v17, %v1863_v31  ;;  %v882_v46 = vadd.f32 %v8689_v42, %v9263_v45  ;;  %v1429_v58 = vrot.slane %v8701_v48, 2 }
 0x1b3   : > { %v1865_v17 = vrot.slane %v8701_v48, 3 }
 0x1b4   : > { %v1552_v2 = vpop.f32.mrf.mxu0  ;;  %v1665_v8 = vpop.f32.mrf.mxu1 }
 0x1b5   : > { %v1985_v9 = vpop.f32.mrf.mxu2  ;;  %v2098_v21 = vpop.f32.mrf.mxu3  ;;  %v1759_v12 = vadd.f32 %v1552_v2, %v1323_v52  ;;  %v1760_v61 = vadd.f32 %v1665_v8, %v1324_v53  ;;  %v1866_v2 = vrot.slane %v8704_v50, 3  ;;  %v883_v50 = vadd.f32 %v8710_v54, %v9261_v55 }
 0x1b6   : > { %v9302_v41 = vadd.f32 %v1985_v9, %v1757_v63  ;;  %v9304_v59 = vadd.f32 %v2098_v21, %v1758_v49  ;;  %v1325_v63 = vadd.f32 %v8714_v57, %v881_v37  ;;  %v1326_v49 = vadd.f32 %v8716_v60, %v882_v46  ;;  %v14444_v37 = vld [vmem:[#allocation13_spill] sm:$0xff] }
 0x1b7   : > { %7209 = vmatmul.msk.f32.gmra.mxu0 %vm552_vm0, %v1426_v19  ;;  %7241 = vmatmul.msk.f32.gmra.mxu1 %vm552_vm0, %v1426_v19  ;;  %v1431_v9 = vsel %vm1383_vm2, %v1429_v58, %v1430_v35  ;;  %v1867_v48 = vsel %vm1819_vm3, %v1865_v17, %v1866_v2  ;;  %v884_v60 = vadd.f32 %v8712_v56, %v9263_v45  ;;  %v1868_v53 = vrot.slane %v8724_v62, 3  ;;  %v14445_v58 = vld [vmem:[#allocation14_spill] sm:$0xff] }
 0x1b8   : > { %14435 = vst [vmem:[#allocation114_spill] sm:$0xff] %v9302_v41  ;;  %v1327_v27 = vadd.f32 %v8733_v4, %v883_v50  ;;  %v1433_v54 = vsel %vm1383_vm2, %v1430_v35, %v1432_v34  ;;  %v885_v62 = vadd.f32 %v8729_v1, %v9261_v55 }
 0x1b9   : > { %14436 = vst [vmem:[#allocation115_spill] sm:$0xff] %v9304_v59  ;;  %7281 = vmatmul.msk.f32.gmra.mxu2 %vm552_vm0, %v1862_v33  ;;  %7313 = vmatmul.msk.f32.gmra.mxu3 %vm552_vm0, %v1862_v33  ;;  %v1328_v52 = vadd.f32 %v8735_v6, %v884_v60  ;;  %v1869_v4 = vsel %vm1819_vm3, %v1866_v2, %v1868_v53  ;;  %v14450_v60 = vld [vmem:[#allocation15_spill] sm:$0xff] }
 0x1ba   : > { %v886_v6 = vadd.f32 %v8731_v3, %v9263_v45  ;;  %v1329_v46 = vadd.f32 %v14444_v37, %v885_v62 }
 0x1bc   : > { %v1555_v13 = vpop.f32.mrf.mxu0  ;;  %v1668_v22 = vpop.f32.mrf.mxu1  ;;  %v1330_v35 = vadd.f32 %v14445_v58, %v886_v6 }
 0x1bd   : > { %v1988_v15 = vpop.f32.mrf.mxu2  ;;  %v2101_v32 = vpop.f32.mrf.mxu3  ;;  %v1761_v40 = vadd.f32 %v1555_v13, %v1325_v63  ;;  %v1762_v8 = vadd.f32 %v1668_v22, %v1326_v49 }
 0x1be   : > { %v9320_v23 = vadd.f32 %v1988_v15, %v1759_v12  ;;  %v9322_v5 = vadd.f32 %v2101_v32, %v1760_v61  ;;  %v14443_v32 = vld [vmem:[#allocation10_spill] sm:$0xff] }
 0x1bf   : > { %7210 = vmatmul.msk.f32.gmra.mxu0 %vm552_vm0, %v1428_v29  ;;  %7242 = vmatmul.msk.f32.gmra.mxu1 %vm552_vm0, %v1428_v29  ;;  %v1870_v63 = vrot.slane %v14443_v32, 3 }
 0x1c0   : > { %14437 = vst [vmem:[#allocation116_spill] sm:$0xff] %v9320_v23 }
 0x1c1   : > { %14438 = vst [vmem:[#allocation117_spill] sm:$0xff] %v9322_v5  ;;  %7282 = vmatmul.msk.f32.gmra.mxu2 %vm552_vm0, %v1864_v43  ;;  %7314 = vmatmul.msk.f32.gmra.mxu3 %vm552_vm0, %v1864_v43  ;;  %v1434_v43 = vrot.slane %v14443_v32, 2 }
 0x1c3   : > { %v1435_v1 = vsel %vm1383_vm2, %v1432_v34, %v1434_v43  ;;  %v1436_v34 = vrot.slane %v14450_v60, 2 }
 0x1c4   : > { %v1558_v19 = vpop.f32.mrf.mxu0  ;;  %v1671_v42 = vpop.f32.mrf.mxu1 }
 0x1c5   : > { %v1991_v21 = vpop.f32.mrf.mxu2  ;;  %v2104_v33 = vpop.f32.mrf.mxu3  ;;  %v1763_v31 = vadd.f32 %v1558_v19, %v1327_v27  ;;  %v1764_v12 = vadd.f32 %v1671_v42, %v1328_v52  ;;  %v14451_v27 = vld [vmem:[#allocation18_spill] sm:$0xff] }
 0x1c6   : > { %v9340_v26 = vadd.f32 %v1991_v21, %v1761_v40  ;;  %v9342_v57 = vadd.f32 %v2104_v33, %v1762_v8  ;;  %v14448_v21 = vld [vmem:[#allocation11_spill] sm:$0xff] }
 0x1c7   : > { %7211 = vmatmul.msk.f32.gmra.mxu0 %vm552_vm0, %v1431_v9  ;;  %7243 = vmatmul.msk.f32.gmra.mxu1 %vm552_vm0, %v1431_v9  ;;  %v1871_v9 = vsel %vm1819_vm3, %v1868_v53, %v1870_v63  ;;  %v887_v33 = vadd.f32 %v14448_v21, %v9261_v55 }
 0x1c8   : > { %14439 = vst [vmem:[#allocation118_spill] sm:$0xff] %v9340_v26 }
 0x1c9   : > { %14440 = vst [vmem:[#allocation119_spill] sm:$0xff] %v9342_v57  ;;  %7283 = vmatmul.msk.f32.gmra.mxu2 %vm552_vm0, %v1867_v48  ;;  %7315 = vmatmul.msk.f32.gmra.mxu3 %vm552_vm0, %v1867_v48  ;;  %v14449_v48 = vld [vmem:[#allocation12_spill] sm:$0xff]  ;;  %v1331_v52 = vadd.f32 %v14451_v27, %v887_v33 }
 0x1ca   : > { %v888_v50 = vadd.f32 %v14449_v48, %v9263_v45 }
 0x1cc   : > { %v1561_v61 = vpop.f32.mrf.mxu0  ;;  %v1674_v13 = vpop.f32.mrf.mxu1 }
 0x1cd   : > { %v1994_v22 = vpop.f32.mrf.mxu2  ;;  %v2107_v56 = vpop.f32.mrf.mxu3  ;;  %v1765_v49 = vadd.f32 %v1561_v61, %v1329_v46  ;;  %v1766_v17 = vadd.f32 %v1674_v13, %v1330_v35  ;;  %v1872_v61 = vrot.slane %v14450_v60, 3  ;;  %v14455_v46 = vld [vmem:[#allocation16_spill] sm:$0xff]  ;;  %v14456_v35 = vld [vmem:[#allocation17_spill] sm:$0xff] }
 0x1ce   : > { %v9358_v29 = vadd.f32 %v1994_v22, %v1763_v31  ;;  %v9360_v15 = vadd.f32 %v2107_v56, %v1764_v12  ;;  %v14452_v31 = vld [vmem:[#allocation19_spill] sm:$0xff]  ;;  %v1437_v56 = vsel %vm1383_vm2, %v1434_v43, %v1436_v34  ;;  %v889_v58 = vadd.f32 %v14455_v46, %v9261_v55 }
 0x1cf   : > { %7212 = vmatmul.msk.f32.gmra.mxu0 %vm552_vm0, %v1433_v54  ;;  %7244 = vmatmul.msk.f32.gmra.mxu1 %vm552_vm0, %v1433_v54  ;;  %v1332_v12 = vadd.f32 %v14452_v31, %v888_v50  ;;  %v1873_v37 = vsel %vm1819_vm3, %v1870_v63, %v1872_v61 }
 0x1d0   : > { %14441 = vst [vmem:[#allocation120_spill] sm:$0xff] %v9358_v29 }
 0x1d1   : > { %14442 = vst [vmem:[#allocation121_spill] sm:$0xff] %v9360_v15  ;;  %7284 = vmatmul.msk.f32.gmra.mxu2 %vm552_vm0, %v1869_v4  ;;  %7316 = vmatmul.msk.f32.gmra.mxu3 %vm552_vm0, %v1869_v4 }
 0x1d4   : > { %v1564_v2 = vpop.f32.mrf.mxu0  ;;  %v1677_v40 = vpop.f32.mrf.mxu1 }
 0x1d5   : > { %v1997_v8 = vpop.f32.mrf.mxu2  ;;  %v2110_v3 = vpop.f32.mrf.mxu3  ;;  %v1767_v13 = vadd.f32 %v1564_v2, %v1331_v52  ;;  %v1768_v53 = vadd.f32 %v1677_v40, %v1332_v12  ;;  %v14458_v2 = vld [vmem:[#allocation21_spill] sm:$0xff] }
 0x1d6   : > { %v9376_v19 = vadd.f32 %v1997_v8, %v1765_v49  ;;  %v9378_v42 = vadd.f32 %v2110_v3, %v1766_v17  ;;  %v890_v49 = vadd.f32 %v14456_v35, %v9263_v45  ;;  %v14457_v17 = vld [vmem:[#allocation20_spill] sm:$0xff]  ;;  %v1439_v40 = vrot.slane %v14458_v2, 2  ;;  %v14460_v3 = vld [vmem:[#allocation25_spill] sm:$0xff] }
 0x1d7   : > { %7213 = vmatmul.msk.f32.gmra.mxu0 %vm552_vm0, %v1435_v1  ;;  %7245 = vmatmul.msk.f32.gmra.mxu1 %vm552_vm0, %v1435_v1  ;;  %v1438_v43 = vrot.slane %v14457_v17, 2  ;;  %v14459_v1 = vld [vmem:[#allocation24_spill] sm:$0xff]  ;;  %v1874_v63 = vrot.slane %v14457_v17, 3  ;;  %v1875_v21 = vrot.slane %v14458_v2, 3 }
 0x1d8   : > { %14446 = vst [vmem:[#allocation10_spill] sm:$0xff] %v9376_v19  ;;  %v1333_v8 = vadd.f32 %v14459_v1, %v889_v58  ;;  %v14464_v58 = vld [vmem:[#allocation31_spill] sm:$0xff] }
 0x1d9   : > { %14447 = vst [vmem:[#allocation13_spill] sm:$0xff] %v9378_v42  ;;  %7285 = vmatmul.msk.f32.gmra.mxu2 %vm552_vm0, %v1871_v9  ;;  %7317 = vmatmul.msk.f32.gmra.mxu3 %vm552_vm0, %v1871_v9  ;;  %v1334_v9 = vadd.f32 %v14460_v3, %v890_v49  ;;  %v1440_v34 = vsel %vm1383_vm2, %v1438_v43, %v1439_v40  ;;  %v1443_v35 = vrot.slane %v14464_v58, 2  ;;  %v1879_v49 = vrot.slane %v14464_v58, 3 }
 0x1da   : > { %v1876_v61 = vsel %vm1819_vm3, %v1874_v63, %v1875_v21 }
 0x1dc   : > { %v1567_v54 = vpop.f32.mrf.mxu0  ;;  %v1680_v22 = vpop.f32.mrf.mxu1 }
 0x1dd   : > { %v2000_v4 = vpop.f32.mrf.mxu2  ;;  %v2113_v62 = vpop.f32.mrf.mxu3  ;;  %v1769_v33 = vadd.f32 %v1567_v54, %v1333_v8  ;;  %v1770_v48 = vadd.f32 %v1680_v22, %v1334_v9  ;;  %v14463_v54 = vld [vmem:[#allocation26_spill] sm:$0xff]  ;;  %v14465_v8 = vld [vmem:[#allocation36_spill] sm:$0xff] }
 0x1de   : > { %v9394_v6 = vadd.f32 %v2000_v4, %v1767_v13  ;;  %v9396_v32 = vadd.f32 %v2113_v62, %v1768_v53  ;;  %v7333_v13 = vld [vmem:[%s14329_s1 + $0x130] sm:$0xff]  ;;  %v7334_v53 = vld [vmem:[%s14329_s1 + $0x138] sm:$0xff]  ;;  %v1441_v22 = vrot.slane %v14463_v54, 2  ;;  %v1445_v3 = vrot.slane %v14465_v8, 2 }
 0x1df   : > { %7214 = vmatmul.msk.f32.gmra.mxu0 %vm552_vm0, %v1437_v56  ;;  %7246 = vmatmul.msk.f32.gmra.mxu1 %vm552_vm0, %v1437_v56  ;;  %v1877_v56 = vrot.slane %v14463_v54, 3  ;;  %v1881_v9 = vrot.slane %v14465_v8, 3  ;;  %v1883_v54 = vrot.slane %v8867_v7, 3 }
 0x1e0   : > { %14453 = vst [vmem:[#allocation14_spill] sm:$0xff] %v9394_v6  ;;  %2413 = vmatpush.msra.mxu0 %v7333_v13  ;;  %2526 = vmatpush.msra.mxu1 %v7334_v53  ;;  %v1444_v2 = vsel %vm1383_vm2, %v1441_v22, %v1443_v35  ;;  %v7331_v13 = vld [vmem:[%s14329_s1 + $0x120] sm:$0xff]  ;;  %v7332_v53 = vld [vmem:[%s14329_s1 + $0x128] sm:$0xff] }
 0x1e1   : > { %14454 = vst [vmem:[#allocation11_spill] sm:$0xff] %v9396_v32  ;;  %7286 = vmatmul.msk.f32.gmra.mxu2 %vm552_vm0, %v1873_v37  ;;  %7318 = vmatmul.msk.f32.gmra.mxu3 %vm552_vm0, %v1873_v37  ;;  %v1442_v37 = vsel %vm1383_vm2, %v1439_v40, %v1441_v22  ;;  %v1878_v46 = vsel %vm1819_vm3, %v1875_v21, %v1877_v56  ;;  %v1884_v22 = vrot.slane %v8870_v51, 3 }
 0x1e2   : > { %v1880_v1 = vsel %vm1819_vm3, %v1877_v56, %v1879_v49  ;;  %2414 = vmatpush.msra.mxu0 %v7331_v13  ;;  %2527 = vmatpush.msra.mxu1 %v7332_v53  ;;  %v7329_v56 = vld [vmem:[%s14329_s1 + $0x110] sm:$0xff]  ;;  %v1452_v13 = vrot.slane %v8951_v28, 2 }
 0x1e4   : > { %v9413_v50 = vpop.f32.mrf.mxu0  ;;  %v9415_v60 = vpop.f32.mrf.mxu1  ;;  %2415 = vmatpush.msra.mxu0 %v7329_v56 }
 0x1e5   : > { %v2003_v27 = vpop.f32.mrf.mxu2  ;;  %v2116_v52 = vpop.f32.mrf.mxu3 }
 0x1e6   : > { %v9418_v31 = vadd.f32 %v2003_v27, %v1769_v33  ;;  %v9420_v12 = vadd.f32 %v2116_v52, %v1770_v48  ;;  %v1446_v33 = vsel %vm1383_vm2, %v1443_v35, %v1445_v3  ;;  %v1882_v48 = vsel %vm1819_vm3, %v1879_v49, %v1881_v9 }
 0x1e7   : > { %7215 = vmatmul.msk.f32.gmra.mxu0 %vm552_vm0, %v1440_v34  ;;  %7247 = vmatmul.msk.f32.gmra.mxu1 %vm552_vm0, %v1440_v34  ;;  %v1447_v34 = vrot.slane %v8867_v7, 2  ;;  %v1448_v27 = vrot.slane %v8870_v51, 2  ;;  %v7327_v7 = vld [vmem:[%s14329_s1 + $0x100] sm:$0xff]  ;;  %v7328_v51 = vld [vmem:[%s14329_s1 + $0x108] sm:$0xff]  ;;  %v1885_v49 = vsel %vm1819_vm3, %v1883_v54, %v1884_v22  ;;  %v1886_v3 = vrot.slane %v8926_v11, 3 }
 0x1e8   : > { %14461 = vst [vmem:[#allocation12_spill] sm:$0xff] %v9418_v31  ;;  %2416 = vmatpush.msra.mxu0 %v7327_v7 }
 0x1e9   : > { %14462 = vst [vmem:[#allocation15_spill] sm:$0xff] %v9420_v12  ;;  %7287 = vmatmul.msk.f32.gmra.mxu2 %vm552_vm0, %v1876_v61  ;;  %7319 = vmatmul.msk.f32.gmra.mxu3 %vm552_vm0, %v1876_v61  ;;  %v1449_v35 = vsel %vm1383_vm2, %v1447_v34, %v1448_v27  ;;  %v1887_v34 = vsel %vm1819_vm3, %v1884_v22, %v1886_v3 }
 0x1ec   : > { %v9435_v4 = vpop.f32.mrf.mxu0  ;;  %v9437_v62 = vpop.f32.mrf.mxu1 }
 0x1ed   : > { %v9452_v40 = vpop.f32.mrf.mxu2  ;;  %v9471_v52 = vpop.f32.mrf.mxu3 }
 0x1ef   : > { %7216 = vmatmul.msk.f32.gmra.mxu0 %vm552_vm0, %v1442_v37  ;;  %7248 = vmatmul.msk.f32.gmra.mxu1 %vm552_vm0, %v1442_v37  ;;  %v7330_v37 = vld [vmem:[%s14329_s1 + $0x118] sm:$0xff] }
 0x1f0   : > { %2528 = vmatpush.msra.mxu1 %v7330_v37 }
 0x1f1   : > { %7288 = vmatmul.msk.f32.gmra.mxu2 %vm552_vm0, %v1878_v46  ;;  %7320 = vmatmul.msk.f32.gmra.mxu3 %vm552_vm0, %v1878_v46 }
 0x1f2   : > { %2529 = vmatpush.msra.mxu1 %v7328_v51 }
 0x1f4   : > { %v9447_v17 = vpop.f32.mrf.mxu0  ;;  %v9449_v43 = vpop.f32.mrf.mxu1 }
 0x1f5   : > { %v9473_v61 = vpop.f32.mrf.mxu2 }
 0x1f7   : > { %7217 = vmatmul.msk.f32.gmra.mxu0 %vm552_vm0, %v1444_v2  ;;  %7249 = vmatmul.msk.f32.gmra.mxu1 %vm552_vm0, %v1444_v2  ;;  %v1450_v2 = vrot.slane %v8926_v11, 2  ;;  %v1888_v11 = vrot.slane %v8951_v28, 3 }
 0x1f9   : > { %7289 = vmatmul.msk.f32.gmra.mxu2 %vm552_vm0, %v1880_v1  ;;  %7321 = vmatmul.msk.f32.gmra.mxu3 %vm552_vm0, %v1880_v1  ;;  %v9508_v1 = vpop.f32.mrf.mxu3  ;;  %v1889_v22 = vsel %vm1819_vm3, %v1886_v3, %v1888_v11 }
 0x1fc   : > { %v9461_v63 = vpop.f32.mrf.mxu0  ;;  %v9463_v21 = vpop.f32.mrf.mxu1 }
 0x1fd   : > { %v9510_v8 = vpop.f32.mrf.mxu2 }
 0x1ff   : > { %7218 = vmatmul.msk.f32.gmra.mxu0 %vm552_vm0, %v1446_v33  ;;  %7250 = vmatmul.msk.f32.gmra.mxu1 %vm552_vm0, %v1446_v33 }
 0x201   : > { %7290 = vmatmul.msk.f32.gmra.mxu2 %vm552_vm0, %v1882_v48  ;;  %7322 = vmatmul.msk.f32.gmra.mxu3 %vm552_vm0, %v1882_v48  ;;  %v1451_v48 = vsel %vm1383_vm2, %v1448_v27, %v1450_v2  ;;  %v1453_v27 = vsel %vm1383_vm2, %v1450_v2, %v1452_v13  ;;  %v9530_v56 = vpop.f32.mrf.mxu3 }
 0x204   : > { %v9491_v46 = vpop.f32.mrf.mxu0  ;;  %v9493_v58 = vpop.f32.mrf.mxu1 }
 0x205   : > { %v9532_v37 = vpop.f32.mrf.mxu2 }
 0x206   : > { %14469 = vst [vmem:[#allocation17_spill] sm:$0xff] %v9532_v37 }
 0x207   : > { %7219 = vmatmul.msk.f32.gmra.mxu0 %vm552_vm0, %v1449_v35  ;;  %7251 = vmatmul.msk.f32.gmra.mxu1 %vm552_vm0, %v1449_v35  ;;  %v14470_v35 = vld [vmem:[#allocation53_spill] sm:$0xff] }
 0x208   : > { %v1454_v28 = vrot.slane %v14470_v35, 2  ;;  %v1890_v7 = vrot.slane %v14470_v35, 3  ;;  %v8145_v35 = vld [vmem:[%s8432_s18 + $0x8] sm:$0xff] }
 0x209   : > { %7291 = vmatmul.msk.f32.gmra.mxu2 %vm552_vm0, %v1885_v49  ;;  %7323 = vmatmul.msk.f32.gmra.mxu3 %vm552_vm0, %v1885_v49  ;;  %v2257_v12 = vrot.slane %v8145_v35, 4 }
 0x20a   : > { %v1455_v2 = vsel %vm1383_vm2, %v1452_v13, %v1454_v28  ;;  %v1891_v3 = vsel %vm1819_vm3, %v1888_v11, %v1890_v7  ;;  %v8146_v11 = vld [vmem:[%s8432_s18 + $0x10] sm:$0xff] }
 0x20b   : > { %v2259_v7 = vrot.slane %v8146_v11, 4 }
 0x20c   : > { %v9513_v9 = vpop.f32.mrf.mxu0  ;;  %v9515_v33 = vpop.f32.mrf.mxu1 }
 0x20d   : > { %14466 = vst [vmem:[#allocation18_spill] sm:$0xff] %v9515_v33  ;;  %v2260_v32 = vsel %vm2255_vm4, %v2257_v12, %v2259_v7 }
 0x20f   : > { %7220 = vmatmul.msk.f32.gmra.mxu0 %vm552_vm0, %v1451_v48  ;;  %7252 = vmatmul.msk.f32.gmra.mxu1 %vm552_vm0, %v1451_v48  ;;  %v9546_v48 = vpop.f32.mrf.mxu3 }
 0x210   : > { %14473 = vst [vmem:[#allocation24_spill] sm:$0xff] %v9546_v48  ;;  %v14554_v48 = vld [vmem:[#allocation61_spill] sm:$0xff] }
 0x211   : > { %7292 = vmatmul.msk.f32.gmra.mxu2 %vm552_vm0, %v1887_v34  ;;  %7324 = vmatmul.msk.f32.gmra.mxu3 %vm552_vm0, %v1887_v34  ;;  %v9548_v34 = vpop.f32.mrf.mxu2 }
 0x212   : > { %14474 = vst [vmem:[#allocation25_spill] sm:$0xff] %v9548_v34 }
 0x214   : > { %v9525_v53 = vpop.f32.mrf.mxu0  ;;  %v9527_v54 = vpop.f32.mrf.mxu1 }
 0x215   : > { %14467 = vst [vmem:[#allocation19_spill] sm:$0xff] %v9525_v53  ;;  %v14552_v53 = vld [vmem:[#allocation57_spill] sm:$0xff] }
 0x216   : > { %14468 = vst [vmem:[#allocation16_spill] sm:$0xff] %v9527_v54  ;;  %v14548_v54 = vld [vmem:[#allocation52_spill] sm:$0xff] }
 0x217   : > { %7221 = vmatmul.msk.f32.gmra.mxu0 %vm552_vm0, %v1453_v27  ;;  %7253 = vmatmul.msk.f32.gmra.mxu1 %vm552_vm0, %v1453_v27  ;;  %v8144_v27 = vld [vmem:[%s8432_s18] sm:$0xff] }
 0x219   : > { %7293 = vmatmul.msk.f32.gmra.mxu2 %vm552_vm0, %v1889_v22  ;;  %7325 = vmatmul.msk.f32.gmra.mxu3 %vm552_vm0, %v1889_v22  ;;  %v2256_v22 = vrot.slane %v8144_v27, 4  ;;  %v9567_v27 = vpop.f32.mrf.mxu2 }
 0x21a   : > { %14478 = vst [vmem:[#allocation53_spill] sm:$0xff] %v9567_v27  ;;  %v14547_v27 = vld [vmem:[#allocation55_spill] sm:$0xff] }
 0x21b   : > { %v2258_v31 = vsel %vm2255_vm4, %v2256_v22, %v2257_v12  ;;  %v8147_v22 = vld [vmem:[%s8432_s18 + $0x18] sm:$0xff]  ;;  %v8148_v12 = vld [vmem:[%s8432_s18 + $0x20] sm:$0xf] }
 0x21c   : > { %v9541_v51 = vpop.f32.mrf.mxu0  ;;  %v9543_v49 = vpop.f32.mrf.mxu1  ;;  %v2261_v6 = vrot.slane %v8147_v22, 4 }
 0x21d   : > { %14471 = vst [vmem:[#allocation20_spill] sm:$0xff] %v9541_v51 }
 0x21e   : > { %14472 = vst [vmem:[#allocation21_spill] sm:$0xff] %v9543_v49  ;;  %v2262_v15 = vsel %vm2255_vm4, %v2259_v7, %v2261_v6  ;;  %v8149_v7 = vld [vmem:[%s8432_s18 + $0x28] sm:$0xff] }
 0x21f   : > { %7222 = vmatmul.msk.f32.gmra.mxu0 %vm552_vm0, %v1455_v2  ;;  %7254 = vmatmul.msk.f32.gmra.mxu1 %vm552_vm0, %v1455_v2  ;;  %v9565_v2 = vpop.f32.mrf.mxu3  ;;  %v2265_v23 = vrot.slane %v8149_v7, 4 }
 0x220   : > { %14477 = vst [vmem:[#allocation36_spill] sm:$0xff] %v9565_v2 }
 0x221   : > { %7294 = vmatmul.msk.f32.gmra.mxu2 %vm552_vm0, %v1891_v3  ;;  %7326 = vmatmul.msk.f32.gmra.mxu3 %vm552_vm0, %v1891_v3  ;;  %v9579_v11 = vpop.f32.mrf.mxu2 }
 0x222   : > { %14482 = vst [vmem:[#allocation125_spill] sm:$0xff] %v9579_v11 }
 0x224   : > { %v9557_v13 = vpop.f32.mrf.mxu0  ;;  %v9559_v28 = vpop.f32.mrf.mxu1 }
 0x225   : > { %14475 = vst [vmem:[#allocation26_spill] sm:$0xff] %v9557_v13 }
 0x226   : > { %14476 = vst [vmem:[#allocation31_spill] sm:$0xff] %v9559_v28 }
 0x227   : > { %7335 = vmatmul.msk.f32.vlgmr.msra.gmra.mxu0 %vm552_vm0, %v2258_v31  ;;  %7367 = vmatmul.msk.f32.vlgmr.msra.gmra.mxu1 %vm552_vm0, %v2258_v31  ;;  %v9577_v31 = vpop.f32.mrf.mxu3 }
 0x228   : > { %14481 = vst [vmem:[#allocation124_spill] sm:$0xff] %v9577_v31 }
 0x229   : > { %v9596_v5 = vpop.f32.mrf.mxu2 }
 0x22a   : > { %14488 = vst [vmem:[#allocation131_spill] sm:$0xff] %v9596_v5  ;;  %v14525_v5 = vld [vmem:[#allocation34_spill] sm:$0xff] }
 0x22c   : > { %v9569_v35 = vpop.f32.mrf.mxu0  ;;  %v9571_v3 = vpop.f32.mrf.mxu1 }
 0x22d   : > { %14479 = vst [vmem:[#allocation122_spill] sm:$0xff] %v9569_v35 }
 0x22e   : > { %14480 = vst [vmem:[#allocation123_spill] sm:$0xff] %v9571_v3  ;;  %v8160_v3 = vld [vmem:[%s8432_s18 + $0x80] sm:$0xff] }
 0x22f   : > { %7336 = vmatmul.msk.f32.gmra.mxu0 %vm552_vm0, %v2260_v32  ;;  %7368 = vmatmul.msk.f32.gmra.mxu1 %vm552_vm0, %v2260_v32  ;;  %v2263_v32 = vrot.slane %v8148_v12, 4  ;;  %v9594_v26 = vpop.f32.mrf.mxu3 }
 0x230   : > { %14487 = vst [vmem:[#allocation130_spill] sm:$0xff] %v9594_v26 }
 0x231   : > { %v2264_v57 = vsel %vm2255_vm4, %v2261_v6, %v2263_v32 }
 0x234   : > { %v9581_v42 = vpop.f32.mrf.mxu0  ;;  %v9583_v19 = vpop.f32.mrf.mxu1 }
 0x235   : > { %14483 = vst [vmem:[#allocation126_spill] sm:$0xff] %v9581_v42 }
 0x236   : > { %14484 = vst [vmem:[#allocation127_spill] sm:$0xff] %v9583_v19 }
 0x237   : > { %7337 = vmatmul.msk.f32.gmra.mxu0 %vm552_vm0, %v2262_v15  ;;  %7369 = vmatmul.msk.f32.gmra.mxu1 %vm552_vm0, %v2262_v15  ;;  %v8150_v15 = vld [vmem:[%s8432_s18 + $0x30] sm:$0xff]  ;;  %v9607_v32 = vpop.f32.mrf.mxu3 }
 0x238   : > { %v2266_v12 = vrot.slane %v8150_v15, 4  ;;  %14491 = vst [vmem:[#allocation134_spill] sm:$0xff] %v9607_v32 }
 0x23a   : > { %v2267_v6 = vsel %vm2255_vm4, %v2265_v23, %v2266_v12  ;;  %v8152_v23 = vld [vmem:[%s8432_s18 + $0x40] sm:$0xff] }
 0x23c   : > { %v9589_v29 = vpop.f32.mrf.mxu0  ;;  %v9591_v22 = vpop.f32.mrf.mxu1 }
 0x23d   : > { %14485 = vst [vmem:[#allocation128_spill] sm:$0xff] %v9589_v29 }
 0x23e   : > { %14486 = vst [vmem:[#allocation129_spill] sm:$0xff] %v9591_v22  ;;  %v9609_v22 = vpop.f32.mrf.mxu2 }
 0x23f   : > { %7338 = vmatmul.msk.f32.gmra.mxu0 %vm552_vm0, %v2264_v57  ;;  %7370 = vmatmul.msk.f32.gmra.mxu1 %vm552_vm0, %v2264_v57  ;;  %14492 = vst [vmem:[#allocation135_spill] sm:$0xff] %v9609_v22  ;;  %v8151_v57 = vld [vmem:[%s8432_s18 + $0x38] sm:$0xff]  ;;  %v9622_v19 = vpop.f32.mrf.mxu3 }
 0x240   : > { %v2268_v7 = vrot.slane %v8151_v57, 4  ;;  %14495 = vst [vmem:[#allocation138_spill] sm:$0xff] %v9622_v19 }
 0x244   : > { %v9602_v59 = vpop.f32.mrf.mxu0  ;;  %v9604_v41 = vpop.f32.mrf.mxu1 }
 0x245   : > { %14489 = vst [vmem:[#allocation132_spill] sm:$0xff] %v9602_v59  ;;  %v2269_v59 = vsel %vm2255_vm4, %v2266_v12, %v2268_v7  ;;  %v8153_v12 = vld [vmem:[%s8432_s18 + $0x48] sm:$0xf] }
 0x246   : > { %14490 = vst [vmem:[#allocation133_spill] sm:$0xff] %v9604_v41  ;;  %v2270_v41 = vrot.slane %v8152_v23, 4  ;;  %v9624_v42 = vpop.f32.mrf.mxu2 }
 0x247   : > { %7339 = vmatmul.msk.f32.gmra.mxu0 %vm552_vm0, %v2267_v6  ;;  %7371 = vmatmul.msk.f32.gmra.mxu1 %vm552_vm0, %v2267_v6  ;;  %14496 = vst [vmem:[#allocation139_spill] sm:$0xff] %v9624_v42 }
 0x24c   : > { %v9614_v29 = vpop.f32.mrf.mxu0  ;;  %v9616_v15 = vpop.f32.mrf.mxu1 }
 0x24d   : > { %14493 = vst [vmem:[#allocation136_spill] sm:$0xff] %v9614_v29  ;;  %v9634_v29 = vpop.f32.mrf.mxu3 }
 0x24e   : > { %14494 = vst [vmem:[#allocation137_spill] sm:$0xff] %v9616_v15  ;;  %v2271_v15 = vsel %vm2255_vm4, %v2268_v7, %v2270_v41  ;;  %v9636_v23 = vpop.f32.mrf.mxu2  ;;  %v8154_v7 = vld [vmem:[%s8432_s18 + $0x50] sm:$0xff] }
 0x24f   : > { %7340 = vmatmul.msk.f32.gmra.mxu0 %vm552_vm0, %v2269_v59  ;;  %7372 = vmatmul.msk.f32.gmra.mxu1 %vm552_vm0, %v2269_v59  ;;  %v2272_v59 = vrot.slane %v8153_v12, 4  ;;  %14499 = vst [vmem:[#allocation142_spill] sm:$0xff] %v9634_v29 }
 0x250   : > { %14500 = vst [vmem:[#allocation143_spill] sm:$0xff] %v9636_v23 }
 0x254   : > { %v9626_v6 = vpop.f32.mrf.mxu0  ;;  %v9628_v57 = vpop.f32.mrf.mxu1 }
 0x255   : > { %14497 = vst [vmem:[#allocation140_spill] sm:$0xff] %v9626_v6  ;;  %v2273_v6 = vsel %vm2255_vm4, %v2270_v41, %v2272_v59  ;;  %v9652_v23 = vpop.f32.mrf.mxu3  ;;  %v8156_v41 = vld [vmem:[%s8432_s18 + $0x60] sm:$0xff] }
 0x256   : > { %14498 = vst [vmem:[#allocation141_spill] sm:$0xff] %v9628_v57  ;;  %v2274_v57 = vrot.slane %v8154_v7, 4 }
 0x257   : > { %7341 = vmatmul.msk.f32.gmra.mxu0 %vm552_vm0, %v2271_v15  ;;  %7373 = vmatmul.msk.f32.gmra.mxu1 %vm552_vm0, %v2271_v15  ;;  %v8155_v15 = vld [vmem:[%s8432_s18 + $0x58] sm:$0xff]  ;;  %14505 = vst [vmem:[#allocation148_spill] sm:$0xff] %v9652_v23 }
 0x258   : > { %v2275_v22 = vrot.slane %v8155_v15, 4  ;;  %v8159_v23 = vld [vmem:[%s8432_s18 + $0x78] sm:$0xff] }
 0x25c   : > { %v9638_v19 = vpop.f32.mrf.mxu0  ;;  %v9640_v42 = vpop.f32.mrf.mxu1 }
 0x25d   : > { %14501 = vst [vmem:[#allocation144_spill] sm:$0xff] %v9638_v19  ;;  %v2276_v19 = vsel %vm2255_vm4, %v2274_v57, %v2275_v22 }
 0x25e   : > { %14502 = vst [vmem:[#allocation145_spill] sm:$0xff] %v9640_v42  ;;  %v9654_v42 = vpop.f32.mrf.mxu2 }
 0x25f   : > { %7342 = vmatmul.msk.f32.gmra.mxu0 %vm552_vm0, %v2273_v6  ;;  %7374 = vmatmul.msk.f32.gmra.mxu1 %vm552_vm0, %v2273_v6  ;;  %14506 = vst [vmem:[#allocation149_spill] sm:$0xff] %v9654_v42  ;;  %v2277_v6 = vrot.slane %v8156_v41, 4 }
 0x261   : > { %v2278_v15 = vsel %vm2255_vm4, %v2275_v22, %v2277_v6  ;;  %v8158_v22 = vld [vmem:[%s8432_s18 + $0x70] sm:$0xf] }
 0x264   : > { %v9647_v12 = vpop.f32.mrf.mxu0  ;;  %v9649_v29 = vpop.f32.mrf.mxu1 }
 0x265   : > { %14503 = vst [vmem:[#allocation146_spill] sm:$0xff] %v9647_v12  ;;  %v8157_v12 = vld [vmem:[%s8432_s18 + $0x68] sm:$0xff] }
 0x266   : > { %14504 = vst [vmem:[#allocation147_spill] sm:$0xff] %v9649_v29  ;;  %v9664_v29 = vpop.f32.mrf.mxu3  ;;  %v9666_v57 = vpop.f32.mrf.mxu2  ;;  %v2279_v42 = vrot.slane %v8157_v12, 4 }
 0x267   : > { %7343 = vmatmul.msk.f32.gmra.mxu0 %vm552_vm0, %v2276_v19  ;;  %7375 = vmatmul.msk.f32.gmra.mxu1 %vm552_vm0, %v2276_v19  ;;  %14509 = vst [vmem:[#allocation152_spill] sm:$0xff] %v9664_v29 }
 0x268   : > { %14510 = vst [vmem:[#allocation153_spill] sm:$0xff] %v9666_v57 }
 0x26c   : > { %v9659_v59 = vpop.f32.mrf.mxu0  ;;  %v9661_v7 = vpop.f32.mrf.mxu1 }
 0x26d   : > { %14507 = vst [vmem:[#allocation150_spill] sm:$0xff] %v9659_v59  ;;  %v2280_v59 = vsel %vm2255_vm4, %v2277_v6, %v2279_v42  ;;  %v14517_v6 = vld [vmem:[#allocation22_spill] sm:$0xff] }
 0x26e   : > { %14508 = vst [vmem:[#allocation151_spill] sm:$0xff] %v9661_v7  ;;  %v2281_v7 = vrot.slane %v8158_v22, 4  ;;  %v9679_v57 = vpop.f32.mrf.mxu3  ;;  %v9681_v29 = vpop.f32.mrf.mxu2 }
 0x26f   : > { %7344 = vmatmul.msk.f32.gmra.mxu0 %vm552_vm0, %v2278_v15  ;;  %7376 = vmatmul.msk.f32.gmra.mxu1 %vm552_vm0, %v2278_v15  ;;  %14513 = vst [vmem:[#allocation156_spill] sm:$0xff] %v9679_v57  ;;  %v2283_v57 = vrot.slane %v8159_v23, 4 }
 0x270   : > { %14514 = vst [vmem:[#allocation157_spill] sm:$0xff] %v9681_v29  ;;  %v2284_v29 = vrot.slane %v8160_v3, 4 }
 0x274   : > { %v9671_v19 = vpop.f32.mrf.mxu0  ;;  %v9673_v41 = vpop.f32.mrf.mxu1 }
 0x275   : > { %14511 = vst [vmem:[#allocation154_spill] sm:$0xff] %v9671_v19  ;;  %v2282_v19 = vsel %vm2255_vm4, %v2279_v42, %v2281_v7  ;;  %v14521_v7 = vld [vmem:[#allocation29_spill] sm:$0xff] }
 0x276   : > { %14512 = vst [vmem:[#allocation155_spill] sm:$0xff] %v9673_v41  ;;  %v891_v41 = vadd.f32 %v14517_v6, %v9261_v55  ;;  %v14523_v6 = vld [vmem:[#allocation32_spill] sm:$0xff]  ;;  %v9715_v13 = vpop.f32.mrf.mxu3 }
 0x277   : > { %7345 = vmatmul.msk.f32.gmra.mxu0 %vm552_vm0, %v2280_v59  ;;  %7377 = vmatmul.msk.f32.gmra.mxu1 %vm552_vm0, %v2280_v59  ;;  %v14518_v59 = vld [vmem:[#allocation23_spill] sm:$0xff]  ;;  %v895_v32 = vadd.f32 %v14523_v6, %v9261_v55  ;;  %14527 = vst [vmem:[#allocation22_spill] sm:$0xff] %v9715_v13  ;;  %v14531_v6 = vld [vmem:[#allocation41_spill] sm:$0xff]  ;;  %v14535_v13 = vld [vmem:[#allocation40_spill] sm:$0xff] }
 0x278   : > { %v892_v22 = vadd.f32 %v14518_v59, %v9263_v45  ;;  %v9701_v39 = vadd.f32 %v14521_v7, %v891_v41  ;;  %v14524_v59 = vld [vmem:[#allocation33_spill] sm:$0xff]  ;;  %v14529_v41 = vld [vmem:[#allocation35_spill] sm:$0xff]  ;;  %v899_v26 = vadd.f32 %v14531_v6, %v9261_v55  ;;  %v14538_v6 = vld [vmem:[#allocation44_spill] sm:$0xff] }
 0x279   : > { %v896_v23 = vadd.f32 %v14524_v59, %v9263_v45 }
 0x27c   : > { %v9683_v15 = vpop.f32.mrf.mxu0  ;;  %v9685_v12 = vpop.f32.mrf.mxu1 }
 0x27d   : > { %14515 = vst [vmem:[#allocation158_spill] sm:$0xff] %v9683_v15  ;;  %v14519_v15 = vld [vmem:[#allocation27_spill] sm:$0xff] }
 0x27e   : > { %14516 = vst [vmem:[#allocation159_spill] sm:$0xff] %v9685_v12  ;;  %v893_v35 = vadd.f32 %v14519_v15, %v9261_v55  ;;  %v14520_v12 = vld [vmem:[#allocation28_spill] sm:$0xff]  ;;  %v14526_v15 = vld [vmem:[#allocation37_spill] sm:$0xff] }
 0x27f   : > { %7346 = vmatmul.msk.f32.gmra.mxu0 %vm552_vm0, %v2282_v19  ;;  %7378 = vmatmul.msk.f32.gmra.mxu1 %vm552_vm0, %v2282_v19  ;;  %v894_v42 = vadd.f32 %v14520_v12, %v9263_v45  ;;  %v14522_v19 = vld [vmem:[#allocation30_spill] sm:$0xff]  ;;  %v897_v28 = vadd.f32 %v14526_v15, %v9261_v55  ;;  %v9717_v12 = vpop.f32.mrf.mxu2  ;;  %v14534_v15 = vld [vmem:[#allocation39_spill] sm:$0xff] }
 0x280   : > { %v9704_v44 = vadd.f32 %v14522_v19, %v892_v22  ;;  %v9711_v3 = vadd.f32 %v14525_v5, %v893_v35  ;;  %14528 = vst [vmem:[#allocation23_spill] sm:$0xff] %v9717_v12  ;;  %v14530_v22 = vld [vmem:[#allocation38_spill] sm:$0xff]  ;;  %v2285_v35 = vsel %vm2255_vm4, %v2283_v57, %v2284_v29  ;;  %v9732_v11 = vadd.f32 %v14534_v15, %v895_v32  ;;  %v14541_v15 = vld [vmem:[#allocation47_spill] sm:$0xff] }
 0x281   : > { %v9720_v7 = vadd.f32 %v14529_v41, %v894_v42  ;;  %v898_v19 = vadd.f32 %v14530_v22, %v9263_v45  ;;  %v9735_v12 = vadd.f32 %v14535_v13, %v896_v23  ;;  %v14536_v42 = vld [vmem:[#allocation42_spill] sm:$0xff]  ;;  %v14537_v22 = vld [vmem:[#allocation43_spill] sm:$0xff]  ;;  %v9750_v31 = vadd.f32 %v14541_v15, %v899_v26  ;;  %v14542_v23 = vld [vmem:[#allocation48_spill] sm:$0xff] }
 0x282   : > { %v900_v41 = vadd.f32 %v14536_v42, %v9263_v45  ;;  %v9740_v49 = vadd.f32 %v14537_v22, %v897_v28  ;;  %v14540_v57 = vld [vmem:[#allocation46_spill] sm:$0xff]  ;;  %v3922_v13 = vld [vmem:[%s14285_s3 + $0x78] sm:$0xff]  ;;  %v14543_v28 = vld [vmem:[#allocation49_spill] sm:$0xff] }
 0x283   : > { %v9743_v51 = vadd.f32 %v14538_v6, %v898_v19  ;;  %v902_v32 = vadd.f32 %v14540_v57, %v9263_v45  ;;  %v903_v19 = vadd.f32 %v14543_v28, %v9261_v55  ;;  %v14544_v22 = vld [vmem:[#allocation50_spill] sm:$0xff]  ;;  %4025 = vmatpush.msra.mxu2 %v3922_v13  ;;  %v14553_v13 = vld [vmem:[#allocation60_spill] sm:$0xff] }
 0x284   : > { %v9726_v59 = vpop.f32.mrf.mxu0  ;;  %v9728_v5 = vpop.f32.mrf.mxu1  ;;  %v9756_v42 = vadd.f32 %v14542_v23, %v900_v41  ;;  %v904_v6 = vadd.f32 %v14544_v22, %v9263_v45  ;;  %v14546_v57 = vld [vmem:[#allocation54_spill] sm:$0xff]  ;;  %v906_v41 = vadd.f32 %v14547_v27, %v9263_v45  ;;  %v9772_v23 = vld [vmem:[%s8432_s18 + $0x88] sm:$0xff]  ;;  %v14551_v27 = vld [vmem:[#allocation59_spill] sm:$0xff] }
 0x285   : > { %14532 = vst [vmem:[#allocation27_spill] sm:$0xff] %v9726_v59  ;;  %v905_v15 = vadd.f32 %v14546_v57, %v9261_v55  ;;  %v3921_v22 = vld [vmem:[%s14285_s3 + $0x70] sm:$0xff]  ;;  %v908_v34 = vadd.f32 %v14551_v27, %v9263_v45  ;;  %v914_v27 = vadd.f32 %v9044_v16, %v9263_v45  ;;  %v915_v16 = vadd.f32 %v9060_v10, %v9261_v55  ;;  %v3919_v10 = vld [vmem:[%s14285_s3 + $0x60] sm:$0xff] }
 0x286   : > { %14533 = vst [vmem:[#allocation28_spill] sm:$0xff] %v9728_v5  ;;  %v14539_v5 = vld [vmem:[#allocation45_spill] sm:$0xff]  ;;  %v14550_v57 = vld [vmem:[#allocation58_spill] sm:$0xff]  ;;  %v9789_v33 = vadd.f32 %v14552_v53, %v904_v6  ;;  %v9795_v37 = vadd.f32 %v14554_v48, %v906_v41  ;;  %4026 = vmatpush.msra.mxu2 %v3921_v22  ;;  %v14558_v6 = vld [vmem:[#allocation64_spill] sm:$0xff]  ;;  %v911_v48 = vadd.f32 %v9026_v36, %v9261_v55 }
 0x287   : > { %v901_v59 = vadd.f32 %v14539_v5, %v9261_v55  ;;  %7347 = vmatmul.msk.f32.gmra.mxu0 %vm552_vm0, %v2285_v35  ;;  %7379 = vmatmul.msk.f32.gmra.mxu1 %vm552_vm0, %v2285_v35  ;;  %v14545_v5 = vld [vmem:[#allocation51_spill] sm:$0xff]  ;;  %v9779_v35 = vadd.f32 %v14548_v54, %v902_v32  ;;  %v907_v2 = vadd.f32 %v14550_v57, %v9261_v55  ;;  %v3920_v32 = vld [vmem:[%s14285_s3 + $0x68] sm:$0xff] }
 0x288   : > { %v9792_v28 = vadd.f32 %v14553_v13, %v905_v15  ;;  %v909_v54 = vadd.f32 %v9010_v18, %v9261_v55  ;;  %v14556_v57 = vld [vmem:[#allocation63_spill] sm:$0xff]  ;;  %v9808_v15 = vadd.f32 %v14558_v6, %v908_v34  ;;  %v14560_v41 = vld [vmem:[#allocation65_spill] sm:$0xff]  ;;  %v913_v22 = vadd.f32 %v9042_v25, %v9261_v55  ;;  %4027 = vmatpush.msra.mxu2 %v3920_v32 }
 0x289   : > { %v9765_v26 = vadd.f32 %v14545_v5, %v901_v59  ;;  %v14549_v59 = vld [vmem:[#allocation56_spill] sm:$0xff]  ;;  %v9805_v53 = vadd.f32 %v14556_v57, %v907_v2  ;;  %v912_v18 = vadd.f32 %v14560_v41, %v9263_v45  ;;  %v14563_v2 = vrot.slane %v9772_v23, 4  ;;  %v14564_v57 = vld [vmem:[#allocation66_spill] sm:$0xff]  ;;  %v14565_v6 = vld [vmem:[#allocation67_spill] sm:$0xff] }
 0x28a   : > { %v9782_v5 = vadd.f32 %v14549_v59, %v903_v19  ;;  %v14555_v19 = vld [vmem:[#allocation62_spill] sm:$0xff]  ;;  %14559 = vst [vmem:[#allocation30_spill] sm:$0xff] %v9808_v15  ;;  %v9826_v36 = vadd.f32 %v14564_v57, %v909_v54  ;;  %v14566_v15 = vld [vmem:[#allocation68_spill] sm:$0xff]  ;;  %4028 = vmatpush.msra.mxu2 %v3919_v10 }
 0x28b   : > { %v910_v59 = vadd.f32 %v14555_v19, %v9263_v45  ;;  %14557 = vst [vmem:[#allocation29_spill] sm:$0xff] %v9805_v53  ;;  %v2287_v34 = vsel %vm2255_vm4, %v2284_v29, %v14563_v2  ;;  %v9832_v25 = vadd.f32 %v14566_v15, %v911_v48  ;;  %v14569_v53 = vld [vmem:[#allocation69_spill] sm:$0xff]  ;;  %v14570_v54 = vld [vmem:[#allocation70_spill] sm:$0xff]  ;;  %v14571_v2 = vld [vmem:[#allocation71_spill] sm:$0xff]  ;;  %v917_v48 = vadd.f32 %v9076_v47, %v9261_v55 }
 0x28c   : > { %v9818_v13 = vpop.f32.mrf.mxu0  ;;  %v9820_v19 = vpop.f32.mrf.mxu1  ;;  %v9841_v29 = vadd.f32 %v14569_v53, %v912_v18  ;;  %v916_v32 = vadd.f32 %v14570_v54, %v9263_v45  ;;  %v14572_v57 = vld [vmem:[#allocation72_spill] sm:$0xff]  ;;  %v14574_v18 = vld [vmem:[#allocation74_spill] sm:$0xff]  ;;  %v919_v54 = vadd.f32 %v9092_v24, %v9261_v55  ;;  %v921_v24 = vadd.f32 %v9108_v0, %v9261_v55 }
 0x28d   : > { %14561 = vst [vmem:[#allocation32_spill] sm:$0xff] %v9818_v13  ;;  %v9829_v41 = vadd.f32 %v14565_v6, %v910_v59  ;;  %v9836_v13 = vpop.f32.mrf.mxu3  ;;  %v9846_v59 = vadd.f32 %v14571_v2, %v913_v22  ;;  %v9849_v15 = vadd.f32 %v14572_v57, %v914_v27  ;;  %v14573_v6 = vld [vmem:[#allocation73_spill] sm:$0xff]  ;;  %v14576_v22 = vld [vmem:[#allocation75_spill] sm:$0xff]  ;;  %v14578_v2 = vld [vmem:[#allocation76_spill] sm:$0xff] }
 0x28e   : > { %14562 = vst [vmem:[#allocation33_spill] sm:$0xff] %v9820_v19  ;;  %v9838_v19 = vpop.f32.mrf.mxu2  ;;  %v918_v53 = vadd.f32 %v14573_v6, %v9263_v45  ;;  %v9864_v27 = vadd.f32 %v14576_v22, %v916_v32  ;;  %v920_v57 = vadd.f32 %v14578_v2, %v9263_v45  ;;  %v9871_v47 = vld [vmem:[%s8432_s18 + $0x90] sm:$0xff]  ;;  %v922_v2 = vadd.f32 %v9110_v30, %v9263_v45  ;;  %v14584_v10 = vld [vmem:[#allocation80_spill] sm:$0xff]  ;;  %v14589_v30 = vld [vmem:[#allocation83_spill] sm:$0xff] }
 0x28f   : > { %14567 = vst [vmem:[#allocation34_spill] sm:$0xff] %v9836_v13  ;;  %7348 = vmatmul.msk.f32.gmra.mxu0 %vm552_vm0, %v2287_v34  ;;  %7380 = vmatmul.msk.f32.gmra.mxu1 %vm552_vm0, %v2287_v34  ;;  %v14580_v32 = vld [vmem:[#allocation78_spill] sm:$0xff]  ;;  %v14582_v13 = vld [vmem:[#allocation79_spill] sm:$0xff] }
 0x290   : > { %14568 = vst [vmem:[#allocation37_spill] sm:$0xff] %v9838_v19  ;;  %v9859_v19 = vadd.f32 %v14574_v18, %v915_v16  ;;  %v3918_v16 = vld [vmem:[%s14285_s3 + $0x58] sm:$0xff]  ;;  %v14579_v18 = vld [vmem:[#allocation77_spill] sm:$0xff]  ;;  %v9881_v22 = vadd.f32 %v14580_v32, %v918_v53  ;;  %v9891_v6 = vadd.f32 %v14584_v10, %v920_v57  ;;  %v3917_v0 = vld [vmem:[%s14285_s3 + $0x50] sm:$0xff] }
 0x291   : > { %14577 = vst [vmem:[#allocation38_spill] sm:$0xff] %v9864_v27  ;;  %v9878_v34 = vadd.f32 %v14579_v18, %v917_v48  ;;  %v9888_v27 = vadd.f32 %v14582_v13, %v919_v54  ;;  %v14586_v48 = vld [vmem:[#allocation81_spill] sm:$0xff]  ;;  %4029 = vmatpush.msra.mxu2 %v3918_v16  ;;  %v14587_v53 = vld [vmem:[#allocation82_spill] sm:$0xff]  ;;  %v9904_v13 = vadd.f32 %v14589_v30, %v922_v2  ;;  %v14591_v57 = vld [vmem:[#allocation84_spill] sm:$0xff]  ;;  %v14597_v2 = vrot.slane %v9871_v47, 4 }
 0x292   : > { %14575 = vst [vmem:[#allocation35_spill] sm:$0xff] %v9859_v19  ;;  %v923_v19 = vadd.f32 %v9126_v20, %v9261_v55  ;;  %v924_v18 = vadd.f32 %v14586_v48, %v9263_v45  ;;  %v9901_v32 = vadd.f32 %v14587_v53, %v921_v24  ;;  %v925_v54 = vadd.f32 %v9142_v14, %v9261_v55  ;;  %v14592_v10 = vld [vmem:[#allocation85_spill] sm:$0xff]  ;;  %v14594_v48 = vld [vmem:[#allocation87_spill] sm:$0xff] }
 0x293   : > { %14581 = vst [vmem:[#allocation41_spill] sm:$0xff] %v9881_v22  ;;  %v926_v20 = vadd.f32 %v14591_v57, %v9263_v45  ;;  %v927_v16 = vadd.f32 %v9158_v38, %v9261_v55  ;;  %v14598_v14 = vrot.slane %v9772_v23, 4  ;;  %4030 = vmatpush.msra.mxu2 %v3917_v0  ;;  %v14599_v57 = vld [vmem:[#allocation86_spill] sm:$0xff]  ;;  %v14605_v23 = vld [vmem:[#allocation89_spill] sm:$0xff]  ;;  %v14607_v0 = vld [vmem:[#allocation92_spill] sm:$0xff] }
 0x294   : > { %14583 = vst [vmem:[#allocation39_spill] sm:$0xff] %v9888_v27  ;;  %v928_v27 = vadd.f32 %v14594_v48, %v9263_v45  ;;  %v9917_v24 = vpop.f32.mrf.mxu0  ;;  %v9919_v53 = vpop.f32.mrf.mxu1  ;;  %v9930_v38 = vadd.f32 %v14599_v57, %v924_v18  ;;  %v14611_v18 = vld [vmem:[#allocation94_spill] sm:$0xff] }
 0x295   : > { %14585 = vst [vmem:[#allocation40_spill] sm:$0xff] %v9891_v6  ;;  %v9911_v6 = vadd.f32 %v14592_v10, %v923_v19  ;;  %v2289_v30 = vsel %vm2255_vm4, %v14598_v14, %v14597_v2  ;;  %v3916_v19 = vld [vmem:[%s14285_s3 + $0x48] sm:$0xff]  ;;  %v14601_v10 = vld [vmem:[#allocation88_spill] sm:$0xff]  ;;  %v9943_v2 = vadd.f32 %v14607_v0, %v927_v16  ;;  %v9961_v0 = vpop.f32.mrf.mxu3 }
 0x296   : > { %14588 = vst [vmem:[#allocation42_spill] sm:$0xff] %v9901_v32  ;;  %v9933_v48 = vadd.f32 %v14601_v10, %v925_v54  ;;  %v9940_v32 = vadd.f32 %v14605_v23, %v926_v20  ;;  %v14609_v14 = vld [vmem:[#allocation93_spill] sm:$0xff]  ;;  %v931_v54 = vadd.f32 %v14611_v18, %v9261_v55  ;;  %4031 = vmatpush.msra.mxu2 %v3916_v19  ;;  %v14613_v20 = vld [vmem:[#allocation96_spill] sm:$0xff]  ;;  %v14619_v19 = vld [vmem:[#allocation98_spill] sm:$0xff] }
 0x297   : > { %14590 = vst [vmem:[#allocation43_spill] sm:$0xff] %v9904_v13  ;;  %v9946_v22 = vadd.f32 %v14609_v14, %v928_v27  ;;  %v14615_v23 = vld [vmem:[#allocation97_spill] sm:$0xff]  ;;  %v9963_v27 = vpop.f32.mrf.mxu2  ;;  %7349 = vmatmul.msk.f32.gmra.mxu0 %vm552_vm0, %v2289_v30  ;;  %7381 = vmatmul.msk.f32.gmra.mxu1 %vm552_vm0, %v2289_v30  ;;  %v933_v14 = vadd.f32 %v14619_v19, %v9261_v55  ;;  %v14620_v18 = vld [vmem:[#allocation99_spill] sm:$0xff] }
 0x298   : > { %14593 = vst [vmem:[#allocation44_spill] sm:$0xff] %v9911_v6  ;;  %v14604_v6 = vld [vmem:[#allocation91_spill] sm:$0xff]  ;;  %v14623_v30 = vld [vmem:[#allocation101_spill] sm:$0xff] }
 0x299   : > { %14595 = vst [vmem:[#allocation45_spill] sm:$0xff] %v9917_v24  ;;  %v14603_v24 = vld [vmem:[#allocation90_spill] sm:$0xff]  ;;  %v930_v13 = vadd.f32 %v14604_v6, %v9263_v45  ;;  %v14612_v6 = vld [vmem:[#allocation95_spill] sm:$0xff] }
 0x29a   : > { %14596 = vst [vmem:[#allocation46_spill] sm:$0xff] %v9919_v53  ;;  %v929_v53 = vadd.f32 %v14603_v24, %v9261_v55  ;;  %v3915_v24 = vld [vmem:[%s14285_s3 + $0x40] sm:$0xff]  ;;  %v932_v57 = vadd.f32 %v14612_v6, %v9263_v45  ;;  %v934_v6 = vadd.f32 %v14620_v18, %v9263_v45  ;;  %v14624_v19 = vld [vmem:[#allocation103_spill] sm:$0xff]  ;;  %v14625_v18 = vld [vmem:[#allocation106_spill] sm:$0xff] }
 0x29b   : > { %14600 = vst [vmem:[#allocation47_spill] sm:$0xff] %v9930_v38  ;;  %v9959_v16 = vadd.f32 %v14615_v23, %v930_v13  ;;  %4032 = vmatpush.msra.mxu2 %v3915_v24  ;;  %v3914_v23 = vld [vmem:[%s14285_s3 + $0x38] sm:$0xff]  ;;  %v14627_v24 = vld [vmem:[#allocation105_spill] sm:$0xff] }
 0x29c   : > { %14602 = vst [vmem:[#allocation48_spill] sm:$0xff] %v9933_v48  ;;  %v9956_v10 = vadd.f32 %v14613_v20, %v929_v53  ;;  %v14621_v53 = vld [vmem:[#allocation102_spill] sm:$0xff] }
 0x29d   : > { %14606 = vst [vmem:[#allocation49_spill] sm:$0xff] %v9940_v32  ;;  %v935_v20 = vadd.f32 %v14621_v53, %v9261_v55  ;;  %v937_v32 = vadd.f32 %v14625_v18, %v9261_v55  ;;  %v14626_v53 = vld [vmem:[#allocation104_spill] sm:$0xff]  ;;  %4033 = vmatpush.msra.mxu2 %v3914_v23  ;;  %v14633_v55 = vld [vmem:[#allocation110_spill] sm:$0xff]  ;;  %v1773_v23 = vadd.f32 %v9435_v4, %v9711_v3 }
 0x29e   : > { %14608 = vst [vmem:[#allocation50_spill] sm:$0xff] %v9943_v2  ;;  %v9981_v2 = vadd.f32 %v14623_v30, %v932_v57  ;;  %v9988_v48 = vadd.f32 %v14626_v53, %v933_v14  ;;  %v3913_v57 = vld [vmem:[%s14285_s3 + $0x30] sm:$0xff]  ;;  %v14631_v30 = vld [vmem:[#allocation109_spill] sm:$0xff]  ;;  %v1774_v18 = vadd.f32 %v9437_v62, %v9720_v7  ;;  %v10020_v53 = vpop.f32.mrf.mxu1  ;;  %v1775_v62 = vadd.f32 %v9447_v17, %v9732_v11  ;;  %v3911_v17 = vld [vmem:[%s14285_s3 + $0x20] sm:$0xff] }
 0x29f   : > { %14610 = vst [vmem:[#allocation51_spill] sm:$0xff] %v9946_v22  ;;  %v10005_v14 = vadd.f32 %v14633_v55, %v937_v32  ;;  %v14639_v32 = vrot.slane %v9871_v47, 4  ;;  %4034 = vmatpush.msra.mxu2 %v3913_v57  ;;  %v1776_v3 = vadd.f32 %v9449_v43, %v9735_v12  ;;  %v10042_v7 = vadd.f32 %v9473_v61, %v1773_v23  ;;  %v14640_v11 = vld [vmem:[#allocation17_spill] sm:$0xff]  ;;  %v14641_v12 = vld [vmem:[#allocation24_spill] sm:$0xff] }
 0x2a0   : > { %14614 = vst [vmem:[#allocation54_spill] sm:$0xff] %v9956_v10  ;;  %v8163_v10 = vld [vmem:[%s8432_s18 + $0x98] sm:$0xf]  ;;  %v10045_v47 = vadd.f32 %v9508_v1, %v1774_v18  ;;  %v10055_v43 = vadd.f32 %v9510_v8, %v1775_v62  ;;  %v1779_v1 = vadd.f32 %v9491_v46, %v9750_v31  ;;  %v10070_v8 = vld [vmem:[%s8432_s18 + $0xa8] sm:$0xff]  ;;  %v14645_v55 = vld [vmem:[#allocation36_spill] sm:$0xff] }
 0x2a1   : > { %14616 = vst [vmem:[#allocation55_spill] sm:$0xff] %v9959_v16  ;;  %v2290_v13 = vrot.slane %v8163_v10, 4  ;;  %v14622_v16 = vld [vmem:[#allocation100_spill] sm:$0xff]  ;;  %v9991_v10 = vadd.f32 %v14627_v24, %v934_v6  ;;  %v1771_v6 = vadd.f32 %v9413_v50, %v9701_v39  ;;  %v3912_v50 = vld [vmem:[%s14285_s3 + $0x28] sm:$0xff]  ;;  %v10058_v61 = vadd.f32 %v9530_v56, %v1776_v3  ;;  %v3910_v46 = vld [vmem:[%s14285_s3 + $0x18] sm:$0xff]  ;;  %v10089_v24 = vpop.f32.mrf.mxu3 }
 0x2a2   : > { %14617 = vst [vmem:[#allocation52_spill] sm:$0xff] %v9961_v0  ;;  %v9978_v22 = vadd.f32 %v14622_v16, %v931_v54  ;;  %v14628_v0 = vld [vmem:[#allocation107_spill] sm:$0xff]  ;;  %v14629_v54 = vld [vmem:[#allocation108_spill] sm:$0xff]  ;;  %4035 = vmatpush.msra.mxu2 %v3912_v50  ;;  %v2293_v56 = vrot.slane %v10070_v8, 4  ;;  %v14644_v57 = vld [vmem:[#allocation25_spill] sm:$0xff] }
 0x2a3   : > { %14618 = vst [vmem:[#allocation56_spill] sm:$0xff] %v9963_v27  ;;  %v936_v27 = vadd.f32 %v14624_v19, %v9263_v45  ;;  %v938_v38 = vadd.f32 %v14628_v0, %v9263_v45  ;;  %v9996_v16 = vadd.f32 %v14629_v54, %v935_v20  ;;  %v1772_v45 = vadd.f32 %v9415_v60, %v9704_v44  ;;  %v14635_v0 = vld [vmem:[#allocation111_spill] sm:$0xff]  ;;  %v3927_v44 = vld [vmem:[%s14285_s3 + $0xa0] sm:$0xff]  ;;  %v10091_v54 = vpop.f32.mrf.mxu2  ;;  %v14647_v23 = vld [vmem:[#allocation53_spill] sm:$0xff] }
 0x2a4   : > { %14634 = vst [vmem:[#allocation57_spill] sm:$0xff] %v10005_v14  ;;  %v2291_v39 = vsel %vm2255_vm4, %v14639_v32, %v2290_v13  ;;  %v10032_v60 = vadd.f32 %v9452_v40, %v1771_v6  ;;  %4149 = vmatpush.msra.mxu3 %v3927_v44  ;;  %v1777_v40 = vadd.f32 %v9461_v63, %v9740_v49  ;;  %v3926_v31 = vld [vmem:[%s14285_s3 + $0x98] sm:$0xff]  ;;  %v14648_v32 = vld [vmem:[#allocation124_spill] sm:$0xff]  ;;  %v14651_v3 = vld [vmem:[#allocation125_spill] sm:$0xff] }
 0x2a5   : > { %14630 = vst [vmem:[#allocation58_spill] sm:$0xff] %v9996_v16  ;;  %v10002_v19 = vadd.f32 %v14631_v30, %v936_v27  ;;  %v10012_v20 = vadd.f32 %v14635_v0, %v938_v38  ;;  %v10018_v27 = vpop.f32.mrf.mxu0  ;;  %v10035_v4 = vadd.f32 %v9471_v52, %v1772_v45  ;;  %v1778_v52 = vadd.f32 %v9463_v21, %v9743_v51  ;;  %v8164_v51 = vld [vmem:[%s8432_s18 + $0xa0] sm:$0xff]  ;;  %v14643_v38 = vld [vmem:[#allocation19_spill] sm:$0xff]  ;;  %v14694_v8 = vld [vmem:[#allocation42_spill] sm:$0xff] }
 0x2a6   : > { %14637 = vst [vmem:[#allocation61_spill] sm:$0xff] %v10018_v27  ;;  %7350 = vmatmul.msk.f32.gmra.mxu0 %vm552_vm0, %v2291_v39  ;;  %7382 = vmatmul.msk.f32.gmra.mxu1 %vm552_vm0, %v2291_v39  ;;  %v1780_v63 = vadd.f32 %v9493_v58, %v9756_v42  ;;  %v1781_v21 = vadd.f32 %v9513_v9, %v9765_v26  ;;  %v2292_v49 = vrot.slane %v8164_v51, 4  ;;  %v14642_v42 = vld [vmem:[#allocation18_spill] sm:$0xff]  ;;  %v14646_v45 = vld [vmem:[#allocation16_spill] sm:$0xff]  ;;  %v14712_v27 = vld [vmem:[#allocation49_spill] sm:$0xff] }
 0x2a7   : > { %14632 = vst [vmem:[#allocation59_spill] sm:$0xff] %v10002_v19  ;;  %4036 = vmatpush.msra.mxu2 %v3911_v17  ;;  %v10080_v58 = vadd.f32 %v14640_v11, %v1777_v40  ;;  %v10083_v9 = vadd.f32 %v14641_v12, %v1778_v52  ;;  %v1782_v26 = vadd.f32 %v14642_v42, %v9779_v35  ;;  %v3909_v35 = vld [vmem:[%s14285_s3 + $0x10] sm:$0xff]  ;;  %v14649_v44 = vld [vmem:[#allocation20_spill] sm:$0xff]  ;;  %v2531_v12 = vpop.f32.mrf.mxu1  ;;  %v3924_v42 = vld [vmem:[%s14285_s3 + $0x88] sm:$0xff] }
 0x2a8   : > { %14636 = vst [vmem:[#allocation60_spill] sm:$0xff] %v10012_v20  ;;  %v1783_v13 = vadd.f32 %v14643_v38, %v9782_v5  ;;  %4150 = vmatpush.msra.mxu3 %v3926_v31  ;;  %v10094_v30 = vadd.f32 %v14644_v57, %v1779_v1  ;;  %v10097_v6 = vadd.f32 %v14645_v55, %v1780_v63  ;;  %v3925_v5 = vld [vmem:[%s14285_s3 + $0x90] sm:$0xff]  ;;  %v14653_v1 = vld [vmem:[#allocation29_spill] sm:$0xff]  ;;  %v14659_v55 = vld [vmem:[#allocation112_spill] sm:$0xff] }
 0x2a9   : > { %14638 = vst [vmem:[#allocation62_spill] sm:$0xff] %v10020_v53  ;;  %v1784_v0 = vadd.f32 %v14646_v45, %v9789_v33  ;;  %v10102_v18 = vadd.f32 %v14647_v23, %v1781_v21  ;;  %4037 = vmatpush.msra.mxu2 %v3910_v46  ;;  %v10111_v39 = vadd.f32 %v14648_v32, %v1782_v26  ;;  %v14650_v33 = vld [vmem:[#allocation21_spill] sm:$0xff]  ;;  %v14652_v52 = vld [vmem:[#allocation130_spill] sm:$0xff]  ;;  %v14656_v46 = vld [vmem:[#allocation31_spill] sm:$0xff] }
 0x2aa   : > { %v1785_v50 = vadd.f32 %v14649_v44, %v9792_v28  ;;  %v1786_v62 = vadd.f32 %v14650_v33, %v9795_v37  ;;  %v10118_v40 = vadd.f32 %v14651_v3, %v1783_v13  ;;  %4151 = vmatpush.msra.mxu3 %v3925_v5  ;;  %v14654_v63 = vld [vmem:[#allocation26_spill] sm:$0xff]  ;;  %v2294_v28 = vsel %vm2255_vm4, %v2292_v49, %v2293_v56  ;;  %v3908_v37 = vld [vmem:[%s14285_s3 + $0x8] sm:$0xff]  ;;  %v14657_v26 = vld [vmem:[#allocation131_spill] sm:$0xff] }
 0x2ab   : > { %v10121_v17 = vadd.f32 %v14652_v52, %v1784_v0  ;;  %v1787_v21 = vadd.f32 %v14654_v63, %v14653_v1  ;;  %v14655_v51 = vld [vmem:[#allocation30_spill] sm:$0xff]  ;;  %4038 = vmatpush.msra.mxu2 %v3909_v35  ;;  %v14660_v0 = vld [vmem:[#allocation113_spill] sm:$0xff]  ;;  %v14662_v5 = vld [vmem:[#allocation123_spill] sm:$0xff] }
 0x2ac   : > { %v1788_v31 = vadd.f32 %v14656_v46, %v14655_v51  ;;  %v10137_v38 = vadd.f32 %v14657_v26, %v1785_v50  ;;  %v14658_v13 = vld [vmem:[#allocation134_spill] sm:$0xff]  ;;  %v2628_v23 = vadd.f32 %v2531_v12, %v14660_v0  ;;  %4152 = vmatpush.msra.mxu3 %v3924_v42  ;;  %v1790_v32 = vadd.f32 %v14662_v5, %v9829_v41  ;;  %v14663_v44 = vld [vmem:[#allocation135_spill] sm:$0xff]  ;;  %v3923_v52 = vld [vmem:[%s14285_s3 + $0x80] sm:$0xff] }
 0x2ad   : > { %v2418_v11 = vpop.f32.mrf.mxu0  ;;  %v10140_v57 = vadd.f32 %v14658_v13, %v1786_v62  ;;  %v14661_v49 = vld [vmem:[#allocation122_spill] sm:$0xff]  ;;  %v10149_v33 = vadd.f32 %v14663_v44, %v1787_v21  ;;  %4039 = vmatpush.msra.mxu2 %v3908_v37  ;;  %v3907_v62 = vld [vmem:[%s14285_s3] sm:$0xff]  ;;  %v14666_v41 = vld [vmem:[#allocation127_spill] sm:$0xff] }
 0x2ae   : > { %v2627_v45 = vadd.f32 %v2418_v11, %v14659_v55  ;;  %v1789_v35 = vadd.f32 %v14661_v49, %v9826_v36  ;;  %v14664_v50 = vld [vmem:[#allocation138_spill] sm:$0xff]  ;;  %v1792_v63 = vadd.f32 %v14666_v41, %v9841_v29  ;;  %v2692_v51 = vsub.f32 0.0, %v2628_v23  ;;  %7351 = vmatmul.msk.f32.gmra.mxu0 %vm552_vm0, %v2294_v28  ;;  %7383 = vmatmul.msk.f32.gmra.mxu1 %vm552_vm0, %v2294_v28  ;;  %v14667_v46 = vld [vmem:[#allocation139_spill] sm:$0xff]  ;;  %v14669_v37 = vld [vmem:[#allocation128_spill] sm:$0xff] }
 0x2af   : > { %v10152_v3 = vadd.f32 %v14664_v50, %v1788_v31  ;;  %v14665_v36 = vld [vmem:[#allocation126_spill] sm:$0xff]  ;;  %v1793_v42 = vadd.f32 %v14669_v37, %v9846_v59  ;;  %4040 = vmatpush.msra.mxu2 %v3907_v62  ;;  %4153 = vmatpush.msra.mxu3 %v3923_v52  ;;  %v14670_v29 = vld [vmem:[#allocation129_spill] sm:$0xff]  ;;  %v14671_v55 = vld [vmem:[#allocation143_spill] sm:$0xff] }
 0x2b0   : > { %v1791_v1 = vadd.f32 %v14665_v36, %v9832_v25  ;;  %v2691_v21 = vsub.f32 0.0, %v2627_v45  ;;  %v10167_v31 = vadd.f32 %v14667_v46, %v1789_v35  ;;  %v14668_v11 = vld [vmem:[#allocation142_spill] sm:$0xff]  ;;  %v1794_v13 = vadd.f32 %v14670_v29, %v9849_v15  ;;  %v14672_v23 = vld [vmem:[#allocation148_spill] sm:$0xff]  ;;  %v14673_v35 = vld [vmem:[#allocation35_spill] sm:$0xff] }
 0x2b1   : > { %v10170_v12 = vadd.f32 %v14668_v11, %v1790_v32  ;;  %v10175_v26 = vld [vmem:[%s8432_s18 + $0xb0] sm:$0xff]  ;;  %v2757_v0 = vmul.f32 1.442695, %v2692_v51  ;;  %v10184_v49 = vadd.f32 %v14672_v23, %v1792_v63  ;;  %v14674_v5 = vld [vmem:[#allocation132_spill] sm:$0xff]  ;;  %v14676_v44 = vld [vmem:[#allocation133_spill] sm:$0xff]  ;;  %v2170_v63 = vpop.f32.mrf.mxu3  ;;  %v2060_v11 = vpop.f32.mrf.mxu2 }
 0x2b2   : > { %v2295_v25 = vrot.slane %v10175_v26, 4  ;;  %v10181_v28 = vadd.f32 %v14671_v55, %v1791_v1  ;;  %v2755_v45 = vmul.f32 1.442695, %v2691_v21  ;;  %v1795_v59 = vadd.f32 %v14674_v5, %v14673_v35  ;;  %v14675_v32 = vld [vmem:[#allocation38_spill] sm:$0xff]  ;;  %v14677_v36 = vld [vmem:[#allocation149_spill] sm:$0xff]  ;;  %v14678_v52 = vld [vmem:[#allocation152_spill] sm:$0xff]  ;;  %v2534_v23 = vpop.f32.mrf.mxu1 }
 0x2b3   : > { %v1796_v50 = vadd.f32 %v14676_v44, %v14675_v32  ;;  %v10191_v62 = vadd.f32 %v14677_v36, %v1793_v42  ;;  %v10194_v41 = vadd.f32 %v14678_v52, %v1794_v13  ;;  %v14679_v15 = vld [vmem:[#allocation136_spill] sm:$0xff]  ;;  %v14680_v21 = vld [vmem:[#allocation41_spill] sm:$0xff]  ;;  %v14689_v52 = vld [vmem:[#allocation115_spill] sm:$0xff] }
 0x2b4   : > { %v1797_v1 = vadd.f32 %v14679_v15, %v9878_v34  ;;  %v14681_v51 = vld [vmem:[#allocation137_spill] sm:$0xff]  ;;  %7760 = vpow2.f32 %v2755_v45  ;;  %v14683_v29 = vld [vmem:[#allocation156_spill] sm:$0xff]  ;;  %v2296_v13 = vsel %vm2255_vm4, %v2293_v56, %v2295_v25  ;;  %v14684_v34 = vld [vmem:[#allocation39_spill] sm:$0xff]  ;;  %v2630_v15 = vadd.f32 %v2534_v23, %v14689_v52 }
 0x2b5   : > { %v1798_v46 = vadd.f32 %v14681_v51, %v14680_v21  ;;  %v14682_v37 = vld [vmem:[#allocation153_spill] sm:$0xff]  ;;  %v10204_v55 = vadd.f32 %v14683_v29, %v1796_v50  ;;  %7762 = vpow2.f32 %v2757_v0  ;;  %v2421_v42 = vpop.f32.mrf.mxu0  ;;  %v14685_v35 = vld [vmem:[#allocation140_spill] sm:$0xff]  ;;  %v14688_v45 = vld [vmem:[#allocation114_spill] sm:$0xff] }
 0x2b6   : > { %v10201_v26 = vadd.f32 %v14682_v37, %v1795_v59  ;;  %v1799_v5 = vadd.f32 %v14685_v35, %v14684_v34  ;;  %v14686_v32 = vld [vmem:[#allocation40_spill] sm:$0xff]  ;;  %v14687_v44 = vld [vmem:[#allocation141_spill] sm:$0xff]  ;;  %v2629_v59 = vadd.f32 %v2421_v42, %v14688_v45  ;;  %v14692_v0 = vld [vmem:[#allocation22_spill] sm:$0xff]  ;;  %v2694_v23 = vsub.f32 0.0, %v2630_v15  ;;  %7352 = vmatmul.msk.f32.gmra.mxu0 %vm552_vm0, %v2296_v13  ;;  %7384 = vmatmul.msk.f32.gmra.mxu1 %vm552_vm0, %v2296_v13 }
 0x2b7   : > { %v1800_v36 = vadd.f32 %v14687_v44, %v14686_v32  ;;  %v14690_v50 = vld [vmem:[#allocation157_spill] sm:$0xff]  ;;  %v10219_v51 = vadd.f32 %v14692_v0, %v1798_v46  ;;  %v14695_v37 = vld [vmem:[#allocation144_spill] sm:$0xff]  ;;  %v14696_v29 = vld [vmem:[#allocation43_spill] sm:$0xff] }
 0x2b8   : > { %v10216_v21 = vadd.f32 %v14690_v50, %v1797_v1  ;;  %v1801_v56 = vadd.f32 %v14695_v37, %v14694_v8  ;;  %v14697_v53 = vld [vmem:[#allocation145_spill] sm:$0xff]  ;;  %v14698_v35 = vld [vmem:[#allocation23_spill] sm:$0xff]  ;;  %v14700_v32 = vld [vmem:[#allocation34_spill] sm:$0xff]  ;;  %v2693_v42 = vsub.f32 0.0, %v2629_v59 }
 0x2b9   : > { %14693 = vst [vmem:[#allocation64_spill] sm:$0xff] %v10219_v51  ;;  %v1802_v34 = vadd.f32 %v14697_v53, %v14696_v29  ;;  %v10226_v20 = vadd.f32 %v14698_v35, %v1799_v5  ;;  %v10229_v44 = vadd.f32 %v14700_v32, %v1800_v36  ;;  %v14702_v1 = vld [vmem:[#allocation44_spill] sm:$0xff]  ;;  %v14703_v46 = vld [vmem:[#allocation146_spill] sm:$0xff]  ;;  %v14704_v52 = vld [vmem:[#allocation47_spill] sm:$0xff] }
 0x2ba   : > { %14691 = vst [vmem:[#allocation63_spill] sm:$0xff] %v10216_v21  ;;  %v1803_v45 = vadd.f32 %v14703_v46, %v14702_v1  ;;  %v14705_v50 = vld [vmem:[#allocation147_spill] sm:$0xff]  ;;  %v14706_v8 = vld [vmem:[#allocation37_spill] sm:$0xff]  ;;  %v7761_v29 = vpop.eup %7760  ;;  %v14708_v36 = vld [vmem:[#allocation52_spill] sm:$0xff] }
 0x2bb   : > { %14699 = vst [vmem:[#allocation65_spill] sm:$0xff] %v10226_v20  ;;  %v1804_v0 = vadd.f32 %v14705_v50, %v14704_v52  ;;  %v10238_v53 = vadd.f32 %v14706_v8, %v1801_v56  ;;  %v8167_v5 = vld [vmem:[%s8432_s18 + $0xb8] sm:$0xff]  ;;  %v10242_v35 = vadd.f32 %v14708_v36, %v1802_v34  ;;  %v14710_v59 = vld [vmem:[#allocation48_spill] sm:$0xff]  ;;  %v14711_v15 = vld [vmem:[#allocation150_spill] sm:$0xff]  ;;  %v7763_v1 = vpop.eup %7762  ;;  %v10254_v52 = vadd.f32 1.0, %v7761_v29 }
 0x2bc   : > { %14701 = vst [vmem:[#allocation66_spill] sm:$0xff] %v10229_v44  ;;  %v2297_v37 = vrot.slane %v8167_v5, 4  ;;  %v1805_v32 = vadd.f32 %v14711_v15, %v14710_v59  ;;  %v14713_v13 = vld [vmem:[#allocation151_spill] sm:$0xff]  ;;  %v2759_v44 = vmul.f32 1.442695, %v2693_v42  ;;  %v14714_v46 = vld [vmem:[#allocation56_spill] sm:$0xff] }
 0x2bd   : > { %14707 = vst [vmem:[#allocation67_spill] sm:$0xff] %v10238_v53  ;;  %v1806_v14 = vadd.f32 %v14713_v13, %v14712_v27  ;;  %v10249_v20 = vadd.f32 %v14714_v46, %v1803_v45  ;;  %v10252_v56 = vadd.f32 %v10089_v24, %v1804_v0  ;;  %v2761_v50 = vmul.f32 1.442695, %v2694_v23  ;;  %v14717_v34 = vld [vmem:[#allocation50_spill] sm:$0xff]  ;;  %v14719_v36 = vld [vmem:[#allocation51_spill] sm:$0xff]  ;;  %v2424_v24 = vpop.f32.mrf.mxu0  ;;  %v2537_v23 = vpop.f32.mrf.mxu1  ;;  %v14723_v29 = vld [vmem:[#allocation116_spill] sm:$0xff] }
 0x2be   : > { %14709 = vst [vmem:[#allocation68_spill] sm:$0xff] %v10242_v35  ;;  %v14718_v8 = vld [vmem:[#allocation154_spill] sm:$0xff]  ;;  %v14720_v59 = vld [vmem:[#allocation155_spill] sm:$0xff]  ;;  %v10260_v35 = vadd.f32 1.0, %v7763_v1  ;;  %7764 = vpow2.f32 %v2759_v44  ;;  %v10263_v27 = vadd.f32 %v10091_v54, %v1805_v32  ;;  %v2298_v45 = vsel %vm2255_vm4, %v2295_v25, %v2297_v37  ;;  %v2173_v0 = vpop.f32.mrf.mxu3  ;;  %v14724_v1 = vld [vmem:[#allocation117_spill] sm:$0xff] }
 0x2bf   : > { %14715 = vst [vmem:[#allocation69_spill] sm:$0xff] %v10249_v20  ;;  %v1807_v5 = vadd.f32 %v14718_v8, %v14717_v34  ;;  %v1808_v15 = vadd.f32 %v14720_v59, %v14719_v36  ;;  %v10265_v42 = vadd.f32 %v2170_v63, %v1806_v14  ;;  %7766 = vrcp.f32 %v10254_v52  ;;  %v8168_v46 = vld [vmem:[%s8432_s18 + $0xc0] sm:$0xf]  ;;  %v14725_v54 = vld [vmem:[#allocation54_spill] sm:$0xff]  ;;  %v2063_v63 = vpop.f32.mrf.mxu2  ;;  %v8169_v8 = vld [vmem:[%s8432_s18 + $0xc8] sm:$0xff]  ;;  %7353 = vmatmul.msk.f32.gmra.mxu0 %vm552_vm0, %v2298_v45 }
 0x2c0   : > { %14716 = vst [vmem:[#allocation70_spill] sm:$0xff] %v10252_v56  ;;  %7768 = vrcp.f32 %v10260_v35  ;;  %v2631_v13 = vadd.f32 %v2424_v24, %v14723_v29  ;;  %v2632_v44 = vadd.f32 %v2537_v23, %v14724_v1  ;;  %v2299_v34 = vrot.slane %v8168_v46, 4  ;;  %v14726_v32 = vld [vmem:[#allocation158_spill] sm:$0xff]  ;;  %v14728_v25 = vld [vmem:[#allocation159_spill] sm:$0xff]  ;;  %7385 = vmatmul.msk.f32.gmra.mxu1 %vm552_vm0, %v2298_v45  ;;  %v14732_v46 = vld [vmem:[#allocation28_spill] sm:$0xff] }
 0x2c1   : > { %14721 = vst [vmem:[#allocation71_spill] sm:$0xff] %v10263_v27  ;;  %v1809_v14 = vadd.f32 %v14726_v32, %v14725_v54  ;;  %7770 = vpow2.f32 %v2761_v50  ;;  %v2301_v36 = vrot.slane %v8169_v8, 4  ;;  %v8170_v59 = vld [vmem:[%s8432_s18 + $0xd0] sm:$0xff]  ;;  %v14727_v27 = vld [vmem:[#allocation55_spill] sm:$0xff]  ;;  %v10281_v20 = vadd.f32 %v2060_v11, %v1807_v5  ;;  %v14748_v21 = vld [vmem:[#allocation121_spill] sm:$0xff] }
 0x2c2   : > { %14722 = vst [vmem:[#allocation72_spill] sm:$0xff] %v10265_v42  ;;  %v2302_v42 = vrot.slane %v8170_v59, 4  ;;  %v10279_v56 = vadd.f32 %v14728_v25, %v14727_v27  ;;  %v2695_v24 = vsub.f32 0.0, %v2631_v13  ;;  %v2696_v29 = vsub.f32 0.0, %v2632_v44  ;;  %v14731_v50 = vld [vmem:[#allocation27_spill] sm:$0xff] }
 0x2c3   : > { %14729 = vst [vmem:[#allocation73_spill] sm:$0xff] %v10281_v20  ;;  %v10285_v23 = vadd.f32 %v2173_v0, %v1808_v15  ;;  %v10289_v1 = vadd.f32 %v14731_v50, %v9978_v22  ;;  %v10293_v54 = vadd.f32 %v14732_v46, %v9981_v2  ;;  %v2956_v27 = vand.u32 2147483647, %v10254_v52  ;;  %v14737_v46 = vld [vmem:[#allocation118_spill] sm:$0xff] }
 0x2c4   : > { %v7765_v11 = vpop.eup %7764  ;;  %v10296_v5 = vadd.f32 %v2063_v63, %v1809_v14  ;;  %v2763_v13 = vmul.f32 1.442695, %v2695_v24  ;;  %v2765_v44 = vmul.f32 1.442695, %v2696_v29  ;;  %v2300_v32 = vsel %vm2255_vm4, %v2297_v37, %v2299_v34  ;;  %v10323_v24 = vld [vmem:[%s8432_s18 + $0xd8] sm:$0xff] }
 0x2c5   : > { %14730 = vst [vmem:[#allocation74_spill] sm:$0xff] %v10285_v23  ;;  %v10299_v45 = vpop.eup %7766  ;;  %v10301_v15 = vadd.f32 1.0, %v7765_v11  ;;  %v2958_v22 = vand.u32 2147483648, %v10254_v52  ;;  %v2971_v0 = vand.u32 2147483647, %v10260_v35  ;;  %v10306_v2 = vsel %vm2255_vm4, %v2301_v36, %v2302_v42  ;;  %v2427_v63 = vpop.f32.mrf.mxu0 }
 0x2c6   : > { %14733 = vst [vmem:[#allocation75_spill] sm:$0xff] %v10293_v54  ;;  %v10308_v8 = vpop.eup %7768  ;;  %7772 = vpow2.f32 %v2763_v13  ;;  %v2948_v14 = vmul.f32 %v10299_v45, %v10254_v52  ;;  %vm2952_vm5 = vweird.f32 %v10254_v52  ;;  %vm2967_vm6 = vweird.f32 %v10260_v35  ;;  %v2540_v59 = vpop.f32.mrf.mxu1  ;;  %v14738_v13 = vld [vmem:[#allocation119_spill] sm:$0xff] }
 0x2c7   : > { %14734 = vst [vmem:[#allocation76_spill] sm:$0xff] %v10296_v5  ;;  %v7771_v37 = vpop.eup %7770  ;;  %v2963_v34 = vmul.f32 %v10308_v8, %v10260_v35  ;;  %7774 = vrcp.f32 %v10301_v15  ;;  %vm10317_vm7 = vcmp.eq.f32.partialorder %v2956_v27, 8.507059e+37  ;;  %v2973_v25 = vand.u32 2147483648, %v10260_v35  ;;  %7354 = vmatmul.msk.f32.gmra.mxu0 %vm552_vm0, %v2300_v32 }
 0x2c8   : > { %v14319_v29 = vrot.slane %v10323_v24, 4  ;;  %v10326_v50 = vadd.f32 1.0, %v7771_v37  ;;  %7776 = vpow2.f32 %v2765_v44  ;;  %v2633_v11 = vadd.f32 %v2427_v63, %v14737_v46  ;;  %7386 = vmatmul.msk.f32.gmra.mxu1 %vm552_vm0, %v2300_v32 }
 0x2c9   : > { %v2634_v5 = vadd.f32 %v2540_v59, %v14738_v13  ;;  %v2964_v23 = vsub.f32 1.0, %v2963_v34  ;;  %v2949_v20 = vsub.f32 1.0, %v2948_v14  ;;  %v2959_v27 = vor.u32 1.1754944e-38, %v2958_v22 }
 0x2ca   : > { %vm10330_vm9 = vcmp.eq.f32.partialorder %v2971_v0, 8.507059e+37  ;;  %7778 = vrcp.f32 %v10326_v50  ;;  %v2697_v19 = vsub.f32 0.0, %v2633_v11  ;;  %vm2953_vm10 = vweird.f32 %v10299_v45 }
 0x2cb   : > { %v2698_v16 = vsub.f32 0.0, %v2634_v5  ;;  %v2950_v44 = vmul.f32 %v10299_v45, %v2949_v20  ;;  %v2965_v37 = vmul.f32 %v10308_v8, %v2964_v23  ;;  %vm2968_vm11 = vweird.f32 %v10308_v8  ;;  %vm10354_vm12 = vmor %vm2952_vm5, %vm2953_vm10 }
 0x2cc   : > { %v2986_v22 = vand.u32 2147483647, %v10301_v15  ;;  %v7773_v0 = vpop.eup %7772  ;;  %v2767_v14 = vmul.f32 1.442695, %v2697_v19  ;;  %v2974_v63 = vor.u32 1.1754944e-38, %v2973_v25  ;;  %v10345_v5 = vsel %vm2255_vm4, %v2302_v42, %v14319_v29  ;;  %vm10365_vm14 = vmor %vm2967_vm6, %vm2968_vm11 }
 0x2cd   : > { %v2769_v34 = vmul.f32 1.442695, %v2698_v16  ;;  %v10347_v32 = vpop.eup %7774  ;;  %v10349_v59 = vadd.f32 1.0, %v7773_v0  ;;  %v2951_v20 = vadd.f32 %v10299_v45, %v2950_v44  ;;  %v2966_v16 = vadd.f32 %v10308_v8, %v2965_v37  ;;  %v2430_v44 = vpop.f32.mrf.mxu0 }
 0x2ce   : > { %vm2982_vm13 = vweird.f32 %v10301_v15  ;;  %v2988_v19 = vand.u32 2147483648, %v10301_v15  ;;  %v7777_v42 = vpop.eup %7776  ;;  %7780 = vpow2.f32 %v2767_v14  ;;  %v2978_v52 = vmul.f32 %v10347_v32, %v10301_v15  ;;  %v2543_v37 = vpop.f32.mrf.mxu1 }
 0x2cf   : > { %v3001_v46 = vand.u32 2147483647, %v10326_v50  ;;  %v3003_v11 = vand.u32 2147483648, %v10326_v50  ;;  %7782 = vrcp.f32 %v10349_v59  ;;  %v10374_v13 = vadd.f32 1.0, %v7777_v42  ;;  %v14747_v42 = vld [vmem:[#allocation120_spill] sm:$0xff]  ;;  %7355 = vmatmul.msk.f32.gmra.mxu0 %vm552_vm0, %v10306_v2 }
 0x2d0   : > { %v2955_v35 = vsel %vm10354_vm12, %v10299_v45, %v2951_v20  ;;  %v2970_v0 = vsel %vm10365_vm14, %v10308_v8, %v2966_v16  ;;  %vm10382_vm15 = vcmp.eq.f32.partialorder %v2986_v22, 8.507059e+37  ;;  %vm2997_vm5 = vweird.f32 %v10326_v50  ;;  %v7779_v29 = vpop.eup %7778  ;;  %7387 = vmatmul.msk.f32.gmra.mxu1 %vm552_vm0, %v10306_v2 }
 0x2d1   : > { %7784 = vpow2.f32 %v2769_v34  ;;  %v2635_v51 = vadd.f32 %v2430_v44, %v14747_v42  ;;  %v2636_v54 = vadd.f32 %v2543_v37, %v14748_v21  ;;  %v2960_v23 = vsel %vm10317_vm7, %v2959_v27, %v2955_v35  ;;  %v10460_v27 = vld [vmem:[%s8432_s18 + $0xe0] sm:$0xff] }
 0x2d2   : > { %7786 = vrcp.f32 %v10374_v13  ;;  %4041 = vmatmul.f32.vlgmr.msra.gmra.mxu2 %v2960_v23  ;;  %v2975_v45 = vsel %vm10330_vm9, %v2974_v63, %v2970_v0  ;;  %v2979_v8 = vsub.f32 1.0, %v2978_v52  ;;  %v2993_v22 = vmul.f32 %v7779_v29, %v10326_v50 }
 0x2d3   : > { %v2699_v20 = vsub.f32 0.0, %v2635_v51  ;;  %v2700_v16 = vsub.f32 0.0, %v2636_v54  ;;  %7399 = vmatmul.msk.f32.vlgmr.msra.gmra.mxu3 %vm3928_vm8, %v2975_v45  ;;  %vm2983_vm6 = vweird.f32 %v10347_v32  ;;  %v2989_v21 = vor.u32 1.1754944e-38, %v2988_v19 }
 0x2d4   : > { %v2980_v36 = vmul.f32 %v10347_v32, %v2979_v8  ;;  %v2994_v53 = vsub.f32 1.0, %v2993_v22  ;;  %vm10402_vm7 = vcmp.eq.f32.partialorder %v3001_v46, 8.507059e+37  ;;  %v3016_v51 = vand.u32 2147483647, %v10349_v59  ;;  %v7781_v54 = vpop.eup %7780  ;;  %vm10417_vm10 = vmor %vm2982_vm13, %vm2983_vm6 }
 0x2d5   : > { %v2771_v34 = vmul.f32 1.442695, %v2699_v20  ;;  %v2773_v63 = vmul.f32 1.442695, %v2700_v16  ;;  %vm2998_vm9 = vweird.f32 %v7779_v29  ;;  %v3004_v25 = vor.u32 1.1754944e-38, %v3003_v11  ;;  %v10407_v52 = vpop.eup %7782  ;;  %v2433_v23 = vpop.f32.mrf.mxu0  ;;  %v14755_v20 = vld [vmem:[#allocation10_spill] sm:$0xff] }
 0x2d6   : > { %v10409_v19 = vadd.f32 1.0, %v7781_v54  ;;  %v2981_v2 = vadd.f32 %v10347_v32, %v2980_v36  ;;  %v2995_v44 = vmul.f32 %v7779_v29, %v2994_v53  ;;  %v3018_v37 = vand.u32 2147483648, %v10349_v59  ;;  %v2546_v45 = vpop.f32.mrf.mxu1  ;;  %v14756_v36 = vld [vmem:[#allocation13_spill] sm:$0xff]  ;;  %vm2999_vm6 = vmor %vm2997_vm5, %vm2998_vm9 }
 0x2d7   : > { %v7785_v46 = vpop.eup %7784  ;;  %7788 = vpow2.f32 %v2771_v34  ;;  %v3008_v11 = vmul.f32 %v10407_v52, %v10349_v59  ;;  %vm3012_vm11 = vweird.f32 %v10349_v59  ;;  %vm3013_vm12 = vweird.f32 %v10407_v52  ;;  %7356 = vmatmul.msk.f32.gmra.mxu0 %vm552_vm0, %v10345_v5 }
 0x2d8   : > { %v10425_v0 = vpop.eup %7786  ;;  %7790 = vrcp.f32 %v10409_v19  ;;  %v10428_v42 = vadd.f32 1.0, %v7785_v46  ;;  %v2985_v15 = vsel %vm10417_vm10, %v10347_v32, %v2981_v2  ;;  %v2996_v8 = vadd.f32 %v7779_v29, %v2995_v44  ;;  %7388 = vmatmul.msk.f32.gmra.mxu1 %vm552_vm0, %v10345_v5 }
 0x2d9   : > { %vm10433_vm13 = vcmp.eq.f32.partialorder %v3016_v51, 8.507059e+37  ;;  %vm3027_vm14 = vweird.f32 %v10374_v13  ;;  %7792 = vpow2.f32 %v2773_v63  ;;  %v2637_v16 = vadd.f32 %v2433_v23, %v14755_v20 }
 0x2da   : > { %v2638_v53 = vadd.f32 %v2546_v45, %v14756_v36  ;;  %v2990_v54 = vsel %vm10382_vm15, %v2989_v21, %v2985_v15  ;;  %v3000_v32 = vsel %vm2999_vm6, %v7779_v29, %v2996_v8  ;;  %v3009_v51 = vsub.f32 1.0, %v3008_v11 }
 0x2db   : > { %4044 = vmatmul.f32.gmra.mxu2 %v2990_v54  ;;  %v3019_v34 = vor.u32 1.1754944e-38, %v3018_v37  ;;  %v3023_v2 = vmul.f32 %v10425_v0, %v10374_v13  ;;  %7794 = vrcp.f32 %v10428_v42  ;;  %v2701_v63 = vsub.f32 0.0, %v2637_v16 }
 0x2dc   : > { %v2702_v44 = vsub.f32 0.0, %v2638_v53  ;;  %v3005_v14 = vsel %vm10402_vm7, %v3004_v25, %v3000_v32  ;;  %v3010_v29 = vmul.f32 %v10407_v52, %v3009_v51  ;;  %v3031_v21 = vand.u32 2147483647, %v10374_v13  ;;  %vm3014_vm7 = vmor %vm3012_vm11, %vm3013_vm12 }
 0x2dd   : > { %7400 = vmatmul.msk.f32.gmra.mxu3 %vm3928_vm8, %v3005_v14  ;;  %v3024_v50 = vsub.f32 1.0, %v3023_v2  ;;  %v3033_v37 = vand.u32 2147483648, %v10374_v13  ;;  %v7789_v46 = vpop.eup %7788  ;;  %v2775_v35 = vmul.f32 1.442695, %v2701_v63  ;;  %vm3028_vm15 = vweird.f32 %v10425_v0  ;;  %v2436_v32 = vpop.f32.mrf.mxu0  ;;  %v14759_v14 = vld [vmem:[#allocation11_spill] sm:$0xff] }
 0x2de   : > { %v2777_v11 = vmul.f32 1.442695, %v2702_v44  ;;  %v2306_v25 = vrot.slane %v10460_v27, 4  ;;  %v10463_v23 = vpop.eup %7790  ;;  %v10465_v45 = vadd.f32 1.0, %v7789_v46  ;;  %v3011_v5 = vadd.f32 %v10407_v52, %v3010_v29  ;;  %v2549_v51 = vpop.f32.mrf.mxu1  ;;  %v14758_v44 = vld [vmem:[#allocation14_spill] sm:$0xff]  ;;  %vm3029_vm9 = vmor %vm3027_vm14, %vm3028_vm15 }
 0x2df   : > { %v3025_v15 = vmul.f32 %v10425_v0, %v3024_v50  ;;  %vm3042_vm5 = vweird.f32 %v10409_v19  ;;  %v7793_v8 = vpop.eup %7792  ;;  %7796 = vpow2.f32 %v2775_v35  ;;  %v3034_v20 = vor.u32 1.1754944e-38, %v3033_v37 }
 0x2e0   : > { %v14757_v16 = vrot.slane %v10323_v24, 4  ;;  %v3038_v53 = vmul.f32 %v10463_v23, %v10409_v19  ;;  %7798 = vrcp.f32 %v10465_v45  ;;  %v10482_v54 = vadd.f32 1.0, %v7793_v8 }
 0x2e1   : > { %v3015_v2 = vsel %vm3014_vm7, %v10407_v52, %v3011_v5  ;;  %v3026_v59 = vadd.f32 %v10425_v0, %v3025_v15  ;;  %v10486_v63 = vpop.eup %7794  ;;  %7800 = vpow2.f32 %v2777_v11  ;;  %v2639_v24 = vadd.f32 %v2436_v32, %v14758_v44 }
 0x2e2   : > { %v2307_v36 = vsel %vm2255_vm4, %v14757_v16, %v2306_v25  ;;  %v2640_v29 = vadd.f32 %v2549_v51, %v14759_v14  ;;  %v3020_v50 = vsel %vm10433_vm13, %v3019_v34, %v3015_v2  ;;  %7802 = vrcp.f32 %v10482_v54 }
 0x2e3   : > { %4047 = vmatmul.f32.gmra.mxu2 %v3020_v50  ;;  %v3030_v52 = vsel %vm3029_vm9, %v10425_v0, %v3026_v59  ;;  %vm3032_vm10 = vcmp.eq.f32.partialorder %v3031_v21, 8.507059e+37  ;;  %v3039_v37 = vsub.f32 1.0, %v3038_v53  ;;  %v2703_v46 = vsub.f32 0.0, %v2639_v24  ;;  %7357 = vmatmul.msk.f32.gmra.mxu0 %vm552_vm0, %v2307_v36  ;;  %v8173_v24 = vld [vmem:[%s8432_s18 + $0xe8] sm:$0xf] }
 0x2e4   : > { %v2704_v35 = vsub.f32 0.0, %v2640_v29  ;;  %v3035_v11 = vsel %vm3032_vm10, %v3034_v20, %v3030_v52  ;;  %v3046_v22 = vand.u32 2147483647, %v10409_v19  ;;  %7389 = vmatmul.msk.f32.gmra.mxu1 %vm552_vm0, %v2307_v36  ;;  %vm3043_vm11 = vweird.f32 %v10463_v23 }
 0x2e5   : > { %7401 = vmatmul.msk.f32.gmra.mxu3 %vm3928_vm8, %v3035_v11  ;;  %v3040_v13 = vmul.f32 %v10463_v23, %v3039_v37  ;;  %v3048_v34 = vand.u32 2147483648, %v10409_v19  ;;  %v3053_v0 = vmul.f32 %v10486_v63, %v10428_v42  ;;  %v7797_v21 = vpop.eup %7796  ;;  %v2779_v5 = vmul.f32 1.442695, %v2703_v46  ;;  %vm10521_vm14 = vmor %vm3042_vm5, %vm3043_vm11  ;;  %v2439_v52 = vpop.f32.mrf.mxu0 }
 0x2e6   : > { %v2781_v15 = vmul.f32 1.442695, %v2704_v35  ;;  %vm10507_vm12 = vcmp.eq.f32.partialorder %v3046_v22, 8.507059e+37  ;;  %vm3058_vm13 = vweird.f32 %v10486_v63  ;;  %v10512_v20 = vpop.eup %7798  ;;  %v10514_v16 = vadd.f32 1.0, %v7797_v21  ;;  %v2552_v37 = vpop.f32.mrf.mxu1  ;;  %v14764_v35 = vld [vmem:[#allocation12_spill] sm:$0xff]  ;;  %v14765_v22 = vld [vmem:[#allocation15_spill] sm:$0xff] }
 0x2e7   : > { %v3041_v36 = vadd.f32 %v10463_v23, %v3040_v13  ;;  %v3049_v53 = vor.u32 1.1754944e-38, %v3048_v34  ;;  %v3054_v32 = vsub.f32 1.0, %v3053_v0  ;;  %v7801_v51 = vpop.eup %7800  ;;  %7804 = vpow2.f32 %v2779_v5 }
 0x2e8   : > { %v3061_v59 = vand.u32 2147483647, %v10428_v42  ;;  %v3063_v44 = vand.u32 2147483648, %v10428_v42  ;;  %v2308_v14 = vrot.slane %v8173_v24, 4  ;;  %v10528_v29 = vpop.eup %7802  ;;  %7806 = vrcp.f32 %v10514_v16 }
 0x2e9   : > { %v10531_v50 = vadd.f32 1.0, %v7801_v51  ;;  %v3045_v19 = vsel %vm10521_vm14, %v10463_v23, %v3041_v36  ;;  %v3055_v46 = vmul.f32 %v10486_v63, %v3054_v32  ;;  %7808 = vpow2.f32 %v2781_v15 }
 0x2ea   : > { %v2641_v11 = vadd.f32 %v2439_v52, %v14764_v35  ;;  %v2642_v13 = vadd.f32 %v2552_v37, %v14765_v22  ;;  %v3050_v34 = vsel %vm10507_vm12, %v3049_v53, %v3045_v19  ;;  %vm3057_vm6 = vweird.f32 %v10428_v42 }
 0x2eb   : > { %7810 = vrcp.f32 %v10531_v50  ;;  %4050 = vmatmul.f32.gmra.mxu2 %v3050_v34  ;;  %v3056_v0 = vadd.f32 %v10486_v63, %v3055_v46  ;;  %v3064_v21 = vor.u32 1.1754944e-38, %v3063_v44  ;;  %vm3059_vm15 = vmor %vm3057_vm6, %vm3058_vm13  ;;  %v2309_v15 = vsel %vm2255_vm4, %v2306_v25, %v2308_v14 }
 0x2ec   : > { %v2705_v5 = vsub.f32 0.0, %v2641_v11  ;;  %v2706_v23 = vsub.f32 0.0, %v2642_v13  ;;  %v3068_v8 = vmul.f32 %v10512_v20, %v10465_v45  ;;  %vm3062_vm5 = vcmp.eq.f32.partialorder %v3061_v59, 8.507059e+37  ;;  %7358 = vmatmul.msk.f32.gmra.mxu0 %vm552_vm0, %v2309_v15  ;;  %7390 = vmatmul.msk.f32.gmra.mxu1 %vm552_vm0, %v2309_v15 }
 0x2ed   : > { %v3060_v36 = vsel %vm3059_vm15, %v10486_v63, %v3056_v0  ;;  %vm3072_vm7 = vweird.f32 %v10465_v45  ;;  %v3076_v42 = vand.u32 2147483647, %v10465_v45  ;;  %v7805_v53 = vpop.eup %7804  ;;  %vm3073_vm9 = vweird.f32 %v10512_v20  ;;  %v2442_v46 = vpop.f32.mrf.mxu0 }
 0x2ee   : > { %v2783_v32 = vmul.f32 1.442695, %v2705_v5  ;;  %v2785_v51 = vmul.f32 1.442695, %v2706_v23  ;;  %v3065_v27 = vsel %vm3062_vm5, %v3064_v21, %v3060_v36  ;;  %v3069_v2 = vsub.f32 1.0, %v3068_v8  ;;  %v10556_v25 = vpop.eup %7806  ;;  %v2555_v35 = vpop.f32.mrf.mxu1  ;;  %vm3074_vm13 = vmor %vm3072_vm7, %vm3073_vm9 }
 0x2ef   : > { %v10558_v44 = vadd.f32 1.0, %v7805_v53  ;;  %7402 = vmatmul.msk.f32.gmra.mxu3 %vm3928_vm8, %v3065_v27  ;;  %v3078_v63 = vand.u32 2147483648, %v10465_v45  ;;  %v3083_v59 = vmul.f32 %v10528_v29, %v10482_v54  ;;  %v7809_v24 = vpop.eup %7808  ;;  %vm10566_vm10 = vcmp.eq.f32.partialorder %v3076_v42, 8.507059e+37 }
 0x2f0   : > { %7812 = vpow2.f32 %v2783_v32  ;;  %v3070_v14 = vmul.f32 %v10512_v20, %v3069_v2  ;;  %vm3087_vm11 = vweird.f32 %v10482_v54  ;;  %v10574_v19 = vadd.f32 1.0, %v7809_v24 }
 0x2f1   : > { %v10571_v37 = vpop.eup %7810  ;;  %7814 = vrcp.f32 %v10558_v44  ;;  %v3084_v11 = vsub.f32 1.0, %v3083_v59  ;;  %vm3088_vm12 = vweird.f32 %v10528_v29  ;;  %v2643_v22 = vadd.f32 %v2442_v46, %v10032_v60  ;;  %v2176_v46 = vpop.f32.mrf.mxu3 }
 0x2f2   : > { %7816 = vpow2.f32 %v2785_v51  ;;  %v2644_v13 = vadd.f32 %v2555_v35, %v10035_v4  ;;  %v3071_v34 = vadd.f32 %v10512_v20, %v3070_v14  ;;  %v3079_v0 = vor.u32 1.1754944e-38, %v3078_v63  ;;  %v8174_v4 = vld [vmem:[%s8432_s18 + $0xf0] sm:$0xff]  ;;  %vm3089_vm14 = vmor %vm3087_vm11, %vm3088_vm12 }
 0x2f3   : > { %v3085_v21 = vmul.f32 %v10528_v29, %v3084_v11  ;;  %v3091_v5 = vand.u32 2147483647, %v10482_v54  ;;  %v3093_v23 = vand.u32 2147483648, %v10482_v54  ;;  %v2707_v15 = vsub.f32 0.0, %v2643_v22 }
 0x2f4   : > { %v2708_v8 = vsub.f32 0.0, %v2644_v13  ;;  %v3075_v60 = vsel %vm3074_vm13, %v10512_v20, %v3071_v34  ;;  %v2310_v36 = vrot.slane %v8174_v4, 4  ;;  %7818 = vrcp.f32 %v10574_v19  ;;  %v8175_v20 = vld [vmem:[%s8432_s18 + $0xf8] sm:$0xff] }
 0x2f5   : > { %v3080_v45 = vsel %vm10566_vm10, %v3079_v0, %v3075_v60  ;;  %v3086_v42 = vadd.f32 %v10528_v29, %v3085_v21  ;;  %v3094_v53 = vor.u32 1.1754944e-38, %v3093_v23  ;;  %v2787_v51 = vmul.f32 1.442695, %v2707_v15  ;;  %v2445_v13 = vpop.f32.mrf.mxu0 }
 0x2f6   : > { %v7813_v32 = vpop.eup %7812  ;;  %v2789_v27 = vmul.f32 1.442695, %v2708_v8  ;;  %4053 = vmatmul.f32.gmra.mxu2 %v3080_v45  ;;  %v2311_v2 = vrot.slane %v8175_v20, 4  ;;  %v3098_v63 = vmul.f32 %v10556_v25, %v10514_v16  ;;  %vm3092_vm6 = vcmp.eq.f32.partialorder %v3091_v5, 8.507059e+37 }
 0x2f7   : > { %v10600_v59 = vpop.eup %7814  ;;  %v10602_v24 = vadd.f32 1.0, %v7813_v32  ;;  %v3090_v14 = vsel %vm3089_vm14, %v10528_v29, %v3086_v42  ;;  %vm3103_vm15 = vweird.f32 %v10556_v25  ;;  %7820 = vpow2.f32 %v2787_v51  ;;  %v2558_v29 = vpop.f32.mrf.mxu1 }
 0x2f8   : > { %v7817_v52 = vpop.eup %7816  ;;  %v3095_v35 = vsel %vm3092_vm6, %v3094_v53, %v3090_v14  ;;  %v2312_v54 = vsel %vm2255_vm4, %v2310_v36, %v2311_v2  ;;  %v3099_v11 = vsub.f32 1.0, %v3098_v63  ;;  %v3106_v34 = vand.u32 2147483647, %v10514_v16 }
 0x2f9   : > { %7822 = vrcp.f32 %v10602_v24  ;;  %v10608_v22 = vadd.f32 1.0, %v7817_v52  ;;  %7403 = vmatmul.msk.f32.gmra.mxu3 %vm3928_vm8, %v3095_v35  ;;  %7359 = vmatmul.msk.f32.gmra.mxu0 %vm552_vm0, %v2312_v54  ;;  %v3108_v0 = vand.u32 2147483648, %v10514_v16  ;;  %v2645_v21 = vadd.f32 %v2445_v13, %v10042_v7 }
 0x2fa   : > { %7824 = vpow2.f32 %v2789_v27  ;;  %7391 = vmatmul.msk.f32.gmra.mxu1 %vm552_vm0, %v2312_v54  ;;  %v2646_v5 = vadd.f32 %v2558_v29, %v10045_v47  ;;  %v3100_v23 = vmul.f32 %v10556_v25, %v3099_v11  ;;  %v10618_v15 = vpop.eup %7818  ;;  %v10621_v8 = vadd.f32 %v2176_v46, %v10279_v56  ;;  %v10634_v27 = vld [vmem:[%s8432_s18 + $0x100] sm:$0xff] }
 0x2fb   : > { %7826 = vrcp.f32 %v10608_v22  ;;  %vm3102_vm5 = vweird.f32 %v10514_v16  ;;  %v3113_v60 = vmul.f32 %v10571_v37, %v10531_v50  ;;  %v2709_v4 = vsub.f32 0.0, %v2645_v21  ;;  %v14768_v54 = vld [vmem:[#allocation32_spill] sm:$0xff] }
 0x2fc   : > { %v2710_v36 = vsub.f32 0.0, %v2646_v5  ;;  %v3101_v7 = vadd.f32 %v10556_v25, %v3100_v23  ;;  %vm3107_vm7 = vcmp.eq.f32.partialorder %v3106_v34, 8.507059e+37  ;;  %vm3104_vm9 = vmor %vm3102_vm5, %vm3103_vm15  ;;  %v3109_v47 = vor.u32 1.1754944e-38, %v3108_v0 }
 0x2fd   : > { %v3114_v45 = vsub.f32 1.0, %v3113_v60  ;;  %v3121_v56 = vand.u32 2147483647, %v10531_v50  ;;  %v3123_v42 = vand.u32 2147483648, %v10531_v50  ;;  %v7821_v53 = vpop.eup %7820  ;;  %v2791_v32 = vmul.f32 1.442695, %v2709_v4 }
 0x2fe   : > { %v2793_v16 = vmul.f32 1.442695, %v2710_v36  ;;  %v3105_v51 = vsel %vm3104_vm9, %v10556_v25, %v3101_v7  ;;  %v2313_v20 = vrot.slane %v10634_v27, 4  ;;  %v10639_v14 = vadd.f32 1.0, %v7821_v53 }
 0x2ff   : > { %v10637_v63 = vpop.eup %7822  ;;  %v3110_v52 = vsel %vm3107_vm7, %v3109_v47, %v3105_v51  ;;  %v3115_v46 = vmul.f32 %v10571_v37, %v3114_v45  ;;  %vm3118_vm10 = vweird.f32 %v10571_v37  ;;  %v10645_v11 = vadd.f32 %v14768_v54, %v9988_v48  ;;  %v2448_v48 = vpop.f32.mrf.mxu0  ;;  %v10683_v54 = vld [vmem:[%s8432_s18 + $0x108] sm:$0xff] }
 0x300   : > { %v7825_v35 = vpop.eup %7824  ;;  %7828 = vpow2.f32 %v2791_v32  ;;  %4056 = vmatmul.f32.gmra.mxu2 %v3110_v52  ;;  %v2314_v25 = vsel %vm2255_vm4, %v2311_v2, %v2313_v20  ;;  %v3128_v13 = vmul.f32 %v10600_v59, %v10558_v44  ;;  %vm3117_vm11 = vweird.f32 %v10531_v50  ;;  %v2561_v21 = vpop.f32.mrf.mxu1 }
 0x301   : > { %v10652_v29 = vpop.eup %7826  ;;  %v3116_v34 = vadd.f32 %v10571_v37, %v3115_v46  ;;  %vm3122_vm12 = vcmp.eq.f32.partialorder %v3121_v56, 8.507059e+37  ;;  %v3124_v0 = vor.u32 1.1754944e-38, %v3123_v42  ;;  %7360 = vmatmul.msk.f32.gmra.mxu0 %vm552_vm0, %v2314_v25  ;;  %7830 = vpow2.f32 %v2793_v16  ;;  %vm3119_vm13 = vmor %vm3117_vm11, %vm3118_vm10 }
 0x302   : > { %7392 = vmatmul.msk.f32.gmra.mxu1 %vm552_vm0, %v2314_v25  ;;  %v2647_v2 = vadd.f32 %v2448_v48, %v10055_v43  ;;  %v2648_v5 = vadd.f32 %v2561_v21, %v10058_v61  ;;  %v3129_v23 = vsub.f32 1.0, %v3128_v13  ;;  %7832 = vrcp.f32 %v10639_v14 }
 0x303   : > { %v3120_v50 = vsel %vm3119_vm13, %v10571_v37, %v3116_v34  ;;  %vm3133_vm14 = vweird.f32 %v10600_v59  ;;  %v3136_v60 = vand.u32 2147483647, %v10558_v44  ;;  %v10667_v45 = vadd.f32 1.0, %v7825_v35 }
 0x304   : > { %v3125_v4 = vsel %vm3122_vm12, %v3124_v0, %v3120_v50  ;;  %v2711_v36 = vsub.f32 0.0, %v2647_v2  ;;  %v2712_v7 = vsub.f32 0.0, %v2648_v5  ;;  %v3130_v47 = vmul.f32 %v10600_v59, %v3129_v23 }
 0x305   : > { %7404 = vmatmul.msk.f32.gmra.mxu3 %vm3928_vm8, %v3125_v4  ;;  %vm3132_vm6 = vweird.f32 %v10558_v44  ;;  %v3138_v43 = vand.u32 2147483648, %v10558_v44  ;;  %v3143_v61 = vmul.f32 %v10618_v15, %v10574_v19  ;;  %vm3137_vm15 = vcmp.eq.f32.partialorder %v3136_v60, 8.507059e+37 }
 0x306   : > { %v7829_v37 = vpop.eup %7828  ;;  %v2795_v56 = vmul.f32 1.442695, %v2711_v36  ;;  %v2797_v42 = vmul.f32 1.442695, %v2712_v7  ;;  %v3131_v53 = vadd.f32 %v10600_v59, %v3130_v47  ;;  %vm3134_vm5 = vmor %vm3132_vm6, %vm3133_vm14  ;;  %v3151_v52 = vand.u32 2147483647, %v10574_v19 }
 0x307   : > { %v10675_v32 = vadd.f32 1.0, %v7829_v37  ;;  %v3139_v16 = vor.u32 1.1754944e-38, %v3138_v43  ;;  %v3144_v51 = vsub.f32 1.0, %v3143_v61  ;;  %v7831_v44 = vpop.eup %7830  ;;  %v3153_v35 = vand.u32 2147483648, %v10574_v19  ;;  %v2451_v48 = vpop.f32.mrf.mxu0 }
 0x308   : > { %7834 = vpow2.f32 %v2795_v56  ;;  %v3135_v46 = vsel %vm3134_vm5, %v10600_v59, %v3131_v53  ;;  %v2315_v25 = vrot.slane %v10683_v54, 4  ;;  %v10686_v13 = vpop.eup %7832  ;;  %vm3148_vm7 = vweird.f32 %v10618_v15  ;;  %v2564_v21 = vpop.f32.mrf.mxu1 }
 0x309   : > { %7836 = vrcp.f32 %v10667_v45  ;;  %v3140_v34 = vsel %vm3137_vm15, %v3139_v16, %v3135_v46  ;;  %v3145_v0 = vmul.f32 %v10618_v15, %v3144_v51  ;;  %v10691_v2 = vadd.f32 1.0, %v7831_v44 }
 0x30a   : > { %7838 = vpow2.f32 %v2797_v42  ;;  %4059 = vmatmul.f32.gmra.mxu2 %v3140_v34  ;;  %vm3147_vm9 = vweird.f32 %v10574_v19  ;;  %v2316_v59 = vsel %vm2255_vm4, %v2313_v20, %v2315_v25  ;;  %v2649_v23 = vadd.f32 %v2451_v48, %v10080_v58 }
 0x30b   : > { %7840 = vrcp.f32 %v10675_v32  ;;  %v3146_v5 = vadd.f32 %v10618_v15, %v3145_v0  ;;  %7361 = vmatmul.msk.f32.gmra.mxu0 %vm552_vm0, %v2316_v59  ;;  %7393 = vmatmul.msk.f32.gmra.mxu1 %vm552_vm0, %v2316_v59  ;;  %v2650_v50 = vadd.f32 %v2564_v21, %v10083_v9  ;;  %vm3149_vm10 = vmor %vm3147_vm9, %vm3148_vm7  ;;  %vm3152_vm11 = vcmp.eq.f32.partialorder %v3151_v52, 8.507059e+37  ;;  %v8178_v59 = vld [vmem:[%s8432_s18 + $0x110] sm:$0xf] }
 0x30c   : > { %v3154_v19 = vor.u32 1.1754944e-38, %v3153_v35  ;;  %v3158_v27 = vmul.f32 %v10637_v63, %v10602_v24  ;;  %v3166_v20 = vand.u32 2147483647, %v10602_v24  ;;  %v2713_v4 = vsub.f32 0.0, %v2649_v23 }
 0x30d   : > { %v3150_v60 = vsel %vm3149_vm10, %v10618_v15, %v3146_v5  ;;  %v2714_v36 = vsub.f32 0.0, %v2650_v50  ;;  %v3168_v7 = vand.u32 2147483648, %v10602_v24  ;;  %7842 = vrcp.f32 %v10691_v2 }
 0x30e   : > { %v7835_v47 = vpop.eup %7834  ;;  %v3155_v58 = vsel %vm3152_vm11, %v3154_v19, %v3150_v60  ;;  %v3159_v43 = vsub.f32 1.0, %v3158_v27  ;;  %v3173_v9 = vmul.f32 %v10652_v29, %v10608_v22  ;;  %v2799_v37 = vmul.f32 1.442695, %v2713_v4 }
 0x30f   : > { %v10713_v61 = vpop.eup %7836  ;;  %7405 = vmatmul.msk.f32.gmra.mxu3 %vm3928_vm8, %v3155_v58  ;;  %vm3162_vm12 = vweird.f32 %v10602_v24  ;;  %vm3163_vm13 = vweird.f32 %v10637_v63  ;;  %vm10718_vm14 = vcmp.eq.f32.partialorder %v3166_v20, 8.507059e+37  ;;  %v10722_v42 = vadd.f32 1.0, %v7835_v47  ;;  %v2454_v34 = vpop.f32.mrf.mxu0 }
 0x310   : > { %v7839_v56 = vpop.eup %7838  ;;  %v2801_v53 = vmul.f32 1.442695, %v2714_v36  ;;  %v3160_v16 = vmul.f32 %v10637_v63, %v3159_v43  ;;  %v3174_v51 = vsub.f32 1.0, %v3173_v9  ;;  %v3169_v44 = vor.u32 1.1754944e-38, %v3168_v7  ;;  %v2567_v0 = vpop.f32.mrf.mxu1  ;;  %vm3164_vm15 = vmor %vm3162_vm12, %vm3163_vm13  ;;  %v14771_v9 = vld [vmem:[#allocation33_spill] sm:$0xff] }
 0x311   : > { %v10725_v52 = vpop.eup %7840  ;;  %vm3178_vm6 = vweird.f32 %v10652_v29  ;;  %v3181_v46 = vand.u32 2147483647, %v10608_v22  ;;  %v3183_v35 = vand.u32 2147483648, %v10608_v22  ;;  %7844 = vpow2.f32 %v2799_v37 }
 0x312   : > { %v3161_v48 = vadd.f32 %v10637_v63, %v3160_v16  ;;  %v3175_v21 = vmul.f32 %v10652_v29, %v3174_v51  ;;  %v2317_v5 = vrot.slane %v8178_v59, 4  ;;  %v10733_v23 = vadd.f32 1.0, %v7839_v56 }
 0x313   : > { %vm3177_vm5 = vweird.f32 %v10608_v22  ;;  %v3184_v50 = vor.u32 1.1754944e-38, %v3183_v35  ;;  %v2651_v19 = vadd.f32 %v2454_v34, %v10094_v30  ;;  %v10741_v27 = vpop.eup %7842  ;;  %7846 = vpow2.f32 %v2801_v53 }
 0x314   : > { %v3165_v20 = vsel %vm3164_vm15, %v10637_v63, %v3161_v48  ;;  %v3176_v60 = vadd.f32 %v10652_v29, %v3175_v21  ;;  %v2318_v4 = vsel %vm2255_vm4, %v2315_v25, %v2317_v5  ;;  %vm3179_vm7 = vmor %vm3177_vm5, %vm3178_vm6  ;;  %v2652_v22 = vadd.f32 %v2567_v0, %v10097_v6  ;;  %v8179_v5 = vld [vmem:[%s8432_s18 + $0x118] sm:$0xff] }
 0x315   : > { %v3170_v24 = vsel %vm10718_vm14, %v3169_v44, %v3165_v20  ;;  %7362 = vmatmul.msk.f32.gmra.mxu0 %vm552_vm0, %v2318_v4  ;;  %7394 = vmatmul.msk.f32.gmra.mxu1 %vm552_vm0, %v2318_v4  ;;  %v2715_v30 = vsub.f32 0.0, %v2651_v19  ;;  %v3188_v63 = vmul.f32 %v10686_v13, %v10639_v14  ;;  %7848 = vrcp.f32 %v10722_v42 }
 0x316   : > { %4062 = vmatmul.f32.gmra.mxu2 %v3170_v24  ;;  %v3180_v54 = vsel %vm3179_vm7, %v10652_v29, %v3176_v60  ;;  %vm3182_vm9 = vcmp.eq.f32.partialorder %v3181_v46, 8.507059e+37  ;;  %v3196_v25 = vand.u32 2147483647, %v10639_v14  ;;  %v2716_v47 = vsub.f32 0.0, %v2652_v22  ;;  %v8180_v60 = vld [vmem:[%s8432_s18 + $0x120] sm:$0xff] }
 0x317   : > { %v3185_v36 = vsel %vm3182_vm9, %v3184_v50, %v3180_v54  ;;  %v2803_v7 = vmul.f32 1.442695, %v2715_v30  ;;  %v3189_v58 = vsub.f32 1.0, %v3188_v63  ;;  %v7845_v43 = vpop.eup %7844  ;;  %v10762_v37 = vadd.f32 %v14771_v9, %v9991_v10  ;;  %v2457_v53 = vpop.f32.mrf.mxu0 }
 0x318   : > { %7850 = vrcp.f32 %v10733_v23  ;;  %7406 = vmatmul.msk.f32.gmra.mxu3 %vm3928_vm8, %v3185_v36  ;;  %v3198_v6 = vand.u32 2147483648, %v10639_v14  ;;  %v3203_v29 = vmul.f32 %v10713_v61, %v10667_v45  ;;  %v2805_v15 = vmul.f32 1.442695, %v2716_v47  ;;  %v2570_v10 = vpop.f32.mrf.mxu1 }
 0x319   : > { %v3190_v56 = vmul.f32 %v10686_v13, %v3189_v58  ;;  %vm3192_vm10 = vweird.f32 %v10639_v14  ;;  %vm3193_vm11 = vweird.f32 %v10686_v13  ;;  %v7847_v16 = vpop.eup %7846  ;;  %v10772_v51 = vadd.f32 1.0, %v7845_v43 }
 0x31a   : > { %7852 = vpow2.f32 %v2803_v7  ;;  %vm10774_vm12 = vcmp.eq.f32.partialorder %v3196_v25, 8.507059e+37  ;;  %v3204_v46 = vsub.f32 1.0, %v3203_v29  ;;  %v3199_v34 = vor.u32 1.1754944e-38, %v3198_v6  ;;  %vm3194_vm14 = vmor %vm3192_vm10, %vm3193_vm11 }
 0x31b   : > { %v3191_v35 = vadd.f32 %v10686_v13, %v3190_v56  ;;  %vm3208_vm13 = vweird.f32 %v10713_v61  ;;  %v3213_v0 = vand.u32 2147483648, %v10667_v45  ;;  %v10781_v48 = vpop.eup %7848  ;;  %7854 = vpow2.f32 %v2805_v15 }
 0x31c   : > { %v3205_v21 = vmul.f32 %v10713_v61, %v3204_v46  ;;  %v3211_v59 = vand.u32 2147483647, %v10667_v45  ;;  %v2319_v50 = vrot.slane %v8179_v5, 4  ;;  %v10788_v19 = vadd.f32 1.0, %v7847_v16  ;;  %v8181_v5 = vld [vmem:[%s8432_s18 + $0x128] sm:$0xff] }
 0x31d   : > { %v3195_v20 = vsel %vm3194_vm14, %v10686_v13, %v3191_v35  ;;  %vm3207_vm6 = vweird.f32 %v10667_v45  ;;  %v2320_v4 = vrot.slane %v8180_v60, 4  ;;  %v2653_v22 = vadd.f32 %v2457_v53, %v10102_v18 }
 0x31e   : > { %v10793_v24 = vpop.eup %7850  ;;  %v3200_v14 = vsel %vm10774_vm12, %v3199_v34, %v3195_v20  ;;  %v3206_v30 = vadd.f32 %v10713_v61, %v3205_v21  ;;  %v2654_v63 = vadd.f32 %v2570_v10, %v10111_v39  ;;  %7856 = vrcp.f32 %v10772_v51  ;;  %vm3209_vm15 = vmor %vm3207_vm6, %vm3208_vm13 }
 0x31f   : > { %4065 = vmatmul.f32.gmra.mxu2 %v3200_v14  ;;  %v3214_v45 = vor.u32 1.1754944e-38, %v3213_v0  ;;  %v2321_v13 = vsel %vm2255_vm4, %v2319_v50, %v2320_v4  ;;  %v3218_v54 = vmul.f32 %v10725_v52, %v10675_v32  ;;  %vm3212_vm5 = vcmp.eq.f32.partialorder %v3211_v59, 8.507059e+37  ;;  %v2460_v43 = vpop.f32.mrf.mxu0 }
 0x320   : > { %v7853_v25 = vpop.eup %7852  ;;  %v3210_v36 = vsel %vm3209_vm15, %v10713_v61, %v3206_v30  ;;  %7363 = vmatmul.msk.f32.gmra.mxu0 %vm552_vm0, %v2321_v13  ;;  %7395 = vmatmul.msk.f32.gmra.mxu1 %vm552_vm0, %v2321_v13  ;;  %v2717_v18 = vsub.f32 0.0, %v2653_v22  ;;  %v2718_v39 = vsub.f32 0.0, %v2654_v63  ;;  %7858 = vrcp.f32 %v10788_v19  ;;  %v2573_v9 = vpop.f32.mrf.mxu1 }
 0x321   : > { %v3215_v7 = vsel %vm3212_vm5, %v3214_v45, %v3210_v36  ;;  %v3219_v47 = vsub.f32 1.0, %v3218_v54  ;;  %v3228_v58 = vand.u32 2147483648, %v10675_v32  ;;  %v7855_v6 = vpop.eup %7854  ;;  %vm3222_vm7 = vweird.f32 %v10675_v32 }
 0x322   : > { %7407 = vmatmul.msk.f32.gmra.mxu3 %vm3928_vm8, %v3215_v7  ;;  %v2807_v29 = vmul.f32 1.442695, %v2717_v18  ;;  %v2809_v61 = vmul.f32 1.442695, %v2718_v39  ;;  %v3233_v15 = vmul.f32 %v10741_v27, %v10691_v2  ;;  %v10815_v56 = vadd.f32 1.0, %v7853_v25 }
 0x323   : > { %v3220_v53 = vmul.f32 %v10725_v52, %v3219_v47  ;;  %vm3223_vm9 = vweird.f32 %v10725_v52  ;;  %v3226_v10 = vand.u32 2147483647, %v10675_v32  ;;  %v10820_v16 = vadd.f32 1.0, %v7855_v6 }
 0x324   : > { %7860 = vpow2.f32 %v2807_v29  ;;  %v3229_v44 = vor.u32 1.1754944e-38, %v3228_v58  ;;  %v3234_v46 = vsub.f32 1.0, %v3233_v15  ;;  %v10822_v35 = vpop.eup %7856  ;;  %vm3238_vm10 = vweird.f32 %v10741_v27  ;;  %vm3224_vm11 = vmor %vm3222_vm7, %vm3223_vm9 }
 0x325   : > { %v3221_v34 = vadd.f32 %v10725_v52, %v3220_v53  ;;  %v3241_v0 = vand.u32 2147483647, %v10691_v2  ;;  %v3243_v21 = vand.u32 2147483648, %v10691_v2  ;;  %7862 = vpow2.f32 %v2809_v61 }
 0x326   : > { %v3235_v59 = vmul.f32 %v10741_v27, %v3234_v46  ;;  %v2322_v50 = vrot.slane %v8181_v5, 4  ;;  %v2655_v20 = vadd.f32 %v2460_v43, %v10118_v40  ;;  %v10833_v60 = vpop.eup %7858  ;;  %vm3227_vm12 = vcmp.eq.f32.partialorder %v3226_v10, 8.507059e+37 }
 0x327   : > { %v3225_v14 = vsel %vm3224_vm11, %v10725_v52, %v3221_v34  ;;  %vm3237_vm13 = vweird.f32 %v10691_v2  ;;  %v2656_v30 = vadd.f32 %v2573_v9, %v10121_v17  ;;  %vm3242_vm6 = vcmp.eq.f32.partialorder %v3241_v0, 8.507059e+37  ;;  %v2463_v13 = vpop.f32.mrf.mxu0  ;;  %v10875_v34 = vld [vmem:[%s8432_s18 + $0x130] sm:$0xff] }
 0x328   : > { %v3230_v22 = vsel %vm3227_vm12, %v3229_v44, %v3225_v14  ;;  %v3236_v63 = vadd.f32 %v10741_v27, %v3235_v59  ;;  %v2323_v32 = vsel %vm2255_vm4, %v2320_v4, %v2322_v50  ;;  %v2719_v45 = vsub.f32 0.0, %v2655_v20  ;;  %vm10842_vm14 = vmor %vm3237_vm13, %vm3238_vm10  ;;  %v2576_v54 = vpop.f32.mrf.mxu1  ;;  %v10880_v59 = vpop.f32.mrf.mxu3 }
 0x329   : > { %4068 = vmatmul.f32.gmra.mxu2 %v3230_v22  ;;  %v3244_v52 = vor.u32 1.1754944e-38, %v3243_v21  ;;  %7364 = vmatmul.msk.f32.gmra.mxu0 %vm552_vm0, %v2323_v32  ;;  %v2720_v2 = vsub.f32 0.0, %v2656_v30  ;;  %v3248_v17 = vmul.f32 %v10781_v48, %v10722_v42  ;;  %v3256_v18 = vand.u32 2147483647, %v10722_v42  ;;  %v10878_v21 = vpop.f32.mrf.mxu2 }
 0x32a   : > { %v7861_v25 = vpop.eup %7860  ;;  %v3240_v4 = vsel %vm10842_vm14, %v10741_v27, %v3236_v63  ;;  %7396 = vmatmul.msk.f32.gmra.mxu1 %vm552_vm0, %v2323_v32  ;;  %v2811_v36 = vmul.f32 1.442695, %v2719_v45  ;;  %v3258_v39 = vand.u32 2147483648, %v10722_v42  ;;  %7864 = vrcp.f32 %v10815_v56 }
 0x32b   : > { %v3245_v7 = vsel %vm3242_vm6, %v3244_v52, %v3240_v4  ;;  %v2813_v47 = vmul.f32 1.442695, %v2720_v2  ;;  %v3249_v58 = vsub.f32 1.0, %v3248_v17  ;;  %v7863_v43 = vpop.eup %7862  ;;  %7866 = vrcp.f32 %v10820_v16 }
 0x32c   : > { %7408 = vmatmul.msk.f32.gmra.mxu3 %vm3928_vm8, %v3245_v7  ;;  %vm3252_vm15 = vweird.f32 %v10722_v42  ;;  %vm3253_vm5 = vweird.f32 %v10781_v48  ;;  %v3263_v27 = vmul.f32 %v10793_v24, %v10733_v23  ;;  %v10862_v9 = vadd.f32 1.0, %v7861_v25 }
 0x32d   : > { %7868 = vpow2.f32 %v2811_v36  ;;  %v3250_v6 = vmul.f32 %v10781_v48, %v3249_v58  ;;  %vm10865_vm7 = vcmp.eq.f32.partialorder %v3256_v18, 8.507059e+37  ;;  %v10869_v61 = vadd.f32 1.0, %v7863_v43  ;;  %vm3254_vm9 = vmor %vm3252_vm15, %vm3253_vm5 }
 0x32e   : > { %7870 = vpow2.f32 %v2813_v47  ;;  %v3259_v15 = vor.u32 1.1754944e-38, %v3258_v39  ;;  %v3264_v53 = vsub.f32 1.0, %v3263_v27  ;;  %v3271_v44 = vand.u32 2147483647, %v10733_v23 }
 0x32f   : > { %v3251_v10 = vadd.f32 %v10781_v48, %v3250_v6  ;;  %v3273_v46 = vand.u32 2147483648, %v10733_v23  ;;  %v2324_v0 = vrot.slane %v10875_v34, 4  ;;  %vm3268_vm10 = vweird.f32 %v10793_v24  ;;  %v2466_v32 = vpop.f32.mrf.mxu0 }
 0x330   : > { %v3265_v5 = vmul.f32 %v10793_v24, %v3264_v53  ;;  %v2657_v20 = vadd.f32 %v2463_v13, %v10137_v38  ;;  %v2658_v14 = vadd.f32 %v2576_v54, %v10140_v57  ;;  %v10890_v30 = vpop.eup %7864  ;;  %vm3267_vm11 = vweird.f32 %v10733_v23  ;;  %v2579_v45 = vpop.f32.mrf.mxu1 }
 0x331   : > { %v3255_v22 = vsel %vm3254_vm9, %v10781_v48, %v3251_v10  ;;  %v2325_v63 = vsel %vm2255_vm4, %v2322_v50, %v2324_v0  ;;  %v3278_v42 = vmul.f32 %v10822_v35, %v10772_v51  ;;  %v10899_v40 = vpop.eup %7866  ;;  %7872 = vrcp.f32 %v10862_v9  ;;  %vm3269_vm12 = vmor %vm3267_vm11, %vm3268_vm10 }
 0x332   : > { %v3260_v38 = vsel %vm10865_vm7, %v3259_v15, %v3255_v22  ;;  %v3266_v57 = vadd.f32 %v10793_v24, %v3265_v5  ;;  %7365 = vmatmul.msk.f32.gmra.mxu0 %vm552_vm0, %v2325_v63  ;;  %7397 = vmatmul.msk.f32.gmra.mxu1 %vm552_vm0, %v2325_v63  ;;  %v2721_v48 = vsub.f32 0.0, %v2657_v20  ;;  %v2722_v52 = vsub.f32 0.0, %v2658_v14  ;;  %v8183_v15 = vld [vmem:[%s8432_s18 + $0x138] sm:$0xf]  ;;  %v10933_v5 = vpop.f32.mrf.mxu2 }
 0x333   : > { %v7869_v2 = vpop.eup %7868  ;;  %4071 = vmatmul.f32.gmra.mxu2 %v3260_v38  ;;  %vm3272_vm13 = vcmp.eq.f32.partialorder %v3271_v44, 8.507059e+37  ;;  %v3274_v50 = vor.u32 1.1754944e-38, %v3273_v46  ;;  %v3279_v17 = vsub.f32 1.0, %v3278_v42  ;;  %v3286_v36 = vand.u32 2147483647, %v10772_v51 }
 0x334   : > { %v7871_v13 = vpop.eup %7870  ;;  %v3270_v54 = vsel %vm3269_vm12, %v10793_v24, %v3266_v57  ;;  %v2815_v25 = vmul.f32 1.442695, %v2721_v48  ;;  %v2817_v4 = vmul.f32 1.442695, %v2722_v52  ;;  %7874 = vrcp.f32 %v10869_v61 }
 0x335   : > { %v3275_v18 = vsel %vm3272_vm13, %v3274_v50, %v3270_v54  ;;  %v3280_v39 = vmul.f32 %v10822_v35, %v3279_v17  ;;  %vm3283_vm14 = vweird.f32 %v10822_v35  ;;  %v10916_v7 = vadd.f32 1.0, %v7869_v2 }
 0x336   : > { %7409 = vmatmul.msk.f32.gmra.mxu3 %vm3928_vm8, %v3275_v18  ;;  %vm3282_vm6 = vweird.f32 %v10772_v51  ;;  %v3288_v23 = vand.u32 2147483648, %v10772_v51  ;;  %v3293_v24 = vmul.f32 %v10833_v60, %v10788_v19  ;;  %v10923_v47 = vadd.f32 1.0, %v7871_v13 }
 0x337   : > { %7876 = vpow2.f32 %v2815_v25  ;;  %v3281_v58 = vadd.f32 %v10822_v35, %v3280_v39  ;;  %vm3287_vm15 = vcmp.eq.f32.partialorder %v3286_v36, 8.507059e+37  ;;  %vm3284_vm5 = vmor %vm3282_vm6, %vm3283_vm14  ;;  %vm3298_vm7 = vweird.f32 %v10833_v60  ;;  %v10927_v6 = vpop.eup %7872  ;;  %v2469_v44 = vpop.f32.mrf.mxu0 }
 0x338   : > { %7878 = vpow2.f32 %v2817_v4  ;;  %v3289_v43 = vor.u32 1.1754944e-38, %v3288_v23  ;;  %v3294_v27 = vsub.f32 1.0, %v3293_v24  ;;  %v3303_v51 = vand.u32 2147483648, %v10788_v19  ;;  %v2582_v46 = vpop.f32.mrf.mxu1 }
 0x339   : > { %v3285_v29 = vsel %vm3284_vm5, %v10822_v35, %v3281_v58  ;;  %v2326_v53 = vrot.slane %v8183_v15, 4  ;;  %v2659_v10 = vadd.f32 %v2466_v32, %v10149_v33  ;;  %v3301_v22 = vand.u32 2147483647, %v10788_v19  ;;  %v10940_v35 = vpop.f32.mrf.mxu3 }
 0x33a   : > { %v3290_v20 = vsel %vm3287_vm15, %v3289_v43, %v3285_v29  ;;  %v3295_v14 = vmul.f32 %v10833_v60, %v3294_v27  ;;  %v2660_v63 = vadd.f32 %v2579_v45, %v10152_v3  ;;  %v10938_v42 = vpop.eup %7874  ;;  %7880 = vrcp.f32 %v10916_v7 }
 0x33b   : > { %4074 = vmatmul.f32.gmra.mxu2 %v3290_v20  ;;  %v2327_v33 = vsel %vm2255_vm4, %v2324_v0, %v2326_v53  ;;  %v2723_v32 = vsub.f32 0.0, %v2659_v10  ;;  %v3308_v38 = vmul.f32 %v10890_v30, %v10815_v56  ;;  %7882 = vrcp.f32 %v10923_v47 }
 0x33c   : > { %v3296_v57 = vadd.f32 %v10833_v60, %v3295_v14  ;;  %vm3297_vm9 = vweird.f32 %v10788_v19  ;;  %7366 = vmatmul.msk.f32.gmra.mxu0 %vm552_vm0, %v2327_v33  ;;  %7398 = vmatmul.msk.f32.gmra.mxu1 %vm552_vm0, %v2327_v33  ;;  %v2724_v3 = vsub.f32 0.0, %v2660_v63  ;;  %v3304_v34 = vor.u32 1.1754944e-38, %v3303_v51 }
 0x33d   : > { %v7877_v45 = vpop.eup %7876  ;;  %vm3299_vm10 = vmor %vm3297_vm9, %vm3298_vm7  ;;  %v2819_v0 = vmul.f32 1.442695, %v2723_v32  ;;  %v3309_v48 = vsub.f32 1.0, %v3308_v38  ;;  %v3316_v52 = vand.u32 2147483647, %v10815_v56  ;;  %vm3302_vm11 = vcmp.eq.f32.partialorder %v3301_v22, 8.507059e+37  ;;  %v10988_v22 = vpop.f32.mrf.mxu2 }
 0x33e   : > { %v7879_v2 = vpop.eup %7878  ;;  %v3300_v50 = vsel %vm3299_vm10, %v10833_v60, %v3296_v57  ;;  %v3318_v19 = vand.u32 2147483648, %v10815_v56  ;;  %v3323_v17 = vmul.f32 %v10899_v40, %v10820_v16  ;;  %vm3312_vm12 = vweird.f32 %v10815_v56 }
 0x33f   : > { %v3305_v13 = vsel %vm3302_vm11, %v3304_v34, %v3300_v50  ;;  %v3310_v54 = vmul.f32 %v10890_v30, %v3309_v48  ;;  %vm3313_vm13 = vweird.f32 %v10890_v30  ;;  %v10963_v25 = vadd.f32 1.0, %v7877_v45  ;;  %v2472_v58 = vpop.f32.mrf.mxu0 }
 0x340   : > { %7410 = vmatmul.msk.f32.gmra.mxu3 %vm3928_vm8, %v3305_v13  ;;  %7884 = vpow2.f32 %v2819_v0  ;;  %v2821_v4 = vmul.f32 1.442695, %v2724_v3  ;;  %v3324_v60 = vsub.f32 1.0, %v3323_v17  ;;  %v10966_v36 = vpop.eup %7880  ;;  %v10968_v18 = vadd.f32 1.0, %v7879_v2  ;;  %v2585_v43 = vpop.f32.mrf.mxu1  ;;  %vm3314_vm6 = vmor %vm3312_vm12, %vm3313_vm13 }
 0x341   : > { %v3311_v39 = vadd.f32 %v10890_v30, %v3310_v54  ;;  %vm10971_vm14 = vcmp.eq.f32.partialorder %v3316_v52, 8.507059e+37  ;;  %v3319_v24 = vor.u32 1.1754944e-38, %v3318_v19  ;;  %v10975_v27 = vpop.eup %7882  ;;  %vm3328_vm15 = vweird.f32 %v10899_v40  ;;  %v10994_v33 = vpop.f32.mrf.mxu3 }
 0x342   : > { %v3325_v29 = vmul.f32 %v10899_v40, %v3324_v60  ;;  %v3331_v51 = vand.u32 2147483647, %v10820_v16  ;;  %v3333_v15 = vand.u32 2147483648, %v10820_v16  ;;  %v2661_v10 = vadd.f32 %v2469_v44, %v10167_v31 }
 0x343   : > { %v3315_v53 = vsel %vm3314_vm6, %v10890_v30, %v3311_v39  ;;  %v2662_v20 = vadd.f32 %v2582_v46, %v10170_v12  ;;  %v3338_v14 = vmul.f32 %v10927_v6, %v10862_v9  ;;  %7886 = vpow2.f32 %v2821_v4 }
 0x344   : > { %v3320_v56 = vsel %vm10971_vm14, %v3319_v24, %v3315_v53  ;;  %v3326_v63 = vadd.f32 %v10899_v40, %v3325_v29  ;;  %vm3327_vm5 = vweird.f32 %v10820_v16  ;;  %v3334_v31 = vor.u32 1.1754944e-38, %v3333_v15 }
 0x345   : > { %4077 = vmatmul.f32.gmra.mxu2 %v3320_v56  ;;  %vm3329_vm7 = vmor %vm3327_vm5, %vm3328_vm15  ;;  %v2725_v30 = vsub.f32 0.0, %v2661_v10  ;;  %v2726_v12 = vsub.f32 0.0, %v2662_v20  ;;  %v3339_v44 = vsub.f32 1.0, %v3338_v14  ;;  %vm3332_vm9 = vcmp.eq.f32.partialorder %v3331_v51, 8.507059e+37  ;;  %v11030_v15 = vpop.f32.mrf.mxu2 }
 0x346   : > { %v7885_v46 = vpop.eup %7884  ;;  %v3330_v32 = vsel %vm3329_vm7, %v10899_v40, %v3326_v63  ;;  %v3346_v38 = vand.u32 2147483647, %v10862_v9  ;;  %v3348_v57 = vand.u32 2147483648, %v10862_v9  ;;  %v11001_v3 = vadd.f32 %v10878_v21, %v10289_v1 }
 0x347   : > { %v11003_v16 = vadd.f32 1.0, %v7885_v46  ;;  %v3335_v45 = vsel %vm3332_vm9, %v3334_v31, %v3330_v32  ;;  %v2823_v34 = vmul.f32 1.442695, %v2725_v30  ;;  %7888 = vrcp.f32 %v10963_v25  ;;  %v2475_v21 = vpop.f32.mrf.mxu0 }
 0x348   : > { %7411 = vmatmul.msk.f32.gmra.mxu3 %vm3928_vm8, %v3335_v45  ;;  %v3340_v0 = vmul.f32 %v10927_v6, %v3339_v44  ;;  %vm3343_vm10 = vweird.f32 %v10927_v6  ;;  %v3353_v40 = vmul.f32 %v10938_v42, %v10869_v61  ;;  %7890 = vrcp.f32 %v10968_v18  ;;  %v2588_v52 = vpop.f32.mrf.mxu1 }
 0x349   : > { %v2825_v48 = vmul.f32 1.442695, %v2726_v12  ;;  %vm3342_vm11 = vweird.f32 %v10862_v9  ;;  %vm11013_vm12 = vcmp.eq.f32.partialorder %v3346_v38, 8.507059e+37  ;;  %v7887_v2 = vpop.eup %7886  ;;  %7892 = vpow2.f32 %v2823_v34 }
 0x34a   : > { %v3341_v50 = vadd.f32 %v10927_v6, %v3340_v0  ;;  %v3349_v19 = vor.u32 1.1754944e-38, %v3348_v57  ;;  %v3354_v17 = vsub.f32 1.0, %v3353_v40  ;;  %7894 = vrcp.f32 %v11003_v16  ;;  %vm3344_vm13 = vmor %vm3342_vm11, %vm3343_vm10 }
 0x34b   : > { %v3363_v13 = vand.u32 2147483648, %v10869_v61  ;;  %v2663_v54 = vadd.f32 %v2472_v58, %v10181_v28  ;;  %v2664_v9 = vadd.f32 %v2585_v43, %v10184_v49  ;;  %vm3358_vm14 = vweird.f32 %v10938_v42  ;;  %v11040_v43 = vpop.f32.mrf.mxu3 }
 0x34c   : > { %v3345_v4 = vsel %vm3344_vm13, %v10927_v6, %v3341_v50  ;;  %v3355_v60 = vmul.f32 %v10938_v42, %v3354_v17  ;;  %v3361_v39 = vand.u32 2147483647, %v10869_v61  ;;  %7896 = vpow2.f32 %v2825_v48 }
 0x34d   : > { %v3350_v23 = vsel %vm11013_vm12, %v3349_v19, %v3345_v4  ;;  %v2727_v24 = vsub.f32 0.0, %v2663_v54  ;;  %v2728_v29 = vsub.f32 0.0, %v2664_v9  ;;  %v11028_v51 = vpop.eup %7888  ;;  %v11032_v28 = vadd.f32 1.0, %v7887_v2 }
 0x34e   : > { %4080 = vmatmul.f32.gmra.mxu2 %v3350_v23  ;;  %v3356_v49 = vadd.f32 %v10938_v42, %v3355_v60  ;;  %vm3357_vm6 = vweird.f32 %v10869_v61  ;;  %v3368_v6 = vmul.f32 %v10966_v36, %v10916_v7  ;;  %v11038_v58 = vpop.eup %7890  ;;  %v3364_v53 = vor.u32 1.1754944e-38, %v3363_v13 }
 0x34f   : > { %vm3359_vm15 = vmor %vm3357_vm6, %vm3358_vm14  ;;  %v2827_v10 = vmul.f32 1.442695, %v2727_v24  ;;  %v3376_v20 = vand.u32 2147483647, %v10916_v7  ;;  %v3383_v14 = vmul.f32 %v10975_v27, %v10923_v47  ;;  %v7893_v56 = vpop.eup %7892  ;;  %vm3362_vm5 = vcmp.eq.f32.partialorder %v3361_v39, 8.507059e+37 }
 0x350   : > { %v3360_v61 = vsel %vm3359_vm15, %v10938_v42, %v3356_v49  ;;  %v3369_v63 = vsub.f32 1.0, %v3368_v6  ;;  %vm3372_vm7 = vweird.f32 %v10916_v7  ;;  %v11049_v31 = vpop.eup %7894  ;;  %v2829_v12 = vmul.f32 1.442695, %v2728_v29  ;;  %v2478_v42 = vpop.f32.mrf.mxu0 }
 0x351   : > { %v3365_v30 = vsel %vm3362_vm5, %v3364_v53, %v3360_v61  ;;  %vm3373_vm9 = vweird.f32 %v10966_v36  ;;  %v3378_v44 = vand.u32 2147483648, %v10916_v7  ;;  %7898 = vpow2.f32 %v2827_v10  ;;  %v2591_v0 = vpop.f32.mrf.mxu1 }
 0x352   : > { %7412 = vmatmul.msk.f32.gmra.mxu3 %vm3928_vm8, %v3365_v30  ;;  %v3370_v46 = vmul.f32 %v10966_v36, %v3369_v63  ;;  %v3384_v32 = vsub.f32 1.0, %v3383_v14  ;;  %vm3387_vm10 = vweird.f32 %v10923_v47  ;;  %v7897_v38 = vpop.eup %7896  ;;  %v11056_v57 = vadd.f32 1.0, %v7893_v56  ;;  %vm3374_vm13 = vmor %vm3372_vm7, %vm3373_vm9 }
 0x353   : > { %vm11058_vm11 = vcmp.eq.f32.partialorder %v3376_v20, 8.507059e+37  ;;  %vm3388_vm12 = vweird.f32 %v10975_v27  ;;  %v3391_v34 = vand.u32 2147483647, %v10923_v47  ;;  %v3393_v1 = vand.u32 2147483648, %v10923_v47 }
 0x354   : > { %v3371_v40 = vadd.f32 %v10966_v36, %v3370_v46  ;;  %v3385_v48 = vmul.f32 %v10975_v27, %v3384_v32  ;;  %v2665_v2 = vadd.f32 %v2475_v21, %v10191_v62  ;;  %7900 = vpow2.f32 %v2829_v12  ;;  %vm3389_vm14 = vmor %vm3387_vm10, %vm3388_vm12 }
 0x355   : > { %v3379_v50 = vor.u32 1.1754944e-38, %v3378_v44  ;;  %v2666_v19 = vadd.f32 %v2588_v52, %v10194_v41  ;;  %v3398_v17 = vmul.f32 %v11028_v51, %v10963_v25  ;;  %v11075_v13 = vadd.f32 1.0, %v7897_v38  ;;  %v11079_v62 = vpop.f32.mrf.mxu2 }
 0x356   : > { %v3375_v54 = vsel %vm3374_vm13, %v10966_v36, %v3371_v40  ;;  %v3386_v9 = vadd.f32 %v10975_v27, %v3385_v48  ;;  %v2729_v4 = vsub.f32 0.0, %v2665_v2  ;;  %v3394_v41 = vor.u32 1.1754944e-38, %v3393_v1  ;;  %v11087_v60 = vpop.f32.mrf.mxu3 }
 0x357   : > { %v3380_v21 = vsel %vm11058_vm11, %v3379_v50, %v3375_v54  ;;  %v2730_v7 = vsub.f32 0.0, %v2666_v19  ;;  %v3399_v52 = vsub.f32 1.0, %v3398_v17  ;;  %v7899_v39 = vpop.eup %7898  ;;  %7902 = vrcp.f32 %v11032_v28 }
 0x358   : > { %4083 = vmatmul.f32.gmra.mxu2 %v3380_v21  ;;  %v3390_v36 = vsel %vm3389_vm14, %v10975_v27, %v3386_v9  ;;  %vm3392_vm6 = vcmp.eq.f32.partialorder %v3391_v34, 8.507059e+37  ;;  %v2831_v23 = vmul.f32 1.442695, %v2729_v4  ;;  %7904 = vrcp.f32 %v11056_v57  ;;  %v2481_v61 = vpop.f32.mrf.mxu0 }
 0x359   : > { %v3395_v24 = vsel %vm3392_vm6, %v3394_v41, %v3390_v36  ;;  %v3400_v29 = vmul.f32 %v11028_v51, %v3399_v52  ;;  %vm3403_vm15 = vweird.f32 %v11028_v51  ;;  %7906 = vrcp.f32 %v11075_v13  ;;  %v2594_v44 = vpop.f32.mrf.mxu1 }
 0x35a   : > { %7413 = vmatmul.msk.f32.gmra.mxu3 %vm3928_vm8, %v3395_v24  ;;  %v3406_v47 = vand.u32 2147483647, %v10963_v25  ;;  %v3408_v49 = vand.u32 2147483648, %v10963_v25  ;;  %v3413_v27 = vmul.f32 %v11038_v58, %v10968_v18  ;;  %v7901_v6 = vpop.eup %7900  ;;  %v11100_v53 = vadd.f32 1.0, %v7899_v39 }
 0x35b   : > { %v2833_v10 = vmul.f32 1.442695, %v2730_v7  ;;  %v3401_v20 = vadd.f32 %v11028_v51, %v3400_v29  ;;  %vm3402_vm5 = vweird.f32 %v10963_v25  ;;  %7908 = vpow2.f32 %v2831_v23 }
 0x35c   : > { %vm3404_vm7 = vmor %vm3402_vm5, %vm3403_vm15  ;;  %v3409_v14 = vor.u32 1.1754944e-38, %v3408_v49  ;;  %v3414_v56 = vsub.f32 1.0, %v3413_v27  ;;  %vm3418_vm9 = vweird.f32 %v11038_v58  ;;  %vm3407_vm10 = vcmp.eq.f32.partialorder %v3406_v47, 8.507059e+37 }
 0x35d   : > { %v3405_v63 = vsel %vm3404_vm7, %v11028_v51, %v3401_v20  ;;  %v3421_v30 = vand.u32 2147483647, %v10968_v18  ;;  %v3423_v12 = vand.u32 2147483648, %v10968_v18  ;;  %v11108_v46 = vpop.eup %7902  ;;  %v2667_v38 = vadd.f32 %v2478_v42, %v10201_v26  ;;  %v14784_v51 = vld [vmem:[#allocation75_spill] sm:$0xff] }
 0x35e   : > { %v3410_v32 = vsel %vm3407_vm10, %v3409_v14, %v3405_v63  ;;  %v3415_v25 = vmul.f32 %v11038_v58, %v3414_v56  ;;  %v2668_v45 = vadd.f32 %v2591_v0, %v10204_v55  ;;  %v11113_v34 = vpop.f32.mrf.mxu2  ;;  %v11115_v40 = vpop.eup %7904  ;;  %v11119_v48 = vadd.f32 %v10880_v59, %v14784_v51 }
 0x35f   : > { %v11121_v1 = vadd.f32 1.0, %v7901_v6  ;;  %7910 = vpow2.f32 %v2833_v10  ;;  %v3428_v2 = vmul.f32 %v11049_v31, %v11003_v16  ;;  %v11125_v50 = vpop.eup %7906  ;;  %vm3417_vm11 = vweird.f32 %v10968_v18  ;;  %v14785_v6 = vld [vmem:[#allocation63_spill] sm:$0xff] }
 0x360   : > { %4086 = vmatmul.f32.gmra.mxu2 %v3410_v32  ;;  %v3416_v26 = vadd.f32 %v11038_v58, %v3415_v25  ;;  %v2731_v55 = vsub.f32 0.0, %v2667_v38  ;;  %v2732_v42 = vsub.f32 0.0, %v2668_v45  ;;  %v11129_v0 = vpop.f32.mrf.mxu3  ;;  %vm3419_vm12 = vmor %vm3417_vm11, %vm3418_vm9  ;;  %v3424_v59 = vor.u32 1.1754944e-38, %v3423_v12  ;;  %v2484_v49 = vpop.f32.mrf.mxu0  ;;  %v14786_v32 = vld [vmem:[#allocation64_spill] sm:$0xff] }
 0x361   : > { %v3429_v19 = vsub.f32 1.0, %v3428_v2  ;;  %v3438_v17 = vand.u32 2147483648, %v11003_v16  ;;  %v3443_v54 = vmul.f32 %v11108_v46, %v11032_v28  ;;  %v7909_v9 = vpop.eup %7908  ;;  %7912 = vrcp.f32 %v11100_v53  ;;  %v2597_v20 = vpop.f32.mrf.mxu1 }
 0x362   : > { %v3420_v4 = vsel %vm3419_vm12, %v11038_v58, %v3416_v26  ;;  %vm3422_vm13 = vcmp.eq.f32.partialorder %v3421_v30, 8.507059e+37  ;;  %v2835_v18 = vmul.f32 1.442695, %v2731_v55  ;;  %vm3433_vm14 = vweird.f32 %v11049_v31 }
 0x363   : > { %v3425_v21 = vsel %vm3422_vm13, %v3424_v59, %v3420_v4  ;;  %v3430_v41 = vmul.f32 %v11049_v31, %v3429_v19  ;;  %v3436_v7 = vand.u32 2147483647, %v11003_v16  ;;  %7914 = vrcp.f32 %v11121_v1  ;;  %v14789_v4 = vld [vmem:[#allocation59_spill] sm:$0xff] }
 0x364   : > { %7414 = vmatmul.msk.f32.gmra.mxu3 %vm3928_vm8, %v3425_v21  ;;  %v2837_v52 = vmul.f32 1.442695, %v2732_v42  ;;  %vm3432_vm6 = vweird.f32 %v11003_v16  ;;  %v3444_v39 = vsub.f32 1.0, %v3443_v54  ;;  %7916 = vpow2.f32 %v2835_v18  ;;  %v14788_v54 = vld [vmem:[#allocation45_spill] sm:$0xff]  ;;  %v14790_v18 = vld [vmem:[#allocation46_spill] sm:$0xff] }
 0x365   : > { %v7911_v36 = vpop.eup %7910  ;;  %v3431_v58 = vadd.f32 %v11049_v31, %v3430_v41  ;;  %v3439_v23 = vor.u32 1.1754944e-38, %v3438_v17  ;;  %vm3447_vm15 = vweird.f32 %v11032_v28  ;;  %vm3434_vm5 = vmor %vm3432_vm6, %vm3433_vm14  ;;  %vm3448_vm7 = vweird.f32 %v11108_v46  ;;  %v14787_v17 = vld [vmem:[#allocation58_spill] sm:$0xff] }
 0x366   : > { %v3445_v24 = vmul.f32 %v11108_v46, %v3444_v39  ;;  %v3451_v29 = vand.u32 2147483647, %v11032_v28  ;;  %v3453_v47 = vand.u32 2147483648, %v11032_v28  ;;  %v11150_v27 = vadd.f32 1.0, %v7909_v9  ;;  %v11154_v14 = vpop.f32.mrf.mxu2  ;;  %vm3449_vm10 = vmor %vm3447_vm15, %vm3448_vm7 }
 0x367   : > { %v3435_v16 = vsel %vm3434_vm5, %v11049_v31, %v3431_v58  ;;  %vm3437_vm9 = vcmp.eq.f32.partialorder %v3436_v7, 8.507059e+37  ;;  %v2669_v10 = vadd.f32 %v2481_v61, %v14785_v6  ;;  %v11156_v56 = vpop.eup %7912  ;;  %v11158_v63 = vadd.f32 1.0, %v7911_v36 }
 0x368   : > { %v3440_v30 = vsel %vm3437_vm9, %v3439_v23, %v3435_v16  ;;  %v3446_v12 = vadd.f32 %v11108_v46, %v3445_v24  ;;  %v2670_v25 = vadd.f32 %v2594_v44, %v14786_v32  ;;  %7918 = vpow2.f32 %v2837_v52  ;;  %v11172_v26 = vpop.f32.mrf.mxu3 }
 0x369   : > { %4089 = vmatmul.f32.gmra.mxu2 %v3440_v30  ;;  %v3454_v31 = vor.u32 1.1754944e-38, %v3453_v47  ;;  %v2733_v61 = vsub.f32 0.0, %v2669_v10  ;;  %v3458_v38 = vmul.f32 %v11115_v40, %v11056_v57  ;;  %v11168_v45 = vpop.eup %7914  ;;  %vm3452_vm11 = vcmp.eq.f32.partialorder %v3451_v29, 8.507059e+37  ;;  %v2487_v10 = vpop.f32.mrf.mxu0 }
 0x36a   : > { %v3450_v51 = vsel %vm3449_vm10, %v11108_v46, %v3446_v12  ;;  %v2734_v2 = vsub.f32 0.0, %v2670_v25  ;;  %v3466_v44 = vand.u32 2147483647, %v11056_v57  ;;  %v7917_v55 = vpop.eup %7916  ;;  %v3468_v19 = vand.u32 2147483648, %v11056_v57  ;;  %v2600_v32 = vpop.f32.mrf.mxu1 }
 0x36b   : > { %v3455_v42 = vsel %vm3452_vm11, %v3454_v31, %v3450_v51  ;;  %v2839_v59 = vmul.f32 1.442695, %v2733_v61  ;;  %v3459_v28 = vsub.f32 1.0, %v3458_v38  ;;  %v11177_v9 = vadd.f32 %v14788_v54, %v14787_v17  ;;  %v14794_v51 = vld [vmem:[#allocation66_spill] sm:$0xff] }
 0x36c   : > { %v11181_v21 = vadd.f32 %v14790_v18, %v14789_v4  ;;  %7920 = vrcp.f32 %v11150_v27  ;;  %7415 = vmatmul.msk.f32.gmra.mxu3 %vm3928_vm8, %v3455_v42  ;;  %v3473_v46 = vmul.f32 %v11125_v50, %v11075_v13  ;;  %v2841_v41 = vmul.f32 1.442695, %v2734_v2 }
 0x36d   : > { %7922 = vrcp.f32 %v11158_v63  ;;  %v3460_v7 = vmul.f32 %v11115_v40, %v3459_v28  ;;  %vm3463_vm12 = vweird.f32 %v11115_v40  ;;  %v11190_v52 = vadd.f32 1.0, %v7917_v55 }
 0x36e   : > { %vm3462_vm13 = vweird.f32 %v11056_v57  ;;  %vm11193_vm14 = vcmp.eq.f32.partialorder %v3466_v44, 8.507059e+37  ;;  %v3474_v36 = vsub.f32 1.0, %v3473_v46  ;;  %v7919_v58 = vpop.eup %7918  ;;  %7924 = vpow2.f32 %v2839_v59  ;;  %v14793_v57 = vld [vmem:[#allocation65_spill] sm:$0xff]  ;;  %v11207_v25 = vpop.f32.mrf.mxu2 }
 0x36f   : > { %v3461_v23 = vadd.f32 %v11115_v40, %v3460_v7  ;;  %v3469_v24 = vor.u32 1.1754944e-38, %v3468_v19  ;;  %v3483_v29 = vand.u32 2147483648, %v11075_v13  ;;  %vm3464_vm6 = vmor %vm3462_vm13, %vm3463_vm12  ;;  %vm3478_vm15 = vweird.f32 %v11125_v50 }
 0x370   : > { %v3475_v47 = vmul.f32 %v11125_v50, %v3474_v36  ;;  %v3481_v16 = vand.u32 2147483647, %v11075_v13  ;;  %v2671_v6 = vadd.f32 %v2484_v49, %v14793_v57  ;;  %7926 = vpow2.f32 %v2841_v41 }
 0x371   : > { %v3465_v30 = vsel %vm3464_vm6, %v11115_v40, %v3461_v23  ;;  %vm3477_vm5 = vweird.f32 %v11075_v13  ;;  %v3488_v12 = vmul.f32 %v11156_v56, %v11100_v53  ;;  %v11211_v61 = vadd.f32 1.0, %v7919_v58 }
 0x372   : > { %v11209_v31 = vpop.eup %7920  ;;  %v3470_v38 = vsel %vm11193_vm14, %v3469_v24, %v3465_v30  ;;  %v3476_v49 = vadd.f32 %v11125_v50, %v3475_v47  ;;  %v2672_v2 = vadd.f32 %v2597_v20, %v14794_v51  ;;  %7928 = vrcp.f32 %v11190_v52  ;;  %vm3479_vm7 = vmor %vm3477_vm5, %vm3478_vm15  ;;  %v11226_v20 = vpop.f32.mrf.mxu3 }
 0x373   : > { %v11217_v40 = vpop.eup %7922  ;;  %4092 = vmatmul.f32.gmra.mxu2 %v3470_v38  ;;  %v3484_v13 = vor.u32 1.1754944e-38, %v3483_v29  ;;  %v2735_v44 = vsub.f32 0.0, %v2671_v6  ;;  %v3489_v55 = vsub.f32 1.0, %v3488_v12  ;;  %vm3482_vm9 = vcmp.eq.f32.partialorder %v3481_v16, 8.507059e+37  ;;  %v14795_v16 = vld [vmem:[#allocation67_spill] sm:$0xff]  ;;  %v14796_v12 = vld [vmem:[#allocation68_spill] sm:$0xff] }
 0x374   : > { %v3480_v42 = vsel %vm3479_vm7, %v11125_v50, %v3476_v49  ;;  %v3498_v59 = vand.u32 2147483648, %v11100_v53  ;;  %v3503_v28 = vmul.f32 %v11168_v45, %v11121_v1  ;;  %v7925_v19 = vpop.eup %7924  ;;  %vm3493_vm10 = vweird.f32 %v11156_v56 }
 0x375   : > { %v3485_v17 = vsel %vm3482_vm9, %v3484_v13, %v3480_v42  ;;  %v3490_v54 = vmul.f32 %v11156_v56, %v3489_v55  ;;  %v3496_v4 = vand.u32 2147483647, %v11100_v53  ;;  %v11233_v18 = vadd.f32 %v10933_v5, %v10645_v11  ;;  %v14797_v42 = vld [vmem:[#allocation57_spill] sm:$0xff] }
 0x376   : > { %v11237_v50 = vadd.f32 %v10940_v35, %v10762_v37  ;;  %7930 = vrcp.f32 %v11211_v61  ;;  %7416 = vmatmul.msk.f32.gmra.mxu3 %vm3928_vm8, %v3485_v17  ;;  %v2736_v46 = vsub.f32 0.0, %v2672_v2  ;;  %v7927_v41 = vpop.eup %7926  ;;  %v2843_v7 = vmul.f32 1.442695, %v2735_v44  ;;  %v2490_v6 = vpop.f32.mrf.mxu0 }
 0x377   : > { %v3491_v39 = vadd.f32 %v11156_v56, %v3490_v54  ;;  %vm3492_vm11 = vweird.f32 %v11100_v53  ;;  %v3504_v36 = vsub.f32 1.0, %v3503_v28  ;;  %v11243_v58 = vadd.f32 1.0, %v7925_v19  ;;  %v2603_v49 = vpop.f32.mrf.mxu1 }
 0x378   : > { %vm3494_vm12 = vmor %vm3492_vm11, %vm3493_vm10  ;;  %v3499_v11 = vor.u32 1.1754944e-38, %v3498_v59  ;;  %v3511_v5 = vand.u32 2147483647, %v11121_v1  ;;  %v3513_v37 = vand.u32 2147483648, %v11121_v1  ;;  %v11247_v35 = vpop.eup %7928  ;;  %vm3497_vm13 = vcmp.eq.f32.partialorder %v3496_v4, 8.507059e+37  ;;  %v14798_v59 = vld [vmem:[#allocation61_spill] sm:$0xff] }
 0x379   : > { %v3495_v23 = vsel %vm3494_vm12, %v11156_v56, %v3491_v39  ;;  %v3505_v24 = vmul.f32 %v11168_v45, %v3504_v36  ;;  %vm3508_vm14 = vweird.f32 %v11168_v45  ;;  %v11252_v29 = vadd.f32 1.0, %v7927_v41  ;;  %v11260_v51 = vpop.f32.mrf.mxu2  ;;  %v14800_v41 = vld [vmem:[#allocation62_spill] sm:$0xff] }
 0x37a   : > { %v2845_v53 = vmul.f32 1.442695, %v2736_v46  ;;  %v3500_v47 = vsel %vm3497_vm13, %v3499_v11, %v3495_v23  ;;  %v2673_v57 = vadd.f32 %v2487_v10, %v14795_v16  ;;  %vm3507_vm6 = vweird.f32 %v11121_v1  ;;  %v14799_v46 = vld [vmem:[#allocation60_spill] sm:$0xff] }
 0x37b   : > { %4095 = vmatmul.f32.gmra.mxu2 %v3500_v47  ;;  %v3506_v30 = vadd.f32 %v11168_v45, %v3505_v24  ;;  %v2674_v38 = vadd.f32 %v2600_v32, %v14796_v12  ;;  %v3518_v56 = vmul.f32 %v11209_v31, %v11150_v27  ;;  %7932 = vpow2.f32 %v2843_v7  ;;  %vm3509_vm15 = vmor %vm3507_vm6, %vm3508_vm14  ;;  %v14801_v47 = vld [vmem:[#allocation69_spill] sm:$0xff] }
 0x37c   : > { %v11262_v2 = vpop.eup %7930  ;;  %vm3512_vm5 = vcmp.eq.f32.partialorder %v3511_v5, 8.507059e+37  ;;  %v3514_v10 = vor.u32 1.1754944e-38, %v3513_v37  ;;  %v2737_v13 = vsub.f32 0.0, %v2673_v57  ;;  %v3526_v32 = vand.u32 2147483647, %v11150_v27  ;;  %v11274_v54 = vpop.f32.mrf.mxu3 }
 0x37d   : > { %v3510_v44 = vsel %vm3509_vm15, %v11168_v45, %v3506_v30  ;;  %v3519_v1 = vsub.f32 1.0, %v3518_v56  ;;  %v3528_v55 = vand.u32 2147483648, %v11150_v27  ;;  %v11271_v28 = vadd.f32 %v14798_v59, %v14797_v42  ;;  %v14802_v30 = vld [vmem:[#allocation70_spill] sm:$0xff] }
 0x37e   : > { %7934 = vrcp.f32 %v11243_v58  ;;  %v3515_v19 = vsel %vm3512_vm5, %v3514_v10, %v3510_v44  ;;  %v2738_v17 = vsub.f32 0.0, %v2674_v38  ;;  %vm3523_vm7 = vweird.f32 %v11209_v31  ;;  %v2493_v44 = vpop.f32.mrf.mxu0 }
 0x37f   : > { %7936 = vrcp.f32 %v11252_v29  ;;  %7417 = vmatmul.msk.f32.gmra.mxu3 %vm3928_vm8, %v3515_v19  ;;  %v3520_v45 = vmul.f32 %v11209_v31, %v3519_v1  ;;  %v3533_v4 = vmul.f32 %v11217_v40, %v11158_v63  ;;  %v11284_v7 = vadd.f32 %v14800_v41, %v14799_v46 }
 0x380   : > { %7938 = vpow2.f32 %v2845_v53  ;;  %v2847_v39 = vmul.f32 1.442695, %v2737_v13  ;;  %vm3522_vm9 = vweird.f32 %v11150_v27  ;;  %vm3527_vm10 = vcmp.eq.f32.partialorder %v3526_v32, 8.507059e+37 }
 0x381   : > { %v3521_v36 = vadd.f32 %v11209_v31, %v3520_v45  ;;  %v3529_v11 = vor.u32 1.1754944e-38, %v3528_v55  ;;  %v3534_v5 = vsub.f32 1.0, %v3533_v4  ;;  %v7933_v37 = vpop.eup %7932  ;;  %v2849_v23 = vmul.f32 1.442695, %v2738_v17  ;;  %vm3524_vm11 = vmor %vm3522_vm9, %vm3523_vm7 }
 0x382   : > { %vm3538_vm12 = vweird.f32 %v11217_v40  ;;  %v3543_v24 = vand.u32 2147483648, %v11158_v63  ;;  %v2675_v16 = vadd.f32 %v2490_v6, %v14801_v47  ;;  %v3541_v27 = vand.u32 2147483647, %v11158_v63 }
 0x383   : > { %v3525_v57 = vsel %vm3524_vm11, %v11209_v31, %v3521_v36  ;;  %v3535_v53 = vmul.f32 %v11217_v40, %v3534_v5  ;;  %v2676_v12 = vadd.f32 %v2603_v49, %v14802_v30  ;;  %7940 = vpow2.f32 %v2847_v39  ;;  %v2606_v49 = vpop.f32.mrf.mxu1  ;;  %v11305_v55 = vpop.f32.mrf.mxu2  ;;  %v14804_v30 = vld [vmem:[#allocation72_spill] sm:$0xff] }
 0x384   : > { %v11295_v38 = vpop.eup %7934  ;;  %v3530_v56 = vsel %vm3527_vm10, %v3529_v11, %v3525_v57  ;;  %v2739_v10 = vsub.f32 0.0, %v2675_v16  ;;  %v3548_v13 = vmul.f32 %v11247_v35, %v11190_v52  ;;  %v11301_v6 = vadd.f32 1.0, %v7933_v37 }
 0x385   : > { %v11299_v1 = vpop.eup %7936  ;;  %4098 = vmatmul.f32.gmra.mxu2 %v3530_v56  ;;  %v3536_v31 = vadd.f32 %v11217_v40, %v3535_v53  ;;  %vm3537_vm13 = vweird.f32 %v11158_v63  ;;  %v3544_v32 = vor.u32 1.1754944e-38, %v3543_v24  ;;  %v2740_v19 = vsub.f32 0.0, %v2676_v12 }
 0x386   : > { %v7939_v42 = vpop.eup %7938  ;;  %vm3539_vm14 = vmor %vm3537_vm13, %vm3538_vm12  ;;  %v2851_v59 = vmul.f32 1.442695, %v2739_v10  ;;  %v3549_v17 = vsub.f32 1.0, %v3548_v13  ;;  %v3558_v45 = vand.u32 2147483648, %v11190_v52  ;;  %7942 = vpow2.f32 %v2849_v23 }
 0x387   : > { %v3540_v4 = vsel %vm3539_vm14, %v11217_v40, %v3536_v31  ;;  %vm3542_vm6 = vcmp.eq.f32.partialorder %v3541_v27, 8.507059e+37  ;;  %v3563_v63 = vmul.f32 %v11262_v2, %v11211_v61  ;;  %vm3553_vm15 = vweird.f32 %v11247_v35 }
 0x388   : > { %v3545_v46 = vsel %vm3542_vm6, %v3544_v32, %v3540_v4  ;;  %v3550_v41 = vmul.f32 %v11247_v35, %v3549_v17  ;;  %v3556_v39 = vand.u32 2147483647, %v11190_v52  ;;  %v11316_v36 = vpop.f32.mrf.mxu3  ;;  %7944 = vrcp.f32 %v11301_v6 }
 0x389   : > { %v11319_v11 = vadd.f32 1.0, %v7939_v42  ;;  %7418 = vmatmul.msk.f32.gmra.mxu3 %vm3928_vm8, %v3545_v46  ;;  %vm3552_vm5 = vweird.f32 %v11190_v52  ;;  %v3564_v40 = vsub.f32 1.0, %v3563_v63  ;;  %v7941_v5 = vpop.eup %7940  ;;  %7946 = vpow2.f32 %v2851_v59  ;;  %v14803_v52 = vld [vmem:[#allocation71_spill] sm:$0xff] }
 0x38a   : > { %v2853_v37 = vmul.f32 1.442695, %v2740_v19  ;;  %v3551_v23 = vadd.f32 %v11247_v35, %v3550_v41  ;;  %v3559_v24 = vor.u32 1.1754944e-38, %v3558_v45  ;;  %vm3554_vm7 = vmor %vm3552_vm5, %vm3553_vm15  ;;  %vm3568_vm9 = vweird.f32 %v11262_v2 }
 0x38b   : > { %v3565_v47 = vmul.f32 %v11262_v2, %v3564_v40  ;;  %v3571_v16 = vand.u32 2147483647, %v11211_v61  ;;  %v3573_v57 = vand.u32 2147483648, %v11211_v61  ;;  %vm3557_vm10 = vcmp.eq.f32.partialorder %v3556_v39, 8.507059e+37 }
 0x38c   : > { %v3555_v53 = vsel %vm3554_vm7, %v11247_v35, %v3551_v23  ;;  %v2677_v27 = vadd.f32 %v2493_v44, %v14803_v52  ;;  %v2678_v12 = vadd.f32 %v2606_v49, %v14804_v30  ;;  %v7943_v56 = vpop.eup %7942  ;;  %v11331_v10 = vadd.f32 1.0, %v7941_v5  ;;  %v2496_v49 = vpop.f32.mrf.mxu0 }
 0x38d   : > { %v3560_v13 = vsel %vm3557_vm10, %v3559_v24, %v3555_v53  ;;  %v3566_v31 = vadd.f32 %v11262_v2, %v3565_v47  ;;  %vm3567_vm11 = vweird.f32 %v11211_v61  ;;  %v11337_v32 = vadd.f32 %v10988_v22, %v11177_v9  ;;  %v2609_v61 = vpop.f32.mrf.mxu1  ;;  %v11344_v45 = vpop.f32.mrf.mxu2 }
 0x38e   : > { %4101 = vmatmul.f32.gmra.mxu2 %v3560_v13  ;;  %vm3569_vm12 = vmor %vm3567_vm11, %vm3568_vm9  ;;  %v3574_v35 = vor.u32 1.1754944e-38, %v3573_v57  ;;  %v2741_v42 = vsub.f32 0.0, %v2677_v27  ;;  %v3578_v44 = vmul.f32 %v11295_v38, %v11243_v58  ;;  %v11341_v59 = vpop.eup %7944  ;;  %7948 = vpow2.f32 %v2853_v37  ;;  %v14805_v27 = vld [vmem:[#allocation73_spill] sm:$0xff] }
 0x38f   : > { %v3570_v19 = vsel %vm3569_vm12, %v11262_v2, %v3566_v31  ;;  %vm3572_vm13 = vcmp.eq.f32.partialorder %v3571_v16, 8.507059e+37  ;;  %v2742_v17 = vsub.f32 0.0, %v2678_v12  ;;  %v7947_v22 = vpop.eup %7946  ;;  %7950 = vrcp.f32 %v11319_v11  ;;  %v14806_v12 = vld [vmem:[#allocation74_spill] sm:$0xff] }
 0x390   : > { %v3575_v9 = vsel %vm3572_vm13, %v3574_v35, %v3570_v19  ;;  %v2855_v4 = vmul.f32 1.442695, %v2741_v42  ;;  %v3579_v63 = vsub.f32 1.0, %v3578_v44  ;;  %7952 = vrcp.f32 %v11331_v10 }
 0x391   : > { %v11348_v46 = vadd.f32 1.0, %v7943_v56  ;;  %7419 = vmatmul.msk.f32.gmra.mxu3 %vm3928_vm8, %v3575_v9  ;;  %v3588_v41 = vand.u32 2147483648, %v11243_v58  ;;  %v3593_v2 = vmul.f32 %v11299_v1, %v11252_v29  ;;  %vm3582_vm14 = vweird.f32 %v11243_v58 }
 0x392   : > { %v3580_v39 = vmul.f32 %v11295_v38, %v3579_v63  ;;  %vm3583_vm6 = vweird.f32 %v11295_v38  ;;  %v3586_v40 = vand.u32 2147483647, %v11243_v58  ;;  %v11358_v5 = vpop.f32.mrf.mxu3  ;;  %v11360_v37 = vadd.f32 1.0, %v7947_v22 }
 0x393   : > { %7954 = vpow2.f32 %v2855_v4  ;;  %v2857_v23 = vmul.f32 1.442695, %v2742_v17  ;;  %v3594_v24 = vsub.f32 1.0, %v3593_v2  ;;  %v3589_v16 = vor.u32 1.1754944e-38, %v3588_v41  ;;  %vm3584_vm5 = vmor %vm3582_vm14, %vm3583_vm6 }
 0x394   : > { %v3581_v47 = vadd.f32 %v11295_v38, %v3580_v39  ;;  %vm3598_vm15 = vweird.f32 %v11299_v1  ;;  %v3603_v57 = vand.u32 2147483648, %v11252_v29  ;;  %v7949_v53 = vpop.eup %7948  ;;  %v3601_v58 = vand.u32 2147483647, %v11252_v29 }
 0x395   : > { %v3595_v52 = vmul.f32 %v11299_v1, %v3594_v24  ;;  %v2679_v30 = vadd.f32 %v2496_v49, %v14805_v27  ;;  %v2680_v56 = vadd.f32 %v2609_v61, %v14806_v12  ;;  %v11369_v13 = vpop.eup %7950  ;;  %vm3587_vm7 = vcmp.eq.f32.partialorder %v3586_v40, 8.507059e+37  ;;  %v2499_v61 = vpop.f32.mrf.mxu0 }
 0x396   : > { %v3585_v31 = vsel %vm3584_vm5, %v11295_v38, %v3581_v47  ;;  %vm3597_vm9 = vweird.f32 %v11252_v29  ;;  %v3608_v35 = vmul.f32 %v11341_v59, %v11301_v6  ;;  %v11375_v42 = vpop.eup %7952  ;;  %7956 = vpow2.f32 %v2857_v23  ;;  %v2612_v41 = vpop.f32.mrf.mxu1 }
 0x397   : > { %v3590_v44 = vsel %vm3587_vm7, %v3589_v16, %v3585_v31  ;;  %v3596_v19 = vadd.f32 %v11299_v1, %v3595_v52  ;;  %v2743_v17 = vsub.f32 0.0, %v2679_v30  ;;  %7958 = vrcp.f32 %v11348_v46  ;;  %vm3599_vm10 = vmor %vm3597_vm9, %vm3598_vm15 }
 0x398   : > { %v11379_v49 = vadd.f32 1.0, %v7949_v53  ;;  %4104 = vmatmul.f32.gmra.mxu2 %v3590_v44  ;;  %v3604_v38 = vor.u32 1.1754944e-38, %v3603_v57  ;;  %v3609_v29 = vsub.f32 1.0, %v3608_v35  ;;  %vm3602_vm11 = vcmp.eq.f32.partialorder %v3601_v58, 8.507059e+37  ;;  %v14807_v35 = vld [vmem:[#allocation76_spill] sm:$0xff] }
 0x399   : > { %v7955_v22 = vpop.eup %7954  ;;  %v3600_v9 = vsel %vm3599_vm10, %v11299_v1, %v3596_v19  ;;  %v2744_v4 = vsub.f32 0.0, %v2680_v56  ;;  %v3616_v63 = vand.u32 2147483647, %v11301_v6  ;;  %v11385_v2 = vpop.f32.mrf.mxu2  ;;  %v11389_v39 = vadd.f32 %v10994_v33, %v11181_v21 }
 0x39a   : > { %v3605_v40 = vsel %vm3602_vm11, %v3604_v38, %v3600_v9  ;;  %v3610_v23 = vmul.f32 %v11341_v59, %v3609_v29  ;;  %vm3613_vm12 = vweird.f32 %v11341_v59  ;;  %7960 = vrcp.f32 %v11360_v37 }
 0x39b   : > { %7420 = vmatmul.msk.f32.gmra.mxu3 %vm3928_vm8, %v3605_v40  ;;  %v2859_v1 = vmul.f32 1.442695, %v2743_v17  ;;  %v3618_v24 = vand.u32 2147483648, %v11301_v6  ;;  %v3623_v47 = vmul.f32 %v11369_v13, %v11319_v11  ;;  %v11398_v16 = vpop.f32.mrf.mxu3  ;;  %7962 = vrcp.f32 %v11379_v49 }
 0x39c   : > { %v11401_v33 = vadd.f32 1.0, %v7955_v22  ;;  %v3611_v21 = vadd.f32 %v11341_v59, %v3610_v23  ;;  %vm3612_vm13 = vweird.f32 %v11301_v6  ;;  %v7957_v57 = vpop.eup %7956  ;;  %v2861_v53 = vmul.f32 1.442695, %v2744_v4 }
 0x39d   : > { %vm3614_vm14 = vmor %vm3612_vm13, %vm3613_vm12  ;;  %vm3617_vm6 = vcmp.eq.f32.partialorder %v3616_v63, 8.507059e+37  ;;  %v3619_v52 = vor.u32 1.1754944e-38, %v3618_v24  ;;  %v3624_v58 = vsub.f32 1.0, %v3623_v47  ;;  %v11405_v27 = vpop.eup %7958  ;;  %vm3628_vm15 = vweird.f32 %v11369_v13 }
 0x39e   : > { %v3615_v30 = vsel %vm3614_vm14, %v11341_v59, %v3611_v21  ;;  %v3631_v12 = vand.u32 2147483647, %v11319_v11  ;;  %v3633_v56 = vand.u32 2147483648, %v11319_v11  ;;  %7964 = vpow2.f32 %v2859_v1  ;;  %v2615_v24 = vpop.f32.mrf.mxu1 }
 0x39f   : > { %v3620_v31 = vsel %vm3617_vm6, %v3619_v52, %v3615_v30  ;;  %v3625_v6 = vmul.f32 %v11369_v13, %v3624_v58  ;;  %v2681_v44 = vadd.f32 %v2499_v61, %v14807_v35  ;;  %v11413_v19 = vadd.f32 1.0, %v7957_v57 }
 0x3a0   : > { %4107 = vmatmul.f32.gmra.mxu2 %v3620_v31  ;;  %vm3627_vm5 = vweird.f32 %v11319_v11  ;;  %v2682_v17 = vadd.f32 %v2612_v41, %v10621_v8  ;;  %v3638_v59 = vmul.f32 %v11375_v42, %v11331_v10  ;;  %v11419_v38 = vpop.eup %7960  ;;  %7966 = vpow2.f32 %v2861_v53  ;;  %v2502_v41 = vpop.f32.mrf.mxu0 }
 0x3a1   : > { %v3626_v29 = vadd.f32 %v11369_v13, %v3625_v6  ;;  %v2745_v22 = vsub.f32 0.0, %v2681_v44  ;;  %v3648_v9 = vand.u32 2147483648, %v11331_v10  ;;  %v11423_v4 = vpop.eup %7962  ;;  %vm3629_vm7 = vmor %vm3627_vm5, %vm3628_vm15  ;;  %v3634_v61 = vor.u32 1.1754944e-38, %v3633_v56 }
 0x3a2   : > { %v2746_v11 = vsub.f32 0.0, %v2682_v17  ;;  %v3639_v63 = vsub.f32 1.0, %v3638_v59  ;;  %v3653_v8 = vmul.f32 %v11405_v27, %v11348_v46  ;;  %v11429_v40 = vpop.f32.mrf.mxu2  ;;  %7968 = vrcp.f32 %v11401_v33 }
 0x3a3   : > { %v3630_v23 = vsel %vm3629_vm7, %v11369_v13, %v3626_v29  ;;  %vm3632_vm9 = vcmp.eq.f32.partialorder %v3631_v12, 8.507059e+37  ;;  %v2863_v1 = vmul.f32 1.442695, %v2745_v22  ;;  %vm3643_vm10 = vweird.f32 %v11375_v42 }
 0x3a4   : > { %v3635_v47 = vsel %vm3632_vm9, %v3634_v61, %v3630_v23  ;;  %v3640_v21 = vmul.f32 %v11375_v42, %v3639_v63  ;;  %v3646_v57 = vand.u32 2147483647, %v11331_v10  ;;  %v7965_v53 = vpop.eup %7964  ;;  %7970 = vrcp.f32 %v11413_v19 }
 0x3a5   : > { %7421 = vmatmul.msk.f32.gmra.mxu3 %vm3928_vm8, %v3635_v47  ;;  %vm3642_vm11 = vweird.f32 %v11331_v10  ;;  %v3649_v52 = vor.u32 1.1754944e-38, %v3648_v9  ;;  %v3654_v58 = vsub.f32 1.0, %v3653_v8  ;;  %v11439_v13 = vpop.f32.mrf.mxu3  ;;  %7972 = vpow2.f32 %v2863_v1 }
 0x3a6   : > { %v2865_v30 = vmul.f32 1.442695, %v2746_v11  ;;  %v3641_v12 = vadd.f32 %v11375_v42, %v3640_v21  ;;  %v3663_v56 = vand.u32 2147483648, %v11348_v46  ;;  %v7967_v31 = vpop.eup %7966  ;;  %vm3644_vm12 = vmor %vm3642_vm11, %vm3643_vm10  ;;  %vm3658_vm13 = vweird.f32 %v11405_v27 }
 0x3a7   : > { %v3655_v6 = vmul.f32 %v11405_v27, %v3654_v58  ;;  %v3661_v35 = vand.u32 2147483647, %v11348_v46  ;;  %v2683_v10 = vadd.f32 %v2502_v41, %v11001_v3  ;;  %v11447_v44 = vadd.f32 1.0, %v7965_v53 }
 0x3a8   : > { %v3645_v17 = vsel %vm3644_vm12, %v11375_v42, %v3641_v12  ;;  %vm3647_vm14 = vcmp.eq.f32.partialorder %v3646_v57, 8.507059e+37  ;;  %vm3657_vm6 = vweird.f32 %v11348_v46  ;;  %v11451_v59 = vpop.eup %7968  ;;  %v2684_v61 = vadd.f32 %v2615_v24, %v11119_v48  ;;  %v2505_v47 = vpop.f32.mrf.mxu0 }
 0x3a9   : > { %v3650_v29 = vsel %vm3647_vm14, %v3649_v52, %v3645_v17  ;;  %v3656_v22 = vadd.f32 %v11405_v27, %v3655_v6  ;;  %v2747_v9 = vsub.f32 0.0, %v2683_v10  ;;  %v11455_v11 = vadd.f32 1.0, %v7967_v31  ;;  %vm3659_vm15 = vmor %vm3657_vm6, %vm3658_vm13  ;;  %v2618_v52 = vpop.f32.mrf.mxu1 }
 0x3aa   : > { %7974 = vpow2.f32 %v2865_v30  ;;  %4110 = vmatmul.f32.gmra.mxu2 %v3650_v29  ;;  %v3664_v3 = vor.u32 1.1754944e-38, %v3663_v56  ;;  %v3668_v42 = vmul.f32 %v11419_v38, %v11360_v37  ;;  %v11461_v46 = vpop.eup %7970  ;;  %vm3662_vm5 = vcmp.eq.f32.partialorder %v3661_v35, 8.507059e+37 }
 0x3ab   : > { %v3660_v63 = vsel %vm3659_vm15, %v11405_v27, %v3656_v22  ;;  %v2867_v8 = vmul.f32 1.442695, %v2747_v9  ;;  %v2748_v41 = vsub.f32 0.0, %v2684_v61  ;;  %v7973_v23 = vpop.eup %7972  ;;  %7976 = vrcp.f32 %v11447_v44 }
 0x3ac   : > { %v3665_v48 = vsel %vm3662_vm5, %v3664_v3, %v3660_v63  ;;  %v3669_v1 = vsub.f32 1.0, %v3668_v42  ;;  %v3676_v24 = vand.u32 2147483647, %v11360_v37  ;;  %v11466_v21 = vpop.f32.mrf.mxu2  ;;  %v3678_v53 = vand.u32 2147483648, %v11360_v37 }
 0x3ad   : > { %7422 = vmatmul.msk.f32.gmra.mxu3 %vm3928_vm8, %v3665_v48  ;;  %7978 = vpow2.f32 %v2867_v8  ;;  %v2869_v57 = vmul.f32 1.442695, %v2748_v41  ;;  %v3683_v27 = vmul.f32 %v11423_v4, %v11379_v49  ;;  %vm3672_vm7 = vweird.f32 %v11360_v37 }
 0x3ae   : > { %7980 = vrcp.f32 %v11455_v11  ;;  %v3670_v58 = vmul.f32 %v11419_v38, %v3669_v1  ;;  %vm3673_vm9 = vweird.f32 %v11419_v38  ;;  %v11476_v30 = vadd.f32 1.0, %v7973_v23 }
 0x3af   : > { %7982 = vpow2.f32 %v2869_v57  ;;  %v3684_v12 = vsub.f32 1.0, %v3683_v27  ;;  %v3691_v56 = vand.u32 2147483647, %v11379_v49  ;;  %v11479_v31 = vpop.f32.mrf.mxu3  ;;  %vm3677_vm10 = vcmp.eq.f32.partialorder %v3676_v24, 8.507059e+37  ;;  %vm3674_vm11 = vmor %vm3672_vm7, %vm3673_vm9 }
 0x3b0   : > { %v7975_v6 = vpop.eup %7974  ;;  %v3671_v35 = vadd.f32 %v11419_v38, %v3670_v58  ;;  %v3693_v10 = vand.u32 2147483648, %v11379_v49  ;;  %v2685_v17 = vadd.f32 %v2505_v47, %v11233_v18  ;;  %v3679_v37 = vor.u32 1.1754944e-38, %v3678_v53  ;;  %v2508_v58 = vpop.f32.mrf.mxu0 }
 0x3b1   : > { %v3685_v29 = vmul.f32 %v11423_v4, %v3684_v12  ;;  %vm3688_vm12 = vweird.f32 %v11423_v4  ;;  %v2686_v22 = vadd.f32 %v2618_v52, %v11237_v50  ;;  %v11487_v9 = vpop.eup %7976  ;;  %vm3687_vm13 = vweird.f32 %v11379_v49 }
 0x3b2   : > { %v3675_v61 = vsel %vm3674_vm11, %v11419_v38, %v3671_v35  ;;  %v2749_v3 = vsub.f32 0.0, %v2685_v17  ;;  %v3698_v42 = vmul.f32 %v11451_v59, %v11401_v33  ;;  %v11493_v18 = vadd.f32 1.0, %v7975_v6  ;;  %vm3689_vm6 = vmor %vm3687_vm13, %vm3688_vm12  ;;  %v2621_v6 = vpop.f32.mrf.mxu1 }
 0x3b3   : > { %v7979_v63 = vpop.eup %7978  ;;  %v3680_v8 = vsel %vm3677_vm10, %v3679_v37, %v3675_v61  ;;  %v3686_v41 = vadd.f32 %v11423_v4, %v3685_v29  ;;  %vm3692_vm14 = vcmp.eq.f32.partialorder %v3691_v56, 8.507059e+37  ;;  %v3694_v50 = vor.u32 1.1754944e-38, %v3693_v10 }
 0x3b4   : > { %v11496_v23 = vpop.eup %7980  ;;  %4113 = vmatmul.f32.gmra.mxu2 %v3680_v8  ;;  %v2871_v48 = vmul.f32 1.442695, %v2749_v3  ;;  %v2750_v38 = vsub.f32 0.0, %v2686_v22  ;;  %v3699_v1 = vsub.f32 1.0, %v3698_v42  ;;  %v11498_v24 = vadd.f32 1.0, %v7979_v63 }
 0x3b5   : > { %v7983_v49 = vpop.eup %7982  ;;  %v3690_v47 = vsel %vm3689_vm6, %v11423_v4, %v3686_v41  ;;  %v3706_v57 = vand.u32 2147483647, %v11401_v33  ;;  %v3708_v53 = vand.u32 2147483648, %v11401_v33  ;;  %7984 = vrcp.f32 %v11476_v30 }
 0x3b6   : > { %v3695_v27 = vsel %vm3692_vm14, %v3694_v50, %v3690_v47  ;;  %v3700_v52 = vmul.f32 %v11451_v59, %v3699_v1  ;;  %vm3703_vm15 = vweird.f32 %v11451_v59  ;;  %v11506_v12 = vpop.f32.mrf.mxu2  ;;  %v11510_v56 = vadd.f32 %v11030_v15, %v11271_v28 }
 0x3b7   : > { %7986 = vrcp.f32 %v11493_v18  ;;  %7423 = vmatmul.msk.f32.gmra.mxu3 %vm3928_vm8, %v3695_v27  ;;  %vm3702_vm5 = vweird.f32 %v11401_v33  ;;  %v3713_v4 = vmul.f32 %v11461_v46, %v11413_v19  ;;  %v11517_v35 = vadd.f32 1.0, %v7983_v49 }
 0x3b8   : > { %7988 = vpow2.f32 %v2871_v48  ;;  %v2873_v10 = vmul.f32 1.442695, %v2750_v38  ;;  %v3701_v17 = vadd.f32 %v11451_v59, %v3700_v52  ;;  %vm3704_vm7 = vmor %vm3702_vm5, %vm3703_vm15  ;;  %vm3707_vm9 = vcmp.eq.f32.partialorder %v3706_v57, 8.507059e+37 }
 0x3b9   : > { %7990 = vrcp.f32 %v11498_v24  ;;  %v3709_v15 = vor.u32 1.1754944e-38, %v3708_v53  ;;  %v3714_v28 = vsub.f32 1.0, %v3713_v4  ;;  %v11521_v37 = vpop.f32.mrf.mxu3  ;;  %v3723_v29 = vand.u32 2147483648, %v11413_v19 }
 0x3ba   : > { %v3705_v33 = vsel %vm3704_vm7, %v11451_v59, %v3701_v17  ;;  %v2687_v22 = vadd.f32 %v2508_v58, %v11337_v32  ;;  %v2688_v61 = vadd.f32 %v2621_v6, %v11389_v39  ;;  %vm3718_vm10 = vweird.f32 %v11461_v46  ;;  %v2511_v6 = vpop.f32.mrf.mxu0  ;;  %v2624_v17 = vpop.f32.mrf.mxu1 }
 0x3bb   : > { %v3710_v3 = vsel %vm3707_vm9, %v3709_v15, %v3705_v33  ;;  %v3715_v42 = vmul.f32 %v11461_v46, %v3714_v28  ;;  %v3721_v63 = vand.u32 2147483647, %v11413_v19  ;;  %v11530_v8 = vpop.eup %7984  ;;  %7992 = vrcp.f32 %v11517_v35 }
 0x3bc   : > { %4116 = vmatmul.f32.gmra.mxu2 %v3710_v3  ;;  %v2751_v41 = vsub.f32 0.0, %v2687_v22  ;;  %v2752_v59 = vsub.f32 0.0, %v2688_v61  ;;  %v3728_v50 = vmul.f32 %v11487_v9, %v11447_v44  ;;  %v2254_v39 = vadd.f32 %v11040_v43, %v11284_v7 }
 0x3bd   : > { %v11535_v32 = vpop.eup %7986  ;;  %7994 = vpow2.f32 %v2873_v10  ;;  %v3716_v48 = vadd.f32 %v11461_v46, %v3715_v42  ;;  %vm3717_vm11 = vweird.f32 %v11413_v19  ;;  %v3724_v1 = vor.u32 1.1754944e-38, %v3723_v29 }
 0x3be   : > { %v7989_v38 = vpop.eup %7988  ;;  %vm3719_vm12 = vmor %vm3717_vm11, %vm3718_vm10  ;;  %v2875_v49 = vmul.f32 1.442695, %v2751_v41  ;;  %v3729_v47 = vsub.f32 1.0, %v3728_v50  ;;  %v3738_v57 = vand.u32 2147483648, %v11447_v44  ;;  %v11542_v53 = vpop.f32.mrf.mxu2  ;;  %vm3722_vm13 = vcmp.eq.f32.partialorder %v3721_v63, 8.507059e+37 }
 0x3bf   : > { %v11544_v27 = vpop.eup %7990  ;;  %v3720_v52 = vsel %vm3719_vm12, %v11461_v46, %v3716_v48  ;;  %v2877_v43 = vmul.f32 1.442695, %v2752_v59  ;;  %v3743_v7 = vmul.f32 %v11496_v23, %v11455_v11  ;;  %vm3733_vm14 = vweird.f32 %v11487_v9 }
 0x3c0   : > { %v3725_v58 = vsel %vm3722_vm13, %v3724_v1, %v3720_v52  ;;  %v3730_v19 = vmul.f32 %v11487_v9, %v3729_v47  ;;  %v3736_v4 = vand.u32 2147483647, %v11447_v44  ;;  %v11552_v10 = vadd.f32 1.0, %v7989_v38 }
 0x3c1   : > { %7424 = vmatmul.msk.f32.gmra.mxu3 %vm3928_vm8, %v3725_v58  ;;  %7996 = vpow2.f32 %v2875_v49  ;;  %vm3732_vm6 = vweird.f32 %v11447_v44  ;;  %v3744_v46 = vsub.f32 1.0, %v3743_v7  ;;  %v11556_v15 = vpop.eup %7992  ;;  %v3739_v33 = vor.u32 1.1754944e-38, %v3738_v57 }
 0x3c2   : > { %v3731_v28 = vadd.f32 %v11487_v9, %v3730_v19  ;;  %v3751_v29 = vand.u32 2147483647, %v11455_v11  ;;  %v3753_v22 = vand.u32 2147483648, %v11455_v11  ;;  %7998 = vpow2.f32 %v2877_v43  ;;  %vm3734_vm15 = vmor %vm3732_vm6, %vm3733_vm14 }
 0x3c3   : > { %v7995_v61 = vpop.eup %7994  ;;  %v3745_v3 = vmul.f32 %v11496_v23, %v3744_v46  ;;  %vm3748_vm5 = vweird.f32 %v11496_v23  ;;  %v2689_v44 = vadd.f32 %v2511_v6, %v11510_v56  ;;  %v11566_v42 = vpop.f32.mrf.mxu3  ;;  %vm3737_vm7 = vcmp.eq.f32.partialorder %v3736_v4, 8.507059e+37 }
 0x3c4   : > { %v3735_v63 = vsel %vm3734_vm15, %v11487_v9, %v3731_v28  ;;  %vm3747_vm9 = vweird.f32 %v11455_v11  ;;  %v2690_v41 = vadd.f32 %v2624_v17, %v2254_v39  ;;  %v3758_v38 = vmul.f32 %v11530_v8, %v11476_v30 }
 0x3c5   : > { %v3740_v59 = vsel %vm3737_vm7, %v3739_v33, %v3735_v63  ;;  %v3746_v50 = vadd.f32 %v11496_v23, %v3745_v3  ;;  %v2753_v48 = vsub.f32 0.0, %v2689_v44  ;;  %v11573_v1 = vadd.f32 1.0, %v7995_v61  ;;  %vm3749_vm10 = vmor %vm3747_vm9, %vm3748_vm5 }
 0x3c6   : > { %4119 = vmatmul.f32.gmra.mxu2 %v3740_v59  ;;  %vm3752_vm11 = vcmp.eq.f32.partialorder %v3751_v29, 8.507059e+37  ;;  %v3754_v56 = vor.u32 1.1754944e-38, %v3753_v22  ;;  %v2754_v49 = vsub.f32 0.0, %v2690_v41  ;;  %v3759_v11 = vsub.f32 1.0, %v3758_v38 }
 0x3c7   : > { %v7997_v47 = vpop.eup %7996  ;;  %v3750_v9 = vsel %vm3749_vm10, %v11496_v23, %v3746_v50  ;;  %v2879_v57 = vmul.f32 1.442695, %v2753_v48  ;;  %v3766_v39 = vand.u32 2147483647, %v11476_v30  ;;  %8000 = vrcp.f32 %v11552_v10 }
 0x3c8   : > { %v3755_v52 = vsel %vm3752_vm11, %v3754_v56, %v3750_v9  ;;  %v2881_v43 = vmul.f32 1.442695, %v2754_v49  ;;  %v3768_v7 = vand.u32 2147483648, %v11476_v30  ;;  %v11579_v58 = vpop.f32.mrf.mxu2  ;;  %v7999_v19 = vpop.eup %7998  ;;  %v3760_v4 = vmul.f32 %v11530_v8, %v3759_v11 }
 0x3c9   : > { %7425 = vmatmul.msk.f32.gmra.mxu3 %vm3928_vm8, %v3755_v52  ;;  %8002 = vpow2.f32 %v2879_v57  ;;  %vm3763_vm12 = vweird.f32 %v11530_v8  ;;  %v3773_v23 = vmul.f32 %v11535_v32, %v11493_v18  ;;  %v11587_v6 = vadd.f32 1.0, %v7997_v47 }
 0x3ca   : > { %8004 = vrcp.f32 %v11573_v1  ;;  %vm3762_vm13 = vweird.f32 %v11476_v30  ;;  %v11590_v46 = vadd.f32 1.0, %v7999_v19  ;;  %v3761_v17 = vadd.f32 %v11530_v8, %v3760_v4 }
 0x3cb   : > { %vm3767_vm14 = vcmp.eq.f32.partialorder %v3766_v39, 8.507059e+37  ;;  %v3774_v28 = vsub.f32 1.0, %v3773_v23  ;;  %v11593_v33 = vpop.f32.mrf.mxu3  ;;  %8006 = vpow2.f32 %v2881_v43  ;;  %vm3764_vm6 = vmor %vm3762_vm13, %vm3763_vm12  ;;  %v3769_v29 = vor.u32 1.1754944e-38, %v3768_v7 }
 0x3cc   : > { %v3783_v22 = vand.u32 2147483648, %v11493_v18  ;;  %v3788_v61 = vmul.f32 %v11544_v27, %v11498_v24  ;;  %v3765_v3 = vsel %vm3764_vm6, %v11530_v8, %v3761_v17  ;;  %vm3778_vm15 = vweird.f32 %v11535_v32 }
 0x3cd   : > { %v3775_v30 = vmul.f32 %v11535_v32, %v3774_v28  ;;  %v3781_v44 = vand.u32 2147483647, %v11493_v18  ;;  %v11602_v63 = vpop.eup %8000  ;;  %8008 = vrcp.f32 %v11587_v6  ;;  %v3770_v41 = vsel %vm3767_vm14, %v3769_v29, %v3765_v3 }
 0x3ce   : > { %vm3777_vm5 = vweird.f32 %v11493_v18  ;;  %v3789_v59 = vsub.f32 1.0, %v3788_v61  ;;  %8010 = vrcp.f32 %v11590_v46  ;;  %4122 = vmatmul.f32.gmra.mxu2 %v3770_v41  ;;  %v3798_v48 = vand.u32 2147483648, %v11498_v24 }
 0x3cf   : > { %v8003_v50 = vpop.eup %8002  ;;  %v3776_v8 = vadd.f32 %v11535_v32, %v3775_v30  ;;  %v3803_v38 = vmul.f32 %v11556_v15, %v11517_v35  ;;  %vm3779_vm7 = vmor %vm3777_vm5, %vm3778_vm15  ;;  %v3784_v49 = vor.u32 1.1754944e-38, %v3783_v22  ;;  %vm3793_vm9 = vweird.f32 %v11544_v27 }
 0x3d0   : > { %v11611_v56 = vpop.eup %8004  ;;  %v3790_v47 = vmul.f32 %v11544_v27, %v3789_v59  ;;  %v3796_v18 = vand.u32 2147483647, %v11498_v24  ;;  %vm3782_vm10 = vcmp.eq.f32.partialorder %v3781_v44, 8.507059e+37  ;;  %vm3792_vm11 = vweird.f32 %v11498_v24 }
 0x3d1   : > { %v3780_v9 = vsel %vm3779_vm7, %v11535_v32, %v3776_v8  ;;  %v3804_v57 = vsub.f32 1.0, %v3803_v38  ;;  %v11618_v11 = vpop.f32.mrf.mxu2  ;;  %v8007_v39 = vpop.eup %8006  ;;  %v11620_v52 = vadd.f32 1.0, %v8003_v50  ;;  %vm3808_vm12 = vweird.f32 %v11556_v15  ;;  %vm3794_vm13 = vmor %vm3792_vm11, %vm3793_vm9 }
 0x3d2   : > { %v3785_v43 = vsel %vm3782_vm10, %v3784_v49, %v3780_v9  ;;  %v3791_v7 = vadd.f32 %v11544_v27, %v3790_v47  ;;  %v3799_v19 = vor.u32 1.1754944e-38, %v3798_v48  ;;  %v3811_v4 = vand.u32 2147483647, %v11517_v35 }
 0x3d3   : > { %7426 = vmatmul.msk.f32.gmra.mxu3 %vm3928_vm8, %v3785_v43  ;;  %v3805_v32 = vmul.f32 %v11556_v15, %v3804_v57  ;;  %v3813_v24 = vand.u32 2147483648, %v11517_v35  ;;  %v11628_v23 = vpop.eup %8008  ;;  %vm3797_vm14 = vcmp.eq.f32.partialorder %v3796_v18, 8.507059e+37  ;;  %v3818_v28 = vmul.f32 %v11602_v63, %v11552_v10 }
 0x3d4   : > { %v3795_v17 = vsel %vm3794_vm13, %v11544_v27, %v3791_v7  ;;  %v11633_v29 = vpop.eup %8010  ;;  %v11635_v22 = vadd.f32 1.0, %v8007_v39  ;;  %vm3807_vm6 = vweird.f32 %v11517_v35  ;;  %8012 = vrcp.f32 %v11620_v52 }
 0x3d5   : > { %v3800_v61 = vsel %vm3797_vm14, %v3799_v19, %v3795_v17  ;;  %v3806_v3 = vadd.f32 %v11556_v15, %v3805_v32  ;;  %v11639_v30 = vpop.f32.mrf.mxu3  ;;  %vm3809_vm15 = vmor %vm3807_vm6, %vm3808_vm12  ;;  %v3814_v27 = vor.u32 1.1754944e-38, %v3813_v24  ;;  %v3819_v44 = vsub.f32 1.0, %v3818_v28 }
 0x3d6   : > { %4125 = vmatmul.f32.gmra.mxu2 %v3800_v61  ;;  %vm3812_vm5 = vcmp.eq.f32.partialorder %v3811_v4, 8.507059e+37  ;;  %v3828_v59 = vand.u32 2147483648, %v11552_v10  ;;  %v3833_v50 = vmul.f32 %v11611_v56, %v11573_v1  ;;  %vm3823_vm7 = vweird.f32 %v11602_v63 }
 0x3d7   : > { %v3810_v41 = vsel %vm3809_vm15, %v11556_v15, %v3806_v3  ;;  %v3820_v35 = vmul.f32 %v11602_v63, %v3819_v44  ;;  %v3826_v48 = vand.u32 2147483647, %v11552_v10  ;;  %8014 = vrcp.f32 %v11635_v22 }
 0x3d8   : > { %v3815_v8 = vsel %vm3812_vm5, %v3814_v27, %v3810_v41  ;;  %v3834_v38 = vsub.f32 1.0, %v3833_v50  ;;  %vm3822_vm9 = vweird.f32 %v11552_v10  ;;  %v3843_v15 = vand.u32 2147483648, %v11573_v1 }
 0x3d9   : > { %v3821_v49 = vadd.f32 %v11602_v63, %v3820_v35  ;;  %v3848_v47 = vmul.f32 %v11628_v23, %v11587_v6  ;;  %vm3824_vm10 = vmor %vm3822_vm9, %vm3823_vm7  ;;  %v3829_v18 = vor.u32 1.1754944e-38, %v3828_v59  ;;  %vm3838_vm11 = vweird.f32 %v11611_v56 }
 0x3da   : > { %v3835_v9 = vmul.f32 %v11611_v56, %v3834_v38  ;;  %v3841_v57 = vand.u32 2147483647, %v11573_v1  ;;  %v11661_v43 = vpop.eup %8012  ;;  %vm3827_vm12 = vcmp.eq.f32.partialorder %v3826_v48, 8.507059e+37  ;;  %v3863_v19 = vmul.f32 %v11633_v29, %v11590_v46 }
 0x3db   : > { %7427 = vmatmul.msk.f32.gmra.mxu3 %vm3928_vm8, %v3815_v8  ;;  %v4084_v39 = vpop.f32.mrf.mxu2  ;;  %v3825_v10 = vsel %vm3824_vm10, %v11602_v63, %v3821_v49  ;;  %v3849_v7 = vsub.f32 1.0, %v3848_v47  ;;  %vm3837_vm13 = vweird.f32 %v11573_v1  ;;  %v3858_v24 = vand.u32 2147483648, %v11587_v6 }
 0x3dc   : > { %v3830_v32 = vsel %vm3827_vm12, %v3829_v18, %v3825_v10  ;;  %v3836_v4 = vadd.f32 %v11611_v56, %v3835_v9  ;;  %vm3839_vm14 = vmor %vm3837_vm13, %vm3838_vm11  ;;  %v3844_v28 = vor.u32 1.1754944e-38, %v3843_v15  ;;  %vm3853_vm6 = vweird.f32 %v11628_v23 }
 0x3dd   : > { %v4197_v17 = vpop.f32.mrf.mxu3  ;;  %v3850_v61 = vmul.f32 %v11628_v23, %v3849_v7  ;;  %v3864_v63 = vsub.f32 1.0, %v3863_v19  ;;  %v11671_v3 = vpop.eup %8014  ;;  %vm3842_vm15 = vcmp.eq.f32.partialorder %v3841_v57, 8.507059e+37  ;;  %vm3852_vm5 = vweird.f32 %v11587_v6 }
 0x3de   : > { %4128 = vmatmul.f32.gmra.mxu2 %v3830_v32  ;;  %v3840_v27 = vsel %vm3839_vm14, %v11611_v56, %v3836_v4  ;;  %v3856_v1 = vand.u32 2147483647, %v11587_v6  ;;  %v3878_v50 = vmul.f32 %v11661_v43, %v11620_v52  ;;  %vm3854_vm7 = vmor %vm3852_vm5, %vm3853_vm6  ;;  %v3859_v8 = vor.u32 1.1754944e-38, %v3858_v24 }
 0x3df   : > { %v3845_v44 = vsel %vm3842_vm15, %v3844_v28, %v3840_v27  ;;  %v3851_v41 = vadd.f32 %v11628_v23, %v3850_v61  ;;  %v3865_v59 = vmul.f32 %v11633_v29, %v3864_v63  ;;  %vm3868_vm9 = vweird.f32 %v11633_v29 }
 0x3e0   : > { %v3873_v48 = vand.u32 2147483648, %v11590_v46  ;;  %v3879_v38 = vsub.f32 1.0, %v3878_v50  ;;  %vm3857_vm10 = vcmp.eq.f32.partialorder %v3856_v1, 8.507059e+37  ;;  %vm3867_vm11 = vweird.f32 %v11590_v46 }
 0x3e1   : > { %v3855_v35 = vsel %vm3854_vm7, %v11628_v23, %v3851_v41  ;;  %v3866_v56 = vadd.f32 %v11633_v29, %v3865_v59  ;;  %v3871_v6 = vand.u32 2147483647, %v11590_v46  ;;  %v3893_v49 = vmul.f32 %v11671_v3, %v11635_v22  ;;  %vm3869_vm12 = vmor %vm3867_vm11, %vm3868_vm9 }
 0x3e2   : > { %v3860_v47 = vsel %vm3857_vm10, %v3859_v8, %v3855_v35  ;;  %v3880_v23 = vmul.f32 %v11661_v43, %v3879_v38  ;;  %vm3883_vm13 = vweird.f32 %v11661_v43  ;;  %v3874_v57 = vor.u32 1.1754944e-38, %v3873_v48  ;;  %v4253_v38 = vld [vmem:[%s14286_s4 + $0x10] sm:$0xff] }
 0x3e3   : > { %7428 = vmatmul.msk.f32.gmra.mxu3 %vm3928_vm8, %v3845_v44  ;;  %v4087_v15 = vpop.f32.mrf.mxu2  ;;  %v3870_v18 = vsel %vm3869_vm12, %v11633_v29, %v3866_v56  ;;  %v3894_v9 = vsub.f32 1.0, %v3893_v49  ;;  %v3888_v7 = vand.u32 2147483648, %v11620_v52  ;;  %vm3872_vm14 = vcmp.eq.f32.partialorder %v3871_v6, 8.507059e+37 }
 0x3e4   : > { %v3881_v10 = vadd.f32 %v11661_v43, %v3880_v23  ;;  %vm3882_vm6 = vweird.f32 %v11620_v52  ;;  %v3886_v46 = vand.u32 2147483647, %v11620_v52  ;;  %v3875_v4 = vsel %vm3872_vm14, %v3874_v57, %v3870_v18  ;;  %v4257_v18 = vld [vmem:[%s14286_s4 + $0x30] sm:$0xff] }
 0x3e5   : > { %v3895_v19 = vmul.f32 %v11671_v3, %v3894_v9  ;;  %vm3884_vm15 = vmor %vm3882_vm6, %vm3883_vm13  ;;  %vm3898_vm5 = vweird.f32 %v11671_v3  ;;  %v4198_v61 = vadd.f32 %v4197_v17, %v4084_v39  ;;  %v3889_v63 = vor.u32 1.1754944e-38, %v3888_v7 }
 0x3e6   : > { %4131 = vmatmul.f32.gmra.mxu2 %v3860_v47  ;;  %v3885_v24 = vsel %vm3884_vm15, %v11661_v43, %v3881_v10  ;;  %v3903_v27 = vand.u32 2147483648, %v11635_v22  ;;  %vm3887_vm7 = vcmp.eq.f32.partialorder %v3886_v46, 8.507059e+37  ;;  %vm3897_vm9 = vweird.f32 %v11635_v22  ;;  %v4259_v10 = vld [vmem:[%s14286_s4 + $0x40] sm:$0xff] }
 0x3e7   : > { %v4200_v32 = vpop.f32.mrf.mxu3  ;;  %v3896_v28 = vadd.f32 %v11671_v3, %v3895_v19  ;;  %v3901_v52 = vand.u32 2147483647, %v11635_v22  ;;  %v4195_v1 = vadd.f32 %v11639_v30, %v11618_v11  ;;  %v3890_v43 = vsel %vm3887_vm7, %v3889_v63, %v3885_v24  ;;  %vm3899_vm10 = vmor %vm3897_vm9, %vm3898_vm5  ;;  %v4261_v19 = vld [vmem:[%s14286_s4 + $0x50] sm:$0xff] }
 0x3e8   : > { %v4201_v29 = vadd.f32 %v4200_v32, %v4087_v15  ;;  %v4192_v17 = vadd.f32 %v11593_v33, %v11579_v58  ;;  %v3904_v41 = vor.u32 1.1754944e-38, %v3903_v27  ;;  %v4189_v22 = vadd.f32 %v11566_v42, %v11542_v53  ;;  %v4255_v15 = vld [vmem:[%s14286_s4 + $0x20] sm:$0xff] }
 0x3e9   : > { %v3900_v39 = vsel %vm3899_vm10, %v11671_v3, %v3896_v28  ;;  %vm3902_vm11 = vcmp.eq.f32.partialorder %v3901_v52, 8.507059e+37  ;;  %v4186_v30 = vadd.f32 %v11521_v37, %v11506_v12  ;;  %v4183_v58 = vadd.f32 %v11479_v31, %v11466_v21  ;;  %v4263_v28 = vld [vmem:[%s14286_s4 + $0x60] sm:$0xff] }
 0x3ea   : > { %4299 = vmatpush.msrb.mxu0 %v4201_v29  ;;  %v3905_v11 = vsel %vm3902_vm11, %v3904_v41, %v3900_v39  ;;  %v4180_v33 = vadd.f32 %v11439_v13, %v11429_v40  ;;  %v4177_v53 = vadd.f32 %v11398_v16, %v11385_v2  ;;  %v4174_v12 = vadd.f32 %v11358_v5, %v11344_v45 }
 0x3eb   : > { %7429 = vmatmul.msk.f32.gmra.mxu3 %vm3928_vm8, %v3875_v4  ;;  %v4171_v21 = vadd.f32 %v11316_v36, %v11305_v55  ;;  %v4168_v40 = vadd.f32 %v11274_v54, %v11260_v51  ;;  %v4165_v2 = vadd.f32 %v11226_v20, %v11207_v25  ;;  %v4162_v16 = vadd.f32 %v11172_v26, %v11154_v14 }
 0x3ec   : > { %4300 = vmatpush.msrb.mxu0 %v4198_v61  ;;  %v11706_v44 = vpop.f32.mrf.mxu2  ;;  %v4159_v55 = vadd.f32 %v11129_v0, %v11113_v34  ;;  %v4156_v51 = vadd.f32 %v11087_v60, %v11079_v62  ;;  %v4251_v60 = vld [vmem:[%s14286_s4] sm:$0xff] }
 0x3ee   : > { %4301 = vmatpush.msrb.mxu0 %v4195_v1  ;;  %4134 = vmatmul.f32.gmra.mxu2 %v3890_v43  ;;  %v4265_v1 = vld [vmem:[%s14286_s4 + $0x70] sm:$0xff] }
 0x3ef   : > { %v11711_v59 = vpop.f32.mrf.mxu3 }
 0x3f0   : > { %4302 = vmatpush.msrb.mxu0 %v4192_v17 }
 0x3f2   : > { %4303 = vmatpush.msrb.mxu0 %v4189_v22  ;;  %v4267_v22 = vld [vmem:[%s14286_s4 + $0x80] sm:$0xff] }
 0x3f3   : > { %7430 = vmatmul.msk.f32.gmra.mxu3 %vm3928_vm8, %v3905_v11  ;;  %vm4505_vm8 = vcmask 687104  }
 0x3f4   : > { %4304 = vmatpush.msrb.mxu0 %v4186_v30 }
 0x3f6   : > { %4305 = vmatpush.msrb.mxu0 %v4183_v58  ;;  %v11722_v3 = vpop.f32.mrf.mxu2 }
 0x3f8   : > { %4306 = vmatpush.msrb.mxu0 %v4180_v33 }
 0x3f9   : > { %v11726_v42 = vpop.f32.mrf.mxu3 }
 0x3fa   : > { %4307 = vmatpush.msrb.mxu0 %v4177_v53  ;;  %v4207_v33 = vadd.f32 %v11726_v42, %v11722_v3  ;;  %v4269_v53 = vld [vmem:[%s14286_s4 + $0x90] sm:$0xff]  ;;  %v4271_v3 = vld [vmem:[%s14286_s4 + $0xa0] sm:$0xff]  ;;  %v4254_v42 = vld [vmem:[%s14286_s4 + $0x18] sm:$0xff] }
 0x3fc   : > { %4308 = vmatpush.msrb.mxu0 %v4174_v12  ;;  %v4204_v12 = vadd.f32 %v11711_v59, %v11706_v44  ;;  %v4273_v44 = vld [vmem:[%s14286_s4 + $0xb0] sm:$0xff]  ;;  %v4256_v59 = vld [vmem:[%s14286_s4 + $0x28] sm:$0xff] }
 0x3fe   : > { %4309 = vmatpush.msrb.mxu0 %v4171_v21  ;;  %v11734_v13 = vpop.f32.mrf.mxu2  ;;  %v4252_v21 = vld [vmem:[%s14286_s4 + $0x8] sm:$0xff] }
 0x400   : > { %4310 = vmatpush.msrb.mxu0 %v4168_v40  ;;  %v4275_v40 = vld [vmem:[%s14286_s4 + $0xc0] sm:$0xff] }
 0x402   : > { %v11740_v31 = vpop.f32.mrf.mxu3  ;;  %4311 = vmatpush.msrb.mxu0 %v4165_v2  ;;  %v4277_v2 = vld [vmem:[%s14286_s4 + $0xd0] sm:$0xff] }
 0x403   : > { %v4210_v58 = vadd.f32 %v11740_v31, %v11734_v13  ;;  %v4258_v13 = vld [vmem:[%s14286_s4 + $0x38] sm:$0xff]  ;;  %v4279_v31 = vld [vmem:[%s14286_s4 + $0xe0] sm:$0xff] }
 0x404   : > { %4312 = vmatpush.msrb.mxu0 %v4162_v16  ;;  %v4260_v16 = vld [vmem:[%s14286_s4 + $0x48] sm:$0xff] }
 0x406   : > { %4313 = vmatpush.msrb.mxu0 %v4159_v55  ;;  %v4262_v55 = vld [vmem:[%s14286_s4 + $0x58] sm:$0xff] }
 0x408   : > { %v11746_v54 = vpop.f32.mrf.mxu2  ;;  %4314 = vmatpush.msrb.mxu0 %v4156_v51  ;;  %v4281_v51 = vld [vmem:[%s14286_s4 + $0xf0] sm:$0xff] }
 0x409   : > { %4315 = vmatmul.f32.vlgmr.msrb.gmra.mxu0 %v4251_v60  ;;  %v4499_v60 = vld [vmem:[%s14287_s5 + $0x80] sm:$0xff] }
 0x40c   : > { %v11748_v36 = vpop.f32.mrf.mxu3 }
 0x40d   : > { %v4213_v30 = vadd.f32 %v11748_v36, %v11746_v54  ;;  %v4264_v54 = vld [vmem:[%s14286_s4 + $0x68] sm:$0xff]  ;;  %v4283_v36 = vld [vmem:[%s14286_s4 + $0x100] sm:$0xff] }
 0x411   : > { %v4102_v25 = vpop.f32.mrf.mxu2  ;;  %4318 = vmatmul.f32.gmra.mxu0 %v4253_v38 }
 0x414   : > { %v4215_v20 = vpop.f32.mrf.mxu3 }
 0x415   : > { %v4216_v11 = vadd.f32 %v4215_v20, %v4102_v25  ;;  %v4266_v25 = vld [vmem:[%s14286_s4 + $0x78] sm:$0xff]  ;;  %v4285_v20 = vld [vmem:[%s14286_s4 + $0x110] sm:$0xff] }
 0x419   : > { %4321 = vmatmul.f32.gmra.mxu0 %v4255_v15  ;;  %v4293_v15 = vld [vmem:[%s14286_s4 + $0x150] sm:$0xff] }
 0x41b   : > { %v4105_v45 = vpop.f32.mrf.mxu2 }
 0x41e   : > { %v4218_v14 = vpop.f32.mrf.mxu3 }
 0x41f   : > { %v4219_v41 = vadd.f32 %v4218_v14, %v4105_v45  ;;  %v4268_v45 = vld [vmem:[%s14286_s4 + $0x88] sm:$0xff]  ;;  %v4287_v14 = vld [vmem:[%s14286_s4 + $0x120] sm:$0xff] }
 0x421   : > { %4324 = vmatmul.f32.gmra.mxu0 %v4257_v18  ;;  %v4276_v18 = vld [vmem:[%s14286_s4 + $0xc8] sm:$0xff] }
 0x423   : > { %v4108_v26 = vpop.f32.mrf.mxu2 }
 0x428   : > { %v4221_v5 = vpop.f32.mrf.mxu3 }
 0x429   : > { %4327 = vmatmul.f32.gmra.mxu0 %v4259_v10  ;;  %v4222_v17 = vadd.f32 %v4221_v5, %v4108_v26  ;;  %v4270_v26 = vld [vmem:[%s14286_s4 + $0x98] sm:$0xff]  ;;  %v4289_v5 = vld [vmem:[%s14286_s4 + $0x130] sm:$0xff]  ;;  %v7541_v10 = vld [vmem:[%s14287_s5 + $0x200] sm:$0xf] }
 0x42a   : > { %7543 = vmatpush.msk.msra.mxu0 %vm2255_vm4, %v7541_v10 }
 0x42d   : > { %v4111_v37 = vpop.f32.mrf.mxu2 }
 0x430   : > { %v4224_v50 = vpop.f32.mrf.mxu3 }
 0x431   : > { %4330 = vmatmul.f32.gmra.mxu0 %v4261_v19  ;;  %v4225_v39 = vadd.f32 %v4224_v50, %v4111_v37  ;;  %v4272_v37 = vld [vmem:[%s14286_s4 + $0xa8] sm:$0xff]  ;;  %v7539_v19 = vld [vmem:[%s14287_s5 + $0x1f0] sm:$0xff] }
 0x432   : > { %5100 = vmatpush.msra.mxu0 %v7539_v19 }
 0x437   : > { %v4114_v8 = vpop.f32.mrf.mxu2 }
 0x439   : > { %4333 = vmatmul.f32.gmra.mxu0 %v4263_v28  ;;  %v4295_v28 = vld [vmem:[%s14286_s4 + $0x160] sm:$0xff] }
 0x43a   : > { %v4227_v34 = vpop.f32.mrf.mxu3 }
 0x43b   : > { %v4228_v43 = vadd.f32 %v4227_v34, %v4114_v8  ;;  %v4503_v8 = vld [vmem:[%s14287_s5 + $0xa0] sm:$0xf]  ;;  %v4504_v34 = vld [vmem:[%s14287_s5 + $0xa8] sm:$0xf] }
 0x43c   : > { %7431 = vmatpush.msk.msrb.mxu2 %vm2255_vm4, %v4503_v8  ;;  %7448 = vmatpush.msk.msrb.mxu3 %vm2255_vm4, %v4504_v34 }
 0x43f   : > { %v4117_v0 = vpop.f32.mrf.mxu2 }
 0x441   : > { %4336 = vmatmul.f32.gmra.mxu0 %v4265_v1  ;;  %v4485_v1 = vld [vmem:[%s14287_s5 + $0x10] sm:$0xff] }
 0x444   : > { %v4230_v35 = vpop.f32.mrf.mxu3 }
 0x445   : > { %v4231_v52 = vadd.f32 %v4230_v35, %v4117_v0  ;;  %v4291_v0 = vld [vmem:[%s14286_s4 + $0x140] sm:$0xff]  ;;  %v4274_v35 = vld [vmem:[%s14286_s4 + $0xb8] sm:$0xff] }
 0x449   : > { %v4120_v56 = vpop.f32.mrf.mxu2  ;;  %4339 = vmatmul.f32.gmra.mxu0 %v4267_v22  ;;  %v7531_v22 = vld [vmem:[%s14287_s5 + $0x1b0] sm:$0xff] }
 0x44c   : > { %v4233_v62 = vpop.f32.mrf.mxu3 }
 0x44d   : > { %v4234_v27 = vadd.f32 %v4233_v62, %v4120_v56  ;;  %v4501_v56 = vld [vmem:[%s14287_s5 + $0x90] sm:$0xff]  ;;  %v4502_v62 = vld [vmem:[%s14287_s5 + $0x98] sm:$0xff] }
 0x44e   : > { %4566 = vmatpush.msrb.mxu2 %v4501_v56  ;;  %4631 = vmatpush.msrb.mxu3 %v4502_v62  ;;  %v7542_v62 = vld [vmem:[%s14287_s5 + $0x208] sm:$0xf] }
 0x450   : > { %4567 = vmatpush.msrb.mxu2 %v4499_v60  ;;  %v7540_v60 = vld [vmem:[%s14287_s5 + $0x1f8] sm:$0xff] }
 0x451   : > { %v4123_v48 = vpop.f32.mrf.mxu2  ;;  %4342 = vmatmul.f32.gmra.mxu0 %v4269_v53  ;;  %v7527_v53 = vld [vmem:[%s14287_s5 + $0x190] sm:$0xff] }
 0x456   : > { %v4236_v6 = vpop.f32.mrf.mxu3 }
 0x457   : > { %v4237_v63 = vadd.f32 %v4236_v6, %v4123_v48  ;;  %v4500_v48 = vld [vmem:[%s14287_s5 + $0x88] sm:$0xff]  ;;  %v4497_v6 = vld [vmem:[%s14287_s5 + $0x70] sm:$0xff] }
 0x458   : > { %4632 = vmatpush.msrb.mxu3 %v4500_v48  ;;  %4568 = vmatpush.msrb.mxu2 %v4497_v6  ;;  %v7538_v48 = vld [vmem:[%s14287_s5 + $0x1e8] sm:$0xff] }
 0x459   : > { %v4126_v49 = vpop.f32.mrf.mxu2  ;;  %4345 = vmatmul.f32.gmra.mxu0 %v4271_v3  ;;  %v7521_v3 = vld [vmem:[%s14287_s5 + $0x160] sm:$0xff] }
 0x45e   : > { %v4239_v47 = vpop.f32.mrf.mxu3 }
 0x45f   : > { %v4240_v61 = vadd.f32 %v4239_v47, %v4126_v49  ;;  %v4498_v49 = vld [vmem:[%s14287_s5 + $0x78] sm:$0xff]  ;;  %v4495_v47 = vld [vmem:[%s14287_s5 + $0x60] sm:$0xff] }
 0x460   : > { %4633 = vmatpush.msrb.mxu3 %v4498_v49  ;;  %4569 = vmatpush.msrb.mxu2 %v4495_v47  ;;  %v7536_v47 = vld [vmem:[%s14287_s5 + $0x1d8] sm:$0xff] }
 0x461   : > { %v4129_v23 = vpop.f32.mrf.mxu2  ;;  %4348 = vmatmul.f32.gmra.mxu0 %v4273_v44 }
 0x466   : > { %v4242_v9 = vpop.f32.mrf.mxu3 }
 0x467   : > { %v4243_v24 = vadd.f32 %v4242_v9, %v4129_v23  ;;  %v4496_v23 = vld [vmem:[%s14287_s5 + $0x68] sm:$0xff]  ;;  %v4493_v9 = vld [vmem:[%s14287_s5 + $0x50] sm:$0xff] }
 0x468   : > { %4634 = vmatpush.msrb.mxu3 %v4496_v23  ;;  %4570 = vmatpush.msrb.mxu2 %v4493_v9 }
 0x469   : > { %v4132_v57 = vpop.f32.mrf.mxu2  ;;  %4351 = vmatmul.f32.gmra.mxu0 %v4275_v40  ;;  %v4284_v40 = vld [vmem:[%s14286_s4 + $0x108] sm:$0xff] }
 0x46e   : > { %v4245_v7 = vpop.f32.mrf.mxu3 }
 0x46f   : > { %v4246_v29 = vadd.f32 %v4245_v7, %v4132_v57  ;;  %v4494_v57 = vld [vmem:[%s14287_s5 + $0x58] sm:$0xff]  ;;  %v4491_v7 = vld [vmem:[%s14287_s5 + $0x40] sm:$0xff] }
 0x470   : > { %4635 = vmatpush.msrb.mxu3 %v4494_v57  ;;  %4571 = vmatpush.msrb.mxu2 %v4491_v7  ;;  %v4290_v7 = vld [vmem:[%s14286_s4 + $0x138] sm:$0xff] }
 0x471   : > { %v4135_v46 = vpop.f32.mrf.mxu2  ;;  %4354 = vmatmul.f32.gmra.mxu0 %v4277_v2 }
 0x476   : > { %v4248_v32 = vpop.f32.mrf.mxu3 }
 0x477   : > { %v4249_v4 = vadd.f32 %v4248_v32, %v4135_v46  ;;  %v4492_v46 = vld [vmem:[%s14287_s5 + $0x48] sm:$0xff]  ;;  %v4489_v32 = vld [vmem:[%s14287_s5 + $0x30] sm:$0xff] }
 0x478   : > { %4636 = vmatpush.msrb.mxu3 %v4492_v46  ;;  %4572 = vmatpush.msrb.mxu2 %v4489_v32  ;;  %v7534_v32 = vld [vmem:[%s14287_s5 + $0x1c8] sm:$0xff] }
 0x479   : > { %4388 = vmatpush.msrb.mxu1 %v4249_v4  ;;  %4357 = vmatmul.f32.gmra.mxu0 %v4279_v31  ;;  %v4490_v4 = vld [vmem:[%s14287_s5 + $0x38] sm:$0xff] }
 0x47a   : > { %4637 = vmatpush.msrb.mxu3 %v4490_v4  ;;  %v4286_v31 = vld [vmem:[%s14286_s4 + $0x118] sm:$0xff] }
 0x47b   : > { %4389 = vmatpush.msrb.mxu1 %v4246_v29  ;;  %v7532_v4 = vld [vmem:[%s14287_s5 + $0x1b8] sm:$0xff] }
 0x47d   : > { %4390 = vmatpush.msrb.mxu1 %v4243_v24  ;;  %v7537_v24 = vld [vmem:[%s14287_s5 + $0x1e0] sm:$0xff] }
 0x47e   : > { %5101 = vmatpush.msra.mxu0 %v7537_v24  ;;  %v7528_v24 = vld [vmem:[%s14287_s5 + $0x198] sm:$0xff] }
 0x47f   : > { %4391 = vmatpush.msrb.mxu1 %v4240_v61  ;;  %v4487_v61 = vld [vmem:[%s14287_s5 + $0x20] sm:$0xff] }
 0x480   : > { %4573 = vmatpush.msrb.mxu2 %v4487_v61  ;;  %v4292_v61 = vld [vmem:[%s14286_s4 + $0x148] sm:$0xff] }
 0x481   : > { %4392 = vmatpush.msrb.mxu1 %v4237_v63  ;;  %4360 = vmatmul.f32.gmra.mxu0 %v4281_v51  ;;  %v4488_v63 = vld [vmem:[%s14287_s5 + $0x28] sm:$0xff] }
 0x482   : > { %4638 = vmatpush.msrb.mxu3 %v4488_v63  ;;  %4574 = vmatpush.msrb.mxu2 %v4485_v1 }
 0x483   : > { %4393 = vmatpush.msrb.mxu1 %v4234_v27  ;;  %v4278_v27 = vld [vmem:[%s14286_s4 + $0xd8] sm:$0xff] }
 0x485   : > { %4394 = vmatpush.msrb.mxu1 %v4231_v52  ;;  %v7535_v52 = vld [vmem:[%s14287_s5 + $0x1d0] sm:$0xff] }
 0x486   : > { %v11851_v50 = vpop.f32.mrf.mxu0  ;;  %5102 = vmatpush.msra.mxu0 %v7535_v52  ;;  %v7524_v52 = vld [vmem:[%s14287_s5 + $0x178] sm:$0xff] }
 0x487   : > { %4395 = vmatpush.msrb.mxu1 %v4228_v43  ;;  %v4486_v43 = vld [vmem:[%s14287_s5 + $0x18] sm:$0xff] }
 0x488   : > { %4639 = vmatpush.msrb.mxu3 %v4486_v43 }
 0x489   : > { %4396 = vmatpush.msrb.mxu1 %v4225_v39  ;;  %4363 = vmatmul.f32.gmra.mxu0 %v4283_v36  ;;  %v7533_v39 = vld [vmem:[%s14287_s5 + $0x1c0] sm:$0xff] }
 0x48a   : > { %5103 = vmatpush.msra.mxu0 %v7533_v39 }
 0x48b   : > { %4397 = vmatpush.msrb.mxu1 %v4222_v17  ;;  %v4483_v17 = vld [vmem:[%s14287_s5] sm:$0xff] }
 0x48c   : > { %4575 = vmatpush.msrb.mxu2 %v4483_v17  ;;  %5104 = vmatpush.msra.mxu0 %v7531_v22  ;;  %v7522_v22 = vld [vmem:[%s14287_s5 + $0x168] sm:$0xff] }
 0x48d   : > { %4398 = vmatpush.msrb.mxu1 %v4219_v41  ;;  %v4484_v41 = vld [vmem:[%s14287_s5 + $0x8] sm:$0xff] }
 0x48e   : > { %v11879_v38 = vpop.f32.mrf.mxu0  ;;  %4640 = vmatpush.msrb.mxu3 %v4484_v41 }
 0x48f   : > { %4399 = vmatpush.msrb.mxu1 %v4216_v11  ;;  %v7529_v11 = vld [vmem:[%s14287_s5 + $0x1a0] sm:$0xff] }
 0x490   : > { %5105 = vmatpush.msra.mxu0 %v7529_v11 }
 0x491   : > { %4400 = vmatpush.msrb.mxu1 %v4213_v30  ;;  %4366 = vmatmul.f32.gmra.mxu0 %v4285_v20  ;;  %v4297_v30 = vld [vmem:[%s14286_s4 + $0x170] sm:$0xff] }
 0x492   : > { %5106 = vmatpush.msra.mxu0 %v7527_v53 }
 0x493   : > { %4401 = vmatpush.msrb.mxu1 %v4210_v58  ;;  %v4280_v58 = vld [vmem:[%s14286_s4 + $0xe8] sm:$0xff] }
 0x495   : > { %4402 = vmatpush.msrb.mxu1 %v4207_v33 }
 0x496   : > { %v11924_v29 = vpop.f32.mrf.mxu0 }
 0x497   : > { %4403 = vmatpush.msrb.mxu1 %v4204_v12  ;;  %v7525_v12 = vld [vmem:[%s14287_s5 + $0x180] sm:$0xff] }
 0x498   : > { %4404 = vmatmul.f32.vlgmr.msrb.gmra.mxu1 %v4252_v21  ;;  %5107 = vmatpush.msra.mxu0 %v7525_v12  ;;  %v7523_v21 = vld [vmem:[%s14287_s5 + $0x170] sm:$0xff] }
 0x499   : > { %4369 = vmatmul.f32.gmra.mxu0 %v4287_v14  ;;  %7560 = vmatpush.msk.msra.mxu1 %vm2255_vm4, %v7542_v62 }
 0x49a   : > { %5108 = vmatpush.msra.mxu0 %v7523_v21 }
 0x49b   : > { %5165 = vmatpush.msra.mxu1 %v7540_v60 }
 0x49c   : > { %5109 = vmatpush.msra.mxu0 %v7521_v3 }
 0x49d   : > { %5166 = vmatpush.msra.mxu1 %v7538_v48 }
 0x49e   : > { %v11971_v33 = vpop.f32.mrf.mxu0 }
 0x49f   : > { %5167 = vmatpush.msra.mxu1 %v7536_v47 }
 0x4a0   : > { %4407 = vmatmul.f32.gmra.mxu1 %v4254_v42  ;;  %v4282_v42 = vld [vmem:[%s14286_s4 + $0xf8] sm:$0xff] }
 0x4a1   : > { %4372 = vmatmul.f32.gmra.mxu0 %v4289_v5  ;;  %5168 = vmatpush.msra.mxu1 %v7534_v32 }
 0x4a3   : > { %5169 = vmatpush.msra.mxu1 %v7532_v4 }
 0x4a6   : > { %v11988_v44 = vpop.f32.mrf.mxu0 }
 0x4a8   : > { %4410 = vmatmul.f32.gmra.mxu1 %v4256_v59 }
 0x4a9   : > { %4375 = vmatmul.f32.gmra.mxu0 %v4291_v0 }
 0x4ae   : > { %v11995_v2 = vpop.f32.mrf.mxu0 }
 0x4b0   : > { %4413 = vmatmul.f32.gmra.mxu1 %v4258_v13 }
 0x4b1   : > { %4378 = vmatmul.f32.gmra.mxu0 %v4293_v15 }
 0x4b6   : > { %v12016_v34 = vpop.f32.mrf.mxu0 }
 0x4b8   : > { %4416 = vmatmul.f32.gmra.mxu1 %v4260_v16 }
 0x4b9   : > { %4381 = vmatmul.f32.gmra.mxu0 %v4295_v28 }
 0x4be   : > { %v4337_v46 = vpop.f32.mrf.mxu0 }
 0x4c0   : > { %4419 = vmatmul.f32.gmra.mxu1 %v4262_v55 }
 0x4c1   : > { %4384 = vmatmul.f32.gmra.mxu0 %v4297_v30 }
 0x4c6   : > { %v12079_v1 = vpop.f32.mrf.mxu0 }
 0x4c8   : > { %4422 = vmatmul.f32.gmra.mxu1 %v4264_v54 }
 0x4d0   : > { %4425 = vmatmul.f32.gmra.mxu1 %v4266_v25 }
 0x4d8   : > { %4428 = vmatmul.f32.gmra.mxu1 %v4268_v45 }
 0x4e0   : > { %4431 = vmatmul.f32.gmra.mxu1 %v4270_v26 }
 0x4e8   : > { %4434 = vmatmul.f32.gmra.mxu1 %v4272_v37 }
 0x4f0   : > { %4437 = vmatmul.f32.gmra.mxu1 %v4274_v35  ;;  %v4288_v35 = vld [vmem:[%s14286_s4 + $0x128] sm:$0xff] }
 0x4f8   : > { %4440 = vmatmul.f32.gmra.mxu1 %v4276_v18 }
 0x500   : > { %4443 = vmatmul.f32.gmra.mxu1 %v4278_v27  ;;  %v7526_v27 = vld [vmem:[%s14287_s5 + $0x188] sm:$0xff] }
 0x508   : > { %4446 = vmatmul.f32.gmra.mxu1 %v4280_v58 }
 0x510   : > { %4449 = vmatmul.f32.gmra.mxu1 %v4282_v42 }
 0x515   : > { %v4405_v59 = vpop.f32.mrf.mxu1 }
 0x516   : > { %v4406_v13 = vadd.f32 %v4405_v59, %v11851_v50 }
 0x518   : > { %4452 = vmatmul.f32.gmra.mxu1 %v4284_v40  ;;  %7432 = vmatmul.msk.f32.vlgmr.msrb.gmra.mxu2 %vm4505_vm8, %v4406_v13  ;;  %v4993_v51 = vrot.slane %v4406_v13, 2  ;;  %v4730_v54 = vrot.slane %v4406_v13, 1  ;;  %v5519_v36 = vrot.slane %v4406_v13, 4  ;;  %v5256_v25 = vrot.slane %v4406_v13, 3 }
 0x519   : > { %7449 = vmatmul.msk.f32.vlgmr.msrb.gmra.mxu3 %vm4505_vm8, %v4406_v13 }
 0x51d   : > { %v4408_v16 = vpop.f32.mrf.mxu1 }
 0x51e   : > { %v4409_v55 = vadd.f32 %v4408_v16, %v11879_v38 }
 0x520   : > { %4455 = vmatmul.f32.gmra.mxu1 %v4286_v31  ;;  %7433 = vmatmul.msk.f32.gmra.mxu2 %vm4505_vm8, %v4409_v55  ;;  %v4994_v20 = vrot.slane %v4409_v55, 2  ;;  %v4731_v45 = vrot.slane %v4409_v55, 1  ;;  %v5520_v14 = vrot.slane %v4409_v55, 4  ;;  %v5257_v26 = vrot.slane %v4409_v55, 3 }
 0x521   : > { %7450 = vmatmul.msk.f32.gmra.mxu3 %vm4505_vm8, %v4409_v55  ;;  %v4343_v55 = vpop.f32.mrf.mxu0 }
 0x522   : > { %v12005_v5 = vsel %vm1383_vm2, %v4993_v51, %v4994_v20  ;;  %v12008_v37 = vsel %vm947_vm1, %v4730_v54, %v4731_v45  ;;  %v12011_v50 = vsel %vm2255_vm4, %v5519_v36, %v5520_v14  ;;  %v12014_v8 = vsel %vm1819_vm3, %v5256_v25, %v5257_v26 }
 0x523   : > { %7544 = vmatmul.msk.f32.vlgmr.msra.gmra.mxu0 %vm4505_vm8, %v12005_v5 }
 0x525   : > { %v4411_v0 = vpop.f32.mrf.mxu1 }
 0x526   : > { %v4412_v56 = vadd.f32 %v4411_v0, %v11924_v29  ;;  %v7530_v29 = vld [vmem:[%s14287_s5 + $0x1a8] sm:$0xff]  ;;  %v4298_v0 = vld [vmem:[%s14286_s4 + $0x178] sm:$0xff] }
 0x527   : > { %5170 = vmatpush.msra.mxu1 %v7530_v29 }
 0x528   : > { %4458 = vmatmul.f32.gmra.mxu1 %v4288_v35  ;;  %v4996_v38 = vrot.slane %v4412_v56, 2  ;;  %v4733_v6 = vrot.slane %v4412_v56, 1  ;;  %v5522_v49 = vrot.slane %v4412_v56, 4  ;;  %v5259_v15 = vrot.slane %v4412_v56, 3 }
 0x529   : > { %5171 = vmatpush.msra.mxu1 %v7528_v24 }
 0x52a   : > { %v12038_v23 = vsel %vm1383_vm2, %v4994_v20, %v4996_v38  ;;  %v12041_v18 = vsel %vm947_vm1, %v4731_v45, %v4733_v6  ;;  %v12044_v9 = vsel %vm2255_vm4, %v5520_v14, %v5522_v49  ;;  %v12049_v57 = vsel %vm1819_vm3, %v5257_v26, %v5259_v15  ;;  %v4296_v20 = vld [vmem:[%s14286_s4 + $0x168] sm:$0xff]  ;;  %v4346_v14 = vpop.f32.mrf.mxu0 }
 0x52b   : > { %7545 = vmatmul.msk.f32.gmra.mxu0 %vm4505_vm8, %v12038_v23  ;;  %5172 = vmatpush.msra.mxu1 %v7526_v27 }
 0x52d   : > { %v4414_v10 = vpop.f32.mrf.mxu1  ;;  %5173 = vmatpush.msra.mxu1 %v7524_v52 }
 0x52e   : > { %v4415_v19 = vadd.f32 %v4414_v10, %v11971_v33 }
 0x52f   : > { %5174 = vmatpush.msra.mxu1 %v7522_v22 }
 0x530   : > { %4461 = vmatmul.f32.gmra.mxu1 %v4290_v7  ;;  %7434 = vmatmul.msk.f32.gmra.mxu2 %vm4505_vm8, %v4415_v19  ;;  %v4998_v43 = vrot.slane %v4415_v19, 2  ;;  %v4735_v39 = vrot.slane %v4415_v19, 1  ;;  %v5524_v17 = vrot.slane %v4415_v19, 4  ;;  %v5261_v41 = vrot.slane %v4415_v19, 3 }
 0x531   : > { %7451 = vmatmul.msk.f32.gmra.mxu3 %vm4505_vm8, %v4415_v19 }
 0x532   : > { %v4349_v19 = vpop.f32.mrf.mxu0 }
 0x535   : > { %v4417_v28 = vpop.f32.mrf.mxu1 }
 0x536   : > { %v4418_v63 = vadd.f32 %v4417_v28, %v11988_v44  ;;  %v4294_v44 = vld [vmem:[%s14286_s4 + $0x158] sm:$0xff] }
 0x538   : > { %4464 = vmatmul.f32.gmra.mxu1 %v4292_v61  ;;  %7435 = vmatmul.msk.f32.gmra.mxu2 %vm4505_vm8, %v4418_v63  ;;  %v4999_v11 = vrot.slane %v4418_v63, 2  ;;  %v4736_v30 = vrot.slane %v4418_v63, 1  ;;  %v5525_v58 = vrot.slane %v4418_v63, 4  ;;  %v5262_v33 = vrot.slane %v4418_v63, 3 }
 0x539   : > { %7452 = vmatmul.msk.f32.gmra.mxu3 %vm4505_vm8, %v4418_v63 }
 0x53a   : > { %v12087_v53 = vsel %vm1383_vm2, %v4998_v43, %v4999_v11  ;;  %v12090_v12 = vsel %vm947_vm1, %v4735_v39, %v4736_v30  ;;  %v12093_v21 = vsel %vm2255_vm4, %v5524_v17, %v5525_v58  ;;  %v12096_v3 = vsel %vm1819_vm3, %v5261_v41, %v5262_v33 }
 0x53b   : > { %7546 = vmatmul.msk.f32.gmra.mxu0 %vm4505_vm8, %v12087_v53 }
 0x53d   : > { %v4420_v42 = vpop.f32.mrf.mxu1 }
 0x53e   : > { %v4421_v59 = vadd.f32 %v4420_v42, %v11995_v2 }
 0x540   : > { %4467 = vmatmul.f32.gmra.mxu1 %v4294_v44  ;;  %v5001_v40 = vrot.slane %v4421_v59, 2  ;;  %v4738_v13 = vrot.slane %v4421_v59, 1  ;;  %v5527_v16 = vrot.slane %v4421_v59, 4  ;;  %v5264_v31 = vrot.slane %v4421_v59, 3 }
 0x542   : > { %v12105_v51 = vsel %vm1383_vm2, %v4999_v11, %v5001_v40  ;;  %v12108_v54 = vsel %vm947_vm1, %v4736_v30, %v4738_v13  ;;  %v12111_v36 = vsel %vm2255_vm4, %v5525_v58, %v5527_v16  ;;  %v12114_v25 = vsel %vm1819_vm3, %v5262_v33, %v5264_v31 }
 0x543   : > { %7547 = vmatmul.msk.f32.gmra.mxu0 %vm4505_vm8, %v12105_v51 }
 0x545   : > { %v4423_v2 = vpop.f32.mrf.mxu1 }
 0x546   : > { %v4424_v45 = vadd.f32 %v4423_v2, %v12016_v34 }
 0x548   : > { %4470 = vmatmul.f32.gmra.mxu1 %v4296_v20  ;;  %7436 = vmatmul.msk.f32.gmra.mxu2 %vm4505_vm8, %v4424_v45  ;;  %v5003_v56 = vrot.slane %v4424_v45, 2  ;;  %v4740_v62 = vrot.slane %v4424_v45, 1  ;;  %v5529_v60 = vrot.slane %v4424_v45, 4  ;;  %v5266_v48 = vrot.slane %v4424_v45, 3 }
 0x549   : > { %7453 = vmatmul.msk.f32.gmra.mxu3 %vm4505_vm8, %v4424_v45 }
 0x54d   : > { %v4426_v26 = vpop.f32.mrf.mxu1 }
 0x54e   : > { %v4427_v35 = vadd.f32 %v4426_v26, %v4337_v46 }
 0x550   : > { %4473 = vmatmul.f32.gmra.mxu1 %v4298_v0  ;;  %7437 = vmatmul.msk.f32.gmra.mxu2 %vm4505_vm8, %v4427_v35  ;;  %v5004_v34 = vrot.slane %v4427_v35, 2  ;;  %v4741_v38 = vrot.slane %v4427_v35, 1  ;;  %v5530_v6 = vrot.slane %v4427_v35, 4  ;;  %v5267_v49 = vrot.slane %v4427_v35, 3 }
 0x551   : > { %7454 = vmatmul.msk.f32.gmra.mxu3 %vm4505_vm8, %v4427_v35 }
 0x552   : > { %v5005_v15 = vsel %vm1383_vm2, %v5003_v56, %v5004_v34  ;;  %v12131_v47 = vsel %vm947_vm1, %v4740_v62, %v4741_v38  ;;  %v12134_v10 = vsel %vm2255_vm4, %v5529_v60, %v5530_v6  ;;  %v12137_v7 = vsel %vm1819_vm3, %v5266_v48, %v5267_v49 }
 0x553   : > { %7548 = vmatmul.msk.f32.gmra.mxu0 %vm4505_vm8, %v5005_v15 }
 0x555   : > { %v4429_v46 = vpop.f32.mrf.mxu1 }
 0x556   : > { %v4430_v32 = vadd.f32 %v4429_v46, %v12079_v1 }
 0x558   : > { %7561 = vmatmul.msk.f32.vlgmr.msra.gmra.mxu1 %vm4505_vm8, %v12005_v5  ;;  %v5006_v4 = vrot.slane %v4430_v32, 2  ;;  %v4743_v29 = vrot.slane %v4430_v32, 1  ;;  %v5532_v24 = vrot.slane %v4430_v32, 4  ;;  %v5269_v28 = vrot.slane %v4430_v32, 3  ;;  %v4352_v5 = vpop.f32.mrf.mxu0 }
 0x55a   : > { %v5007_v61 = vsel %vm1383_vm2, %v5004_v34, %v5006_v4  ;;  %v12145_v63 = vsel %vm947_vm1, %v4741_v38, %v4743_v29  ;;  %v12148_v27 = vsel %vm2255_vm4, %v5530_v6, %v5532_v24  ;;  %v12151_v52 = vsel %vm1819_vm3, %v5267_v49, %v5269_v28 }
 0x55b   : > { %7549 = vmatmul.msk.f32.gmra.mxu0 %vm4505_vm8, %v5007_v61 }
 0x55d   : > { %v4432_v1 = vpop.f32.mrf.mxu1 }
 0x55e   : > { %v4433_v43 = vadd.f32 %v4432_v1, %v4343_v55 }
 0x560   : > { %7562 = vmatmul.msk.f32.gmra.mxu1 %vm4505_vm8, %v12038_v23  ;;  %7438 = vmatmul.msk.f32.gmra.mxu2 %vm4505_vm8, %v4433_v43  ;;  %v5008_v41 = vrot.slane %v4433_v43, 2  ;;  %v4745_v22 = vrot.slane %v4433_v43, 1  ;;  %v5534_v11 = vrot.slane %v4433_v43, 4  ;;  %v5271_v30 = vrot.slane %v4433_v43, 3  ;;  %v4355_v23 = vpop.f32.mrf.mxu0 }
 0x561   : > { %7455 = vmatmul.msk.f32.gmra.mxu3 %vm4505_vm8, %v4433_v43 }
 0x565   : > { %v4435_v39 = vpop.f32.mrf.mxu1 }
 0x566   : > { %v4436_v17 = vadd.f32 %v4435_v39, %v4346_v14 }
 0x568   : > { %7563 = vmatmul.msk.f32.gmra.mxu1 %vm4505_vm8, %v12087_v53  ;;  %7439 = vmatmul.msk.f32.gmra.mxu2 %vm4505_vm8, %v4436_v17  ;;  %v5009_v58 = vrot.slane %v4436_v17, 2  ;;  %v4746_v33 = vrot.slane %v4436_v17, 1  ;;  %v5535_v42 = vrot.slane %v4436_v17, 4  ;;  %v5272_v44 = vrot.slane %v4436_v17, 3  ;;  %v4358_v56 = vpop.f32.mrf.mxu0 }
 0x569   : > { %7456 = vmatmul.msk.f32.gmra.mxu3 %vm4505_vm8, %v4436_v17 }
 0x56a   : > { %v5010_v59 = vsel %vm1383_vm2, %v5008_v41, %v5009_v58  ;;  %v12164_v40 = vsel %vm947_vm1, %v4745_v22, %v4746_v33  ;;  %v12167_v13 = vsel %vm2255_vm4, %v5534_v11, %v5535_v42  ;;  %v12170_v16 = vsel %vm1819_vm3, %v5271_v30, %v5272_v44 }
 0x56b   : > { %7550 = vmatmul.msk.f32.gmra.mxu0 %vm4505_vm8, %v5010_v59 }
 0x56d   : > { %v4438_v53 = vpop.f32.mrf.mxu1 }
 0x56e   : > { %v4439_v31 = vadd.f32 %v4438_v53, %v4349_v19 }
 0x570   : > { %7564 = vmatmul.msk.f32.gmra.mxu1 %vm4505_vm8, %v12105_v51  ;;  %v5011_v55 = vrot.slane %v4439_v31, 2  ;;  %v4748_v2 = vrot.slane %v4439_v31, 1  ;;  %v5537_v20 = vrot.slane %v4439_v31, 4  ;;  %v5274_v45 = vrot.slane %v4439_v31, 3  ;;  %v4361_v48 = vpop.f32.mrf.mxu0  ;;  %v7485_v31 = vld [vmem:[%s14287_s5 + $0x150] sm:$0xf] }
 0x571   : > { %7487 = vmatpush.msk.msra.mxu2 %vm2255_vm4, %v7485_v31 }
 0x572   : > { %v5012_v14 = vsel %vm1383_vm2, %v5009_v58, %v5011_v55  ;;  %v12177_v26 = vsel %vm947_vm1, %v4746_v33, %v4748_v2  ;;  %v12180_v0 = vsel %vm2255_vm4, %v5535_v42, %v5537_v20  ;;  %v12183_v35 = vsel %vm1819_vm3, %v5272_v44, %v5274_v45  ;;  %v7486_v55 = vld [vmem:[%s14287_s5 + $0x158] sm:$0xf] }
 0x573   : > { %7551 = vmatmul.msk.f32.gmra.mxu0 %vm4505_vm8, %v5012_v14  ;;  %7504 = vmatpush.msk.msra.mxu3 %vm2255_vm4, %v7486_v55 }
 0x575   : > { %v4441_v62 = vpop.f32.mrf.mxu1 }
 0x576   : > { %v4442_v51 = vadd.f32 %v4441_v62, %v4352_v5 }
 0x578   : > { %7565 = vmatmul.msk.f32.gmra.mxu1 %vm4505_vm8, %v5005_v15  ;;  %7440 = vmatmul.msk.f32.gmra.mxu2 %vm4505_vm8, %v4442_v51  ;;  %v5013_v38 = vrot.slane %v4442_v51, 2  ;;  %v4750_v6 = vrot.slane %v4442_v51, 1  ;;  %v5539_v49 = vrot.slane %v4442_v51, 4  ;;  %v5276_v46 = vrot.slane %v4442_v51, 3  ;;  %v4364_v5 = vpop.f32.mrf.mxu0 }
 0x579   : > { %7457 = vmatmul.msk.f32.gmra.mxu3 %vm4505_vm8, %v4442_v51 }
 0x57d   : > { %v4444_v60 = vpop.f32.mrf.mxu1 }
 0x57e   : > { %v4445_v34 = vadd.f32 %v4444_v60, %v4355_v23 }
 0x580   : > { %7566 = vmatmul.msk.f32.gmra.mxu1 %vm4505_vm8, %v5007_v61  ;;  %7441 = vmatmul.msk.f32.gmra.mxu2 %vm4505_vm8, %v4445_v34  ;;  %v5014_v19 = vrot.slane %v4445_v34, 2  ;;  %v4751_v32 = vrot.slane %v4445_v34, 1  ;;  %v5540_v4 = vrot.slane %v4445_v34, 4  ;;  %v5277_v29 = vrot.slane %v4445_v34, 3  ;;  %v4367_v23 = vpop.f32.mrf.mxu0 }
 0x581   : > { %7458 = vmatmul.msk.f32.gmra.mxu3 %vm4505_vm8, %v4445_v34 }
 0x582   : > { %v5015_v15 = vsel %vm1383_vm2, %v5013_v38, %v5014_v19  ;;  %v12194_v24 = vsel %vm947_vm1, %v4750_v6, %v4751_v32  ;;  %v12197_v28 = vsel %vm2255_vm4, %v5539_v49, %v5540_v4  ;;  %v12200_v1 = vsel %vm1819_vm3, %v5276_v46, %v5277_v29 }
 0x583   : > { %7552 = vmatmul.msk.f32.gmra.mxu0 %vm4505_vm8, %v5015_v15 }
 0x585   : > { %v4447_v61 = vpop.f32.mrf.mxu1 }
 0x586   : > { %v4448_v43 = vadd.f32 %v4447_v61, %v4358_v56 }
 0x588   : > { %7567 = vmatmul.msk.f32.gmra.mxu1 %vm4505_vm8, %v5010_v59  ;;  %v5016_v39 = vrot.slane %v4448_v43, 2  ;;  %v4753_v17 = vrot.slane %v4448_v43, 1  ;;  %v5542_v41 = vrot.slane %v4448_v43, 4  ;;  %v5279_v22 = vrot.slane %v4448_v43, 3  ;;  %v4370_v49 = vpop.f32.mrf.mxu0  ;;  %v7479_v43 = vld [vmem:[%s14287_s5 + $0x120] sm:$0xff] }
 0x58a   : > { %v5017_v11 = vsel %vm1383_vm2, %v5014_v19, %v5016_v39  ;;  %v12206_v30 = vsel %vm947_vm1, %v4751_v32, %v4753_v17  ;;  %v12209_v58 = vsel %vm2255_vm4, %v5540_v4, %v5542_v41  ;;  %v12212_v33 = vsel %vm1819_vm3, %v5277_v29, %v5279_v22  ;;  %v7483_v32 = vld [vmem:[%s14287_s5 + $0x140] sm:$0xff]  ;;  %v7484_v4 = vld [vmem:[%s14287_s5 + $0x148] sm:$0xff]  ;;  %v7481_v29 = vld [vmem:[%s14287_s5 + $0x130] sm:$0xff] }
 0x58b   : > { %7553 = vmatmul.msk.f32.gmra.mxu0 %vm4505_vm8, %v5017_v11  ;;  %4837 = vmatpush.msra.mxu2 %v7483_v32  ;;  %v7480_v17 = vld [vmem:[%s14287_s5 + $0x128] sm:$0xff]  ;;  %v7469_v32 = vld [vmem:[%s14287_s5 + $0xd0] sm:$0xff] }
 0x58c   : > { %4902 = vmatpush.msra.mxu3 %v7484_v4  ;;  %v7647_v4 = vld [vmem:[%s14287_s5 + $0x330] sm:$0xff] }
 0x58d   : > { %v4450_v42 = vpop.f32.mrf.mxu1  ;;  %4838 = vmatpush.msra.mxu2 %v7481_v29  ;;  %v7648_v29 = vld [vmem:[%s14287_s5 + $0x338] sm:$0xff] }
 0x58e   : > { %v4451_v44 = vadd.f32 %v4450_v42, %v4361_v48 }
 0x58f   : > { %4839 = vmatpush.msra.mxu2 %v7479_v43  ;;  %v7467_v43 = vld [vmem:[%s14287_s5 + $0xc0] sm:$0xff] }
 0x590   : > { %7568 = vmatmul.msk.f32.gmra.mxu1 %vm4505_vm8, %v5012_v14  ;;  %7442 = vmatmul.msk.f32.gmra.mxu2 %vm4505_vm8, %v4451_v44  ;;  %v5018_v2 = vrot.slane %v4451_v44, 2  ;;  %v4755_v20 = vrot.slane %v4451_v44, 1  ;;  %v5544_v45 = vrot.slane %v4451_v44, 4  ;;  %v5281_v14 = vrot.slane %v4451_v44, 3  ;;  %v4373_v31 = vpop.f32.mrf.mxu0 }
 0x591   : > { %7459 = vmatmul.msk.f32.gmra.mxu3 %vm4505_vm8, %v4451_v44 }
 0x595   : > { %v4453_v59 = vpop.f32.mrf.mxu1 }
 0x596   : > { %v4454_v53 = vadd.f32 %v4453_v59, %v4364_v5 }
 0x598   : > { %7569 = vmatmul.msk.f32.gmra.mxu1 %vm4505_vm8, %v5015_v15  ;;  %7443 = vmatmul.msk.f32.gmra.mxu2 %vm4505_vm8, %v4454_v53  ;;  %v5019_v56 = vrot.slane %v4454_v53, 2  ;;  %v4756_v62 = vrot.slane %v4454_v53, 1  ;;  %v5545_v51 = vrot.slane %v4454_v53, 4  ;;  %v5282_v60 = vrot.slane %v4454_v53, 3  ;;  %v7482_v15 = vld [vmem:[%s14287_s5 + $0x138] sm:$0xff] }
 0x599   : > { %7460 = vmatmul.msk.f32.gmra.mxu3 %vm4505_vm8, %v4454_v53 }
 0x59a   : > { %v5020_v48 = vsel %vm1383_vm2, %v5018_v2, %v5019_v56  ;;  %v12231_v34 = vsel %vm947_vm1, %v4755_v20, %v4756_v62  ;;  %v12234_v38 = vsel %vm2255_vm4, %v5544_v45, %v5545_v51  ;;  %v12237_v6 = vsel %vm1819_vm3, %v5281_v14, %v5282_v60  ;;  %4903 = vmatpush.msra.mxu3 %v7482_v15  ;;  %v7475_v2 = vld [vmem:[%s14287_s5 + $0x100] sm:$0xff]  ;;  %v7476_v45 = vld [vmem:[%s14287_s5 + $0x108] sm:$0xff] }
 0x59b   : > { %7554 = vmatmul.msk.f32.gmra.mxu0 %vm4505_vm8, %v5020_v48  ;;  %v7653_v20 = vld [vmem:[%s14287_s5 + $0x360] sm:$0xf]  ;;  %v7654_v14 = vld [vmem:[%s14287_s5 + $0x368] sm:$0xf] }
 0x59c   : > { %4904 = vmatpush.msra.mxu3 %v7480_v17  ;;  %7655 = vmatpush.msk.msrb.mxu0 %vm2255_vm4, %v7653_v20  ;;  %v7470_v17 = vld [vmem:[%s14287_s5 + $0xd8] sm:$0xff] }
 0x59d   : > { %v4456_v46 = vpop.f32.mrf.mxu1  ;;  %7672 = vmatpush.msk.msrb.mxu1 %vm2255_vm4, %v7654_v14 }
 0x59e   : > { %v4457_v19 = vadd.f32 %v4456_v46, %v4367_v23  ;;  %v7478_v23 = vld [vmem:[%s14287_s5 + $0x118] sm:$0xff]  ;;  %v7650_v46 = vld [vmem:[%s14287_s5 + $0x348] sm:$0xff] }
 0x59f   : > { %4905 = vmatpush.msra.mxu3 %v7478_v23 }
 0x5a0   : > { %7570 = vmatmul.msk.f32.gmra.mxu1 %vm4505_vm8, %v5017_v11  ;;  %v5021_v61 = vrot.slane %v4457_v19, 2  ;;  %v4758_v5 = vrot.slane %v4457_v19, 1  ;;  %v5547_v39 = vrot.slane %v4457_v19, 4  ;;  %v5284_v41 = vrot.slane %v4457_v19, 3  ;;  %v7477_v11 = vld [vmem:[%s14287_s5 + $0x110] sm:$0xff]  ;;  %v7472_v19 = vld [vmem:[%s14287_s5 + $0xe8] sm:$0xff] }
 0x5a1   : > { %4840 = vmatpush.msra.mxu2 %v7477_v11  ;;  %4906 = vmatpush.msra.mxu3 %v7476_v45  ;;  %v7465_v45 = vld [vmem:[%s14287_s5 + $0xb0] sm:$0xff] }
 0x5a2   : > { %v5022_v22 = vsel %vm1383_vm2, %v5019_v56, %v5021_v61  ;;  %v12264_v42 = vsel %vm947_vm1, %v4756_v62, %v4758_v5  ;;  %v12267_v44 = vsel %vm2255_vm4, %v5545_v51, %v5547_v39  ;;  %v12274_v59 = vsel %vm1819_vm3, %v5282_v60, %v5284_v41  ;;  %v7473_v56 = vld [vmem:[%s14287_s5 + $0xf0] sm:$0xff]  ;;  %v7652_v51 = vld [vmem:[%s14287_s5 + $0x358] sm:$0xff]  ;;  %v4376_v5 = vpop.f32.mrf.mxu0  ;;  %v7645_v41 = vld [vmem:[%s14287_s5 + $0x320] sm:$0xff] }
 0x5a3   : > { %7555 = vmatmul.msk.f32.gmra.mxu0 %vm4505_vm8, %v5022_v22  ;;  %4841 = vmatpush.msra.mxu2 %v7475_v2  ;;  %v7651_v62 = vld [vmem:[%s14287_s5 + $0x350] sm:$0xff]  ;;  %v7474_v60 = vld [vmem:[%s14287_s5 + $0xf8] sm:$0xff] }
 0x5a4   : > { %5626 = vmatpush.msrb.mxu0 %v7651_v62  ;;  %5691 = vmatpush.msrb.mxu1 %v7652_v51  ;;  %v7643_v51 = vld [vmem:[%s14287_s5 + $0x310] sm:$0xff] }
 0x5a5   : > { %v4459_v53 = vpop.f32.mrf.mxu1  ;;  %4842 = vmatpush.msra.mxu2 %v7473_v56  ;;  %4907 = vmatpush.msra.mxu3 %v7474_v60  ;;  %v7644_v60 = vld [vmem:[%s14287_s5 + $0x318] sm:$0xff] }
 0x5a6   : > { %v12276_v55 = vadd.f32 %v4459_v53, %v4370_v49  ;;  %v7649_v49 = vld [vmem:[%s14287_s5 + $0x340] sm:$0xff]  ;;  %5692 = vmatpush.msrb.mxu1 %v7650_v46  ;;  %v7646_v53 = vld [vmem:[%s14287_s5 + $0x328] sm:$0xff] }
 0x5a7   : > { %5627 = vmatpush.msrb.mxu0 %v7649_v49  ;;  %4908 = vmatpush.msra.mxu3 %v7472_v19  ;;  %v7641_v19 = vld [vmem:[%s14287_s5 + $0x300] sm:$0xff] }
 0x5a8   : > { %7571 = vmatmul.msk.f32.gmra.mxu1 %vm4505_vm8, %v5020_v48  ;;  %7444 = vmatmul.msk.f32.gmra.mxu2 %vm4505_vm8, %v12276_v55  ;;  %v7471_v48 = vld [vmem:[%s14287_s5 + $0xe0] sm:$0xff]  ;;  %v5023_v39 = vrot.slane %v12276_v55, 2  ;;  %v4760_v11 = vrot.slane %v12276_v55, 1  ;;  %v5549_v2 = vrot.slane %v12276_v55, 4  ;;  %v5286_v14 = vrot.slane %v12276_v55, 3 }
 0x5a9   : > { %7461 = vmatmul.msk.f32.gmra.mxu3 %vm4505_vm8, %v12276_v55  ;;  %4843 = vmatpush.msra.mxu2 %v7471_v48  ;;  %v7466_v55 = vld [vmem:[%s14287_s5 + $0xb8] sm:$0xff] }
 0x5aa   : > { %5628 = vmatpush.msrb.mxu0 %v7647_v4  ;;  %5693 = vmatpush.msrb.mxu1 %v7648_v29 }
 0x5ab   : > { %4844 = vmatpush.msra.mxu2 %v7469_v32  ;;  %4909 = vmatpush.msra.mxu3 %v7470_v17  ;;  %v7642_v32 = vld [vmem:[%s14287_s5 + $0x308] sm:$0xff] }
 0x5ac   : > { %5629 = vmatpush.msrb.mxu0 %v7645_v41  ;;  %5694 = vmatpush.msrb.mxu1 %v7646_v53  ;;  %v4379_v41 = vpop.f32.mrf.mxu0 }
 0x5ad   : > { %v4462_v15 = vpop.f32.mrf.mxu1  ;;  %4845 = vmatpush.msra.mxu2 %v7467_v43 }
 0x5ae   : > { %v12330_v61 = vadd.f32 %v4462_v15, %v4373_v31  ;;  %5630 = vmatpush.msrb.mxu0 %v7643_v51  ;;  %5695 = vmatpush.msrb.mxu1 %v7644_v60  ;;  %v7639_v15 = vld [vmem:[%s14287_s5 + $0x2f0] sm:$0xff] }
 0x5af   : > { %4846 = vmatpush.msra.mxu2 %v7465_v45 }
 0x5b0   : > { %7572 = vmatmul.msk.f32.gmra.mxu1 %vm4505_vm8, %v5022_v22  ;;  %7445 = vmatmul.msk.f32.gmra.mxu2 %vm4505_vm8, %v12330_v61  ;;  %v5024_v23 = vrot.slane %v12330_v61, 2  ;;  %v4761_v31 = vrot.slane %v12330_v61, 1  ;;  %v5550_v20 = vrot.slane %v12330_v61, 4  ;;  %v7468_v22 = vld [vmem:[%s14287_s5 + $0xc8] sm:$0xff]  ;;  %v5287_v56 = vrot.slane %v12330_v61, 3 }
 0x5b1   : > { %7462 = vmatmul.msk.f32.gmra.mxu3 %vm4505_vm8, %v12330_v61  ;;  %v7640_v61 = vld [vmem:[%s14287_s5 + $0x2f8] sm:$0xff]  ;;  %5631 = vmatpush.msrb.mxu0 %v7641_v19 }
 0x5b2   : > { %v5025_v62 = vsel %vm1383_vm2, %v5023_v39, %v5024_v23  ;;  %v12371_v48 = vsel %vm947_vm1, %v4760_v11, %v4761_v31  ;;  %v12374_v49 = vsel %vm2255_vm4, %v5549_v2, %v5550_v20  ;;  %v12381_v46 = vsel %vm1819_vm3, %v5286_v14, %v5287_v56  ;;  %4910 = vmatpush.msra.mxu3 %v7468_v22  ;;  %v7638_v39 = vld [vmem:[%s14287_s5 + $0x2e8] sm:$0xff]  ;;  %v7637_v11 = vld [vmem:[%s14287_s5 + $0x2e0] sm:$0xff]  ;;  %v7636_v22 = vld [vmem:[%s14287_s5 + $0x2d8] sm:$0xff] }
 0x5b3   : > { %7556 = vmatmul.msk.f32.gmra.mxu0 %vm4505_vm8, %v5025_v62  ;;  %5696 = vmatpush.msrb.mxu1 %v7642_v32  ;;  %v12430_v32 = vpop.f32.mrf.mxu3 }
 0x5b4   : > { %4911 = vmatpush.msra.mxu3 %v7466_v55  ;;  %5632 = vmatpush.msrb.mxu0 %v7639_v15  ;;  %v12428_v55 = vpop.f32.mrf.mxu2 }
 0x5b5   : > { %v4465_v4 = vpop.f32.mrf.mxu1  ;;  %5697 = vmatpush.msrb.mxu1 %v7640_v61 }
 0x5b6   : > { %v4466_v29 = vadd.f32 %v4465_v4, %v4376_v5  ;;  %5633 = vmatpush.msrb.mxu0 %v7637_v11 }
 0x5b7   : > { %5698 = vmatpush.msrb.mxu1 %v7638_v39 }
 0x5b8   : > { %7573 = vmatmul.msk.f32.gmra.mxu1 %vm4505_vm8, %v5025_v62  ;;  %v5026_v43 = vrot.slane %v4466_v29, 2  ;;  %v4763_v17 = vrot.slane %v4466_v29, 1  ;;  %v5552_v5 = vrot.slane %v4466_v29, 4  ;;  %v5289_v53 = vrot.slane %v4466_v29, 3  ;;  %v7635_v62 = vld [vmem:[%s14287_s5 + $0x2d0] sm:$0xff] }
 0x5b9   : > { %5699 = vmatpush.msrb.mxu1 %v7636_v22  ;;  %5634 = vmatpush.msrb.mxu0 %v7635_v62 }
 0x5ba   : > { %v5027_v2 = vsel %vm1383_vm2, %v5024_v23, %v5026_v43  ;;  %v12407_v45 = vsel %vm947_vm1, %v4761_v31, %v4763_v17  ;;  %v12410_v14 = vsel %vm2255_vm4, %v5550_v20, %v5552_v5  ;;  %v12417_v51 = vsel %vm1819_vm3, %v5287_v56, %v5289_v53  ;;  %v7634_v23 = vld [vmem:[%s14287_s5 + $0x2c8] sm:$0xff]  ;;  %v7633_v20 = vld [vmem:[%s14287_s5 + $0x2c0] sm:$0xff]  ;;  %v4382_v56 = vpop.f32.mrf.mxu0 }
 0x5bb   : > { %7557 = vmatmul.msk.f32.gmra.mxu0 %vm4505_vm8, %v5027_v2  ;;  %5700 = vmatpush.msrb.mxu1 %v7634_v23 }
 0x5bc   : > { %5635 = vmatpush.msrb.mxu0 %v7633_v20  ;;  %v12448_v20 = vpop.f32.mrf.mxu3 }
 0x5bd   : > { %v4468_v31 = vpop.f32.mrf.mxu1 }
 0x5be   : > { %v4469_v60 = vadd.f32 %v4468_v31, %v4379_v41 }
 0x5c0   : > { %7446 = vmatmul.msk.f32.gmra.mxu2 %vm4505_vm8, %v4469_v60  ;;  %7463 = vmatmul.msk.f32.gmra.mxu3 %vm4505_vm8, %v4469_v60  ;;  %v5028_v29 = vrot.slane %v4469_v60, 2  ;;  %v4765_v15 = vrot.slane %v4469_v60, 1  ;;  %v5554_v61 = vrot.slane %v4469_v60, 4  ;;  %v5291_v43 = vrot.slane %v4469_v60, 3  ;;  %v12446_v60 = vpop.f32.mrf.mxu2 }
 0x5c1   : > { %7574 = vmatmul.msk.f32.gmra.mxu1 %vm4505_vm8, %v5027_v2 }
 0x5c2   : > { %v4385_v62 = vpop.f32.mrf.mxu0 }
 0x5c5   : > { %v4471_v19 = vpop.f32.mrf.mxu1 }
 0x5c6   : > { %v4472_v4 = vadd.f32 %v4471_v19, %v4382_v56 }
 0x5c8   : > { %7447 = vmatmul.msk.f32.gmra.mxu2 %vm4505_vm8, %v4472_v4  ;;  %7464 = vmatmul.msk.f32.gmra.mxu3 %vm4505_vm8, %v4472_v4  ;;  %v5029_v39 = vrot.slane %v4472_v4, 2  ;;  %v4766_v17 = vrot.slane %v4472_v4, 1  ;;  %v5555_v5 = vrot.slane %v4472_v4, 4  ;;  %v5292_v41 = vrot.slane %v4472_v4, 3 }
 0x5ca   : > { %v5030_v11 = vsel %vm1383_vm2, %v5028_v29, %v5029_v39  ;;  %v12436_v53 = vsel %vm947_vm1, %v4765_v15, %v4766_v17  ;;  %v12439_v2 = vsel %vm2255_vm4, %v5554_v61, %v5555_v5  ;;  %v12442_v22 = vsel %vm1819_vm3, %v5291_v43, %v5292_v41 }
 0x5cb   : > { %7558 = vmatmul.msk.f32.gmra.mxu0 %vm4505_vm8, %v5030_v11  ;;  %7575 = vmatmul.msk.f32.gmra.mxu1 %vm4505_vm8, %v5030_v11 }
 0x5cd   : > { %v4474_v23 = vpop.f32.mrf.mxu1 }
 0x5ce   : > { %v4475_v31 = vadd.f32 %v4474_v23, %v4385_v62  ;;  %v12468_v62 = vpop.f32.mrf.mxu3  ;;  %v7593_v23 = vld [vmem:[%s14287_s5 + $0x290] sm:$0xff] }
 0x5d0   : > { %7488 = vmatmul.msk.f32.vlgmr.msra.gmra.mxu2 %vm4505_vm8, %v12008_v37  ;;  %7505 = vmatmul.msk.f32.vlgmr.msra.gmra.mxu3 %vm4505_vm8, %v12008_v37  ;;  %v5031_v56 = vrot.slane %v4475_v31, 2  ;;  %v4768_v19 = vrot.slane %v4475_v31, 1  ;;  %v5557_v4 = vrot.slane %v4475_v31, 4  ;;  %v5294_v29 = vrot.slane %v4475_v31, 3  ;;  %v12466_v37 = vpop.f32.mrf.mxu2 }
 0x5d2   : > { %v5032_v15 = vsel %vm1383_vm2, %v5029_v39, %v5031_v56  ;;  %v12456_v61 = vsel %vm947_vm1, %v4766_v17, %v4768_v19  ;;  %v12459_v43 = vsel %vm2255_vm4, %v5555_v5, %v5557_v4  ;;  %v12462_v11 = vsel %vm1819_vm3, %v5292_v41, %v5294_v29  ;;  %v7596_v41 = vld [vmem:[%s14287_s5 + $0x2a8] sm:$0xff]  ;;  %v7591_v29 = vld [vmem:[%s14287_s5 + $0x280] sm:$0xff] }
 0x5d3   : > { %7559 = vmatmul.msk.f32.gmra.mxu0 %vm4505_vm8, %v5032_v15  ;;  %7576 = vmatmul.msk.f32.gmra.mxu1 %vm4505_vm8, %v5032_v15  ;;  %v7592_v15 = vld [vmem:[%s14287_s5 + $0x288] sm:$0xff] }
 0x5d6   : > { %v12484_v17 = vpop.f32.mrf.mxu3 }
 0x5d8   : > { %7489 = vmatmul.msk.f32.gmra.mxu2 %vm4505_vm8, %v12041_v18  ;;  %7506 = vmatmul.msk.f32.gmra.mxu3 %vm4505_vm8, %v12041_v18  ;;  %v12482_v39 = vpop.f32.mrf.mxu2 }
 0x5db   : > { %7656 = vmatmul.msk.f32.vlgmr.msrb.gmra.mxu0 %vm4505_vm8, %v12011_v50  ;;  %7673 = vmatmul.msk.f32.vlgmr.msrb.gmra.mxu1 %vm4505_vm8, %v12011_v50 }
 0x5de   : > { %v12496_v18 = vpop.f32.mrf.mxu3 }
 0x5e0   : > { %7490 = vmatmul.msk.f32.gmra.mxu2 %vm4505_vm8, %v12090_v12  ;;  %7507 = vmatmul.msk.f32.gmra.mxu3 %vm4505_vm8, %v12090_v12  ;;  %v12494_v50 = vpop.f32.mrf.mxu2 }
 0x5e3   : > { %7657 = vmatmul.msk.f32.gmra.mxu0 %vm4505_vm8, %v12044_v9  ;;  %7674 = vmatmul.msk.f32.gmra.mxu1 %vm4505_vm8, %v12044_v9 }
 0x5e6   : > { %v12512_v12 = vpop.f32.mrf.mxu3 }
 0x5e8   : > { %7491 = vmatmul.msk.f32.gmra.mxu2 %vm4505_vm8, %v12108_v54  ;;  %7508 = vmatmul.msk.f32.gmra.mxu3 %vm4505_vm8, %v12108_v54  ;;  %v12510_v9 = vpop.f32.mrf.mxu2 }
 0x5eb   : > { %7658 = vmatmul.msk.f32.gmra.mxu0 %vm4505_vm8, %v12093_v21  ;;  %7675 = vmatmul.msk.f32.gmra.mxu1 %vm4505_vm8, %v12093_v21 }
 0x5ee   : > { %v12524_v54 = vpop.f32.mrf.mxu3 }
 0x5f0   : > { %7492 = vmatmul.msk.f32.gmra.mxu2 %vm4505_vm8, %v12131_v47  ;;  %7509 = vmatmul.msk.f32.gmra.mxu3 %vm4505_vm8, %v12131_v47  ;;  %v12522_v21 = vpop.f32.mrf.mxu2 }
 0x5f3   : > { %7659 = vmatmul.msk.f32.gmra.mxu0 %vm4505_vm8, %v12111_v36  ;;  %7676 = vmatmul.msk.f32.gmra.mxu1 %vm4505_vm8, %v12111_v36 }
 0x5f6   : > { %v12536_v47 = vpop.f32.mrf.mxu3 }
 0x5f8   : > { %7493 = vmatmul.msk.f32.gmra.mxu2 %vm4505_vm8, %v12145_v63  ;;  %7510 = vmatmul.msk.f32.gmra.mxu3 %vm4505_vm8, %v12145_v63  ;;  %v12534_v36 = vpop.f32.mrf.mxu2 }
 0x5fb   : > { %7660 = vmatmul.msk.f32.gmra.mxu0 %vm4505_vm8, %v12134_v10  ;;  %7677 = vmatmul.msk.f32.gmra.mxu1 %vm4505_vm8, %v12134_v10  ;;  %v12546_v10 = vpop.f32.mrf.mxu1 }
 0x600   : > { %7494 = vmatmul.msk.f32.gmra.mxu2 %vm4505_vm8, %v12164_v40  ;;  %7511 = vmatmul.msk.f32.gmra.mxu3 %vm4505_vm8, %v12164_v40  ;;  %v12548_v63 = vpop.f32.mrf.mxu2  ;;  %v12556_v40 = vpop.f32.mrf.mxu0 }
 0x603   : > { %7661 = vmatmul.msk.f32.gmra.mxu0 %vm4505_vm8, %v12148_v27  ;;  %7678 = vmatmul.msk.f32.gmra.mxu1 %vm4505_vm8, %v12148_v27  ;;  %v12550_v27 = vpop.f32.mrf.mxu3 }
 0x608   : > { %7495 = vmatmul.msk.f32.gmra.mxu2 %vm4505_vm8, %v12177_v26  ;;  %7512 = vmatmul.msk.f32.gmra.mxu3 %vm4505_vm8, %v12177_v26  ;;  %v12564_v26 = vpop.f32.mrf.mxu2  ;;  %v12593_v31 = vpop.f32.mrf.mxu0 }
 0x60b   : > { %7662 = vmatmul.msk.f32.gmra.mxu0 %vm4505_vm8, %v12167_v13  ;;  %7679 = vmatmul.msk.f32.gmra.mxu1 %vm4505_vm8, %v12167_v13  ;;  %v12562_v13 = vpop.f32.mrf.mxu1  ;;  %v12566_v5 = vpop.f32.mrf.mxu3 }
 0x610   : > { %7496 = vmatmul.msk.f32.gmra.mxu2 %vm4505_vm8, %v12194_v24  ;;  %7513 = vmatmul.msk.f32.gmra.mxu3 %vm4505_vm8, %v12194_v24  ;;  %v7597_v24 = vld [vmem:[%s14287_s5 + $0x2b0] sm:$0xf] }
 0x611   : > { %7599 = vmatpush.msk.msrb.mxu2 %vm2255_vm4, %v7597_v24  ;;  %v12618_v24 = vpop.f32.mrf.mxu0 }
 0x612   : > { %14809 = vst [vmem:[#allocation78_spill] sm:$0xff] %v12618_v24 }
 0x613   : > { %7663 = vmatmul.msk.f32.gmra.mxu0 %vm4505_vm8, %v12180_v0  ;;  %7680 = vmatmul.msk.f32.gmra.mxu1 %vm4505_vm8, %v12180_v0  ;;  %v7598_v0 = vld [vmem:[%s14287_s5 + $0x2b8] sm:$0xf]  ;;  %v12598_v56 = vpop.f32.mrf.mxu2  ;;  %v12602_v4 = vpop.f32.mrf.mxu1 }
 0x614   : > { %7616 = vmatpush.msk.msrb.mxu3 %vm2255_vm4, %v7598_v0  ;;  %v12600_v19 = vpop.f32.mrf.mxu3  ;;  %14808 = vst [vmem:[#allocation77_spill] sm:$0xff] %v12602_v4  ;;  %v7590_v0 = vld [vmem:[%s14287_s5 + $0x278] sm:$0xff] }
 0x616   : > { %5428 = vmatpush.msrb.mxu3 %v7596_v41  ;;  %v7585_v41 = vld [vmem:[%s14287_s5 + $0x250] sm:$0xff] }
 0x618   : > { %7497 = vmatmul.msk.f32.gmra.mxu2 %vm4505_vm8, %v12206_v30  ;;  %7514 = vmatmul.msk.f32.gmra.mxu3 %vm4505_vm8, %v12206_v30  ;;  %v7595_v30 = vld [vmem:[%s14287_s5 + $0x2a0] sm:$0xff] }
 0x619   : > { %5363 = vmatpush.msrb.mxu2 %v7595_v30  ;;  %v7587_v30 = vld [vmem:[%s14287_s5 + $0x260] sm:$0xff] }
 0x61b   : > { %7664 = vmatmul.msk.f32.gmra.mxu0 %vm4505_vm8, %v12197_v28  ;;  %7681 = vmatmul.msk.f32.gmra.mxu1 %vm4505_vm8, %v12197_v28  ;;  %v7594_v28 = vld [vmem:[%s14287_s5 + $0x298] sm:$0xff] }
 0x61c   : > { %5364 = vmatpush.msrb.mxu2 %v7593_v23  ;;  %5429 = vmatpush.msrb.mxu3 %v7594_v28  ;;  %v7586_v23 = vld [vmem:[%s14287_s5 + $0x258] sm:$0xff]  ;;  %v12642_v28 = vpop.f32.mrf.mxu2 }
 0x61e   : > { %5365 = vmatpush.msrb.mxu2 %v7591_v29  ;;  %5430 = vmatpush.msrb.mxu3 %v7592_v15  ;;  %v12644_v29 = vpop.f32.mrf.mxu3  ;;  %v7583_v15 = vld [vmem:[%s14287_s5 + $0x240] sm:$0xff] }
 0x620   : > { %7498 = vmatmul.msk.f32.gmra.mxu2 %vm4505_vm8, %v12231_v34  ;;  %7515 = vmatmul.msk.f32.gmra.mxu3 %vm4505_vm8, %v12231_v34  ;;  %v7589_v34 = vld [vmem:[%s14287_s5 + $0x270] sm:$0xff] }
 0x621   : > { %5366 = vmatpush.msrb.mxu2 %v7589_v34  ;;  %5431 = vmatpush.msrb.mxu3 %v7590_v0  ;;  %v7584_v34 = vld [vmem:[%s14287_s5 + $0x248] sm:$0xff]  ;;  %v12652_v0 = vpop.f32.mrf.mxu1 }
 0x622   : > { %14810 = vst [vmem:[#allocation79_spill] sm:$0xff] %v12652_v0 }
 0x623   : > { %7665 = vmatmul.msk.f32.gmra.mxu0 %vm4505_vm8, %v12209_v58  ;;  %7682 = vmatmul.msk.f32.gmra.mxu1 %vm4505_vm8, %v12209_v58  ;;  %v7588_v58 = vld [vmem:[%s14287_s5 + $0x268] sm:$0xff] }
 0x624   : > { %5367 = vmatpush.msrb.mxu2 %v7587_v30  ;;  %5432 = vmatpush.msrb.mxu3 %v7588_v58  ;;  %v7582_v30 = vld [vmem:[%s14287_s5 + $0x238] sm:$0xff]  ;;  %v12664_v58 = vpop.f32.mrf.mxu0 }
 0x625   : > { %14811 = vst [vmem:[#allocation80_spill] sm:$0xff] %v12664_v58 }
 0x626   : > { %5368 = vmatpush.msrb.mxu2 %v7585_v41  ;;  %5433 = vmatpush.msrb.mxu3 %v7586_v23  ;;  %v7579_v41 = vld [vmem:[%s14287_s5 + $0x220] sm:$0xff] }
 0x628   : > { %7499 = vmatmul.msk.f32.gmra.mxu2 %vm4505_vm8, %v12264_v42  ;;  %7516 = vmatmul.msk.f32.gmra.mxu3 %vm4505_vm8, %v12264_v42  ;;  %v7581_v42 = vld [vmem:[%s14287_s5 + $0x230] sm:$0xff] }
 0x629   : > { %5369 = vmatpush.msrb.mxu2 %v7583_v15  ;;  %5434 = vmatpush.msrb.mxu3 %v7584_v34  ;;  %v7577_v34 = vld [vmem:[%s14287_s5 + $0x210] sm:$0xff] }
 0x62b   : > { %7666 = vmatmul.msk.f32.gmra.mxu0 %vm4505_vm8, %v12234_v38  ;;  %7683 = vmatmul.msk.f32.gmra.mxu1 %vm4505_vm8, %v12234_v38  ;;  %v7580_v38 = vld [vmem:[%s14287_s5 + $0x228] sm:$0xff]  ;;  %v12676_v23 = vpop.f32.mrf.mxu2 }
 0x62c   : > { %5370 = vmatpush.msrb.mxu2 %v7581_v42  ;;  %5435 = vmatpush.msrb.mxu3 %v7582_v30  ;;  %v12678_v15 = vpop.f32.mrf.mxu3  ;;  %v7578_v42 = vld [vmem:[%s14287_s5 + $0x218] sm:$0xff]  ;;  %v12692_v30 = vpop.f32.mrf.mxu0 }
 0x62d   : > { %14813 = vst [vmem:[#allocation82_spill] sm:$0xff] %v12692_v30 }
 0x62e   : > { %5371 = vmatpush.msrb.mxu2 %v7579_v41  ;;  %5436 = vmatpush.msrb.mxu3 %v7580_v38 }
 0x630   : > { %7500 = vmatmul.msk.f32.gmra.mxu2 %vm4505_vm8, %v12371_v48  ;;  %7517 = vmatmul.msk.f32.gmra.mxu3 %vm4505_vm8, %v12371_v48  ;;  %v12690_v48 = vpop.f32.mrf.mxu1 }
 0x631   : > { %14812 = vst [vmem:[#allocation81_spill] sm:$0xff] %v12690_v48  ;;  %5372 = vmatpush.msrb.mxu2 %v7577_v34  ;;  %5437 = vmatpush.msrb.mxu3 %v7578_v42 }
 0x633   : > { %7667 = vmatmul.msk.f32.gmra.mxu0 %vm4505_vm8, %v12267_v44  ;;  %7684 = vmatmul.msk.f32.gmra.mxu1 %vm4505_vm8, %v12267_v44  ;;  %v12698_v41 = vpop.f32.mrf.mxu2 }
 0x634   : > { %v12700_v38 = vpop.f32.mrf.mxu3  ;;  %v12708_v34 = vpop.f32.mrf.mxu0 }
 0x635   : > { %14815 = vst [vmem:[#allocation84_spill] sm:$0xff] %v12708_v34 }
 0x638   : > { %7501 = vmatmul.msk.f32.gmra.mxu2 %vm4505_vm8, %v12407_v45  ;;  %7518 = vmatmul.msk.f32.gmra.mxu3 %vm4505_vm8, %v12407_v45  ;;  %v12706_v44 = vpop.f32.mrf.mxu1 }
 0x639   : > { %14814 = vst [vmem:[#allocation83_spill] sm:$0xff] %v12706_v44 }
 0x63b   : > { %7668 = vmatmul.msk.f32.gmra.mxu0 %vm4505_vm8, %v12374_v49  ;;  %7685 = vmatmul.msk.f32.gmra.mxu1 %vm4505_vm8, %v12374_v49 }
 0x63c   : > { %v12722_v49 = vpop.f32.mrf.mxu0 }
 0x63d   : > { %14816 = vst [vmem:[#allocation85_spill] sm:$0xff] %v12722_v49 }
 0x640   : > { %7502 = vmatmul.msk.f32.gmra.mxu2 %vm4505_vm8, %v12436_v53  ;;  %7519 = vmatmul.msk.f32.gmra.mxu3 %vm4505_vm8, %v12436_v53  ;;  %v12724_v44 = vpop.f32.mrf.mxu1 }
 0x641   : > { %14817 = vst [vmem:[#allocation87_spill] sm:$0xff] %v12724_v44 }
 0x643   : > { %v12714_v45 = vpop.f32.mrf.mxu2  ;;  %v12716_v42 = vpop.f32.mrf.mxu3  ;;  %7669 = vmatmul.msk.f32.gmra.mxu0 %vm4505_vm8, %v12410_v14  ;;  %7686 = vmatmul.msk.f32.gmra.mxu1 %vm4505_vm8, %v12410_v14 }
 0x644   : > { %v12742_v14 = vpop.f32.mrf.mxu0 }
 0x645   : > { %14818 = vst [vmem:[#allocation86_spill] sm:$0xff] %v12742_v14 }
 0x648   : > { %7503 = vmatmul.msk.f32.gmra.mxu2 %vm4505_vm8, %v12456_v61  ;;  %7520 = vmatmul.msk.f32.gmra.mxu3 %vm4505_vm8, %v12456_v61  ;;  %v12744_v44 = vpop.f32.mrf.mxu1 }
 0x649   : > { %14819 = vst [vmem:[#allocation88_spill] sm:$0xff] %v12744_v44 }
 0x64b   : > { %v12730_v53 = vpop.f32.mrf.mxu2  ;;  %v12732_v34 = vpop.f32.mrf.mxu3  ;;  %7670 = vmatmul.msk.f32.gmra.mxu0 %vm4505_vm8, %v12439_v2  ;;  %7687 = vmatmul.msk.f32.gmra.mxu1 %vm4505_vm8, %v12439_v2 }
 0x64c   : > { %v12788_v0 = vpop.f32.mrf.mxu0 }
 0x64d   : > { %14821 = vst [vmem:[#allocation91_spill] sm:$0xff] %v12788_v0 }
 0x650   : > { %7600 = vmatmul.msk.f32.vlgmr.msrb.gmra.mxu2 %vm4505_vm8, %v12014_v8  ;;  %7617 = vmatmul.msk.f32.vlgmr.msrb.gmra.mxu3 %vm4505_vm8, %v12014_v8 }
 0x653   : > { %v12746_v61 = vpop.f32.mrf.mxu2  ;;  %v12748_v49 = vpop.f32.mrf.mxu3  ;;  %7671 = vmatmul.msk.f32.gmra.mxu0 %vm4505_vm8, %v12459_v43  ;;  %7688 = vmatmul.msk.f32.gmra.mxu1 %vm4505_vm8, %v12459_v43 }
 0x658   : > { %7601 = vmatmul.msk.f32.gmra.mxu2 %vm4505_vm8, %v12049_v57  ;;  %7618 = vmatmul.msk.f32.gmra.mxu3 %vm4505_vm8, %v12049_v57 }
 0x65b   : > { %v12758_v8 = vpop.f32.mrf.mxu2  ;;  %v12760_v2 = vpop.f32.mrf.mxu3 }
 0x660   : > { %7602 = vmatmul.msk.f32.gmra.mxu2 %vm4505_vm8, %v12096_v3  ;;  %7619 = vmatmul.msk.f32.gmra.mxu3 %vm4505_vm8, %v12096_v3  ;;  %v12782_v3 = vpop.f32.mrf.mxu1 }
 0x661   : > { %14820 = vst [vmem:[#allocation90_spill] sm:$0xff] %v12782_v3 }
 0x663   : > { %v12766_v44 = vpop.f32.mrf.mxu2  ;;  %v12768_v14 = vpop.f32.mrf.mxu3 }
 0x668   : > { %7603 = vmatmul.msk.f32.gmra.mxu2 %vm4505_vm8, %v12114_v25  ;;  %7620 = vmatmul.msk.f32.gmra.mxu3 %vm4505_vm8, %v12114_v25  ;;  %v12798_v4 = vpop.f32.mrf.mxu1 }
 0x669   : > { %14823 = vst [vmem:[#allocation92_spill] sm:$0xff] %v12798_v4 }
 0x66b   : > { %v12774_v57 = vpop.f32.mrf.mxu2  ;;  %v12776_v43 = vpop.f32.mrf.mxu3 }
 0x670   : > { %7604 = vmatmul.msk.f32.gmra.mxu2 %vm4505_vm8, %v12137_v7  ;;  %7621 = vmatmul.msk.f32.gmra.mxu3 %vm4505_vm8, %v12137_v7  ;;  %v12800_v7 = vpop.f32.mrf.mxu0 }
 0x671   : > { %14824 = vst [vmem:[#allocation93_spill] sm:$0xff] %v12800_v7 }
 0x673   : > { %v12784_v48 = vpop.f32.mrf.mxu2  ;;  %v12786_v30 = vpop.f32.mrf.mxu3 }
 0x678   : > { %7605 = vmatmul.msk.f32.gmra.mxu2 %vm4505_vm8, %v12151_v52  ;;  %7622 = vmatmul.msk.f32.gmra.mxu3 %vm4505_vm8, %v12151_v52  ;;  %v12810_v24 = vpop.f32.mrf.mxu0  ;;  %v12812_v52 = vpop.f32.mrf.mxu1 }
 0x679   : > { %14826 = vst [vmem:[#allocation95_spill] sm:$0xff] %v12810_v24 }
 0x67a   : > { %14827 = vst [vmem:[#allocation96_spill] sm:$0xff] %v12812_v52 }
 0x67b   : > { %v12794_v25 = vpop.f32.mrf.mxu2  ;;  %v12796_v58 = vpop.f32.mrf.mxu3 }
 0x67c   : > { %14822 = vst [vmem:[#allocation89_spill] sm:$0xff] %v12796_v58 }
 0x680   : > { %7606 = vmatmul.msk.f32.gmra.mxu2 %vm4505_vm8, %v12170_v16  ;;  %7623 = vmatmul.msk.f32.gmra.mxu3 %vm4505_vm8, %v12170_v16  ;;  %v12822_v58 = vpop.f32.mrf.mxu0  ;;  %v12824_v16 = vpop.f32.mrf.mxu1 }
 0x681   : > { %14828 = vst [vmem:[#allocation97_spill] sm:$0xff] %v12822_v58 }
 0x682   : > { %14829 = vst [vmem:[#allocation98_spill] sm:$0xff] %v12824_v16 }
 0x683   : > { %v12806_v3 = vpop.f32.mrf.mxu2  ;;  %v12808_v0 = vpop.f32.mrf.mxu3 }
 0x684   : > { %14825 = vst [vmem:[#allocation94_spill] sm:$0xff] %v12808_v0 }
 0x688   : > { %7607 = vmatmul.msk.f32.gmra.mxu2 %vm4505_vm8, %v12183_v35  ;;  %7624 = vmatmul.msk.f32.gmra.mxu3 %vm4505_vm8, %v12183_v35  ;;  %v12834_v0 = vpop.f32.mrf.mxu0  ;;  %v12840_v35 = vpop.f32.mrf.mxu1 }
 0x689   : > { %14832 = vst [vmem:[#allocation100_spill] sm:$0xff] %v12834_v0 }
 0x68a   : > { %14833 = vst [vmem:[#allocation101_spill] sm:$0xff] %v12840_v35 }
 0x68b   : > { %v12818_v4 = vpop.f32.mrf.mxu2  ;;  %v12820_v7 = vpop.f32.mrf.mxu3 }
 0x690   : > { %7608 = vmatmul.msk.f32.gmra.mxu2 %vm4505_vm8, %v12200_v1  ;;  %7625 = vmatmul.msk.f32.gmra.mxu3 %vm4505_vm8, %v12200_v1  ;;  %v12850_v1 = vpop.f32.mrf.mxu0 }
 0x691   : > { %14835 = vst [vmem:[#allocation106_spill] sm:$0xff] %v12850_v1 }
 0x693   : > { %v12830_v52 = vpop.f32.mrf.mxu2  ;;  %v12832_v24 = vpop.f32.mrf.mxu3 }
 0x694   : > { %14830 = vst [vmem:[#allocation99_spill] sm:$0xff] %v12830_v52  ;;  %v12856_v52 = vpop.f32.mrf.mxu1 }
 0x695   : > { %14831 = vst [vmem:[#allocation102_spill] sm:$0xff] %v12832_v24 }
 0x696   : > { %14837 = vst [vmem:[#allocation105_spill] sm:$0xff] %v12856_v52 }
 0x698   : > { %7609 = vmatmul.msk.f32.gmra.mxu2 %vm4505_vm8, %v12212_v33  ;;  %7626 = vmatmul.msk.f32.gmra.mxu3 %vm4505_vm8, %v12212_v33  ;;  %v12862_v33 = vpop.f32.mrf.mxu0 }
 0x699   : > { %14838 = vst [vmem:[#allocation107_spill] sm:$0xff] %v12862_v33 }
 0x69b   : > { %v12842_v16 = vpop.f32.mrf.mxu2  ;;  %v12844_v58 = vpop.f32.mrf.mxu3 }
 0x69c   : > { %14834 = vst [vmem:[#allocation103_spill] sm:$0xff] %v12844_v58 }
 0x6a0   : > { %7610 = vmatmul.msk.f32.gmra.mxu2 %vm4505_vm8, %v12237_v6  ;;  %7627 = vmatmul.msk.f32.gmra.mxu3 %vm4505_vm8, %v12237_v6  ;;  %v12868_v6 = vpop.f32.mrf.mxu1 }
 0x6a1   : > { %14841 = vst [vmem:[#allocation110_spill] sm:$0xff] %v12868_v6 }
 0x6a3   : > { %v12852_v0 = vpop.f32.mrf.mxu2  ;;  %v12854_v24 = vpop.f32.mrf.mxu3 }
 0x6a4   : > { %14836 = vst [vmem:[#allocation104_spill] sm:$0xff] %v12854_v24  ;;  %v12878_v24 = vpop.f32.mrf.mxu0 }
 0x6a5   : > { %14844 = vst [vmem:[#allocation24_spill] sm:$0xff] %v12878_v24  ;;  %v4477_v24 = vld [vmem:[%s14288_s6] sm:$0x3] }
 0x6a8   : > { %7611 = vmatmul.msk.f32.gmra.mxu2 %vm4505_vm8, %v12274_v59  ;;  %7628 = vmatmul.msk.f32.gmra.mxu3 %vm4505_vm8, %v12274_v59  ;;  %v12880_v59 = vpop.f32.mrf.mxu1 }
 0x6a9   : > { %14845 = vst [vmem:[#allocation18_spill] sm:$0xff] %v12880_v59  ;;  %v6405_v59 = vld [vmem:[%s14289_s7 + $0x78] sm:$0xff] }
 0x6aa   : > { %6458 = vmatpush.msra.mxu2 %v6405_v59  ;;  %v12916_v59 = vperm.slane %v4477_v24, 1 }
 0x6ab   : > { %v12864_v35 = vpop.f32.mrf.mxu2  ;;  %v12866_v58 = vpop.f32.mrf.mxu3 }
 0x6ac   : > { %14839 = vst [vmem:[#allocation108_spill] sm:$0xff] %v12864_v35 }
 0x6ad   : > { %14840 = vst [vmem:[#allocation109_spill] sm:$0xff] %v12866_v58  ;;  %v12890_v58 = vpop.f32.mrf.mxu0 }
 0x6b0   : > { %7612 = vmatmul.msk.f32.gmra.mxu2 %vm4505_vm8, %v12381_v46  ;;  %7629 = vmatmul.msk.f32.gmra.mxu3 %vm4505_vm8, %v12381_v46  ;;  %v12892_v46 = vpop.f32.mrf.mxu1 }
 0x6b3   : > { %v12874_v52 = vpop.f32.mrf.mxu2  ;;  %v12876_v1 = vpop.f32.mrf.mxu3 }
 0x6b4   : > { %14842 = vst [vmem:[#allocation111_spill] sm:$0xff] %v12874_v52  ;;  %v6402_v52 = vld [vmem:[%s14289_s7 + $0x60] sm:$0xff] }
 0x6b5   : > { %14843 = vst [vmem:[#allocation17_spill] sm:$0xff] %v12876_v1  ;;  %v12914_v1 = vperm.slane %v4477_v24, 0  ;;  %v12921_v35 = vpop.f32.mrf.mxu0 }
 0x6b6   : > { %14850 = vst [vmem:[#allocation53_spill] sm:$0xff] %v12921_v35 }
 0x6b7   : > { %v4690_v24 = vadd.f32 %v12428_v55, %v12914_v1  ;;  %v4695_v55 = vadd.f32 %v12468_v62, %v12916_v59  ;;  %v6399_v62 = vld [vmem:[%s14289_s7 + $0x48] sm:$0xff] }
 0x6b8   : > { %7613 = vmatmul.msk.f32.gmra.mxu2 %vm4505_vm8, %v12417_v51  ;;  %7630 = vmatmul.msk.f32.gmra.mxu3 %vm4505_vm8, %v12417_v51  ;;  %v6404_v51 = vld [vmem:[%s14289_s7 + $0x70] sm:$0xff] }
 0x6b9   : > { %6459 = vmatpush.msra.mxu2 %v6404_v51  ;;  %v6401_v51 = vld [vmem:[%s14289_s7 + $0x58] sm:$0xff] }
 0x6bb   : > { %v12886_v6 = vpop.f32.mrf.mxu2  ;;  %v12888_v33 = vpop.f32.mrf.mxu3 }
 0x6bc   : > { %14846 = vst [vmem:[#allocation19_spill] sm:$0xff] %v12886_v6 }
 0x6bd   : > { %14847 = vst [vmem:[#allocation25_spill] sm:$0xff] %v12888_v33 }
 0x6c0   : > { %7614 = vmatmul.msk.f32.gmra.mxu2 %vm4505_vm8, %v12442_v22  ;;  %7631 = vmatmul.msk.f32.gmra.mxu3 %vm4505_vm8, %v12442_v22  ;;  %v6403_v22 = vld [vmem:[%s14289_s7 + $0x68] sm:$0xff] }
 0x6c1   : > { %6460 = vmatpush.msra.mxu2 %v6403_v22  ;;  %v4691_v22 = vadd.f32 %v12430_v32, %v12916_v59 }
 0x6c3   : > { %v12907_v33 = vpop.f32.mrf.mxu2  ;;  %v12909_v6 = vpop.f32.mrf.mxu3  ;;  %6461 = vmatpush.msra.mxu2 %v6402_v52 }
 0x6c4   : > { %14848 = vst [vmem:[#allocation36_spill] sm:$0xff] %v12907_v33  ;;  %v12934_v52 = vpop.f32.mrf.mxu1  ;;  %v4693_v33 = vadd.f32 %v12448_v20, %v12916_v59  ;;  %v4698_v20 = vadd.f32 %v12494_v50, %v12914_v1  ;;  %v12978_v50 = vadd.f32 %v12534_v36, %v12914_v1  ;;  %v12995_v36 = vadd.f32 %v12550_v27, %v12916_v59 }
 0x6c5   : > { %14849 = vst [vmem:[#allocation16_spill] sm:$0xff] %v12909_v6  ;;  %6462 = vmatpush.msra.mxu2 %v6401_v51  ;;  %v6400_v6 = vld [vmem:[%s14289_s7 + $0x50] sm:$0xff]  ;;  %v4694_v51 = vadd.f32 %v12466_v37, %v12914_v1  ;;  %v4699_v37 = vadd.f32 %v12496_v18, %v12916_v59  ;;  %v12982_v18 = vadd.f32 %v12536_v47, %v12916_v59 }
 0x6c6   : > { %14851 = vst [vmem:[#allocation124_spill] sm:$0xff] %v12934_v52  ;;  %v4696_v52 = vadd.f32 %v12482_v39, %v12914_v1  ;;  %v12970_v39 = vadd.f32 %v12522_v21, %v12914_v1  ;;  %v6398_v21 = vld [vmem:[%s14289_s7 + $0x40] sm:$0xff]  ;;  %v12999_v47 = vadd.f32 %v12564_v26, %v12914_v1  ;;  %v13015_v27 = vadd.f32 %v12642_v28, %v12914_v1 }
 0x6c7   : > { %6463 = vmatpush.msra.mxu2 %v6400_v6  ;;  %v12966_v6 = vadd.f32 %v12512_v12, %v12916_v59  ;;  %v4962_v12 = vadd.f32 %v12748_v49, %v4691_v22  ;;  %v13007_v49 = vadd.f32 %v12598_v56, %v12914_v1  ;;  %v13019_v26 = vadd.f32 %v12644_v29, %v12916_v59  ;;  %v13045_v22 = vpop.f32.mrf.mxu0 }
 0x6c8   : > { %7615 = vmatmul.msk.f32.gmra.mxu2 %vm4505_vm8, %v12462_v11  ;;  %7632 = vmatmul.msk.f32.gmra.mxu3 %vm4505_vm8, %v12462_v11  ;;  %v4692_v11 = vadd.f32 %v12446_v60, %v12914_v1  ;;  %v4697_v60 = vadd.f32 %v12484_v17, %v12916_v59  ;;  %v12974_v17 = vadd.f32 %v12524_v54, %v12916_v59 }
 0x6c9   : > { %6464 = vmatpush.msra.mxu2 %v6399_v62  ;;  %v12991_v54 = vadd.f32 %v12548_v63, %v12914_v1  ;;  %v13011_v63 = vadd.f32 %v12600_v19, %v12916_v59  ;;  %v13026_v56 = vadd.f32 %v12676_v23, %v12914_v1  ;;  %v13030_v19 = vadd.f32 %v12678_v15, %v12916_v59 }
 0x6ca   : > { %v13034_v28 = vadd.f32 %v12698_v41, %v12914_v1  ;;  %v13038_v29 = vadd.f32 %v12700_v38, %v12916_v59  ;;  %v4963_v23 = vadd.f32 %v12758_v8, %v4692_v11  ;;  %v5225_v62 = vadd.f32 %v12546_v10, %v4962_v12  ;;  %v6396_v41 = vld [vmem:[%s14289_s7 + $0x30] sm:$0xff] }
 0x6cb   : > { %v12947_v35 = vpop.f32.mrf.mxu2  ;;  %v12949_v32 = vpop.f32.mrf.mxu3  ;;  %6465 = vmatpush.msra.mxu2 %v6398_v21  ;;  %v4964_v38 = vadd.f32 %v12760_v2, %v4693_v33  ;;  %v4965_v21 = vadd.f32 %v12766_v44, %v4694_v51  ;;  %v4969_v10 = vadd.f32 %v12784_v48, %v4698_v20  ;;  %v6395_v2 = vld [vmem:[%s14289_s7 + $0x28] sm:$0xff]  ;;  %v13065_v44 = vadd.f32 %v12716_v42, %v12916_v59 }
 0x6cc   : > { %14852 = vst [vmem:[#allocation20_spill] sm:$0xff] %v12947_v35  ;;  %v13056_v11 = vpop.f32.mrf.mxu1  ;;  %v13075_v48 = vadd.f32 %v12732_v34, %v12916_v59  ;;  %v5226_v42 = vadd.f32 %v12593_v31, %v4963_v23  ;;  %v14856_v34 = vld [vmem:[#allocation80_spill] sm:$0xff] }
 0x6cd   : > { %14853 = vst [vmem:[#allocation21_spill] sm:$0xff] %v12949_v32  ;;  %v4700_v32 = vadd.f32 %v12510_v9, %v12914_v1  ;;  %v4961_v9 = vadd.f32 %v12746_v61, %v4690_v24  ;;  %v13003_v61 = vadd.f32 %v12566_v5, %v12916_v59  ;;  %v6397_v5 = vld [vmem:[%s14289_s7 + $0x38] sm:$0xff]  ;;  %v13042_v24 = vadd.f32 %v12714_v45, %v12914_v1 }
 0x6ce   : > { %6466 = vmatpush.msra.mxu2 %v6397_v5  ;;  %v4966_v5 = vadd.f32 %v12768_v14, %v4695_v55  ;;  %v4967_v45 = vadd.f32 %v12774_v57, %v4696_v52  ;;  %v13069_v14 = vadd.f32 %v12730_v53, %v12914_v1  ;;  %v4970_v57 = vadd.f32 %v12786_v30, %v4699_v37  ;;  %v6394_v53 = vld [vmem:[%s14289_s7 + $0x20] sm:$0xff]  ;;  %v14854_v30 = vld [vmem:[#allocation78_spill] sm:$0xff]  ;;  %v14857_v55 = vld [vmem:[#allocation79_spill] sm:$0xff] }
 0x6cf   : > { %v5224_v15 = vadd.f32 %v12556_v40, %v4961_v9  ;;  %v4968_v40 = vadd.f32 %v12776_v43, %v4697_v60  ;;  %v4971_v43 = vadd.f32 %v12794_v25, %v4700_v32  ;;  %v5227_v1 = vadd.f32 %v12562_v13, %v4964_v38  ;;  %v14855_v25 = vld [vmem:[#allocation77_spill] sm:$0xff]  ;;  %v6393_v32 = vld [vmem:[%s14289_s7 + $0x18] sm:$0xff]  ;;  %v14858_v60 = vld [vmem:[#allocation82_spill] sm:$0xff] }
 0x6d0   : > { %6467 = vmatpush.msra.mxu2 %v6396_v41  ;;  %v13085_v52 = vadd.f32 %v14854_v30, %v4965_v21  ;;  %v13088_v51 = vadd.f32 %v14855_v25, %v4966_v5  ;;  %v13091_v59 = vadd.f32 %v14856_v34, %v4967_v45  ;;  %v6409_v13 = vld [vmem:[%s14289_s7 + $0x98] sm:$0xff]  ;;  %v13103_v20 = vadd.f32 %v14858_v60, %v4969_v10  ;;  %v14859_v37 = vld [vmem:[#allocation89_spill] sm:$0xff]  ;;  %v14861_v41 = vld [vmem:[#allocation84_spill] sm:$0xff] }
 0x6d1   : > { %v13094_v31 = vadd.f32 %v14857_v55, %v4968_v40  ;;  %v4972_v23 = vadd.f32 %v14859_v37, %v12966_v6  ;;  %6535 = vmatpush.msra.mxu3 %v6409_v13  ;;  %v13111_v38 = vadd.f32 %v14861_v41, %v4971_v43  ;;  %v4973_v21 = vadd.f32 %v12806_v3, %v12970_v39  ;;  %v14862_v5 = vld [vmem:[#allocation94_spill] sm:$0xff]  ;;  %v14863_v3 = vld [vmem:[#allocation99_spill] sm:$0xff]  ;;  %v14867_v25 = vld [vmem:[#allocation124_spill] sm:$0xff] }
 0x6d2   : > { %6468 = vmatpush.msra.mxu2 %v6395_v2  ;;  %v4974_v45 = vadd.f32 %v14862_v5, %v12974_v17  ;;  %v6392_v6 = vld [vmem:[%s14289_s7 + $0x10] sm:$0xff]  ;;  %v4977_v39 = vadd.f32 %v14863_v3, %v12991_v54  ;;  %v14872_v60 = vld [vmem:[#allocation88_spill] sm:$0xff]  ;;  %v14873_v5 = vld [vmem:[#allocation91_spill] sm:$0xff] }
 0x6d3   : > { %v5374_v35 = vpop.f32.mrf.mxu2  ;;  %v5439_v8 = vpop.f32.mrf.mxu3  ;;  %v6408_v10 = vld [vmem:[%s14289_s7 + $0x90] sm:$0xff]  ;;  %v14877_v3 = vld [vmem:[#allocation92_spill] sm:$0xff] }
 0x6d4   : > { %v5487_v9 = vadd.f32 %v5374_v35, %v5224_v15  ;;  %v5488_v12 = vadd.f32 %v5439_v8, %v5225_v62  ;;  %6469 = vmatpush.msra.mxu2 %v6394_v53  ;;  %v14860_v15 = vld [vmem:[#allocation81_spill] sm:$0xff]  ;;  %6536 = vmatpush.msra.mxu3 %v6408_v10  ;;  %v14864_v43 = vld [vmem:[#allocation102_spill] sm:$0xff] }
 0x6d5   : > { %v13108_v62 = vadd.f32 %v14860_v15, %v4970_v57  ;;  %v13129_v57 = vpop.f32.mrf.mxu0  ;;  %v14876_v10 = vld [vmem:[#allocation93_spill] sm:$0xff] }
 0x6d6   : > { %v5750_v35 = vadd.f32 %v12890_v58, %v5487_v9  ;;  %v5751_v33 = vadd.f32 %v12892_v46, %v5488_v12  ;;  %6470 = vmatpush.msra.mxu2 %v6393_v32  ;;  %v4975_v9 = vadd.f32 %v12818_v4, %v12978_v50  ;;  %v4976_v12 = vadd.f32 %v12820_v7, %v12982_v18  ;;  %v6391_v4 = vld [vmem:[%s14289_s7 + $0x8] sm:$0xff]  ;;  %v14865_v18 = vld [vmem:[#allocation103_spill] sm:$0xff]  ;;  %v14871_v32 = vld [vmem:[#allocation86_spill] sm:$0xff] }
 0x6d7   : > { %v6407_v7 = vld [vmem:[%s14289_s7 + $0x88] sm:$0xff]  ;;  %v4979_v50 = vadd.f32 %v12842_v16, %v12999_v47  ;;  %v4980_v54 = vadd.f32 %v14865_v18, %v13003_v61  ;;  %v6406_v16 = vld [vmem:[%s14289_s7 + $0x80] sm:$0xff]  ;;  %v14868_v47 = vld [vmem:[#allocation83_spill] sm:$0xff] }
 0x6d8   : > { %v5782_v58 = vsub.f32 0.0, %v5750_v35  ;;  %v5783_v46 = vsub.f32 0.0, %v5751_v33  ;;  %6471 = vmatpush.msra.mxu2 %v6392_v6  ;;  %v4978_v35 = vadd.f32 %v14864_v43, %v12995_v36  ;;  %v4981_v36 = vadd.f32 %v12852_v0, %v13007_v49  ;;  %6537 = vmatpush.msra.mxu3 %v6407_v7  ;;  %v14869_v0 = vld [vmem:[#allocation85_spill] sm:$0xff]  ;;  %v14879_v43 = vld [vmem:[#allocation108_spill] sm:$0xff] }
 0x6d9   : > { %v13156_v61 = vadd.f32 %v14868_v47, %v4972_v23  ;;  %v13159_v49 = vadd.f32 %v14869_v0, %v4973_v21  ;;  %v13165_v13 = vadd.f32 %v14871_v32, %v4975_v9  ;;  %v13168_v37 = vadd.f32 %v14872_v60, %v4976_v12  ;;  %v14874_v23 = vld [vmem:[#allocation90_spill] sm:$0xff]  ;;  %v14875_v21 = vld [vmem:[#allocation104_spill] sm:$0xff] }
 0x6da   : > { %v5814_v8 = vmul.f32 1.442695, %v5782_v58  ;;  %v5816_v40 = vmul.f32 1.442695, %v5783_v46  ;;  %6472 = vmatpush.msra.mxu2 %v6391_v4  ;;  %v6390_v58 = vld [vmem:[%s14289_s7] sm:$0xff]  ;;  %6538 = vmatpush.msra.mxu3 %v6406_v16  ;;  %v14870_v46 = vld [vmem:[#allocation87_spill] sm:$0xff]  ;;  %v4982_v6 = vadd.f32 %v14875_v21, %v13011_v63  ;;  %v13182_v9 = vadd.f32 %v14877_v3, %v4980_v54 }
 0x6db   : > { %v5377_v17 = vpop.f32.mrf.mxu2  ;;  %v5442_v2 = vpop.f32.mrf.mxu3  ;;  %v13162_v55 = vadd.f32 %v14870_v46, %v4974_v45  ;;  %v13179_v45 = vadd.f32 %v14876_v10, %v4979_v50  ;;  %v14882_v50 = vld [vmem:[#allocation17_spill] sm:$0xff]  ;;  %v14883_v54 = vld [vmem:[#allocation19_spill] sm:$0xff]  ;;  %v14887_v32 = vld [vmem:[#allocation16_spill] sm:$0xff] }
 0x6dc   : > { %8016 = vpow2.f32 %v5814_v8  ;;  %v5489_v33 = vadd.f32 %v5377_v17, %v5226_v42  ;;  %v5490_v53 = vadd.f32 %v5442_v2, %v5227_v1  ;;  %v13145_v42 = vpop.f32.mrf.mxu1  ;;  %v14866_v1 = vld [vmem:[#allocation53_spill] sm:$0xff]  ;;  %6473 = vmatpush.msra.mxu2 %v6390_v58  ;;  %v13171_v8 = vadd.f32 %v14873_v5, %v4977_v39  ;;  %v14878_v17 = vld [vmem:[#allocation95_spill] sm:$0xff]  ;;  %v14890_v5 = vld [vmem:[#allocation100_spill] sm:$0xff] }
 0x6dd   : > { %8018 = vpow2.f32 %v5816_v40  ;;  %v13174_v40 = vadd.f32 %v14874_v23, %v4978_v35  ;;  %v13185_v12 = vadd.f32 %v14878_v17, %v4981_v36  ;;  %v4983_v39 = vadd.f32 %v14879_v43, %v13015_v27  ;;  %v14884_v58 = vld [vmem:[#allocation25_spill] sm:$0xff]  ;;  %v13211_v46 = vpop.f32.mrf.mxu0 }
 0x6de   : > { %v5752_v30 = vadd.f32 %v14866_v1, %v5489_v33  ;;  %v5753_v34 = vadd.f32 %v14867_v25, %v5490_v53  ;;  %v14880_v33 = vld [vmem:[#allocation109_spill] sm:$0xff]  ;;  %v14881_v53 = vld [vmem:[#allocation111_spill] sm:$0xff]  ;;  %v4986_v18 = vadd.f32 %v14882_v50, %v13030_v19  ;;  %v4987_v1 = vadd.f32 %v14883_v54, %v13034_v28  ;;  %v14885_v19 = vld [vmem:[#allocation36_spill] sm:$0xff] }
 0x6df   : > { %v4984_v35 = vadd.f32 %v14880_v33, %v13019_v26  ;;  %v4985_v4 = vadd.f32 %v14881_v53, %v13026_v56  ;;  %v4988_v16 = vadd.f32 %v14884_v58, %v13038_v29  ;;  %v4989_v47 = vadd.f32 %v14885_v19, %v13042_v24  ;;  %v14886_v28 = vld [vmem:[#allocation96_spill] sm:$0xff]  ;;  %v14888_v29 = vld [vmem:[#allocation97_spill] sm:$0xff]  ;;  %v14889_v24 = vld [vmem:[#allocation98_spill] sm:$0xff] }
 0x6e0   : > { %v5784_v15 = vsub.f32 0.0, %v5752_v30  ;;  %v5785_v41 = vsub.f32 0.0, %v5753_v34  ;;  %v13209_v0 = vadd.f32 %v14886_v28, %v4982_v6  ;;  %v4990_v60 = vadd.f32 %v14887_v32, %v13065_v44  ;;  %v14891_v10 = vld [vmem:[#allocation101_spill] sm:$0xff]  ;;  %v14894_v33 = vld [vmem:[#allocation107_spill] sm:$0xff] }
 0x6e1   : > { %v13225_v23 = vadd.f32 %v14890_v5, %v4985_v4  ;;  %v13230_v3 = vadd.f32 %v14891_v10, %v4986_v18  ;;  %v14893_v43 = vld [vmem:[#allocation105_spill] sm:$0xff] }
 0x6e2   : > { %v8017_v2 = vpop.eup %8016  ;;  %v5818_v63 = vmul.f32 1.442695, %v5784_v15  ;;  %v5820_v30 = vmul.f32 1.442695, %v5785_v41  ;;  %v13219_v15 = vadd.f32 %v14888_v29, %v4983_v39  ;;  %v13222_v41 = vadd.f32 %v14889_v24, %v4984_v35 }
 0x6e3   : > { %v8019_v7 = vpop.eup %8018  ;;  %v13197_v36 = vadd.f32 1.0, %v8017_v2  ;;  %v5380_v25 = vpop.f32.mrf.mxu2  ;;  %v13238_v39 = vadd.f32 %v14893_v43, %v4988_v16  ;;  %v13241_v35 = vadd.f32 %v14894_v33, %v4989_v47 }
 0x6e4   : > { %v5445_v34 = vpop.f32.mrf.mxu3  ;;  %v13199_v27 = vadd.f32 1.0, %v8019_v7  ;;  %8020 = vpow2.f32 %v5818_v63  ;;  %v5491_v26 = vadd.f32 %v5380_v25, %v13085_v52  ;;  %v13227_v21 = vpop.f32.mrf.mxu1  ;;  %v14895_v7 = vld [vmem:[#allocation110_spill] sm:$0xff] }
 0x6e5   : > { %v5492_v56 = vadd.f32 %v5445_v34, %v13088_v51  ;;  %8022 = vrcp.f32 %v13197_v36  ;;  %v5921_v2 = vand.u32 2147483648, %v13197_v36  ;;  %vm5915_vm1 = vweird.f32 %v13197_v36  ;;  %v13272_v5 = vpop.f32.mrf.mxu0 }
 0x6e6   : > { %8024 = vrcp.f32 %v13199_v27  ;;  %v5754_v52 = vadd.f32 %v13045_v22, %v5491_v26  ;;  %v14892_v22 = vld [vmem:[#allocation106_spill] sm:$0xff]  ;;  %v13245_v50 = vadd.f32 %v14895_v7, %v4990_v60  ;;  %vm5930_vm2 = vweird.f32 %v13199_v27 }
 0x6e7   : > { %v5755_v51 = vadd.f32 %v13056_v11, %v5492_v56  ;;  %8026 = vpow2.f32 %v5820_v30  ;;  %v13233_v17 = vadd.f32 %v14892_v22, %v4987_v1  ;;  %v5919_v11 = vand.u32 2147483647, %v13197_v36 }
 0x6e8   : > { %v5786_v6 = vsub.f32 0.0, %v5754_v52  ;;  %v5934_v25 = vand.u32 2147483647, %v13199_v27  ;;  %v5936_v34 = vand.u32 2147483648, %v13199_v27  ;;  %v5922_v32 = vor.u32 1.1754944e-38, %v5921_v2 }
 0x6e9   : > { %v5787_v44 = vsub.f32 0.0, %v5755_v51  ;;  %vm13260_vm3 = vcmp.eq.f32.partialorder %v5919_v11, 8.507059e+37 }
 0x6ea   : > { %v8021_v53 = vpop.eup %8020  ;;  %v5822_v4 = vmul.f32 1.442695, %v5786_v6  ;;  %vm13268_vm12 = vcmp.eq.f32.partialorder %v5934_v25, 8.507059e+37  ;;  %v5937_v24 = vor.u32 1.1754944e-38, %v5936_v34 }
 0x6eb   : > { %v5824_v63 = vmul.f32 1.442695, %v5787_v44  ;;  %v13247_v18 = vpop.eup %8022  ;;  %v13249_v54 = vadd.f32 1.0, %v8021_v53  ;;  %v5383_v1 = vpop.f32.mrf.mxu2 }
 0x6ec   : > { %v5448_v30 = vpop.f32.mrf.mxu3  ;;  %v8025_v26 = vpop.eup %8024  ;;  %8028 = vpow2.f32 %v5822_v4  ;;  %v5493_v56 = vadd.f32 %v5383_v1, %v13091_v59  ;;  %v5911_v16 = vmul.f32 %v13247_v18, %v13197_v36  ;;  %vm5916_vm13 = vweird.f32 %v13247_v18 }
 0x6ed   : > { %v5494_v58 = vadd.f32 %v5448_v30, %v13094_v31  ;;  %v8027_v19 = vpop.eup %8026  ;;  %v5926_v47 = vmul.f32 %v8025_v26, %v13199_v27  ;;  %8030 = vrcp.f32 %v13249_v54  ;;  %vm5931_vm14 = vweird.f32 %v8025_v26  ;;  %v13278_v11 = vpop.f32.mrf.mxu1  ;;  %vm13291_vm6 = vmor %vm5915_vm1, %vm5916_vm13 }
 0x6ee   : > { %v13264_v60 = vadd.f32 1.0, %v8027_v19  ;;  %8032 = vpow2.f32 %v5824_v63  ;;  %v5756_v59 = vadd.f32 %v13129_v57, %v5493_v56  ;;  %v5912_v52 = vsub.f32 1.0, %v5911_v16  ;;  %vm5932_vm5 = vmor %vm5930_vm2, %vm5931_vm14  ;;  %v13334_v29 = vpop.f32.mrf.mxu0 }
 0x6ef   : > { %v5757_v31 = vadd.f32 %v13145_v42, %v5494_v58  ;;  %v5927_v51 = vsub.f32 1.0, %v5926_v47  ;;  %v5949_v42 = vand.u32 2147483647, %v13249_v54  ;;  %v5951_v33 = vand.u32 2147483648, %v13249_v54 }
 0x6f0   : > { %8034 = vrcp.f32 %v13264_v60  ;;  %v5788_v6 = vsub.f32 0.0, %v5756_v59  ;;  %v5913_v10 = vmul.f32 %v13247_v18, %v5912_v52  ;;  %v5966_v53 = vand.u32 2147483648, %v13264_v60 }
 0x6f1   : > { %v5789_v44 = vsub.f32 0.0, %v5757_v31  ;;  %v5928_v57 = vmul.f32 %v8025_v26, %v5927_v51  ;;  %vm5945_vm15 = vweird.f32 %v13249_v54  ;;  %v5964_v56 = vand.u32 2147483647, %v13264_v60 }
 0x6f2   : > { %v8029_v22 = vpop.eup %8028  ;;  %v5826_v2 = vmul.f32 1.442695, %v5788_v6  ;;  %v5914_v30 = vadd.f32 %v13247_v18, %v5913_v10  ;;  %vm13310_vm7 = vcmp.eq.f32.partialorder %v5949_v42, 8.507059e+37  ;;  %vm5960_vm9 = vweird.f32 %v13264_v60 }
 0x6f3   : > { %v5828_v43 = vmul.f32 1.442695, %v5789_v44  ;;  %v13282_v4 = vpop.eup %8030  ;;  %v13284_v63 = vadd.f32 1.0, %v8029_v22  ;;  %v5386_v7 = vpop.f32.mrf.mxu2  ;;  %v5929_v34 = vadd.f32 %v8025_v26, %v5928_v57  ;;  %vm13330_vm1 = vcmp.eq.f32.partialorder %v5964_v56, 8.507059e+37 }
 0x6f4   : > { %v5451_v1 = vpop.f32.mrf.mxu3  ;;  %v8033_v58 = vpop.eup %8032  ;;  %8036 = vpow2.f32 %v5826_v2  ;;  %v5495_v16 = vadd.f32 %v5386_v7, %v13103_v20  ;;  %v5941_v36 = vmul.f32 %v13282_v4, %v13249_v54  ;;  %v5918_v59 = vsel %vm13291_vm6, %v13247_v18, %v5914_v30 }
 0x6f5   : > { %v5496_v19 = vadd.f32 %v5451_v1, %v13108_v62  ;;  %8038 = vrcp.f32 %v13284_v63  ;;  %v13305_v47 = vadd.f32 1.0, %v8033_v58  ;;  %v5933_v31 = vsel %vm5932_vm5, %v8025_v26, %v5929_v34  ;;  %v5720_v56 = vpop.f32.mrf.mxu1 }
 0x6f6   : > { %v13314_v62 = vpop.eup %8034  ;;  %8040 = vpow2.f32 %v5828_v43  ;;  %v5758_v27 = vadd.f32 %v13211_v46, %v5495_v16  ;;  %v5923_v51 = vsel %vm13260_vm3, %v5922_v32, %v5918_v59  ;;  %v5938_v6 = vsel %vm13268_vm12, %v5937_v24, %v5933_v31 }
 0x6f7   : > { %v5759_v52 = vadd.f32 %v13227_v21, %v5496_v19  ;;  %6474 = vmatmul.f32.vlgmr.msra.gmra.mxu2 %v5923_v51  ;;  %v5942_v18 = vsub.f32 1.0, %v5941_v36  ;;  %v5952_v26 = vor.u32 1.1754944e-38, %v5951_v33  ;;  %8042 = vrcp.f32 %v13305_v47  ;;  %7689 = vmatmul.msk.f32.vlgmr.msra.gmra.mxu3 %vm552_vm0, %v5938_v6 }
 0x6f8   : > { %v5790_v44 = vsub.f32 0.0, %v5758_v27  ;;  %v5956_v46 = vmul.f32 %v13314_v62, %v13264_v60  ;;  %vm5946_vm10 = vweird.f32 %v13282_v4  ;;  %vm5961_vm11 = vweird.f32 %v13314_v62 }
 0x6f9   : > { %v5791_v10 = vsub.f32 0.0, %v5759_v52  ;;  %v5943_v21 = vmul.f32 %v13282_v4, %v5942_v18  ;;  %v5967_v22 = vor.u32 1.1754944e-38, %v5966_v53  ;;  %vm5975_vm2 = vweird.f32 %v13284_v63  ;;  %vm5947_vm3 = vmor %vm5945_vm15, %vm5946_vm10 }
 0x6fa   : > { %v8037_v32 = vpop.eup %8036  ;;  %v5830_v24 = vmul.f32 1.442695, %v5790_v44  ;;  %v5957_v42 = vsub.f32 1.0, %v5956_v46  ;;  %v5979_v30 = vand.u32 2147483647, %v13284_v63  ;;  %v5981_v25 = vand.u32 2147483648, %v13284_v63  ;;  %vm5962_vm13 = vmor %vm5960_vm9, %vm5961_vm11 }
 0x6fb   : > { %v5832_v57 = vmul.f32 1.442695, %v5791_v10  ;;  %v13336_v2 = vpop.eup %8038  ;;  %v13338_v43 = vadd.f32 1.0, %v8037_v32  ;;  %v5389_v33 = vpop.f32.mrf.mxu2  ;;  %v5944_v1 = vadd.f32 %v13282_v4, %v5943_v21  ;;  %vm5990_vm12 = vweird.f32 %v13305_v47 }
 0x6fc   : > { %v5454_v7 = vpop.f32.mrf.mxu3  ;;  %v8041_v34 = vpop.eup %8040  ;;  %8044 = vpow2.f32 %v5830_v24  ;;  %v5497_v58 = vadd.f32 %v5389_v33, %v13111_v38  ;;  %v5958_v16 = vmul.f32 %v13314_v62, %v5957_v42  ;;  %v5971_v59 = vmul.f32 %v13336_v2, %v13284_v63 }
 0x6fd   : > { %v5498_v53 = vadd.f32 %v5454_v7, %v13156_v61  ;;  %8046 = vrcp.f32 %v13338_v43  ;;  %v13352_v19 = vadd.f32 1.0, %v8041_v34  ;;  %v5948_v36 = vsel %vm5947_vm3, %v13282_v4, %v5944_v1  ;;  %v13357_v31 = vpop.eup %8042  ;;  %v5658_v7 = vpop.f32.mrf.mxu0 }
 0x6fe   : > { %8048 = vpow2.f32 %v5832_v57  ;;  %v5760_v38 = vadd.f32 %v13272_v5, %v5497_v58  ;;  %v5953_v54 = vsel %vm13310_vm7, %v5952_v26, %v5948_v36  ;;  %v5959_v27 = vadd.f32 %v13314_v62, %v5958_v16 }
 0x6ff   : > { %v5761_v61 = vadd.f32 %v13278_v11, %v5498_v53  ;;  %8050 = vrcp.f32 %v13352_v19  ;;  %6477 = vmatmul.f32.gmra.mxu2 %v5953_v54  ;;  %v5972_v52 = vsub.f32 1.0, %v5971_v59  ;;  %vm5976_vm14 = vweird.f32 %v13336_v2 }
 0x700   : > { %v5792_v4 = vsub.f32 0.0, %v5760_v38  ;;  %vm13371_vm6 = vcmp.eq.f32.partialorder %v5979_v30, 8.507059e+37  ;;  %v5963_v11 = vsel %vm5962_vm13, %v13314_v62, %v5959_v27  ;;  %v5982_v6 = vor.u32 1.1754944e-38, %v5981_v25  ;;  %vm5977_vm5 = vmor %vm5975_vm2, %vm5976_vm14 }
 0x701   : > { %v5793_v51 = vsub.f32 0.0, %v5761_v61  ;;  %v5973_v20 = vmul.f32 %v13336_v2, %v5972_v52  ;;  %v5986_v18 = vmul.f32 %v13357_v31, %v13305_v47  ;;  %v5968_v60 = vsel %vm13330_vm1, %v5967_v22, %v5963_v11 }
 0x702   : > { %v8045_v26 = vpop.eup %8044  ;;  %v5834_v44 = vmul.f32 1.442695, %v5792_v4  ;;  %vm5991_vm15 = vweird.f32 %v13357_v31  ;;  %7690 = vmatmul.msk.f32.gmra.mxu3 %vm552_vm0, %v5968_v60  ;;  %v5994_v42 = vand.u32 2147483647, %v13305_v47  ;;  %v5996_v1 = vand.u32 2147483648, %v13305_v47 }
 0x703   : > { %v5836_v10 = vmul.f32 1.442695, %v5793_v51  ;;  %v13382_v46 = vpop.eup %8046  ;;  %v13384_v21 = vadd.f32 1.0, %v8045_v26  ;;  %v5392_v62 = vpop.f32.mrf.mxu2  ;;  %v5974_v24 = vadd.f32 %v13336_v2, %v5973_v20  ;;  %v5987_v57 = vsub.f32 1.0, %v5986_v18  ;;  %vm5992_vm9 = vmor %vm5990_vm12, %vm5991_vm15 }
 0x704   : > { %v5457_v32 = vpop.f32.mrf.mxu3  ;;  %v8049_v33 = vpop.eup %8048  ;;  %8052 = vpow2.f32 %v5834_v44  ;;  %v5499_v28 = vadd.f32 %v5392_v62, %v13159_v49  ;;  %vm5995_vm7 = vcmp.eq.f32.partialorder %v5994_v42, 8.507059e+37  ;;  %v6001_v36 = vmul.f32 %v13382_v46, %v13338_v43 }
 0x705   : > { %v5500_v22 = vadd.f32 %v5457_v32, %v13162_v55  ;;  %v13396_v30 = vpop.eup %8050  ;;  %8054 = vrcp.f32 %v13384_v21  ;;  %v13399_v25 = vadd.f32 1.0, %v8049_v33  ;;  %v5978_v34 = vsel %vm5977_vm5, %v13336_v2, %v5974_v24  ;;  %v5723_v49 = vpop.f32.mrf.mxu1 }
 0x706   : > { %v5988_v58 = vmul.f32 %v13357_v31, %v5987_v57  ;;  %8056 = vpow2.f32 %v5836_v10  ;;  %v5762_v55 = vadd.f32 %v13334_v29, %v5499_v28  ;;  %v5983_v63 = vsel %vm13371_vm6, %v5982_v6, %v5978_v34  ;;  %v5661_v42 = vpop.f32.mrf.mxu0 }
 0x707   : > { %v5763_v53 = vadd.f32 %v5720_v56, %v5500_v22  ;;  %8058 = vrcp.f32 %v13399_v25  ;;  %6480 = vmatmul.f32.gmra.mxu2 %v5983_v63  ;;  %v5997_v29 = vor.u32 1.1754944e-38, %v5996_v1  ;;  %vm6005_vm10 = vweird.f32 %v13338_v43 }
 0x708   : > { %v5989_v16 = vadd.f32 %v13357_v31, %v5988_v58  ;;  %v5794_v2 = vsub.f32 0.0, %v5762_v55  ;;  %v6002_v38 = vsub.f32 1.0, %v6001_v36  ;;  %v6009_v61 = vand.u32 2147483647, %v13338_v43 }
 0x709   : > { %v5795_v59 = vsub.f32 0.0, %v5763_v53  ;;  %v6011_v54 = vand.u32 2147483648, %v13338_v43  ;;  %v6016_v5 = vmul.f32 %v13396_v30, %v13352_v19  ;;  %vm6006_vm11 = vweird.f32 %v13382_v46  ;;  %v14910_v43 = vld [vmem:[#allocation20_spill] sm:$0xff] }
 0x70a   : > { %v5993_v56 = vsel %vm5992_vm9, %v13357_v31, %v5989_v16  ;;  %v8053_v27 = vpop.eup %8052  ;;  %v5838_v52 = vmul.f32 1.442695, %v5794_v2  ;;  %v6003_v6 = vmul.f32 %v13382_v46, %v6002_v38  ;;  %vm13427_vm1 = vcmp.eq.f32.partialorder %v6009_v61, 8.507059e+37  ;;  %vm6007_vm2 = vmor %vm6005_vm10, %vm6006_vm11 }
 0x70b   : > { %v5840_v4 = vmul.f32 1.442695, %v5795_v59  ;;  %v5998_v51 = vsel %vm5995_vm7, %v5997_v29, %v5993_v56  ;;  %v13420_v11 = vpop.eup %8054  ;;  %v13422_v47 = vadd.f32 1.0, %v8053_v27  ;;  %v5395_v20 = vpop.f32.mrf.mxu2  ;;  %v6017_v60 = vsub.f32 1.0, %v6016_v5 }
 0x70c   : > { %7691 = vmatmul.msk.f32.gmra.mxu3 %vm552_vm0, %v5998_v51  ;;  %v5460_v31 = vpop.f32.mrf.mxu3  ;;  %v8057_v26 = vpop.eup %8056  ;;  %8060 = vpow2.f32 %v5838_v52  ;;  %v5501_v44 = vadd.f32 %v5395_v20, %v13165_v13  ;;  %v6004_v24 = vadd.f32 %v13382_v46, %v6003_v6  ;;  %v6012_v57 = vor.u32 1.1754944e-38, %v6011_v54 }
 0x70d   : > { %v5502_v10 = vadd.f32 %v5460_v31, %v13168_v37  ;;  %v13433_v62 = vpop.eup %8058  ;;  %8062 = vrcp.f32 %v13422_v47  ;;  %v13436_v32 = vadd.f32 1.0, %v8057_v26  ;;  %v6018_v13 = vmul.f32 %v13396_v30, %v6017_v60  ;;  %v5726_v1 = vpop.f32.mrf.mxu1 }
 0x70e   : > { %8064 = vpow2.f32 %v5840_v4  ;;  %v5764_v33 = vadd.f32 %v5658_v7, %v5501_v44  ;;  %v6008_v37 = vsel %vm6007_vm2, %v13382_v46, %v6004_v24  ;;  %vm6020_vm3 = vweird.f32 %v13352_v19  ;;  %v5664_v44 = vpop.f32.mrf.mxu0 }
 0x70f   : > { %v5765_v28 = vadd.f32 %v5723_v49, %v5502_v10  ;;  %vm6021_vm12 = vweird.f32 %v13396_v30  ;;  %v6024_v22 = vand.u32 2147483647, %v13352_v19  ;;  %v6013_v7 = vsel %vm13427_vm1, %v6012_v57, %v6008_v37 }
 0x710   : > { %v5796_v34 = vsub.f32 0.0, %v5764_v33  ;;  %v6019_v49 = vadd.f32 %v13396_v30, %v6018_v13  ;;  %v13453_v55 = vadd.f32 %v14910_v43, %v13069_v14  ;;  %8066 = vrcp.f32 %v13436_v32  ;;  %6483 = vmatmul.f32.gmra.mxu2 %v6013_v7  ;;  %vm13456_vm13 = vmor %vm6020_vm3, %vm6021_vm12 }
 0x711   : > { %v5797_v58 = vsub.f32 0.0, %v5765_v28  ;;  %v6026_v53 = vand.u32 2147483648, %v13352_v19  ;;  %v6031_v63 = vmul.f32 %v13420_v11, %v13384_v21  ;;  %vm6025_vm14 = vcmp.eq.f32.partialorder %v6024_v22, 8.507059e+37 }
 0x712   : > { %v8061_v16 = vpop.eup %8060  ;;  %v5842_v36 = vmul.f32 1.442695, %v5796_v34  ;;  %v6023_v14 = vsel %vm13456_vm13, %v13396_v30, %v6019_v49  ;;  %v6039_v19 = vand.u32 2147483647, %v13384_v21  ;;  %v6041_v51 = vand.u32 2147483648, %v13384_v21 }
 0x713   : > { %v5844_v2 = vmul.f32 1.442695, %v5797_v58  ;;  %v13466_v59 = vpop.eup %8062  ;;  %v13468_v29 = vadd.f32 1.0, %v8061_v16  ;;  %v6027_v56 = vor.u32 1.1754944e-38, %v6026_v53  ;;  %v5398_v38 = vpop.f32.mrf.mxu2  ;;  %v6032_v54 = vsub.f32 1.0, %v6031_v63 }
 0x714   : > { %v5463_v61 = vpop.f32.mrf.mxu3  ;;  %v8065_v27 = vpop.eup %8064  ;;  %8068 = vpow2.f32 %v5842_v36  ;;  %v5503_v52 = vadd.f32 %v5398_v38, %v13171_v8  ;;  %vm6036_vm6 = vweird.f32 %v13420_v11  ;;  %vm6035_vm15 = vweird.f32 %v13384_v21 }
 0x715   : > { %v5504_v4 = vadd.f32 %v5463_v61, %v13174_v40  ;;  %v13474_v30 = vadd.f32 1.0, %v8065_v27  ;;  %v6028_v5 = vsel %vm6025_vm14, %v6027_v56, %v6023_v14  ;;  %v6033_v20 = vmul.f32 %v13420_v11, %v6032_v54  ;;  %vm6037_vm7 = vmor %vm6035_vm15, %vm6036_vm6  ;;  %v5729_v13 = vpop.f32.mrf.mxu1  ;;  %v14920_v40 = vld [vmem:[#allocation24_spill] sm:$0xff] }
 0x716   : > { %8070 = vpow2.f32 %v5844_v2  ;;  %7692 = vmatmul.msk.f32.gmra.mxu3 %vm552_vm0, %v6028_v5  ;;  %v5766_v31 = vadd.f32 %v5661_v42, %v5503_v52  ;;  %v13480_v18 = vpop.eup %8066  ;;  %vm13484_vm5 = vcmp.eq.f32.partialorder %v6039_v19, 8.507059e+37  ;;  %v6046_v26 = vmul.f32 %v13433_v62, %v13399_v25 }
 0x717   : > { %v5767_v6 = vadd.f32 %v5726_v1, %v5504_v4  ;;  %8072 = vrcp.f32 %v13468_v29  ;;  %v6034_v8 = vadd.f32 %v13420_v11, %v6033_v20  ;;  %v6042_v21 = vor.u32 1.1754944e-38, %v6041_v51  ;;  %v14917_v51 = vld [vmem:[#allocation21_spill] sm:$0xff] }
 0x718   : > { %8074 = vrcp.f32 %v13474_v30  ;;  %v5798_v10 = vsub.f32 0.0, %v5766_v31  ;;  %v6047_v57 = vsub.f32 1.0, %v6046_v26  ;;  %v6054_v42 = vand.u32 2147483647, %v13399_v25 }
 0x719   : > { %v5799_v60 = vsub.f32 0.0, %v5767_v6  ;;  %v6038_v24 = vsel %vm6037_vm7, %v13420_v11, %v6034_v8  ;;  %v6056_v33 = vand.u32 2147483648, %v13399_v25  ;;  %v6061_v34 = vmul.f32 %v13466_v59, %v13422_v47  ;;  %v5667_v6 = vpop.f32.mrf.mxu0 }
 0x71a   : > { %v8069_v28 = vpop.eup %8068  ;;  %v5846_v37 = vmul.f32 1.442695, %v5798_v10  ;;  %v6043_v1 = vsel %vm13484_vm5, %v6042_v21, %v6038_v24  ;;  %v6048_v11 = vmul.f32 %v13433_v62, %v6047_v57  ;;  %vm6050_vm9 = vweird.f32 %v13399_v25 }
 0x71b   : > { %v5848_v22 = vmul.f32 1.442695, %v5799_v60  ;;  %v13500_v58 = vadd.f32 1.0, %v8069_v28  ;;  %6486 = vmatmul.f32.gmra.mxu2 %v6043_v1  ;;  %vm6051_vm10 = vweird.f32 %v13433_v62  ;;  %v5401_v7 = vpop.f32.mrf.mxu2  ;;  %vm13505_vm11 = vcmp.eq.f32.partialorder %v6054_v42, 8.507059e+37 }
 0x71c   : > { %v5466_v49 = vpop.f32.mrf.mxu3  ;;  %v8071_v43 = vpop.eup %8070  ;;  %v5505_v53 = vadd.f32 %v5401_v7, %v13179_v45  ;;  %v6062_v16 = vsub.f32 1.0, %v6061_v34  ;;  %8076 = vpow2.f32 %v5846_v37  ;;  %v6049_v14 = vadd.f32 %v13433_v62, %v6048_v11  ;;  %vm6052_vm1 = vmor %vm6050_vm9, %vm6051_vm10 }
 0x71d   : > { %v5506_v63 = vadd.f32 %v5466_v49, %v13182_v9  ;;  %v13511_v36 = vpop.eup %8072  ;;  %v13513_v2 = vadd.f32 1.0, %v8071_v43  ;;  %v6057_v56 = vor.u32 1.1754944e-38, %v6056_v33  ;;  %8078 = vpow2.f32 %v5848_v22  ;;  %v5732_v42 = vpop.f32.mrf.mxu1 }
 0x71e   : > { %v13516_v38 = vpop.eup %8074  ;;  %v5768_v45 = vadd.f32 %v5664_v44, %v5505_v53  ;;  %v6063_v9 = vmul.f32 %v13466_v59, %v6062_v16  ;;  %v6053_v54 = vsel %vm6052_vm1, %v13433_v62, %v6049_v14  ;;  %vm6065_vm2 = vweird.f32 %v13422_v47 }
 0x71f   : > { %v5769_v61 = vadd.f32 %v5729_v13, %v5506_v63  ;;  %vm6066_vm3 = vweird.f32 %v13466_v59  ;;  %v6069_v19 = vand.u32 2147483647, %v13422_v47  ;;  %v6058_v27 = vsel %vm13505_vm11, %v6057_v56, %v6053_v54 }
 0x720   : > { %v5800_v52 = vsub.f32 0.0, %v5768_v45  ;;  %v6064_v25 = vadd.f32 %v13466_v59, %v6063_v9  ;;  %v13532_v5 = vadd.f32 %v14917_v51, %v13075_v48  ;;  %8080 = vrcp.f32 %v13500_v58  ;;  %7693 = vmatmul.msk.f32.gmra.mxu3 %vm552_vm0, %v6058_v27  ;;  %vm13536_vm12 = vmor %vm6065_vm2, %vm6066_vm3 }
 0x721   : > { %v5801_v4 = vsub.f32 0.0, %v5769_v61  ;;  %v6071_v20 = vand.u32 2147483648, %v13422_v47  ;;  %v6076_v31 = vmul.f32 %v13480_v18, %v13436_v32  ;;  %8082 = vrcp.f32 %v13513_v2  ;;  %v5670_v51 = vpop.f32.mrf.mxu0 }
 0x722   : > { %v5850_v8 = vmul.f32 1.442695, %v5800_v52  ;;  %v6068_v48 = vsel %vm13536_vm12, %v13466_v59, %v6064_v25  ;;  %v13549_v26 = vadd.f32 %v14920_v40, %v13453_v55  ;;  %v8077_v44 = vpop.eup %8076  ;;  %vm6070_vm13 = vcmp.eq.f32.partialorder %v6069_v19, 8.507059e+37 }
 0x723   : > { %v5852_v10 = vmul.f32 1.442695, %v5801_v4  ;;  %v6072_v60 = vor.u32 1.1754944e-38, %v6071_v20  ;;  %v6077_v47 = vsub.f32 1.0, %v6076_v31  ;;  %v5404_v21 = vpop.f32.mrf.mxu2  ;;  %v8079_v57 = vpop.eup %8078  ;;  %v6084_v33 = vand.u32 2147483647, %v13436_v32 }
 0x724   : > { %v5469_v24 = vpop.f32.mrf.mxu3  ;;  %v6086_v28 = vand.u32 2147483648, %v13436_v32  ;;  %v5507_v13 = vadd.f32 %v5404_v21, %v13185_v12  ;;  %vm6080_vm14 = vweird.f32 %v13436_v32  ;;  %vm6081_vm6 = vweird.f32 %v13480_v18 }
 0x725   : > { %v5508_v59 = vadd.f32 %v5469_v24, %v13209_v0  ;;  %v6073_v37 = vsel %vm6070_vm13, %v6072_v60, %v6068_v48  ;;  %v6078_v55 = vmul.f32 %v13480_v18, %v6077_v47  ;;  %v13558_v22 = vadd.f32 1.0, %v8077_v44  ;;  %vm6082_vm15 = vmor %vm6080_vm14, %vm6081_vm6 }
 0x726   : > { %v13560_v1 = vadd.f32 1.0, %v8079_v57  ;;  %8084 = vpow2.f32 %v5850_v8  ;;  %6489 = vmatmul.f32.gmra.mxu2 %v6073_v37  ;;  %v5770_v34 = vadd.f32 %v5667_v6, %v5507_v13  ;;  %v13562_v11 = vpop.eup %8080  ;;  %v6091_v7 = vmul.f32 %v13511_v36, %v13468_v29  ;;  %v5735_v6 = vpop.f32.mrf.mxu1 }
 0x727   : > { %8086 = vpow2.f32 %v5852_v10  ;;  %v6079_v12 = vadd.f32 %v13480_v18, %v6078_v55  ;;  %v5771_v0 = vadd.f32 %v5732_v42, %v5508_v59  ;;  %v13567_v49 = vpop.eup %8082  ;;  %vm6085_vm5 = vcmp.eq.f32.partialorder %v6084_v33, 8.507059e+37 }
 0x728   : > { %v6087_v32 = vor.u32 1.1754944e-38, %v6086_v28  ;;  %v5802_v43 = vsub.f32 0.0, %v5770_v34  ;;  %v6099_v46 = vand.u32 2147483647, %v13468_v29  ;;  %v6092_v16 = vsub.f32 1.0, %v6091_v7 }
 0x729   : > { %v6083_v53 = vsel %vm6082_vm15, %v13480_v18, %v6079_v12  ;;  %v5803_v63 = vsub.f32 0.0, %v5771_v0  ;;  %v6101_v14 = vand.u32 2147483648, %v13468_v29  ;;  %8088 = vrcp.f32 %v13558_v22 }
 0x72a   : > { %v6088_v56 = vsel %vm6085_vm5, %v6087_v32, %v6083_v53  ;;  %v5854_v45 = vmul.f32 1.442695, %v5802_v43  ;;  %v6106_v61 = vmul.f32 %v13516_v38, %v13474_v30  ;;  %8090 = vrcp.f32 %v13560_v1 }
 0x72b   : > { %7694 = vmatmul.msk.f32.gmra.mxu3 %vm552_vm0, %v6088_v56  ;;  %v5856_v9 = vmul.f32 1.442695, %v5803_v63  ;;  %v6093_v54 = vmul.f32 %v13511_v36, %v6092_v16  ;;  %vm6096_vm7 = vweird.f32 %v13511_v36  ;;  %v5407_v18 = vpop.f32.mrf.mxu2  ;;  %vm6095_vm9 = vweird.f32 %v13468_v29  ;;  %v5673_v56 = vpop.f32.mrf.mxu0 }
 0x72c   : > { %v5472_v19 = vpop.f32.mrf.mxu3  ;;  %v8085_v27 = vpop.eup %8084  ;;  %8092 = vpow2.f32 %v5854_v45  ;;  %vm13580_vm10 = vcmp.eq.f32.partialorder %v6099_v46, 8.507059e+37  ;;  %v6107_v4 = vsub.f32 1.0, %v6106_v61  ;;  %v6102_v20 = vor.u32 1.1754944e-38, %v6101_v14  ;;  %vm6097_vm1 = vmor %vm6095_vm9, %vm6096_vm7 }
 0x72d   : > { %v8087_v25 = vpop.eup %8086  ;;  %v6094_v62 = vadd.f32 %v13511_v36, %v6093_v54  ;;  %vm6111_vm11 = vweird.f32 %v13516_v38  ;;  %v6114_v31 = vand.u32 2147483647, %v13474_v30  ;;  %8094 = vpow2.f32 %v5856_v9 }
 0x72e   : > { %v6108_v29 = vmul.f32 %v13516_v38, %v6107_v4  ;;  %v6116_v8 = vand.u32 2147483648, %v13474_v30  ;;  %v5509_v48 = vadd.f32 %v5407_v18, %v13219_v15  ;;  %v13592_v40 = vadd.f32 1.0, %v8085_v27  ;;  %v5738_v18 = vpop.f32.mrf.mxu1 }
 0x72f   : > { %v6098_v44 = vsel %vm6097_vm1, %v13511_v36, %v6094_v62  ;;  %vm6110_vm2 = vweird.f32 %v13474_v30  ;;  %v5510_v10 = vadd.f32 %v5472_v19, %v13222_v41  ;;  %v13597_v60 = vpop.eup %8088  ;;  %v13599_v47 = vadd.f32 1.0, %v8087_v25 }
 0x730   : > { %v6103_v21 = vsel %vm13580_vm10, %v6102_v20, %v6098_v44  ;;  %v6109_v24 = vadd.f32 %v13516_v38, %v6108_v29  ;;  %v5772_v57 = vadd.f32 %v5670_v51, %v5509_v48  ;;  %v13604_v42 = vpop.eup %8090  ;;  %vm6112_vm3 = vmor %vm6110_vm2, %vm6111_vm11  ;;  %vm6115_vm12 = vcmp.eq.f32.partialorder %v6114_v31, 8.507059e+37 }
 0x731   : > { %6492 = vmatmul.f32.gmra.mxu2 %v6103_v21  ;;  %v6117_v15 = vor.u32 1.1754944e-38, %v6116_v8  ;;  %v5773_v30 = vadd.f32 %v5735_v6, %v5510_v10  ;;  %v6121_v41 = vmul.f32 %v13562_v11, %v13500_v58  ;;  %v6129_v13 = vand.u32 2147483647, %v13500_v58 }
 0x732   : > { %v8093_v36 = vpop.eup %8092  ;;  %v6113_v33 = vsel %vm6112_vm3, %v13516_v38, %v6109_v24  ;;  %v5804_v28 = vsub.f32 0.0, %v5772_v57  ;;  %v6131_v59 = vand.u32 2147483648, %v13500_v58  ;;  %8096 = vrcp.f32 %v13592_v40 }
 0x733   : > { %v6118_v37 = vsel %vm6115_vm12, %v6117_v15, %v6113_v33  ;;  %v5805_v55 = vsub.f32 0.0, %v5773_v30  ;;  %v6122_v34 = vsub.f32 1.0, %v6121_v41  ;;  %v5410_v12 = vpop.f32.mrf.mxu2  ;;  %v8095_v0 = vpop.eup %8094  ;;  %8098 = vrcp.f32 %v13599_v47  ;;  %v14925_v41 = vld [vmem:[#allocation18_spill] sm:$0xff] }
 0x734   : > { %7695 = vmatmul.msk.f32.gmra.mxu3 %vm552_vm0, %v6118_v37  ;;  %v5858_v7 = vmul.f32 1.442695, %v5804_v28  ;;  %vm6125_vm13 = vweird.f32 %v13500_v58  ;;  %v6136_v38 = vmul.f32 %v13567_v49, %v13513_v2  ;;  %v5475_v32 = vpop.f32.mrf.mxu3  ;;  %v13619_v43 = vadd.f32 1.0, %v8093_v36 }
 0x735   : > { %v5860_v46 = vmul.f32 1.442695, %v5805_v55  ;;  %v6123_v53 = vmul.f32 %v13562_v11, %v6122_v34  ;;  %vm6126_vm14 = vweird.f32 %v13562_v11  ;;  %vm13623_vm6 = vcmp.eq.f32.partialorder %v6129_v13, 8.507059e+37  ;;  %v5676_v55 = vpop.f32.mrf.mxu0 }
 0x736   : > { %8100 = vpow2.f32 %v5858_v7  ;;  %v6132_v16 = vor.u32 1.1754944e-38, %v6131_v59  ;;  %v6137_v14 = vsub.f32 1.0, %v6136_v38  ;;  %v13627_v45 = vadd.f32 1.0, %v8095_v0  ;;  %vm6127_vm15 = vmor %vm6125_vm13, %vm6126_vm14  ;;  %v5741_v0 = vpop.f32.mrf.mxu1 }
 0x737   : > { %v6124_v61 = vadd.f32 %v13562_v11, %v6123_v53  ;;  %v6144_v9 = vand.u32 2147483647, %v13513_v2  ;;  %v6146_v54 = vand.u32 2147483648, %v13513_v2  ;;  %vm6141_vm5 = vweird.f32 %v13567_v49 }
 0x738   : > { %v6138_v19 = vmul.f32 %v13567_v49, %v6137_v14  ;;  %v5511_v27 = vadd.f32 %v5410_v12, %v13225_v23  ;;  %v5512_v52 = vadd.f32 %v5475_v32, %v13230_v3  ;;  %v13638_v4 = vpop.eup %8096  ;;  %8102 = vpow2.f32 %v5860_v46 }
 0x739   : > { %v6128_v25 = vsel %vm6127_vm15, %v13562_v11, %v6124_v61  ;;  %vm6140_vm7 = vweird.f32 %v13513_v2  ;;  %v6151_v51 = vmul.f32 %v13597_v60, %v13558_v22  ;;  %v13644_v58 = vpop.eup %8098  ;;  %vm6145_vm10 = vcmp.eq.f32.partialorder %v6144_v9, 8.507059e+37 }
 0x73a   : > { %v6133_v62 = vsel %vm13623_vm6, %v6132_v16, %v6128_v25  ;;  %v6139_v20 = vadd.f32 %v13567_v49, %v6138_v19  ;;  %v5774_v23 = vadd.f32 %v5673_v56, %v5511_v27  ;;  %v5775_v31 = vadd.f32 %v5738_v18, %v5512_v52  ;;  %vm6142_vm9 = vmor %vm6140_vm7, %vm6141_vm5 }
 0x73b   : > { %6495 = vmatmul.f32.gmra.mxu2 %v6133_v62  ;;  %v6147_v3 = vor.u32 1.1754944e-38, %v6146_v54  ;;  %v6152_v6 = vsub.f32 1.0, %v6151_v51  ;;  %v6159_v11 = vand.u32 2147483647, %v13558_v22  ;;  %v6161_v44 = vand.u32 2147483648, %v13558_v22  ;;  %v5413_v57 = vpop.f32.mrf.mxu2 }
 0x73c   : > { %v8101_v2 = vpop.eup %8100  ;;  %v6143_v29 = vsel %vm6142_vm9, %v13567_v49, %v6139_v20  ;;  %v5806_v8 = vsub.f32 0.0, %v5774_v23  ;;  %v5807_v48 = vsub.f32 0.0, %v5775_v31  ;;  %vm6156_vm11 = vweird.f32 %v13597_v60  ;;  %v5478_v30 = vpop.f32.mrf.mxu3 }
 0x73d   : > { %v13652_v10 = vadd.f32 1.0, %v8101_v2  ;;  %v6148_v21 = vsel %vm6145_vm10, %v6147_v3, %v6143_v29  ;;  %v6153_v24 = vmul.f32 %v13597_v60, %v6152_v6  ;;  %8104 = vrcp.f32 %v13619_v43 }
 0x73e   : > { %7696 = vmatmul.msk.f32.gmra.mxu3 %vm552_vm0, %v6148_v21  ;;  %v5862_v15 = vmul.f32 1.442695, %v5806_v8  ;;  %v6166_v49 = vmul.f32 %v13604_v42, %v13560_v1  ;;  %v13662_v36 = vadd.f32 %v14925_v41, %v13532_v5  ;;  %v8103_v33 = vpop.eup %8102  ;;  %8106 = vrcp.f32 %v13627_v45 }
 0x73f   : > { %v6154_v28 = vadd.f32 %v13597_v60, %v6153_v24  ;;  %vm6155_vm1 = vweird.f32 %v13558_v22  ;;  %vm6160_vm2 = vcmp.eq.f32.partialorder %v6159_v11, 8.507059e+37  ;;  %8108 = vrcp.f32 %v13652_v10 }
 0x740   : > { %v5864_v13 = vmul.f32 1.442695, %v5807_v48  ;;  %vm6157_vm3 = vmor %vm6155_vm1, %vm6156_vm11  ;;  %v6162_v59 = vor.u32 1.1754944e-38, %v6161_v44  ;;  %v6167_v37 = vsub.f32 1.0, %v6166_v49  ;;  %8110 = vpow2.f32 %v5862_v15  ;;  %v5679_v48 = vpop.f32.mrf.mxu0  ;;  %v5744_v15 = vpop.f32.mrf.mxu1 }
 0x741   : > { %v6158_v5 = vsel %vm6157_vm3, %v13597_v60, %v6154_v28  ;;  %v6176_v34 = vand.u32 2147483648, %v13560_v1  ;;  %v5513_v12 = vadd.f32 %v5413_v57, %v13233_v17  ;;  %vm6171_vm12 = vweird.f32 %v13604_v42 }
 0x742   : > { %v6163_v7 = vsel %vm6160_vm2, %v6162_v59, %v6158_v5  ;;  %v6168_v22 = vmul.f32 %v13604_v42, %v6167_v37  ;;  %v6174_v38 = vand.u32 2147483647, %v13560_v1  ;;  %v13676_v32 = vadd.f32 1.0, %v8103_v33 }
 0x743   : > { %6498 = vmatmul.f32.gmra.mxu2 %v6163_v7  ;;  %v5776_v46 = vadd.f32 %v5676_v55, %v5513_v12  ;;  %v5514_v53 = vadd.f32 %v5478_v30, %v13238_v39  ;;  %v6181_v60 = vmul.f32 %v13638_v4, %v13592_v40  ;;  %v13681_v63 = vpop.eup %8104  ;;  %8112 = vpow2.f32 %v5864_v13  ;;  %v5416_v62 = vpop.f32.mrf.mxu2 }
 0x744   : > { %v6169_v17 = vadd.f32 %v13604_v42, %v6168_v22  ;;  %vm6170_vm13 = vweird.f32 %v13560_v1  ;;  %v6189_v16 = vand.u32 2147483647, %v13592_v40  ;;  %v13686_v14 = vpop.eup %8106  ;;  %v6177_v56 = vor.u32 1.1754944e-38, %v6176_v34  ;;  %v5481_v31 = vpop.f32.mrf.mxu3 }
 0x745   : > { %vm6172_vm14 = vmor %vm6170_vm13, %vm6171_vm12  ;;  %v5808_v61 = vsub.f32 0.0, %v5776_v46  ;;  %v5777_v9 = vadd.f32 %v5741_v0, %v5514_v53  ;;  %v6182_v54 = vsub.f32 1.0, %v6181_v60  ;;  %v13688_v39 = vpop.eup %8108  ;;  %vm6175_vm6 = vcmp.eq.f32.partialorder %v6174_v38, 8.507059e+37 }
 0x746   : > { %v6173_v18 = vsel %vm6172_vm14, %v13604_v42, %v6169_v17  ;;  %vm6185_vm15 = vweird.f32 %v13592_v40  ;;  %v6196_v19 = vmul.f32 %v13644_v58, %v13599_v47  ;;  %v8111_v1 = vpop.eup %8110  ;;  %v6191_v51 = vand.u32 2147483648, %v13592_v40 }
 0x747   : > { %v6178_v27 = vsel %vm6175_vm6, %v6177_v56, %v6173_v18  ;;  %v5866_v52 = vmul.f32 1.442695, %v5808_v61  ;;  %v5809_v25 = vsub.f32 0.0, %v5777_v9  ;;  %v6183_v20 = vmul.f32 %v13638_v4, %v6182_v54 }
 0x748   : > { %7697 = vmatmul.msk.f32.gmra.mxu3 %vm552_vm0, %v6178_v27  ;;  %vm6186_vm5 = vweird.f32 %v13638_v4  ;;  %vm13698_vm7 = vcmp.eq.f32.partialorder %v6189_v16, 8.507059e+37  ;;  %v6197_v23 = vsub.f32 1.0, %v6196_v19  ;;  %vm6200_vm9 = vweird.f32 %v13599_v47 }
 0x749   : > { %v5868_v3 = vmul.f32 1.442695, %v5809_v25  ;;  %vm6201_vm10 = vweird.f32 %v13644_v58  ;;  %v6204_v6 = vand.u32 2147483647, %v13599_v47  ;;  %v8113_v11 = vpop.eup %8112  ;;  %8114 = vpow2.f32 %v5866_v52  ;;  %vm6187_vm11 = vmor %vm6185_vm15, %vm6186_vm5 }
 0x74a   : > { %v6184_v2 = vadd.f32 %v13638_v4, %v6183_v20  ;;  %v6198_v29 = vmul.f32 %v13644_v58, %v6197_v23  ;;  %v6206_v8 = vand.u32 2147483648, %v13599_v47  ;;  %v13708_v44 = vadd.f32 1.0, %v8111_v1  ;;  %vm6202_vm1 = vmor %vm6200_vm9, %vm6201_vm10  ;;  %v5682_v1 = vpop.f32.mrf.mxu0 }
 0x74b   : > { %v6192_v21 = vor.u32 1.1754944e-38, %v6191_v51  ;;  %v5515_v24 = vadd.f32 %v5416_v62, %v13241_v35  ;;  %v5516_v57 = vadd.f32 %v5481_v31, %v13245_v50  ;;  %8116 = vpow2.f32 %v5868_v3  ;;  %v5419_v7 = vpop.f32.mrf.mxu2  ;;  %v5747_v62 = vpop.f32.mrf.mxu1 }
 0x74c   : > { %v6188_v49 = vsel %vm6187_vm11, %v13638_v4, %v6184_v2  ;;  %v6199_v30 = vadd.f32 %v13644_v58, %v6198_v29  ;;  %v6207_v41 = vor.u32 1.1754944e-38, %v6206_v8  ;;  %v6211_v35 = vmul.f32 %v13681_v63, %v13619_v43  ;;  %v5484_v17 = vpop.f32.mrf.mxu3 }
 0x74d   : > { %v6193_v33 = vsel %vm13698_vm7, %v6192_v21, %v6188_v49  ;;  %v5778_v40 = vadd.f32 %v5679_v48, %v5515_v24  ;;  %v5779_v28 = vadd.f32 %v5744_v15, %v5516_v57  ;;  %8118 = vrcp.f32 %v13676_v32 }
 0x74e   : > { %6501 = vmatmul.f32.gmra.mxu2 %v6193_v33  ;;  %v6203_v50 = vsel %vm6202_vm1, %v13644_v58, %v6199_v30  ;;  %vm6205_vm2 = vcmp.eq.f32.partialorder %v6204_v6, 8.507059e+37  ;;  %v6219_v4 = vand.u32 2147483647, %v13619_v43  ;;  %v6212_v55 = vsub.f32 1.0, %v6211_v35 }
 0x74f   : > { %v6208_v13 = vsel %vm6205_vm2, %v6207_v41, %v6203_v50  ;;  %v5810_v59 = vsub.f32 0.0, %v5778_v40  ;;  %v5811_v37 = vsub.f32 0.0, %v5779_v28  ;;  %v8115_v5 = vpop.eup %8114  ;;  %8120 = vrcp.f32 %v13708_v44 }
 0x750   : > { %v13730_v47 = vadd.f32 1.0, %v8113_v11  ;;  %7698 = vmatmul.msk.f32.gmra.mxu3 %vm552_vm0, %v6208_v13  ;;  %v6221_v34 = vand.u32 2147483648, %v13619_v43  ;;  %v6226_v12 = vmul.f32 %v13686_v14, %v13627_v45  ;;  %v6213_v0 = vmul.f32 %v13681_v63, %v6212_v55 }
 0x751   : > { %v5870_v58 = vmul.f32 1.442695, %v5810_v59  ;;  %vm6215_vm3 = vweird.f32 %v13619_v43  ;;  %vm6216_vm12 = vweird.f32 %v13681_v63  ;;  %v8117_v22 = vpop.eup %8116  ;;  %v13739_v38 = vadd.f32 1.0, %v8115_v5 }
 0x752   : > { %v5872_v46 = vmul.f32 1.442695, %v5811_v37  ;;  %vm13741_vm13 = vcmp.eq.f32.partialorder %v6219_v4, 8.507059e+37  ;;  %v6227_v60 = vsub.f32 1.0, %v6226_v12  ;;  %v6214_v16 = vadd.f32 %v13681_v63, %v6213_v0  ;;  %vm6217_vm6 = vmor %vm6215_vm3, %vm6216_vm12 }
 0x753   : > { %v6222_v56 = vor.u32 1.1754944e-38, %v6221_v34  ;;  %vm6231_vm14 = vweird.f32 %v13686_v14  ;;  %v6236_v61 = vand.u32 2147483648, %v13627_v45  ;;  %v13748_v9 = vpop.eup %8118  ;;  %8122 = vpow2.f32 %v5870_v58 }
 0x754   : > { %v6228_v54 = vmul.f32 %v13686_v14, %v6227_v60  ;;  %v6234_v18 = vand.u32 2147483647, %v13627_v45  ;;  %v5517_v19 = vadd.f32 %v5419_v7, %v13549_v26  ;;  %v13755_v27 = vadd.f32 1.0, %v8117_v22 }
 0x755   : > { %v6218_v52 = vsel %vm6217_vm6, %v13681_v63, %v6214_v16  ;;  %vm6230_vm15 = vweird.f32 %v13627_v45  ;;  %v5518_v25 = vadd.f32 %v5484_v17, %v13662_v36  ;;  %v13760_v51 = vpop.eup %8120  ;;  %8124 = vpow2.f32 %v5872_v46 }
 0x756   : > { %v6223_v43 = vsel %vm13741_vm13, %v6222_v56, %v6218_v52  ;;  %v6229_v20 = vadd.f32 %v13686_v14, %v6228_v54  ;;  %v5780_v42 = vadd.f32 %v5682_v1, %v5517_v19  ;;  %8126 = vrcp.f32 %v13730_v47  ;;  %vm6232_vm5 = vmor %vm6230_vm15, %vm6231_vm14 }
 0x757   : > { %6504 = vmatmul.f32.gmra.mxu2 %v6223_v43  ;;  %v6237_v26 = vor.u32 1.1754944e-38, %v6236_v61  ;;  %v5781_v45 = vadd.f32 %v5747_v62, %v5518_v25  ;;  %v6241_v36 = vmul.f32 %v13688_v39, %v13652_v10  ;;  %8128 = vrcp.f32 %v13739_v38 }
 0x758   : > { %v6233_v63 = vsel %vm6232_vm5, %v13686_v14, %v6229_v20  ;;  %vm6235_vm7 = vcmp.eq.f32.partialorder %v6234_v18, 8.507059e+37  ;;  %v5812_v23 = vsub.f32 0.0, %v5780_v42  ;;  %v6256_v11 = vmul.f32 %v13748_v9, %v13676_v32 }
 0x759   : > { %v6238_v31 = vsel %vm6235_vm7, %v6237_v26, %v6233_v63  ;;  %v5813_v3 = vsub.f32 0.0, %v5781_v45  ;;  %v6242_v6 = vsub.f32 1.0, %v6241_v36  ;;  %v8123_v2 = vpop.eup %8122  ;;  %8130 = vrcp.f32 %v13755_v27 }
 0x75a   : > { %7699 = vmatmul.msk.f32.gmra.mxu3 %vm552_vm0, %v6238_v31  ;;  %v5874_v29 = vmul.f32 1.442695, %v5812_v23  ;;  %v6249_v8 = vand.u32 2147483647, %v13652_v10  ;;  %v6251_v48 = vand.u32 2147483648, %v13652_v10  ;;  %vm6246_vm9 = vweird.f32 %v13688_v39 }
 0x75b   : > { %v5876_v21 = vmul.f32 1.442695, %v5813_v3  ;;  %v6243_v14 = vmul.f32 %v13688_v39, %v6242_v6  ;;  %v6257_v24 = vsub.f32 1.0, %v6256_v11  ;;  %v8125_v57 = vpop.eup %8124  ;;  %v13780_v15 = vadd.f32 1.0, %v8123_v2 }
 0x75c   : > { %8132 = vpow2.f32 %v5874_v29  ;;  %vm6245_vm10 = vweird.f32 %v13652_v10  ;;  %v6266_v49 = vand.u32 2147483648, %v13676_v32  ;;  %v13784_v30 = vpop.eup %8126  ;;  %vm6261_vm11 = vweird.f32 %v13748_v9 }
 0x75d   : > { %v6244_v41 = vadd.f32 %v13688_v39, %v6243_v14  ;;  %v6258_v33 = vmul.f32 %v13748_v9, %v6257_v24  ;;  %v6264_v40 = vand.u32 2147483647, %v13676_v32  ;;  %v13790_v28 = vpop.eup %8128  ;;  %8134 = vpow2.f32 %v5876_v21  ;;  %vm6247_vm1 = vmor %vm6245_vm10, %vm6246_vm9 }
 0x75e   : > { %vm6250_vm2 = vcmp.eq.f32.partialorder %v6249_v8, 8.507059e+37  ;;  %v6252_v35 = vor.u32 1.1754944e-38, %v6251_v48  ;;  %v6271_v10 = vmul.f32 %v13760_v51, %v13708_v44  ;;  %v13794_v50 = vadd.f32 1.0, %v8125_v57 }
 0x75f   : > { %v6248_v4 = vsel %vm6247_vm1, %v13688_v39, %v6244_v41  ;;  %v6259_v13 = vadd.f32 %v13748_v9, %v6258_v33  ;;  %vm6260_vm3 = vweird.f32 %v13676_v32  ;;  %v13799_v59 = vpop.eup %8130  ;;  %8136 = vrcp.f32 %v13780_v15 }
 0x760   : > { %v6253_v37 = vsel %vm6250_vm2, %v6252_v35, %v6248_v4  ;;  %vm6262_vm12 = vmor %vm6260_vm3, %vm6261_vm11  ;;  %v6267_v55 = vor.u32 1.1754944e-38, %v6266_v49  ;;  %v6272_v5 = vsub.f32 1.0, %v6271_v10  ;;  %vm6265_vm13 = vcmp.eq.f32.partialorder %v6264_v40, 8.507059e+37 }
 0x761   : > { %6507 = vmatmul.f32.gmra.mxu2 %v6253_v37  ;;  %v6263_v34 = vsel %vm6262_vm12, %v13748_v9, %v6259_v13  ;;  %v6281_v39 = vand.u32 2147483648, %v13708_v44  ;;  %v6286_v12 = vmul.f32 %v13784_v30, %v13730_v47  ;;  %vm6276_vm14 = vweird.f32 %v13760_v51 }
 0x762   : > { %v8133_v32 = vpop.eup %8132  ;;  %v6268_v58 = vsel %vm6265_vm13, %v6267_v55, %v6263_v34  ;;  %v6273_v0 = vmul.f32 %v13760_v51, %v6272_v5  ;;  %v6279_v7 = vand.u32 2147483647, %v13708_v44  ;;  %8138 = vrcp.f32 %v13794_v50 }
 0x763   : > { %v13812_v22 = vadd.f32 1.0, %v8133_v32  ;;  %7700 = vmatmul.msk.f32.gmra.mxu3 %vm552_vm0, %v6268_v58  ;;  %vm6275_vm6 = vweird.f32 %v13708_v44  ;;  %v6287_v46 = vsub.f32 1.0, %v6286_v12  ;;  %v8135_v53 = vpop.eup %8134  ;;  %vm6290_vm15 = vweird.f32 %v13730_v47 }
 0x764   : > { %v6274_v60 = vadd.f32 %v13760_v51, %v6273_v0  ;;  %v6296_v17 = vand.u32 2147483648, %v13730_v47  ;;  %v6301_v16 = vmul.f32 %v13790_v28, %v13739_v38  ;;  %vm6277_vm5 = vmor %vm6275_vm6, %vm6276_vm14  ;;  %v6282_v56 = vor.u32 1.1754944e-38, %v6281_v39 }
 0x765   : > { %v6288_v61 = vmul.f32 %v13784_v30, %v6287_v46  ;;  %vm6291_vm7 = vweird.f32 %v13784_v30  ;;  %v6294_v9 = vand.u32 2147483647, %v13730_v47  ;;  %v13824_v44 = vpop.eup %8136  ;;  %v13826_v54 = vadd.f32 1.0, %v8135_v53 }
 0x766   : > { %v6278_v18 = vsel %vm6277_vm5, %v13760_v51, %v6274_v60  ;;  %vm6280_vm9 = vcmp.eq.f32.partialorder %v6279_v7, 8.507059e+37  ;;  %v6302_v19 = vsub.f32 1.0, %v6301_v16  ;;  %8140 = vrcp.f32 %v13812_v22  ;;  %vm6292_vm10 = vmor %vm6290_vm15, %vm6291_vm7 }
 0x767   : > { %v6283_v1 = vsel %vm6280_vm9, %v6282_v56, %v6278_v18  ;;  %v6289_v52 = vadd.f32 %v13784_v30, %v6288_v61  ;;  %v6297_v25 = vor.u32 1.1754944e-38, %v6296_v17  ;;  %vm6306_vm11 = vweird.f32 %v13790_v28 }
 0x768   : > { %v6303_v62 = vmul.f32 %v13790_v28, %v6302_v19  ;;  %v6311_v43 = vand.u32 2147483648, %v13739_v38  ;;  %v6316_v51 = vmul.f32 %v13799_v59, %v13755_v27  ;;  %v13838_v20 = vpop.eup %8138  ;;  %vm6295_vm1 = vcmp.eq.f32.partialorder %v6294_v9, 8.507059e+37 }
 0x769   : > { %6510 = vmatmul.f32.gmra.mxu2 %v6283_v1  ;;  %v6293_v42 = vsel %vm6292_vm10, %v13784_v30, %v6289_v52  ;;  %vm6305_vm2 = vweird.f32 %v13739_v38  ;;  %v6309_v47 = vand.u32 2147483647, %v13739_v38  ;;  %8142 = vrcp.f32 %v13826_v54 }
 0x76a   : > { %v6298_v26 = vsel %vm6295_vm1, %v6297_v25, %v6293_v42  ;;  %v6304_v45 = vadd.f32 %v13790_v28, %v6303_v62  ;;  %v6317_v36 = vsub.f32 1.0, %v6316_v51  ;;  %vm6307_vm3 = vmor %vm6305_vm2, %vm6306_vm11  ;;  %v6324_v63 = vand.u32 2147483647, %v13755_v27 }
 0x76b   : > { %7701 = vmatmul.msk.f32.gmra.mxu3 %vm552_vm0, %v6298_v26  ;;  %v6326_v23 = vand.u32 2147483648, %v13755_v27  ;;  %v6331_v31 = vmul.f32 %v13824_v44, %v13780_v15  ;;  %v6312_v6 = vor.u32 1.1754944e-38, %v6311_v43  ;;  %vm6321_vm12 = vweird.f32 %v13799_v59 }
 0x76c   : > { %v6308_v3 = vsel %vm6307_vm3, %v13790_v28, %v6304_v45  ;;  %v6318_v38 = vmul.f32 %v13799_v59, %v6317_v36  ;;  %v13853_v11 = vpop.eup %8140  ;;  %vm6310_vm13 = vcmp.eq.f32.partialorder %v6309_v47, 8.507059e+37  ;;  %vm6320_vm14 = vweird.f32 %v13755_v27 }
 0x76d   : > { %v6332_v2 = vsub.f32 1.0, %v6331_v31  ;;  %v6313_v29 = vsel %vm6310_vm13, %v6312_v6, %v6308_v3  ;;  %v6346_v48 = vmul.f32 %v13838_v20, %v13794_v50  ;;  %vm6322_vm6 = vmor %vm6320_vm14, %vm6321_vm12  ;;  %vm6325_vm15 = vcmp.eq.f32.partialorder %v6324_v63, 8.507059e+37 }
 0x76e   : > { %v6319_v8 = vadd.f32 %v13799_v59, %v6318_v38  ;;  %v6327_v21 = vor.u32 1.1754944e-38, %v6326_v23  ;;  %vm6336_vm5 = vweird.f32 %v13824_v44  ;;  %v6341_v49 = vand.u32 2147483648, %v13780_v15 }
 0x76f   : > { %v6333_v14 = vmul.f32 %v13824_v44, %v6332_v2  ;;  %v8143_v24 = vpop.eup %8142  ;;  %v6347_v30 = vsub.f32 1.0, %v6346_v48  ;;  %v6361_v41 = vmul.f32 %v13853_v11, %v13812_v22  ;;  %vm6335_vm7 = vweird.f32 %v13780_v15 }
 0x770   : > { %v6323_v57 = vsel %vm6322_vm6, %v13799_v59, %v6319_v8  ;;  %v6339_v40 = vand.u32 2147483647, %v13780_v15  ;;  %vm13868_vm9 = vmor %vm6335_vm7, %vm6336_vm5  ;;  %vm6351_vm10 = vweird.f32 %v13838_v20  ;;  %v6356_v10 = vand.u32 2147483648, %v13794_v50 }
 0x771   : > { %6513 = vmatmul.f32.gmra.mxu2 %v6313_v29  ;;  %v6328_v27 = vsel %vm6325_vm15, %v6327_v21, %v6323_v57  ;;  %v6334_v33 = vadd.f32 %v13824_v44, %v6333_v14  ;;  %v6348_v35 = vmul.f32 %v13838_v20, %v6347_v30  ;;  %v6362_v4 = vsub.f32 1.0, %v6361_v41 }
 0x772   : > { %v6354_v59 = vand.u32 2147483647, %v13794_v50  ;;  %v6376_v15 = vmul.f32 %v8143_v24, %v13826_v54  ;;  %v6342_v37 = vor.u32 1.1754944e-38, %v6341_v49  ;;  %vm6350_vm11 = vweird.f32 %v13794_v50 }
 0x773   : > { %7702 = vmatmul.msk.f32.gmra.mxu3 %vm552_vm0, %v6328_v27  ;;  %v6338_v13 = vsel %vm13868_vm9, %v13824_v44, %v6334_v33  ;;  %v6349_v55 = vadd.f32 %v13838_v20, %v6348_v35  ;;  %v6363_v5 = vmul.f32 %v13853_v11, %v6362_v4  ;;  %vm6340_vm1 = vcmp.eq.f32.partialorder %v6339_v40, 8.507059e+37  ;;  %vm6352_vm2 = vmor %vm6350_vm11, %vm6351_vm10 }
 0x774   : > { %v6377_v34 = vsub.f32 1.0, %v6376_v15  ;;  %v6343_v39 = vsel %vm6340_vm1, %v6342_v37, %v6338_v13  ;;  %v6357_v32 = vor.u32 1.1754944e-38, %v6356_v10  ;;  %vm6355_vm3 = vcmp.eq.f32.partialorder %v6354_v59, 8.507059e+37 }
 0x775   : > { %v6353_v12 = vsel %vm6352_vm2, %v13838_v20, %v6349_v55  ;;  %v6364_v58 = vadd.f32 %v13853_v11, %v6363_v5  ;;  %vm6366_vm12 = vweird.f32 %v13853_v11  ;;  %v6371_v46 = vand.u32 2147483648, %v13812_v22 }
 0x776   : > { %v6378_v0 = vmul.f32 %v8143_v24, %v6377_v34  ;;  %v6358_v7 = vsel %vm6355_vm3, %v6357_v32, %v6353_v12  ;;  %vm6365_vm13 = vweird.f32 %v13812_v22  ;;  %v6369_v50 = vand.u32 2147483647, %v13812_v22  ;;  %v6588_v12 = vld [vmem:[%s14290_s8] sm:$0xff]  ;;  %v6589_v32 = vld [vmem:[%s14290_s8 + $0x8] sm:$0xff] }
 0x777   : > { %vm6381_vm14 = vweird.f32 %v8143_v24  ;;  %vm6367_vm6 = vmor %vm6365_vm13, %vm6366_vm12  ;;  %v6386_v60 = vand.u32 2147483648, %v13826_v54  ;;  %vm6380_vm15 = vweird.f32 %v13826_v54  ;;  %v6384_v56 = vand.u32 2147483647, %v13826_v54 }
 0x778   : > { %v6379_v53 = vadd.f32 %v8143_v24, %v6378_v0  ;;  %v6368_v16 = vsel %vm6367_vm6, %v13853_v11, %v6364_v58  ;;  %v6372_v9 = vor.u32 1.1754944e-38, %v6371_v46  ;;  %vm6382_vm5 = vmor %vm6380_vm15, %vm6381_vm14  ;;  %vm6370_vm7 = vcmp.eq.f32.partialorder %v6369_v50, 8.507059e+37  ;;  %v6590_v58 = vld [vmem:[%s14290_s8 + $0x10] sm:$0xff]  ;;  %v6591_v0 = vld [vmem:[%s14290_s8 + $0x18] sm:$0xff] }
 0x779   : > { %6516 = vmatmul.f32.gmra.mxu2 %v6343_v39  ;;  %v6387_v19 = vor.u32 1.1754944e-38, %v6386_v60  ;;  %vm6385_vm9 = vcmp.eq.f32.partialorder %v6384_v56, 8.507059e+37  ;;  %v6593_v46 = vld [vmem:[%s14290_s8 + $0x28] sm:$0xff]  ;;  %v6594_v50 = vld [vmem:[%s14290_s8 + $0x30] sm:$0xff]  ;;  %vm6646_vm10 = vcmask 1041409   ;;  %vm6649_vm11 = vcmask 1042434  }
 0x77a   : > { %v6475_v17 = vpop.f32.mrf.mxu2  ;;  %v6540_v61 = vpop.f32.mrf.mxu3  ;;  %v6383_v22 = vsel %vm6382_vm5, %v8143_v24, %v6379_v53  ;;  %v6373_v18 = vsel %vm6370_vm7, %v6372_v9, %v6368_v16  ;;  %v6595_v53 = vld [vmem:[%s14290_s8 + $0x38] sm:$0xff]  ;;  %vm6652_vm1 = vcmask 1043459   ;;  %vm6655_vm2 = vcmask 1044484  }
 0x77b   : > { %7703 = vmatmul.msk.f32.gmra.mxu3 %vm552_vm0, %v6358_v7  ;;  %v13895_v44 = vadd.f32 %v6540_v61, %v6475_v17  ;;  %v6388_v1 = vsel %vm6385_vm9, %v6387_v19, %v6383_v22  ;;  %v6592_v7 = vld [vmem:[%s14290_s8 + $0x20] sm:$0xff]  ;;  %vm6658_vm3 = vcmask 1045509   ;;  %vm6661_vm12 = vcmask 1046534  }
 0x77c   : > { %vm6664_vm13 = vcmask 1047559   ;;  %vm6735_vm14 = vcmask 654336   ;;  %vm6740_vm6 = vcmask 523264   ;;  %vm6738_vm15 = vcmask 916480  }
 0x77d   : > { %vm6796_vm5 = vcmask 130048  }
 0x781   : > { %6519 = vmatmul.f32.gmra.mxu2 %v6373_v18 }
 0x782   : > { %v6478_v52 = vpop.f32.mrf.mxu2 }
 0x783   : > { %7704 = vmatmul.msk.f32.gmra.mxu3 %vm552_vm0, %v6388_v1 }
 0x785   : > { %v6543_v25 = vpop.f32.mrf.mxu3 }
 0x786   : > { %v6544_v62 = vadd.f32 %v6543_v25, %v6478_v52 }
 0x78a   : > { %v6481_v43 = vpop.f32.mrf.mxu2 }
 0x78f   : > { %v6546_v51 = vpop.f32.mrf.mxu3 }
 0x790   : > { %v6547_v54 = vadd.f32 %v6546_v51, %v6481_v43  ;;  %v6756_v43 = vld [vmem:[%s14291_s9 + $0x70] sm:$0xff]  ;;  %v6755_v51 = vld [vmem:[%s14291_s9 + $0x68] sm:$0xff] }
 0x793   : > { %v6484_v20 = vpop.f32.mrf.mxu2 }
 0x799   : > { %v6549_v42 = vpop.f32.mrf.mxu3 }
 0x79a   : > { %v6550_v47 = vadd.f32 %v6549_v42, %v6484_v20  ;;  %v6754_v20 = vld [vmem:[%s14291_s9 + $0x60] sm:$0xff] }
 0x79e   : > { %v6487_v26 = vpop.f32.mrf.mxu2 }
 0x7a3   : > { %v6552_v45 = vpop.f32.mrf.mxu3 }
 0x7a4   : > { %v6553_v36 = vadd.f32 %v6552_v45, %v6487_v26  ;;  %v6789_v26 = vld [vmem:[%s14291_s9 + $0x178] sm:$0xff] }
 0x7a9   : > { %v6490_v63 = vpop.f32.mrf.mxu2 }
 0x7ae   : > { %v6555_v23 = vpop.f32.mrf.mxu3 }
 0x7af   : > { %v6556_v31 = vadd.f32 %v6555_v23, %v6490_v63  ;;  %v6788_v63 = vld [vmem:[%s14291_s9 + $0x170] sm:$0xff]  ;;  %v6751_v23 = vld [vmem:[%s14291_s9 + $0x48] sm:$0xff] }
 0x7b4   : > { %v6493_v3 = vpop.f32.mrf.mxu2 }
 0x7b7   : > { %v6558_v6 = vpop.f32.mrf.mxu3 }
 0x7b8   : > { %v6559_v38 = vadd.f32 %v6558_v6, %v6493_v3  ;;  %v6750_v6 = vld [vmem:[%s14291_s9 + $0x40] sm:$0xff] }
 0x7be   : > { %v6496_v11 = vpop.f32.mrf.mxu2 }
 0x7c1   : > { %v6561_v2 = vpop.f32.mrf.mxu3 }
 0x7c2   : > { %v6562_v29 = vadd.f32 %v6561_v2, %v6496_v11  ;;  %v6786_v2 = vld [vmem:[%s14291_s9 + $0x160] sm:$0xff] }
 0x7c6   : > { %v6499_v8 = vpop.f32.mrf.mxu2 }
 0x7cb   : > { %v6564_v48 = vpop.f32.mrf.mxu3 }
 0x7cc   : > { %v6565_v21 = vadd.f32 %v6564_v48, %v6499_v8  ;;  %v6749_v48 = vld [vmem:[%s14291_s9 + $0x38] sm:$0xff] }
 0x7d1   : > { %v6502_v14 = vpop.f32.mrf.mxu2 }
 0x7d3   : > { %v6567_v24 = vpop.f32.mrf.mxu3 }
 0x7d4   : > { %v6568_v39 = vadd.f32 %v6567_v24, %v6502_v14 }
 0x7da   : > { %v6505_v57 = vpop.f32.mrf.mxu2 }
 0x7dd   : > { %v6570_v49 = vpop.f32.mrf.mxu3 }
 0x7de   : > { %v6571_v34 = vadd.f32 %v6570_v49, %v6505_v57  ;;  %v6785_v57 = vld [vmem:[%s14291_s9 + $0x158] sm:$0xff] }
 0x7e4   : > { %v6508_v30 = vpop.f32.mrf.mxu2 }
 0x7e6   : > { %v6573_v41 = vpop.f32.mrf.mxu3 }
 0x7e7   : > { %v6574_v5 = vadd.f32 %v6573_v41, %v6508_v30 }
 0x7ec   : > { %v6511_v27 = vpop.f32.mrf.mxu2 }
 0x7ee   : > { %v6576_v33 = vpop.f32.mrf.mxu3 }
 0x7ef   : > { %v6577_v55 = vadd.f32 %v6576_v33, %v6511_v27  ;;  %v6748_v33 = vld [vmem:[%s14291_s9 + $0x30] sm:$0xff] }
 0x7f4   : > { %v6514_v40 = vpop.f32.mrf.mxu2 }
 0x7f6   : > { %v6579_v28 = vpop.f32.mrf.mxu3 }
 0x7f7   : > { %v6580_v37 = vadd.f32 %v6579_v28, %v6514_v40 }
 0x7fc   : > { %v6517_v35 = vpop.f32.mrf.mxu2 }
 0x7fe   : > { %v6582_v10 = vpop.f32.mrf.mxu3 }
 0x7ff   : > { %v6583_v15 = vadd.f32 %v6582_v10, %v6517_v35 }
 0x804   : > { %v6520_v4 = vpop.f32.mrf.mxu2 }
 0x806   : > { %v6585_v13 = vpop.f32.mrf.mxu3 }
 0x807   : > { %v6586_v59 = vadd.f32 %v6585_v13, %v6520_v4  ;;  %v6784_v4 = vld [vmem:[%s14291_s9 + $0x150] sm:$0xff] }
 0x809   : > { %6596 = vmatpush.msra.mxu0 %v6586_v59 }
 0x80b   : > { %6597 = vmatpush.msra.mxu0 %v6583_v15 }
 0x80d   : > { %6598 = vmatpush.msra.mxu0 %v6580_v37 }
 0x80f   : > { %6599 = vmatpush.msra.mxu0 %v6577_v55  ;;  %v6747_v55 = vld [vmem:[%s14291_s9 + $0x28] sm:$0xff] }
 0x811   : > { %6600 = vmatpush.msra.mxu0 %v6574_v5 }
 0x813   : > { %6601 = vmatpush.msra.mxu0 %v6571_v34 }
 0x815   : > { %6602 = vmatpush.msra.mxu0 %v6568_v39 }
 0x817   : > { %6603 = vmatpush.msra.mxu0 %v6565_v21 }
 0x819   : > { %6604 = vmatpush.msra.mxu0 %v6562_v29 }
 0x81b   : > { %6605 = vmatpush.msra.mxu0 %v6559_v38 }
 0x81d   : > { %6606 = vmatpush.msra.mxu0 %v6556_v31  ;;  %v6787_v31 = vld [vmem:[%s14291_s9 + $0x168] sm:$0xff] }
 0x81f   : > { %6607 = vmatpush.msra.mxu0 %v6553_v36  ;;  %v6752_v36 = vld [vmem:[%s14291_s9 + $0x50] sm:$0xff] }
 0x821   : > { %6608 = vmatpush.msra.mxu0 %v6550_v47  ;;  %v6753_v47 = vld [vmem:[%s14291_s9 + $0x58] sm:$0xff] }
 0x823   : > { %6609 = vmatpush.msra.mxu0 %v6547_v54 }
 0x825   : > { %6610 = vmatpush.msra.mxu0 %v6544_v62  ;;  %v6757_v62 = vld [vmem:[%s14291_s9 + $0x78] sm:$0xff] }
 0x826   : > { %6799 = vmatpush.msra.mxu1 %v6757_v62 }
 0x827   : > { %6611 = vmatpush.msra.mxu0 %v13895_v44 }
 0x828   : > { %6612 = vmatmul.f32.vlgmr.msra.gmra.mxu0 %v6588_v12  ;;  %6800 = vmatpush.msra.mxu1 %v6756_v43 }
 0x829   : > { %6839 = vmatpush.msrb.mxu0 %v6789_v26 }
 0x82a   : > { %6801 = vmatpush.msra.mxu1 %v6755_v51 }
 0x82b   : > { %6840 = vmatpush.msrb.mxu0 %v6788_v63 }
 0x82c   : > { %6802 = vmatpush.msra.mxu1 %v6754_v20 }
 0x82d   : > { %6841 = vmatpush.msrb.mxu0 %v6787_v31 }
 0x82e   : > { %6803 = vmatpush.msra.mxu1 %v6753_v47 }
 0x82f   : > { %6842 = vmatpush.msrb.mxu0 %v6786_v2 }
 0x830   : > { %6615 = vmatmul.f32.gmra.mxu0 %v6589_v32  ;;  %6804 = vmatpush.msra.mxu1 %v6752_v36  ;;  %v6783_v32 = vld [vmem:[%s14291_s9 + $0x148] sm:$0xff] }
 0x831   : > { %6843 = vmatpush.msrb.mxu0 %v6785_v57  ;;  %v6773_v57 = vld [vmem:[%s14291_s9 + $0xf8] sm:$0xff] }
 0x832   : > { %6805 = vmatpush.msra.mxu1 %v6751_v23 }
 0x833   : > { %6844 = vmatpush.msrb.mxu0 %v6784_v4  ;;  %v6764_v4 = vld [vmem:[%s14291_s9 + $0xb0] sm:$0xff] }
 0x834   : > { %6806 = vmatpush.msra.mxu1 %v6750_v6 }
 0x835   : > { %6845 = vmatpush.msrb.mxu0 %v6783_v32  ;;  %v6758_v32 = vld [vmem:[%s14291_s9 + $0x80] sm:$0xff] }
 0x836   : > { %6807 = vmatpush.msra.mxu1 %v6749_v48 }
 0x838   : > { %6618 = vmatmul.f32.gmra.mxu0 %v6590_v58  ;;  %6808 = vmatpush.msra.mxu1 %v6748_v33  ;;  %v6769_v33 = vld [vmem:[%s14291_s9 + $0xd8] sm:$0xff] }
 0x83a   : > { %6809 = vmatpush.msra.mxu1 %v6747_v55  ;;  %v6780_v55 = vld [vmem:[%s14291_s9 + $0x130] sm:$0xff] }
 0x840   : > { %6621 = vmatmul.f32.gmra.mxu0 %v6591_v0 }
 0x848   : > { %6624 = vmatmul.f32.gmra.mxu0 %v6592_v7 }
 0x850   : > { %6627 = vmatmul.f32.gmra.mxu0 %v6593_v46 }
 0x858   : > { %6630 = vmatmul.f32.gmra.mxu0 %v6594_v50  ;;  %v6746_v50 = vld [vmem:[%s14291_s9 + $0x20] sm:$0xff] }
 0x859   : > { %6810 = vmatpush.msra.mxu1 %v6746_v50  ;;  %v6893_v50 = vld [vmem:[%s14293_s11 + $0x70] sm:$0xff] }
 0x85a   : > { %6903 = vmatpush.msrb.mxu2 %v6893_v50 }
 0x860   : > { %6633 = vmatmul.f32.gmra.mxu0 %v6595_v53 }
 0x8a5   : > { %v13923_v60 = vpop.f32.mrf.mxu0 }
 0x8a6   : > { %v6667_v21 = vrot.slane %v13923_v60, 1  ;;  %v6701_v14 = vrot.slane %v13923_v60, 3  ;;  %v6684_v30 = vrot.slane %v13923_v60, 2  ;;  %v6718_v5 = vrot.slane %v13923_v60, 4 }
 0x8ad   : > { %v13925_v17 = vpop.f32.mrf.mxu0 }
 0x8ae   : > { %v6645_v16 = vrot.slane %v13925_v17, 7  ;;  %v6702_v38 = vrot.slane %v13925_v17, 2  ;;  %v6668_v40 = vsel %vm6646_vm10, %v13925_v17, %v6667_v21  ;;  %v6685_v34 = vrot.slane %v13925_v17, 1 }
 0x8af   : > { %v6719_v58 = vrot.slane %v13925_v17, 3  ;;  %v6782_v17 = vld [vmem:[%s14291_s9 + $0x140] sm:$0xff] }
 0x8b0   : > { %v6647_v56 = vsel %vm6646_vm10, %v6645_v16, %v13923_v60  ;;  %v6703_v28 = vsel %vm6646_vm10, %v6702_v38, %v6701_v14  ;;  %6846 = vmatpush.msrb.mxu0 %v6782_v17  ;;  %v6686_v26 = vsel %vm6646_vm10, %v6685_v34, %v6684_v30  ;;  %v6743_v38 = vld [vmem:[%s14291_s9 + $0x8] sm:$0xff]  ;;  %v6772_v30 = vld [vmem:[%s14291_s9 + $0xf0] sm:$0xff] }
 0x8b1   : > { %v6779_v34 = vld [vmem:[%s14291_s9 + $0x128] sm:$0xff] }
 0x8b5   : > { %v13930_v61 = vpop.f32.mrf.mxu0 }
 0x8b6   : > { %v6648_v9 = vrot.slane %v13930_v61, 6  ;;  %v6669_v29 = vrot.slane %v13930_v61, 7  ;;  %v6704_v8 = vrot.slane %v13930_v61, 1  ;;  %v6687_v63 = vsel %vm6649_vm11, %v13930_v61, %v6686_v26  ;;  %v6884_v26 = vld [vmem:[%s14293_s11 + $0x28] sm:$0xff] }
 0x8b8   : > { %v6650_v44 = vsel %vm6649_vm11, %v6648_v9, %v6647_v56  ;;  %v6705_v13 = vsel %vm6649_vm11, %v6704_v8, %v6703_v28  ;;  %v6670_v59 = vsel %vm6649_vm11, %v6669_v29, %v6668_v40  ;;  %v6721_v9 = vrot.slane %v13930_v61, 2  ;;  %v6768_v40 = vld [vmem:[%s14291_s9 + $0xd0] sm:$0xff]  ;;  %v6767_v28 = vld [vmem:[%s14291_s9 + $0xc8] sm:$0xff] }
 0x8bd   : > { %v13934_v22 = vpop.f32.mrf.mxu0 }
 0x8be   : > { %v6651_v18 = vrot.slane %v13934_v22, 5  ;;  %v6671_v24 = vrot.slane %v13934_v22, 6  ;;  %v6706_v39 = vsel %vm6652_vm1, %v13934_v22, %v6705_v13  ;;  %v6723_v62 = vrot.slane %v13934_v22, 1  ;;  %v6763_v13 = vld [vmem:[%s14291_s9 + $0xa8] sm:$0xff] }
 0x8c0   : > { %v6653_v19 = vsel %vm6652_vm1, %v6651_v18, %v6650_v44  ;;  %v6672_v12 = vsel %vm6652_vm1, %v6671_v24, %v6670_v59  ;;  %v6762_v59 = vld [vmem:[%s14291_s9 + $0xa0] sm:$0xff] }
 0x8c5   : > { %v13938_v1 = vpop.f32.mrf.mxu0 }
 0x8c6   : > { %v6654_v52 = vrot.slane %v13938_v1, 4  ;;  %v6673_v41 = vrot.slane %v13938_v1, 5  ;;  %v6707_v27 = vrot.slane %v13938_v1, 7  ;;  %v6690_v20 = vrot.slane %v13938_v1, 6 }
 0x8c8   : > { %v6656_v25 = vsel %vm6655_vm2, %v6654_v52, %v6653_v19  ;;  %v6674_v7 = vsel %vm6655_vm2, %v6673_v41, %v6672_v12  ;;  %v6708_v46 = vsel %vm6655_vm2, %v6707_v27, %v6706_v39  ;;  %v6745_v19 = vld [vmem:[%s14291_s9 + $0x18] sm:$0xff]  ;;  %v6771_v41 = vld [vmem:[%s14291_s9 + $0xe8] sm:$0xff]  ;;  %v6770_v27 = vld [vmem:[%s14291_s9 + $0xe0] sm:$0xff] }
 0x8c9   : > { %6811 = vmatpush.msra.mxu1 %v6745_v19  ;;  %v6759_v39 = vld [vmem:[%s14291_s9 + $0x88] sm:$0xff]  ;;  %v6778_v12 = vld [vmem:[%s14291_s9 + $0x120] sm:$0xff] }
 0x8ca   : > { %v6790_v19 = vld [vmem:[%s14291_s9 + $0x180] sm:$0xff] }
 0x8cd   : > { %v13951_v54 = vpop.f32.mrf.mxu0 }
 0x8ce   : > { %v6657_v42 = vrot.slane %v13951_v54, 3  ;;  %v6675_v35 = vrot.slane %v13951_v54, 4  ;;  %v6709_v10 = vrot.slane %v13951_v54, 6  ;;  %v6726_v36 = vrot.slane %v13951_v54, 7 }
 0x8d0   : > { %v6659_v45 = vsel %vm6658_vm3, %v6657_v42, %v6656_v25  ;;  %v6676_v53 = vsel %vm6658_vm3, %v6675_v35, %v6674_v7  ;;  %v6710_v16 = vsel %vm6658_vm3, %v6709_v10, %v6708_v46  ;;  %v6688_v25 = vrot.slane %v13934_v22, 7  ;;  %v6744_v42 = vld [vmem:[%s14291_s9 + $0x10] sm:$0xff]  ;;  %v6766_v35 = vld [vmem:[%s14291_s9 + $0xc0] sm:$0xff]  ;;  %v6765_v10 = vld [vmem:[%s14291_s9 + $0xb8] sm:$0xff] }
 0x8d1   : > { %v6720_v22 = vsel %vm6646_vm10, %v6719_v58, %v6718_v5  ;;  %6812 = vmatpush.msra.mxu1 %v6744_v42  ;;  %v6760_v5 = vld [vmem:[%s14291_s9 + $0x90] sm:$0xff]  ;;  %v6777_v58 = vld [vmem:[%s14291_s9 + $0x118] sm:$0xff]  ;;  %v6775_v7 = vld [vmem:[%s14291_s9 + $0x108] sm:$0xff] }
 0x8d2   : > { %v6722_v31 = vsel %vm6649_vm11, %v6721_v9, %v6720_v22  ;;  %v6774_v46 = vld [vmem:[%s14291_s9 + $0x100] sm:$0xff]  ;;  %v6885_v22 = vld [vmem:[%s14293_s11 + $0x30] sm:$0xff] }
 0x8d3   : > { %v6724_v29 = vsel %vm6652_vm1, %v6723_v62, %v6722_v31  ;;  %6813 = vmatpush.msra.mxu1 %v6743_v38  ;;  %v6887_v42 = vld [vmem:[%s14293_s11 + $0x40] sm:$0xff]  ;;  %v6931_v38 = vld [vmem:[%s14295_s13 + $0x48] sm:$0xff] }
 0x8d4   : > { %v6725_v61 = vsel %vm6655_vm2, %v13938_v1, %v6724_v29  ;;  %v6879_v31 = vld [vmem:[%s14293_s11] sm:$0xff]  ;;  %v6928_v29 = vld [vmem:[%s14295_s13 + $0x30] sm:$0xff] }
 0x8d5   : > { %v13976_v3 = vpop.f32.mrf.mxu0  ;;  %v6727_v21 = vsel %vm6658_vm3, %v6726_v36, %v6725_v61  ;;  %v6882_v36 = vld [vmem:[%s14293_s11 + $0x18] sm:$0xff] }
 0x8d6   : > { %v6660_v11 = vrot.slane %v13976_v3, 2  ;;  %v6677_v15 = vrot.slane %v13976_v3, 3  ;;  %v6711_v37 = vrot.slane %v13976_v3, 5  ;;  %v6694_v23 = vrot.slane %v13976_v3, 4 }
 0x8d7   : > { %v6728_v6 = vrot.slane %v13976_v3, 6  ;;  %v6742_v3 = vld [vmem:[%s14291_s9] sm:$0xff] }
 0x8d8   : > { %v6662_v49 = vsel %vm6661_vm12, %v6660_v11, %v6659_v45  ;;  %v6678_v44 = vsel %vm6661_vm12, %v6677_v15, %v6676_v53  ;;  %v6712_v18 = vsel %vm6661_vm12, %v6711_v37, %v6710_v16  ;;  %v6692_v45 = vrot.slane %v13951_v54, 5  ;;  %6814 = vmatpush.msra.mxu1 %v6742_v3  ;;  %v6781_v15 = vld [vmem:[%s14291_s9 + $0x138] sm:$0xff]  ;;  %v6892_v53 = vld [vmem:[%s14293_s11 + $0x68] sm:$0xff] }
 0x8d9   : > { %v6689_v11 = vsel %vm6652_vm1, %v6688_v25, %v6687_v63  ;;  %v6729_v24 = vsel %vm6661_vm12, %v6728_v6, %v6727_v21  ;;  %6847 = vmatpush.msrb.mxu0 %v6781_v15  ;;  %v6761_v37 = vld [vmem:[%s14291_s9 + $0x98] sm:$0xff]  ;;  %6904 = vmatpush.msrb.mxu2 %v6892_v53  ;;  %v6881_v63 = vld [vmem:[%s14293_s11 + $0x10] sm:$0xff]  ;;  %v7757_v21 = vld [vmem:[%s14292_s10] ss:$0 sm:$0xff] }
 0x8da   : > { %v6691_v8 = vsel %vm6655_vm2, %v6690_v20, %v6689_v11  ;;  %6819 = vmatpush.msrb.mxu1 %v6773_v57  ;;  %v6890_v16 = vld [vmem:[%s14293_s11 + $0x58] sm:$0xff]  ;;  %v6888_v20 = vld [vmem:[%s14293_s11 + $0x48] sm:$0xff]  ;;  %v6932_v6 = vld [vmem:[%s14295_s13 + $0x50] sm:$0xf] }
 0x8db   : > { %v6693_v48 = vsel %vm6658_vm3, %v6692_v45, %v6691_v8  ;;  %6848 = vmatpush.msrb.mxu0 %v6780_v55  ;;  %v6883_v45 = vld [vmem:[%s14293_s11 + $0x20] sm:$0xff]  ;;  %v6925_v3 = vld [vmem:[%s14295_s13 + $0x18] sm:$0xff] }
 0x8dc   : > { %v6695_v14 = vsel %vm6661_vm12, %v6694_v23, %v6693_v48  ;;  %6820 = vmatpush.msrb.mxu1 %v6772_v30  ;;  %v6880_v23 = vld [vmem:[%s14293_s11 + $0x8] sm:$0xff]  ;;  %v6930_v11 = vld [vmem:[%s14295_s13 + $0x40] sm:$0xff]  ;;  %v6924_v48 = vld [vmem:[%s14295_s13 + $0x10] sm:$0xff] }
 0x8dd   : > { %v6634_v0 = vpop.f32.mrf.mxu0  ;;  %6849 = vmatpush.msrb.mxu0 %v6779_v34  ;;  %v6926_v8 = vld [vmem:[%s14295_s13 + $0x20] sm:$0xff] }
 0x8de   : > { %v6679_v60 = vrot.slane %v6634_v0, 2  ;;  %v6713_v56 = vrot.slane %v6634_v0, 4  ;;  %v6663_v52 = vrot.slane %v6634_v0, 1  ;;  %v6696_v2 = vrot.slane %v6634_v0, 3  ;;  %6821 = vmatpush.msrb.mxu1 %v6771_v41 }
 0x8df   : > { %v6730_v54 = vrot.slane %v6634_v0, 5  ;;  %6850 = vmatpush.msrb.mxu0 %v6778_v12  ;;  %v6776_v0 = vld [vmem:[%s14291_s9 + $0x110] sm:$0xff] }
 0x8e0   : > { %v6680_v43 = vsel %vm6664_vm13, %v6679_v60, %v6678_v44  ;;  %v6714_v51 = vsel %vm6664_vm13, %v6713_v56, %v6712_v18  ;;  %v14053_v47 = vsel %vm6664_vm13, %v6663_v52, %v6662_v49  ;;  %v6697_v49 = vsel %vm6664_vm13, %v6696_v2, %v6695_v14  ;;  %6822 = vmatpush.msrb.mxu1 %v6770_v27  ;;  %v6891_v60 = vld [vmem:[%s14293_s11 + $0x60] sm:$0xff]  ;;  %v6889_v56 = vld [vmem:[%s14293_s11 + $0x50] sm:$0xff]  ;;  %v6791_v44 = vld [vmem:[%s14291_s9 + $0x188] sm:$0xff] }
 0x8e1   : > { %6681 = vrot.lane.b32.xlu0 %v6680_v43, %s8248_s29  ;;  %6715 = vrot.lane.b32.xlu1 %v6714_v51, %s8249_s20  ;;  %v6731_v1 = vsel %vm6664_vm13, %v6730_v54, %v6729_v24  ;;  %s8251_s29 = smov 64   ;;  %v6929_v2 = vld [vmem:[%s14295_s13 + $0x38] sm:$0xff]  ;;  %v6927_v54 = vld [vmem:[%s14295_s13 + $0x28] sm:$0xff]  ;;  %s6976_s20 = scalar_lea.hbm %s14297_s15, %s8386_s27 }
 0x8e2   : > { %6823 = vmatpush.msrb.mxu1 %v6769_v33  ;;  %6851 = vmatpush.msrb.mxu0 %v6777_v58  ;;  %v6923_v27 = vld [vmem:[%s14295_s13 + $0x8] sm:$0xff]  ;;  %v6922_v33 = vld [vmem:[%s14295_s13] sm:$0xff]  ;;  %s6980_s0 = sshll.u32 %s6976_s20, 4  ;;  %s6981_s0 = int_to_ptr.hbm [resolvable:$true] %s6980_s0 }
 0x8e3   : > { %6905 = vmatpush.msrb.mxu2 %v6891_v60  ;;  %s8198_s23 = sshra.s32 %s6981_s0, 4  ;;  %s8199_s23 = int_to_ptr.hbm [resolvable:$true] %s8198_s23 }
 0x8e4   : > { %6824 = vmatpush.msrb.mxu1 %v6768_v40  ;;  %6852 = vmatpush.msrb.mxu0 %v6776_v0  ;;  %v7758_v40 = vld [vmem:[%s14294_s12] ss:$0 sm:$0xff]  ;;  %s8200_s1 = scalar_lea.hbm %s8199_s23, 8  ;;  %p8205_p0 = scmp.lt.s32.totalorder %s8199_s23, %s14297_s15 }
 0x8e5   : > { %6906 = vmatpush.msrb.mxu2 %v6890_v16  ;;  %p8201_p11 = scmp.ne.s32.totalorder %s8199_s23, %s8200_s1  ;;  %p8206_p1 = scmp.lt.s32.totalorder %s8204_s25, %s8200_s1 }
 0x8e6   : > { %6825 = vmatpush.msrb.mxu1 %v6767_v28  ;;  %6853 = vmatpush.msrb.mxu0 %v6775_v7 }
 0x8e7   : > { %6907 = vmatpush.msrb.mxu2 %v6889_v56  ;;  %p8202_p12 = pnand %p8201_p11, %p8367_p5  ;;  %p8207_p2 = por %p8206_p1, %p8205_p0 }
 0x8e8   : > { %6826 = vmatpush.msrb.mxu1 %v6766_v35  ;;  %6854 = vmatpush.msrb.mxu0 %v6774_v46 }
 0x8e9   : > { %6698 = vrot.lane.b32.xlu0 %v6697_v49, %s8250_s26  ;;  %6732 = vrot.lane.b32.xlu1 %v6731_v1, %s8251_s29  ;;  %p8203_p13 = pneg %p8202_p12 }
 0x8ea   : > { %6827 = vmatpush.msrb.mxu1 %v6765_v10  ;;  %6908 = vmatpush.msrb.mxu2 %v6888_v20  ;;  %v7759_v10 = vld [vmem:[%s14296_s14] ss:$0 sm:$0xff] }
 0x8eb   : > { %p8208_p3 = pnand %p8207_p2, %p8203_p13 }
 0x8ec   : > { %6828 = vmatpush.msrb.mxu1 %v6764_v4  ;;  %6909 = vmatpush.msrb.mxu2 %v6887_v42 }
 0x8ee   : > { %6829 = vmatpush.msrb.mxu1 %v6763_v13 }
 0x8f0   : > { %6830 = vmatpush.msrb.mxu1 %v6762_v59 }
 0x8f2   : > { %6831 = vmatpush.msrb.mxu1 %v6761_v37 }
 0x8f4   : > { %6832 = vmatpush.msrb.mxu1 %v6760_v5 }
 0x8f6   : > { %6833 = vmatpush.msrb.mxu1 %v6759_v39 }
 0x8f8   : > { %6834 = vmatpush.msrb.mxu1 %v6758_v32 }
 0x953   : > { %v6682_v17 = vpop.permute.xlu0 %6681  ;;  %v6716_v9 = vpop.permute.xlu1 %6715 }
 0x954   : > { %v6736_v18 = vsel %vm6735_vm14, %v14053_v47, %v6682_v17  ;;  %v6886_v47 = vld [vmem:[%s14293_s11 + $0x38] sm:$0xff] }
 0x955   : > { %6815 = vmatmul.f32.vlgmr.msra.gmra.mxu1 %v6736_v18  ;;  %6910 = vmatpush.msrb.mxu2 %v6886_v47 }
 0x956   : > { %6873 = vmatpush.msra.mxu1 %v6791_v44 }
 0x957   : > { %6911 = vmatpush.msrb.mxu2 %v6885_v22 }
 0x958   : > { %6874 = vmatpush.msra.mxu1 %v6790_v19 }
 0x959   : > { %6912 = vmatpush.msrb.mxu2 %v6884_v26 }
 0x95b   : > { %v6699_v52 = vpop.permute.xlu0 %6698  ;;  %v6733_v25 = vpop.permute.xlu1 %6732  ;;  %6913 = vmatpush.msrb.mxu2 %v6883_v45 }
 0x95c   : > { %v6737_v62 = vsel %vm552_vm0, %v6682_v17, %v6699_v52  ;;  %v6741_v43 = vsel %vm6740_vm6, %v6716_v9, %v6733_v25  ;;  %vm6898_vm0 = vcmask 982016  }
 0x95d   : > { %v6739_v51 = vsel %vm6738_vm15, %v6737_v62, %v6716_v9  ;;  %6855 = vmatmul.f32.vlgmr.msrb.gmra.mxu0 %v6741_v43  ;;  %6914 = vmatpush.msrb.mxu2 %v6882_v36 }
 0x95e   : > { %6835 = vmatmul.f32.vlgmr.msrb.gmra.mxu1 %v6739_v51 }
 0x95f   : > { %6915 = vmatpush.msrb.mxu2 %v6881_v63  ;;  %7707 = vmatpush.msk.msrb.mxu1 %vm2255_vm4, %v6932_v6  ;;  %vm6963_vm4 = vcmask 80896  }
 0x961   : > { %6916 = vmatpush.msrb.mxu2 %v6880_v23  ;;  %6949 = vmatpush.msrb.mxu1 %v6931_v38 }
 0x963   : > { %6917 = vmatpush.msrb.mxu2 %v6879_v31  ;;  %6950 = vmatpush.msrb.mxu1 %v6930_v11 }
 0x965   : > { %6951 = vmatpush.msrb.mxu1 %v6929_v2 }
 0x966   : > { %7705 = vmatmul.msk.f32.vlgmr.msra.gmra.mxu1 %vm6796_vm5, %v6733_v25 }
 0x967   : > { %6952 = vmatpush.msrb.mxu1 %v6928_v29 }
 0x969   : > { %6953 = vmatpush.msrb.mxu1 %v6927_v54 }
 0x96b   : > { %6954 = vmatpush.msrb.mxu1 %v6926_v8 }
 0x96d   : > { %6955 = vmatpush.msrb.mxu1 %v6925_v3 }
 0x96f   : > { %6956 = vmatpush.msrb.mxu1 %v6924_v48 }
 0x971   : > { %6957 = vmatpush.msrb.mxu1 %v6923_v27 }
 0x973   : > { %6958 = vmatpush.msrb.mxu1 %v6922_v33 }
 0x9d2   : > { %v6816_v61 = vpop.f32.mrf.mxu1 }
 0x9d3   : > { %v6817_v24 = vadd.f32 %v7757_v21, %v6816_v61 }
 0x9da   : > { %v6856_v49 = vpop.f32.mrf.mxu0 }
 0x9db   : > { %v6836_v14 = vpop.f32.mrf.mxu1 }
 0x9dc   : > { %v6837_v57 = vadd.f32 %v6836_v14, %v6817_v24 }
 0x9de   : > { %v6857_v1 = vadd.f32 %v6856_v49, %v6837_v57 }
 0x9e3   : > { %v6876_v30 = vpop.f32.mrf.mxu1 }
 0x9e4   : > { %v6877_v41 = vadd.f32 %v6876_v30, %v6857_v1 }
 0x9e6   : > { %7706 = vmatmul.msk.f32.vlgmr.msrb.gmra.mxu2 %vm6898_vm0, %v6877_v41 }
 0xa69   : > { %v6919_v28 = vpop.f32.mrf.mxu2 }
 0xa6a   : > { %v6920_v35 = vadd.f32 %v7758_v40, %v6919_v28 }
 0xa6c   : > { %7708 = vmatmul.msk.f32.vlgmr.msrb.gmra.mxu1 %vm4505_vm8, %v6920_v35 }
 0xae9   : > { %v6960_v4 = vpop.f32.mrf.mxu1 }
 0xaea   : > { %v6961_v13 = vadd.f32 %v7759_v10, %v6960_v4 }
 0xaec   : > { %6964 = vst.msk [vmem:[%s490_s30] sm:$0xff] %vm6963_vm4, %v6961_v13 }
 0xaed   : > { %8211 = shalt.err (!%p8208_p3)
}
 0xaee   : > { %7714 = dma.vmem_to_hbm [thread:$0]  (%p8367_p5), %s6979_s16, 128, %s6981_s0, %s6966_s17  }
 0xaef PF: > { %s14932_s22 = sld [smem:[#allocation5_spill]]  ;;  %p7720_p4 = scmp.ge.s32.totalorder %s8246_s21, 2 }
 0xaf1   : > { %p7717_p7 = pnand %p7720_p4, %p8371_p6 }
 0xaf3   : > { %p7718_p8 = pneg %p7717_p7 }
 0xaf5   : > { %s6992_s24 = sand.u32 1, %s14932_s22  }
 0xaf6   : > { %s6993_s30 = scalar_lea.sflag [#allocation3], %s6992_s24 }
 0xaf7   : > { %8229 = dma.done.wait (%p7718_p8), %s6993_s30, 128  }
 0xaf8   : > { %8231 = vsyncadd (%p7718_p8), %s6993_s30, 4294967168  ;;  %s14934_s21 = sld [smem:[#allocation7_spill]]  ;;  %s14937_s18 = smov %s8238_s19 }
 0xaf9   : > { %s14935_s1 = sld [smem:[#allocation6_spill]] }
 0xafa   : > { %s14936_s20 = sld [smem:[#allocation8_spill]] }
 0xafe   : > { %p25_p9 = scmp.ge.s32.totalorder %s14934_s21, 4  }
 0xaff   : > { %s14938_s19 = smov %s14935_s1 }
 0xb00   :  { %27 = sbr.rel (!%p25_p9) target bundleno = 6 (0x6), region = 123 }
 0xb05   :  { %6999 = vsyncpa [#allocation3], 1 }
 0xb06   :  { %7001 = vsyncpa [#allocation3 + $0x1], 1 }

</bundles_post_ra>
